<compile_context>
chip_gen: v5e
topology: v5e:2x2
jax: 0.10.0
libtpu: 0.0.40
codegen_flags: <defaults>
</compile_context>

<pallas_src>
import jax
import jax.numpy as jnp
from jax.experimental import pallas as pl
from jax.experimental.pallas import tpu as pltpu

# Logical layer widths and their 128-lane-padded counterparts.
DIMS = [784, 520, 320, 240, 120, 10]
PAD_DIMS = [896, 640, 384, 256, 128, 128]
BIAS_PACK_COLS = max(PAD_DIMS[1:])  # 640


def _round_up(n, m):
    return ((n + m - 1) // m) * m


def _cdiv(a, b):
    return -(-a // b)


def mlp_kernel(x_ref,
               w1_ref, w2_ref, w3_ref, w4_ref, w5_ref,
               b_ref,
               o_ref):
    """5-layer MLP on one (tile_b, 896) batch tile.

    Weights are bf16 MXU operands (resident VMEM, constant-index blocks);
    accumulation, bias add and ReLU are f32 on the VPU; activations are cast
    back to bf16 only as the next matmul's LHS. Biases live in one (8, 640)
    f32 block, row i = layer-i bias zero-padded.
    """
    h = x_ref[...]  # bf16 (tile_b, 896)
    w_refs = (w1_ref, w2_ref, w3_ref, w4_ref, w5_ref)
    n_layers = len(w_refs)
    for i, w_ref in enumerate(w_refs):
        out_w = PAD_DIMS[i + 1]
        acc = jnp.dot(h, w_ref[...], preferred_element_type=jnp.float32)
        acc = acc + b_ref[i:i + 1, :out_w]          # (1, out_w) f32 broadcast
        if i == n_layers - 1:
            o_ref[...] = acc.astype(o_ref.dtype)    # lane-dense (tile_b, 128) store
        else:
            h = jnp.maximum(acc, 0.0).astype(jnp.bfloat16)


def init_params(key):
    """PyTorch-Linear-like init; logical (in,out) f32 weights + (out,) f32 biases."""
    params = []
    for i in range(5):
        fan_in, fan_out = DIMS[i], DIMS[i + 1]
        key, kw, kb = jax.random.split(key, 3)
        bound = 1.0 / (fan_in ** 0.5)
        # PyTorch stores W as (out, in); keep the transpose (in, out): y = x @ W + b.
        w_t = jax.random.uniform(kw, (fan_in, fan_out), jnp.float32, -bound, bound)
        b = jax.random.uniform(kb, (fan_out,), jnp.float32, -bound, bound)
        params.append((w_t, b))
    return params


def prepare_params(params):
    """Pad weights to 128-lane multiples (bf16); pack all biases into one (8,640) f32."""
    weights = []
    bias_pack = jnp.zeros((8, BIAS_PACK_COLS), jnp.float32)
    for i, (wt, b) in enumerate(params):
        ip, op = PAD_DIMS[i], PAD_DIMS[i + 1]
        wp = jnp.zeros((ip, op), jnp.float32).at[: wt.shape[0], : wt.shape[1]].set(wt)
        weights.append(wp.astype(jnp.bfloat16))
        bias_pack = bias_pack.at[i, : b.shape[0]].set(b)
    return weights, bias_pack


def mlp_forward(x, prepped_params, *, tile_b=512):
    """x: anything that flattens to (-1, 784). prepped_params: prepare_params output."""
    weights, bias_pack = prepped_params
    x2d = x.reshape(-1, DIMS[0])
    B = x2d.shape[0]
    if B == 0:
        return jnp.zeros((0, DIMS[-1]), jnp.float32)

    # Tile selection: biggest tile up to tile_b; balance steps so padding is minimal.
    n_steps = _cdiv(B, tile_b)
    # v7x: split a single full-size tile across both TensorCores only when each
    # step still gets >= 256 rows (full MXU row fill). Neutral on v5e/v6e.
    if n_steps == 1 and B >= 512:
        n_steps = 2
    tb = _round_up(_cdiv(B, n_steps), 8)
    Bp = n_steps * tb

    # Build the padded input directly in bf16 (no f32 (Bp, 896) intermediate).
    xp = jnp.zeros((Bp, PAD_DIMS[0]), jnp.bfloat16)
    xp = xp.at[:B, : DIMS[0]].set(x2d.astype(jnp.bfloat16))

    def run(single_buffer_resident):
        resident_kwargs = (
            dict(pipeline_mode=pl.Buffered(1)) if single_buffer_resident else {}
        )
        in_specs = [pl.BlockSpec((tb, PAD_DIMS[0]), lambda i: (i, 0))]
        for wt in weights:
            # Constant-index block: whole padded weight resident in VMEM.
            in_specs.append(pl.BlockSpec(wt.shape, lambda i: (0, 0), **resident_kwargs))
        in_specs.append(
            pl.BlockSpec(bias_pack.shape, lambda i: (0, 0), **resident_kwargs))

        return pl.pallas_call(
            mlp_kernel,
            out_shape=jax.ShapeDtypeStruct((Bp, PAD_DIMS[-1]), jnp.float32),
            grid_spec=pltpu.PrefetchScalarGridSpec(
                num_scalar_prefetch=0,
                grid=(n_steps,),
                in_specs=in_specs,
                out_specs=pl.BlockSpec((tb, PAD_DIMS[-1]), lambda i: (i, 0)),
            ),
            compiler_params=pltpu.CompilerParams(
                dimension_semantics=("parallel",)),
        )(xp, *weights, bias_pack)

    try:
        out = run(True)
    except Exception:
        # Fall back to default (double) buffering if Buffered(1) is rejected.
        out = run(False)
    return out[:B, : DIMS[-1]]


def mlp_reference(x, prepped_params):
    """Pure-JAX reference with the same padded bf16 weights / f32 accumulation."""
    weights, bias_pack = prepped_params
    x2d = x.reshape(-1, DIMS[0])
    h = jnp.zeros((x2d.shape[0], PAD_DIMS[0]), jnp.bfloat16)
    h = h.at[:, : DIMS[0]].set(x2d.astype(jnp.bfloat16))
    acc = None
    for i, wt in enumerate(weights):
        out_w = PAD_DIMS[i + 1]
        acc = jnp.dot(h, wt, preferred_element_type=jnp.float32)
        acc = acc + bias_pack[i:i + 1, :out_w]
        if i < len(weights) - 1:
            h = jnp.maximum(acc, 0.0).astype(jnp.bfloat16)
    return acc[:, : DIMS[-1]]


if __name__ == "__main__":
    key = jax.random.PRNGKey(0)
    kx, kp = jax.random.split(key)
    params = init_params(kp)
    prepped = prepare_params(params)

    # MNIST-like input: (batch=8, 1, 28, 28) -> flattened to (8, 784) inside forward.
    x = jax.random.normal(kx, (8, 1, 28, 28), jnp.float32)

    out = jax.block_until_ready(mlp_forward(x, prepped))
    ref = mlp_reference(x, prepped)

    assert out.shape == (8, 10), out.shape
    assert jnp.allclose(out, ref, atol=1e-2, rtol=1e-2), float(jnp.abs(out - ref).max())
    print("KERNEL_OK")
</pallas_src>

<mosaic_0001>
module attributes {stable_mosaic.version = 11 : i64} {
  func.func @mlp_kernel(%arg0: i32, %arg1: memref<8x896xbf16, #tpu.memory_space<vmem>>, %arg2: memref<896x640xbf16, #tpu.memory_space<vmem>>, %arg3: memref<640x384xbf16, #tpu.memory_space<vmem>>, %arg4: memref<384x256xbf16, #tpu.memory_space<vmem>>, %arg5: memref<256x128xbf16, #tpu.memory_space<vmem>>, %arg6: memref<128x128xbf16, #tpu.memory_space<vmem>>, %arg7: memref<8x640xf32, #tpu.memory_space<vmem>>, %arg8: memref<8x128xf32, #tpu.memory_space<vmem>>) attributes {dimension_semantics = [#tpu.dimension_semantics<parallel>], iteration_bounds = array<i64: 1>, scalar_prefetch = 0 : i64, scratch_operands = 0 : i64, tpu.core_type = #tpu.core_type<tc>, window_params = [{transform_indices = @transform_0, window_bounds = array<i64: 8, 896>}, {pipeline_mode = #tpu.pipeline_mode<synchronous>, transform_indices = @transform_1, window_bounds = array<i64: 896, 640>}, {pipeline_mode = #tpu.pipeline_mode<synchronous>, transform_indices = @transform_2, window_bounds = array<i64: 640, 384>}, {pipeline_mode = #tpu.pipeline_mode<synchronous>, transform_indices = @transform_3, window_bounds = array<i64: 384, 256>}, {pipeline_mode = #tpu.pipeline_mode<synchronous>, transform_indices = @transform_4, window_bounds = array<i64: 256, 128>}, {pipeline_mode = #tpu.pipeline_mode<synchronous>, transform_indices = @transform_5, window_bounds = array<i64: 128, 128>}, {pipeline_mode = #tpu.pipeline_mode<synchronous>, transform_indices = @transform_6, window_bounds = array<i64: 8, 640>}, {transform_indices = @transform_7, window_bounds = array<i64: 8, 128>}]} {
    %c0 = arith.constant 0 : index
    %c0_0 = arith.constant 0 : index
    %0 = vector.load %arg1[%c0, %c0_0] : memref<8x896xbf16, #tpu.memory_space<vmem>>, vector<8x896xbf16>
    %c0_1 = arith.constant 0 : index
    %c0_2 = arith.constant 0 : index
    %1 = vector.load %arg2[%c0_1, %c0_2] : memref<896x640xbf16, #tpu.memory_space<vmem>>, vector<896x640xbf16>
    %cst = arith.constant dense<0.000000e+00> : vector<8x640xf32>
    %2 = tpu.matmul %0, %1, %cst {dimension_numbers = #tpu.dot_dimension_numbers<[1], [0], [0], [1], [0, 0, 1, 1], [], []>} : vector<8x896xbf16>, vector<896x640xbf16>, vector<8x640xf32> -> vector<8x640xf32>
    %c0_3 = arith.constant 0 : index
    %c0_4 = arith.constant 0 : index
    %3 = vector.load %arg7[%c0_3, %c0_4] : memref<8x640xf32, #tpu.memory_space<vmem>>, vector<1x640xf32>
    %4 = vector.broadcast %3 : vector<1x640xf32> to vector<8x640xf32>
    %5 = arith.addf %2, %4 : vector<8x640xf32>
    %cst_5 = arith.constant 0.000000e+00 : f32
    %6 = vector.broadcast %cst_5 : f32 to vector<8x640xf32>
    %7 = arith.maximumf %5, %6 : vector<8x640xf32>
    %8 = arith.truncf %7 : vector<8x640xf32> to vector<8x640xbf16>
    %c0_6 = arith.constant 0 : index
    %c0_7 = arith.constant 0 : index
    %9 = vector.load %arg3[%c0_6, %c0_7] : memref<640x384xbf16, #tpu.memory_space<vmem>>, vector<640x384xbf16>
    %cst_8 = arith.constant dense<0.000000e+00> : vector<8x384xf32>
    %10 = tpu.matmul %8, %9, %cst_8 {dimension_numbers = #tpu.dot_dimension_numbers<[1], [0], [0], [1], [0, 0, 1, 1], [], []>} : vector<8x640xbf16>, vector<640x384xbf16>, vector<8x384xf32> -> vector<8x384xf32>
    %c1 = arith.constant 1 : index
    %c0_9 = arith.constant 0 : index
    %11 = vector.load %arg7[%c1, %c0_9] : memref<8x640xf32, #tpu.memory_space<vmem>>, vector<1x384xf32>
    %12 = vector.broadcast %11 : vector<1x384xf32> to vector<8x384xf32>
    %13 = arith.addf %10, %12 : vector<8x384xf32>
    %cst_10 = arith.constant 0.000000e+00 : f32
    %14 = vector.broadcast %cst_10 : f32 to vector<8x384xf32>
    %15 = arith.maximumf %13, %14 : vector<8x384xf32>
    %16 = arith.truncf %15 : vector<8x384xf32> to vector<8x384xbf16>
    %c0_11 = arith.constant 0 : index
    %c0_12 = arith.constant 0 : index
    %17 = vector.load %arg4[%c0_11, %c0_12] : memref<384x256xbf16, #tpu.memory_space<vmem>>, vector<384x256xbf16>
    %cst_13 = arith.constant dense<0.000000e+00> : vector<8x256xf32>
    %18 = tpu.matmul %16, %17, %cst_13 {dimension_numbers = #tpu.dot_dimension_numbers<[1], [0], [0], [1], [0, 0, 1, 1], [], []>} : vector<8x384xbf16>, vector<384x256xbf16>, vector<8x256xf32> -> vector<8x256xf32>
    %c2 = arith.constant 2 : index
    %c0_14 = arith.constant 0 : index
    %19 = vector.load %arg7[%c2, %c0_14] : memref<8x640xf32, #tpu.memory_space<vmem>>, vector<1x256xf32>
    %20 = vector.broadcast %19 : vector<1x256xf32> to vector<8x256xf32>
    %21 = arith.addf %18, %20 : vector<8x256xf32>
    %cst_15 = arith.constant 0.000000e+00 : f32
    %22 = vector.broadcast %cst_15 : f32 to vector<8x256xf32>
    %23 = arith.maximumf %21, %22 : vector<8x256xf32>
    %24 = arith.truncf %23 : vector<8x256xf32> to vector<8x256xbf16>
    %c0_16 = arith.constant 0 : index
    %c0_17 = arith.constant 0 : index
    %25 = vector.load %arg5[%c0_16, %c0_17] : memref<256x128xbf16, #tpu.memory_space<vmem>>, vector<256x128xbf16>
    %cst_18 = arith.constant dense<0.000000e+00> : vector<8x128xf32>
    %26 = tpu.matmul %24, %25, %cst_18 {dimension_numbers = #tpu.dot_dimension_numbers<[1], [0], [0], [1], [0, 0, 1, 1], [], []>} : vector<8x256xbf16>, vector<256x128xbf16>, vector<8x128xf32> -> vector<8x128xf32>
    %c3 = arith.constant 3 : index
    %c0_19 = arith.constant 0 : index
    %27 = vector.load %arg7[%c3, %c0_19] : memref<8x640xf32, #tpu.memory_space<vmem>>, vector<1x128xf32>
    %28 = vector.broadcast %27 : vector<1x128xf32> to vector<8x128xf32>
    %29 = arith.addf %26, %28 : vector<8x128xf32>
    %cst_20 = arith.constant 0.000000e+00 : f32
    %30 = vector.broadcast %cst_20 : f32 to vector<8x128xf32>
    %31 = arith.maximumf %29, %30 : vector<8x128xf32>
    %32 = arith.truncf %31 : vector<8x128xf32> to vector<8x128xbf16>
    %c0_21 = arith.constant 0 : index
    %c0_22 = arith.constant 0 : index
    %33 = vector.load %arg6[%c0_21, %c0_22] : memref<128x128xbf16, #tpu.memory_space<vmem>>, vector<128x128xbf16>
    %cst_23 = arith.constant dense<0.000000e+00> : vector<8x128xf32>
    %34 = tpu.matmul %32, %33, %cst_23 {dimension_numbers = #tpu.dot_dimension_numbers<[1], [0], [0], [1], [0, 0, 1, 1], [], []>} : vector<8x128xbf16>, vector<128x128xbf16>, vector<8x128xf32> -> vector<8x128xf32>
    %c4 = arith.constant 4 : index
    %c0_24 = arith.constant 0 : index
    %35 = vector.load %arg7[%c4, %c0_24] : memref<8x640xf32, #tpu.memory_space<vmem>>, vector<1x128xf32>
    %36 = vector.broadcast %35 : vector<1x128xf32> to vector<8x128xf32>
    %37 = arith.addf %34, %36 : vector<8x128xf32>
    %c0_25 = arith.constant 0 : index
    %c0_26 = arith.constant 0 : index
    %38 = vector.load %arg8[%c0_25, %c0_26] : memref<8x128xf32, #tpu.memory_space<vmem>>, vector<8x128xf32>
    tpu.vector_store %arg8[%c0_25, %c0_26], %37 {strides = array<i32>} : memref<8x128xf32, #tpu.memory_space<vmem>>, vector<8x128xf32>,
    return
  }
  func.func @transform_0(%arg0: i32) -> (i32, i32) {
    %c0_i32 = arith.constant 0 : i32
    %c0_i32_0 = arith.constant 0 : i32
    return %arg0, %c0_i32 : i32, i32
  }
  func.func @transform_1(%arg0: i32) -> (i32, i32) {
    %c0_i32 = arith.constant 0 : i32
    %c0_i32_0 = arith.constant 0 : i32
    %c0_i32_1 = arith.constant 0 : i32
    return %c0_i32, %c0_i32_0 : i32, i32
  }
  func.func @transform_2(%arg0: i32) -> (i32, i32) {
    %c0_i32 = arith.constant 0 : i32
    %c0_i32_0 = arith.constant 0 : i32
    %c0_i32_1 = arith.constant 0 : i32
    return %c0_i32, %c0_i32_0 : i32, i32
  }
  func.func @transform_3(%arg0: i32) -> (i32, i32) {
    %c0_i32 = arith.constant 0 : i32
    %c0_i32_0 = arith.constant 0 : i32
    %c0_i32_1 = arith.constant 0 : i32
    return %c0_i32, %c0_i32_0 : i32, i32
  }
  func.func @transform_4(%arg0: i32) -> (i32, i32) {
    %c0_i32 = arith.constant 0 : i32
    %c0_i32_0 = arith.constant 0 : i32
    %c0_i32_1 = arith.constant 0 : i32
    return %c0_i32, %c0_i32_0 : i32, i32
  }
  func.func @transform_5(%arg0: i32) -> (i32, i32) {
    %c0_i32 = arith.constant 0 : i32
    %c0_i32_0 = arith.constant 0 : i32
    %c0_i32_1 = arith.constant 0 : i32
    return %c0_i32, %c0_i32_0 : i32, i32
  }
  func.func @transform_6(%arg0: i32) -> (i32, i32) {
    %c0_i32 = arith.constant 0 : i32
    %c0_i32_0 = arith.constant 0 : i32
    %c0_i32_1 = arith.constant 0 : i32
    return %c0_i32, %c0_i32_0 : i32, i32
  }
  func.func @transform_7(%arg0: i32) -> (i32, i32) {
    %c0_i32 = arith.constant 0 : i32
    %c0_i32_0 = arith.constant 0 : i32
    return %arg0, %c0_i32 : i32, i32
  }
}

module attributes {stable_mosaic.version = 11 : i64} {
  func.func @mlp_kernel(%arg0: i32, %arg1: memref<8x896xbf16, #tpu.memory_space<vmem>>, %arg2: memref<896x640xbf16, #tpu.memory_space<vmem>>, %arg3: memref<640x384xbf16, #tpu.memory_space<vmem>>, %arg4: memref<384x256xbf16, #tpu.memory_space<vmem>>, %arg5: memref<256x128xbf16, #tpu.memory_space<vmem>>, %arg6: memref<128x128xbf16, #tpu.memory_space<vmem>>, %arg7: memref<8x640xf32, #tpu.memory_space<vmem>>, %arg8: memref<8x128xf32, #tpu.memory_space<vmem>>) attributes {dimension_semantics = [#tpu.dimension_semantics<parallel>], iteration_bounds = array<i64: 1>, scalar_prefetch = 0 : i64, scratch_operands = 0 : i64, tpu.core_type = #tpu.core_type<tc>, window_params = [{transform_indices = @transform_0, window_bounds = array<i64: 8, 896>}, {pipeline_mode = #tpu.pipeline_mode<synchronous>, transform_indices = @transform_1, window_bounds = array<i64: 896, 640>}, {pipeline_mode = #tpu.pipeline_mode<synchronous>, transform_indices = @transform_2, window_bounds = array<i64: 640, 384>}, {pipeline_mode = #tpu.pipeline_mode<synchronous>, transform_indices = @transform_3, window_bounds = array<i64: 384, 256>}, {pipeline_mode = #tpu.pipeline_mode<synchronous>, transform_indices = @transform_4, window_bounds = array<i64: 256, 128>}, {pipeline_mode = #tpu.pipeline_mode<synchronous>, transform_indices = @transform_5, window_bounds = array<i64: 128, 128>}, {pipeline_mode = #tpu.pipeline_mode<synchronous>, transform_indices = @transform_6, window_bounds = array<i64: 8, 640>}, {transform_indices = @transform_7, window_bounds = array<i64: 8, 128>}]} {
    %c0 = arith.constant 0 : index
    %c0_0 = arith.constant 0 : index
    %0 = vector.load %arg1[%c0, %c0_0] : memref<8x896xbf16, #tpu.memory_space<vmem>>, vector<8x896xbf16>
    %c0_1 = arith.constant 0 : index
    %c0_2 = arith.constant 0 : index
    %1 = vector.load %arg2[%c0_1, %c0_2] : memref<896x640xbf16, #tpu.memory_space<vmem>>, vector<896x640xbf16>
    %cst = arith.constant dense<0.000000e+00> : vector<8x640xf32>
    %2 = tpu.matmul %0, %1, %cst {dimension_numbers = #tpu.dot_dimension_numbers<[1], [0], [0], [1], [0, 0, 1, 1], [], []>} : vector<8x896xbf16>, vector<896x640xbf16>, vector<8x640xf32> -> vector<8x640xf32>
    %c0_3 = arith.constant 0 : index
    %c0_4 = arith.constant 0 : index
    %3 = vector.load %arg7[%c0_3, %c0_4] : memref<8x640xf32, #tpu.memory_space<vmem>>, vector<1x640xf32>
    %4 = vector.broadcast %3 : vector<1x640xf32> to vector<8x640xf32>
    %5 = arith.addf %2, %4 : vector<8x640xf32>
    %cst_5 = arith.constant 0.000000e+00 : f32
    %6 = vector.broadcast %cst_5 : f32 to vector<8x640xf32>
    %7 = arith.maximumf %5, %6 : vector<8x640xf32>
    %8 = arith.truncf %7 : vector<8x640xf32> to vector<8x640xbf16>
    %c0_6 = arith.constant 0 : index
    %c0_7 = arith.constant 0 : index
    %9 = vector.load %arg3[%c0_6, %c0_7] : memref<640x384xbf16, #tpu.memory_space<vmem>>, vector<640x384xbf16>
    %cst_8 = arith.constant dense<0.000000e+00> : vector<8x384xf32>
    %10 = tpu.matmul %8, %9, %cst_8 {dimension_numbers = #tpu.dot_dimension_numbers<[1], [0], [0], [1], [0, 0, 1, 1], [], []>} : vector<8x640xbf16>, vector<640x384xbf16>, vector<8x384xf32> -> vector<8x384xf32>
    %c1 = arith.constant 1 : index
    %c0_9 = arith.constant 0 : index
    %11 = vector.load %arg7[%c1, %c0_9] : memref<8x640xf32, #tpu.memory_space<vmem>>, vector<1x384xf32>
    %12 = vector.broadcast %11 : vector<1x384xf32> to vector<8x384xf32>
    %13 = arith.addf %10, %12 : vector<8x384xf32>
    %cst_10 = arith.constant 0.000000e+00 : f32
    %14 = vector.broadcast %cst_10 : f32 to vector<8x384xf32>
    %15 = arith.maximumf %13, %14 : vector<8x384xf32>
    %16 = arith.truncf %15 : vector<8x384xf32> to vector<8x384xbf16>
    %c0_11 = arith.constant 0 : index
    %c0_12 = arith.constant 0 : index
    %17 = vector.load %arg4[%c0_11, %c0_12] : memref<384x256xbf16, #tpu.memory_space<vmem>>, vector<384x256xbf16>
    %cst_13 = arith.constant dense<0.000000e+00> : vector<8x256xf32>
    %18 = tpu.matmul %16, %17, %cst_13 {dimension_numbers = #tpu.dot_dimension_numbers<[1], [0], [0], [1], [0, 0, 1, 1], [], []>} : vector<8x384xbf16>, vector<384x256xbf16>, vector<8x256xf32> -> vector<8x256xf32>
    %c2 = arith.constant 2 : index
    %c0_14 = arith.constant 0 : index
    %19 = vector.load %arg7[%c2, %c0_14] : memref<8x640xf32, #tpu.memory_space<vmem>>, vector<1x256xf32>
    %20 = vector.broadcast %19 : vector<1x256xf32> to vector<8x256xf32>
    %21 = arith.addf %18, %20 : vector<8x256xf32>
    %cst_15 = arith.constant 0.000000e+00 : f32
    %22 = vector.broadcast %cst_15 : f32 to vector<8x256xf32>
    %23 = arith.maximumf %21, %22 : vector<8x256xf32>
    %24 = arith.truncf %23 : vector<8x256xf32> to vector<8x256xbf16>
    %c0_16 = arith.constant 0 : index
    %c0_17 = arith.constant 0 : index
    %25 = vector.load %arg5[%c0_16, %c0_17] : memref<256x128xbf16, #tpu.memory_space<vmem>>, vector<256x128xbf16>
    %cst_18 = arith.constant dense<0.000000e+00> : vector<8x128xf32>
    %26 = tpu.matmul %24, %25, %cst_18 {dimension_numbers = #tpu.dot_dimension_numbers<[1], [0], [0], [1], [0, 0, 1, 1], [], []>} : vector<8x256xbf16>, vector<256x128xbf16>, vector<8x128xf32> -> vector<8x128xf32>
    %c3 = arith.constant 3 : index
    %c0_19 = arith.constant 0 : index
    %27 = vector.load %arg7[%c3, %c0_19] : memref<8x640xf32, #tpu.memory_space<vmem>>, vector<1x128xf32>
    %28 = vector.broadcast %27 : vector<1x128xf32> to vector<8x128xf32>
    %29 = arith.addf %26, %28 : vector<8x128xf32>
    %cst_20 = arith.constant 0.000000e+00 : f32
    %30 = vector.broadcast %cst_20 : f32 to vector<8x128xf32>
    %31 = arith.maximumf %29, %30 : vector<8x128xf32>
    %32 = arith.truncf %31 : vector<8x128xf32> to vector<8x128xbf16>
    %c0_21 = arith.constant 0 : index
    %c0_22 = arith.constant 0 : index
    %33 = vector.load %arg6[%c0_21, %c0_22] : memref<128x128xbf16, #tpu.memory_space<vmem>>, vector<128x128xbf16>
    %cst_23 = arith.constant dense<0.000000e+00> : vector<8x128xf32>
    %34 = tpu.matmul %32, %33, %cst_23 {dimension_numbers = #tpu.dot_dimension_numbers<[1], [0], [0], [1], [0, 0, 1, 1], [], []>} : vector<8x128xbf16>, vector<128x128xbf16>, vector<8x128xf32> -> vector<8x128xf32>
    %c4 = arith.constant 4 : index
    %c0_24 = arith.constant 0 : index
    %35 = vector.load %arg7[%c4, %c0_24] : memref<8x640xf32, #tpu.memory_space<vmem>>, vector<1x128xf32>
    %36 = vector.broadcast %35 : vector<1x128xf32> to vector<8x128xf32>
    %37 = arith.addf %34, %36 : vector<8x128xf32>
    %c0_25 = arith.constant 0 : index
    %c0_26 = arith.constant 0 : index
    %38 = vector.load %arg8[%c0_25, %c0_26] : memref<8x128xf32, #tpu.memory_space<vmem>>, vector<8x128xf32>
    tpu.vector_store %arg8[%c0_25, %c0_26], %37 {strides = array<i32>} : memref<8x128xf32, #tpu.memory_space<vmem>>, vector<8x128xf32>,
    return
  }
  func.func @transform_0(%arg0: i32) -> (i32, i32) {
    %c0_i32 = arith.constant 0 : i32
    %c0_i32_0 = arith.constant 0 : i32
    return %arg0, %c0_i32 : i32, i32
  }
  func.func @transform_1(%arg0: i32) -> (i32, i32) {
    %c0_i32 = arith.constant 0 : i32
    %c0_i32_0 = arith.constant 0 : i32
    %c0_i32_1 = arith.constant 0 : i32
    return %c0_i32, %c0_i32_0 : i32, i32
  }
  func.func @transform_2(%arg0: i32) -> (i32, i32) {
    %c0_i32 = arith.constant 0 : i32
    %c0_i32_0 = arith.constant 0 : i32
    %c0_i32_1 = arith.constant 0 : i32
    return %c0_i32, %c0_i32_0 : i32, i32
  }
  func.func @transform_3(%arg0: i32) -> (i32, i32) {
    %c0_i32 = arith.constant 0 : i32
    %c0_i32_0 = arith.constant 0 : i32
    %c0_i32_1 = arith.constant 0 : i32
    return %c0_i32, %c0_i32_0 : i32, i32
  }
  func.func @transform_4(%arg0: i32) -> (i32, i32) {
    %c0_i32 = arith.constant 0 : i32
    %c0_i32_0 = arith.constant 0 : i32
    %c0_i32_1 = arith.constant 0 : i32
    return %c0_i32, %c0_i32_0 : i32, i32
  }
  func.func @transform_5(%arg0: i32) -> (i32, i32) {
    %c0_i32 = arith.constant 0 : i32
    %c0_i32_0 = arith.constant 0 : i32
    %c0_i32_1 = arith.constant 0 : i32
    return %c0_i32, %c0_i32_0 : i32, i32
  }
  func.func @transform_6(%arg0: i32) -> (i32, i32) {
    %c0_i32 = arith.constant 0 : i32
    %c0_i32_0 = arith.constant 0 : i32
    %c0_i32_1 = arith.constant 0 : i32
    return %c0_i32, %c0_i32_0 : i32, i32
  }
  func.func @transform_7(%arg0: i32) -> (i32, i32) {
    %c0_i32 = arith.constant 0 : i32
    %c0_i32_0 = arith.constant 0 : i32
    return %arg0, %c0_i32 : i32, i32
  }
}

</mosaic_0001>

<bundles_post_ra>
// kernel: tpu_custom_call.1
= control target key start
LH: loop header
LB: loop body
LE: loop exit
PB: predicated region body
PF: predicated region fallthrough
CT: control target
= control target key end

     0   :  { %12 = vsyncpa [#allocation3], 0  ;;  %s6880_s0 = inlined_call_operand.hbm [shape: bf16[8,896], index: 0, kind: input, shape index: {}]   ;;  %s6881_s1 = inlined_call_operand.hbm [shape: bf16[896,640], index: 1, kind: input, shape index: {}]   ;;  %s6882_s2 = inlined_call_operand.hbm [shape: bf16[640,384], index: 2, kind: input, shape index: {}]   ;;  %s6883_s3 = inlined_call_operand.hbm [shape: bf16[384,256], index: 3, kind: input, shape index: {}]   ;;  %s6884_s4 = inlined_call_operand.hbm [shape: bf16[256,128], index: 4, kind: input, shape index: {}]   ;;  %s6885_s5 = inlined_call_operand.hbm [shape: bf16[128,128], index: 5, kind: input, shape index: {}]   ;;  %s6886_s6 = inlined_call_operand.hbm [shape: f32[8,640], index: 6, kind: input, shape index: {}]   ;;  %s6887_s7 = inlined_call_operand.hbm [shape: f32[8,128], index: 7, kind: output, shape index: {}]  }
   0x1   :  { %13 = vsyncpa [#allocation6], 0 }
   0x2   :  { %14 = vsyncpa [#allocation9], 0 }
   0x3   :  { %15 = vsyncpa [#allocation12], 0  ;;  %s32_s26 = sshll.u32 %s6881_s1, 4  ;;  %s33_s26 = int_to_ptr.hbm [resolvable:$true] %s32_s26 }
   0x4   :  { %16 = vsyncpa [#allocation4], 0  ;;  %s6653_s27 = smov [#allocation5]   ;;  %s58_s8 = sshll.u32 %s6883_s3, 4  ;;  %s59_s8 = int_to_ptr.hbm [resolvable:$true] %s58_s8 }
   0x5   :  { %s34_s28 = sshll.u32 %s6653_s27, 4  ;;  %s6654_s9 = smov 320   ;;  %s35_s28 = int_to_ptr.vmem [resolvable:$true] %s34_s28 }
   0x6   :  { %s6655_s10 = smov 20   ;;  %s6656_s11 = smov [#allocation8]  }
   0x7   :  { %40 = dma.hbm_to_vmem [thread:$0]  %s33_s26, 35840, %s35_s28, [#allocation6], %s6654_s9, %s6654_s9, %s6655_s10  }
   0x8   :  { %s60_s12 = sshll.u32 %s6656_s11, 4  ;;  %s6657_s13 = smov 128   ;;  %s61_s12 = int_to_ptr.vmem [resolvable:$true] %s60_s12 }
   0x9   :  { %s6658_s14 = smov 8   ;;  %s84_s16 = sshll.u32 %s6885_s5, 4  ;;  %s85_s16 = int_to_ptr.hbm [resolvable:$true] %s84_s16 }
   0xa   :  { %66 = dma.hbm_to_vmem [thread:$0]  %s59_s8, 6144, %s61_s12, [#allocation9], %s6657_s13, %s6657_s13, %s6658_s14  }
   0xb   :  { %s6659_s17 = smov [#allocation11]   ;;  %s22_s20 = sshll.u32 %s6880_s0, 4  ;;  %s23_s20 = int_to_ptr.hbm [resolvable:$true] %s22_s20 }
   0xc   :  { %s86_s18 = sshll.u32 %s6659_s17, 4  ;;  %s6660_s21 = smov 64   ;;  %s87_s18 = int_to_ptr.vmem [resolvable:$true] %s86_s18 }
   0xd   :  { %s6661_s22 = smov 4   ;;  %s6662_s23 = smov [#allocation2]  }
   0xe   :  { %92 = dma.hbm_to_vmem [thread:$0]  %s85_s16, 1024, %s87_s18, [#allocation12], %s6660_s21, %s6660_s21, %s6661_s22  }
   0xf   :  { %s24_s24 = sshll.u32 %s6662_s23, 4  ;;  %s45_s27 = sshll.u32 %s6882_s2, 4  ;;  %s25_s24 = int_to_ptr.vmem [resolvable:$true] %s24_s24  ;;  %s46_s27 = int_to_ptr.hbm [resolvable:$true] %s45_s27 }
  0x10   :  { %27 = dma.hbm_to_vmem [thread:$0]  %s23_s20, 448, %s25_s24, [#allocation3]  }
  0x11   :  { %s6663_s5 = smov [#allocation7]   ;;  %s71_s0 = sshll.u32 %s6884_s4, 4  ;;  %s72_s0 = int_to_ptr.hbm [resolvable:$true] %s71_s0 }
  0x12   :  { %s47_s28 = sshll.u32 %s6663_s5, 4  ;;  %s6664_s8 = smov 192   ;;  %s48_s28 = int_to_ptr.vmem [resolvable:$true] %s47_s28 }
  0x13   :  { %s6665_s9 = smov 12   ;;  %s6666_s10 = smov [#allocation10]  }
  0x14   :  { %53 = dma.hbm_to_vmem [thread:$0]  %s46_s27, 15360, %s48_s28, [#allocation6], %s6664_s8, %s6664_s8, %s6665_s9  }
  0x15   :  { %s73_s11 = sshll.u32 %s6666_s10, 4  ;;  %s98_s2 = sshll.u32 %s6886_s6, 4  ;;  %s74_s11 = int_to_ptr.vmem [resolvable:$true] %s73_s11  ;;  %s99_s2 = int_to_ptr.hbm [resolvable:$true] %s98_s2 }
  0x16   :  { %79 = dma.hbm_to_vmem [thread:$0]  %s72_s0, 2048, %s74_s11, [#allocation9], %s6660_s21, %s6660_s21, %s6661_s22  }
  0x17   :  { %s6667_s14 = smov [#allocation13]  }
  0x18   :  { %s100_s1 = sshll.u32 %s6667_s14, 4  ;;  %s101_s1 = int_to_ptr.vmem [resolvable:$true] %s100_s1 }
  0x19   :  { %103 = dma.hbm_to_vmem [thread:$0]  %s99_s2, 640, %s101_s1, [#allocation12]  }
  0x1a   :  { %6643 = dma.done.wait [#allocation3], 448  }
  0x1b   :  { %6644 = vsyncadd [#allocation3], 4294966848 }
  0x1c   :  { %6645 = dma.done.wait [#allocation6], 51200  }
  0x1d   :  { %6646 = vsyncadd [#allocation6], 4294916096 }
  0x1e   :  { %6647 = dma.done.wait [#allocation9], 8192  }
  0x1f   :  { %6648 = vsyncadd [#allocation9], 4294959104 }
  0x20   :  { %6649 = dma.done.wait [#allocation12], 1664  }
  0x21   :  { %6650 = vsyncadd [#allocation12], 4294965632  ;;  %v4217_v0 = vld [vmem:[#allocation5 + $0x118] sm:$0xf]  ;;  %v6000_v1 = vld [vmem:[#allocation5 + $0x128] sm:$0xf0] }
  0x22   :  { %v4377_v2 = vld [vmem:[#allocation5 + $0x258] sm:$0xf]  ;;  %v4218_v3 = vor.u32 %v6000_v1, %v4217_v0  ;;  %v6040_v4 = vld [vmem:[#allocation5 + $0x268] sm:$0xf0]  ;;  %v4197_v11 = vld [vmem:[#allocation5 + $0xf0] sm:$0xf] }
  0x23   :  { %v4537_v5 = vld [vmem:[#allocation5 + $0x398] sm:$0xf]  ;;  %v6080_v6 = vld [vmem:[#allocation5 + $0x3a8] sm:$0xf0]  ;;  %v4378_v7 = vor.u32 %v6040_v4, %v4377_v2  ;;  %v5995_v13 = vld [vmem:[#allocation5 + $0x100] sm:$0xf0] }
  0x24   :  { %v4538_v8 = vor.u32 %v6080_v6, %v4537_v5  ;;  %v4697_v9 = vld [vmem:[#allocation5 + $0x4d8] sm:$0xf]  ;;  %v6120_v10 = vld [vmem:[#allocation5 + $0x4e8] sm:$0xf0]  ;;  %1967 = vmatpush.bf16.msra.mxu0 %v4218_v3  ;;  %v4357_v14 = vld [vmem:[#allocation5 + $0x230] sm:$0xf]  ;;  %v4198_v16 = vor.u32 %v5995_v13, %v4197_v11 }
  0x25   :  { %v4698_v12 = vor.u32 %v6120_v10, %v4697_v9  ;;  %v6035_v15 = vld [vmem:[#allocation5 + $0x240] sm:$0xf0]  ;;  %1980 = vmatpush.bf16.msra.mxu1 %v4378_v7  ;;  %v4517_v18 = vld [vmem:[#allocation5 + $0x370] sm:$0xf]  ;;  %v4177_v23 = vld [vmem:[#allocation5 + $0xc8] sm:$0xf] }
  0x26   :  { %1993 = vmatpush.bf16.msra.mxu2 %v4538_v8  ;;  %v4358_v17 = vor.u32 %v6035_v15, %v4357_v14  ;;  %v6075_v19 = vld [vmem:[#allocation5 + $0x380] sm:$0xf0]  ;;  %v4677_v20 = vld [vmem:[#allocation5 + $0x4b0] sm:$0xf]  ;;  %v5990_v24 = vld [vmem:[#allocation5 + $0xd8] sm:$0xf0] }
  0x27   :  { %2006 = vmatpush.bf16.msra.mxu3 %v4698_v12  ;;  %v4518_v21 = vor.u32 %v6075_v19, %v4517_v18  ;;  %v6115_v22 = vld [vmem:[#allocation5 + $0x4c0] sm:$0xf0]  ;;  %v4337_v26 = vld [vmem:[#allocation5 + $0x208] sm:$0xf]  ;;  %v6030_v27 = vld [vmem:[#allocation5 + $0x218] sm:$0xf0]  ;;  %v4178_v29 = vor.u32 %v5990_v24, %v4177_v23 }
  0x28   :  { %v4678_v25 = vor.u32 %v6115_v22, %v4677_v20  ;;  %v4497_v28 = vld [vmem:[#allocation5 + $0x348] sm:$0xf]  ;;  %1968 = vmatpush.bf16.msra.mxu0 %v4198_v16  ;;  %v6070_v30 = vld [vmem:[#allocation5 + $0x358] sm:$0xf0]  ;;  %v4338_v33 = vor.u32 %v6030_v27, %v4337_v26  ;;  %v4157_v35 = vld [vmem:[#allocation5 + $0xa0] sm:$0xf] }
  0x29   :  { %v4657_v31 = vld [vmem:[#allocation5 + $0x488] sm:$0xf]  ;;  %v6110_v32 = vld [vmem:[#allocation5 + $0x498] sm:$0xf0]  ;;  %1981 = vmatpush.bf16.msra.mxu1 %v4358_v17  ;;  %v4498_v34 = vor.u32 %v6070_v30, %v4497_v28  ;;  %v5985_v36 = vld [vmem:[#allocation5 + $0xb0] sm:$0xf0] }
  0x2a   :  { %1994 = vmatpush.bf16.msra.mxu2 %v4518_v21  ;;  %v4317_v37 = vld [vmem:[#allocation5 + $0x1e0] sm:$0xf]  ;;  %v4658_v38 = vor.u32 %v6110_v32, %v4657_v31  ;;  %v6025_v39 = vld [vmem:[#allocation5 + $0x1f0] sm:$0xf0]  ;;  %v4158_v44 = vor.u32 %v5985_v36, %v4157_v35  ;;  %v4137_v47 = vld [vmem:[#allocation5 + $0x78] sm:$0xf] }
  0x2b   :  { %2007 = vmatpush.bf16.msra.mxu3 %v4678_v25  ;;  %v4477_v40 = vld [vmem:[#allocation5 + $0x320] sm:$0xf]  ;;  %v6065_v41 = vld [vmem:[#allocation5 + $0x330] sm:$0xf0]  ;;  %v4318_v45 = vor.u32 %v6025_v39, %v4317_v37  ;;  %v5980_v48 = vld [vmem:[#allocation5 + $0x88] sm:$0xf0] }
  0x2c   :  { %v4637_v42 = vld [vmem:[#allocation5 + $0x460] sm:$0xf]  ;;  %v6105_v43 = vld [vmem:[#allocation5 + $0x470] sm:$0xf0]  ;;  %1969 = vmatpush.bf16.msra.mxu0 %v4178_v29  ;;  %v4478_v46 = vor.u32 %v6065_v41, %v4477_v40  ;;  %v4297_v49 = vld [vmem:[#allocation5 + $0x1b8] sm:$0xf]  ;;  %v4138_v56 = vor.u32 %v5980_v48, %v4137_v47 }
  0x2d   :  { %1982 = vmatpush.bf16.msra.mxu1 %v4338_v33  ;;  %v4638_v50 = vor.u32 %v6105_v43, %v4637_v42  ;;  %v6020_v51 = vld [vmem:[#allocation5 + $0x1c8] sm:$0xf0]  ;;  %v4457_v52 = vld [vmem:[#allocation5 + $0x2f8] sm:$0xf]  ;;  %v4117_v59 = vld [vmem:[#allocation5 + $0x50] sm:$0xf] }
  0x2e   :  { %1995 = vmatpush.bf16.msra.mxu2 %v4498_v34  ;;  %v6060_v53 = vld [vmem:[#allocation5 + $0x308] sm:$0xf0]  ;;  %v4617_v54 = vld [vmem:[#allocation5 + $0x438] sm:$0xf]  ;;  %v4298_v57 = vor.u32 %v6020_v51, %v4297_v49  ;;  %v5975_v60 = vld [vmem:[#allocation5 + $0x60] sm:$0xf0] }
  0x2f   :  { %2008 = vmatpush.bf16.msra.mxu3 %v4658_v38  ;;  %v6100_v55 = vld [vmem:[#allocation5 + $0x448] sm:$0xf0]  ;;  %v4458_v58 = vor.u32 %v6060_v53, %v4457_v52  ;;  %v4277_v61 = vld [vmem:[#allocation5 + $0x190] sm:$0xf]  ;;  %v6015_v63 = vld [vmem:[#allocation5 + $0x1a0] sm:$0xf0]  ;;  %v4118_v4 = vor.u32 %v5975_v60, %v4117_v59 }
  0x30   :  { %1970 = vmatpush.bf16.msra.mxu0 %v4158_v44  ;;  %v4618_v62 = vor.u32 %v6100_v55, %v4617_v54  ;;  %v4437_v0 = vld [vmem:[#allocation5 + $0x2d0] sm:$0xf]  ;;  %v6055_v1 = vld [vmem:[#allocation5 + $0x2e0] sm:$0xf0]  ;;  %v4278_v5 = vor.u32 %v6015_v63, %v4277_v61  ;;  %v4097_v7 = vld [vmem:[#allocation5 + $0x28] sm:$0xf] }
  0x31   :  { %1983 = vmatpush.bf16.msra.mxu1 %v4318_v45  ;;  %v4597_v2 = vld [vmem:[#allocation5 + $0x410] sm:$0xf]  ;;  %v6095_v3 = vld [vmem:[#allocation5 + $0x420] sm:$0xf0]  ;;  %v4438_v6 = vor.u32 %v6055_v1, %v4437_v0  ;;  %v5970_v8 = vld [vmem:[#allocation5 + $0x38] sm:$0xf0] }
  0x32   :  { %1996 = vmatpush.bf16.msra.mxu2 %v4478_v46  ;;  %v4257_v9 = vld [vmem:[#allocation5 + $0x168] sm:$0xf]  ;;  %v4598_v10 = vor.u32 %v6095_v3, %v4597_v2  ;;  %v6010_v11 = vld [vmem:[#allocation5 + $0x178] sm:$0xf0]  ;;  %v4098_v16 = vor.u32 %v5970_v8, %v4097_v7  ;;  %v4077_v17 = vld [vmem:[#allocation5] sm:$0xf] }
  0x33   :  { %2009 = vmatpush.bf16.msra.mxu3 %v4638_v50  ;;  %v4417_v12 = vld [vmem:[#allocation5 + $0x2a8] sm:$0xf]  ;;  %v6050_v13 = vld [vmem:[#allocation5 + $0x2b8] sm:$0xf0]  ;;  %v5965_v18 = vld [vmem:[#allocation5 + $0x10] sm:$0xf0]  ;;  %v4258_v19 = vor.u32 %v6010_v11, %v4257_v9 }
  0x34   :  { %1971 = vmatpush.bf16.msra.mxu0 %v4138_v56  ;;  %v4577_v14 = vld [vmem:[#allocation5 + $0x3e8] sm:$0xf]  ;;  %v6090_v15 = vld [vmem:[#allocation5 + $0x3f8] sm:$0xf0]  ;;  %v4418_v20 = vor.u32 %v6050_v13, %v4417_v12  ;;  %v4237_v21 = vld [vmem:[#allocation5 + $0x140] sm:$0xf]  ;;  %v4078_v31 = vor.u32 %v5965_v18, %v4077_v17 }
  0x35   :  { %1984 = vmatpush.bf16.msra.mxu1 %v4298_v57  ;;  %v6005_v22 = vld [vmem:[#allocation5 + $0x150] sm:$0xf0]  ;;  %v4397_v23 = vld [vmem:[#allocation5 + $0x280] sm:$0xf]  ;;  %v4578_v24 = vor.u32 %v6090_v15, %v4577_v14  ;;  %v4857_v28 = vld [vmem:[#allocation5 + $0x618] sm:$0xf] }
  0x36   :  { %1997 = vmatpush.bf16.msra.mxu2 %v4458_v58  ;;  %v6045_v25 = vld [vmem:[#allocation5 + $0x290] sm:$0xf0]  ;;  %v4557_v26 = vld [vmem:[#allocation5 + $0x3c0] sm:$0xf]  ;;  %v6160_v29 = vld [vmem:[#allocation5 + $0x628] sm:$0xf0]  ;;  %v4238_v35 = vor.u32 %v6005_v22, %v4237_v21 }
  0x37   :  { %2010 = vmatpush.bf16.msra.mxu3 %v4618_v62  ;;  %v6085_v27 = vld [vmem:[#allocation5 + $0x3d0] sm:$0xf0]  ;;  %v5017_v30 = vld [vmem:[#allocation5 + $0x758] sm:$0xf]  ;;  %v6200_v32 = vld [vmem:[#allocation5 + $0x768] sm:$0xf0]  ;;  %v4398_v36 = vor.u32 %v6045_v25, %v4397_v23  ;;  %v4858_v40 = vor.u32 %v6160_v29, %v4857_v28 }
  0x38   :  { %1972 = vmatpush.bf16.msra.mxu0 %v4118_v4  ;;  %v5177_v33 = vld [vmem:[#allocation5 + $0x898] sm:$0xf]  ;;  %v6240_v34 = vld [vmem:[#allocation5 + $0x8a8] sm:$0xf0]  ;;  %v5998_v37 = vld [vmem:[#allocation5 + $0x11c] sm:$0xf]  ;;  %v4558_v39 = vor.u32 %v6085_v27, %v4557_v26  ;;  %v5018_v41 = vor.u32 %v6200_v32, %v5017_v30 }
  0x39   :  { %1985 = vmatpush.bf16.msra.mxu1 %v4278_v5  ;;  %v4219_v38 = vld [vmem:[#allocation5 + $0x12c] sm:$0xf0]  ;;  %v5178_v42 = vor.u32 %v6240_v34, %v5177_v33  ;;  %v6155_v44 = vld [vmem:[#allocation5 + $0x600] sm:$0xf0]  ;;  %v5993_v50 = vld [vmem:[#allocation5 + $0xf4] sm:$0xf] }
  0x3a   :  { %1998 = vmatpush.bf16.msra.mxu2 %v4438_v6  ;;  %v4837_v43 = vld [vmem:[#allocation5 + $0x5f0] sm:$0xf]  ;;  %v4222_v46 = vor.u32 %v5998_v37, %v4219_v38  ;;  %v6195_v47 = vld [vmem:[#allocation5 + $0x740] sm:$0xf0]  ;;  %v4199_v51 = vld [vmem:[#allocation5 + $0x104] sm:$0xf0] }
  0x3b   :  { %2011 = vmatpush.bf16.msra.mxu3 %v4598_v10  ;;  %v4997_v45 = vld [vmem:[#allocation5 + $0x730] sm:$0xf]  ;;  %v6235_v49 = vld [vmem:[#allocation5 + $0x880] sm:$0xf0]  ;;  %v4838_v52 = vor.u32 %v6155_v44, %v4837_v43  ;;  %v4817_v53 = vld [vmem:[#allocation5 + $0x5c8] sm:$0xf]  ;;  %v4202_v59 = vor.u32 %v5993_v50, %v4199_v51 }
  0x3c   :  { %1973 = vmatpush.bf16.msra.mxu0 %v4098_v16  ;;  %v5157_v48 = vld [vmem:[#allocation5 + $0x870] sm:$0xf]  ;;  %v4998_v54 = vor.u32 %v6195_v47, %v4997_v45  ;;  %v6150_v56 = vld [vmem:[#allocation5 + $0x5d8] sm:$0xf0]  ;;  %v4977_v57 = vld [vmem:[#allocation5 + $0x708] sm:$0xf] }
  0x3d   :  { %1986 = vmatpush.bf16.msra.mxu1 %v4258_v19  ;;  %v5158_v55 = vor.u32 %v6235_v49, %v5157_v48  ;;  %v6190_v58 = vld [vmem:[#allocation5 + $0x718] sm:$0xf0]  ;;  %v5137_v60 = vld [vmem:[#allocation5 + $0x848] sm:$0xf]  ;;  %v5988_v62 = vld [vmem:[#allocation5 + $0xcc] sm:$0xf]  ;;  %v4818_v0 = vor.u32 %v6150_v56, %v4817_v53 }
  0x3e   :  { %1999 = vmatpush.bf16.msra.mxu2 %v4418_v20  ;;  %v6230_v61 = vld [vmem:[#allocation5 + $0x858] sm:$0xf0]  ;;  %v4179_v63 = vld [vmem:[#allocation5 + $0xdc] sm:$0xf0]  ;;  %v4978_v1 = vor.u32 %v6190_v58, %v4977_v57  ;;  %v133_v2 = vld [vmem:[#allocation2 + $0x8] sm:$0xff]  ;;  %s6668_s4 = smov [#allocation14]  }
  0x3f   :  { %2012 = vmatpush.bf16.msra.mxu3 %v4578_v24  ;;  %v132_v3 = vld [vmem:[#allocation2] sm:$0xff]  ;;  %v5138_v4 = vor.u32 %v6230_v61, %v5137_v60  ;;  %v4797_v5 = vld [vmem:[#allocation5 + $0x5a0] sm:$0xf]  ;;  %v6145_v6 = vld [vmem:[#allocation5 + $0x5b0] sm:$0xf0]  ;;  %v492_v8 = vunpack.c.l.b16 %v133_v2  ;;  %v4182_v11 = vor.u32 %v5988_v62, %v4179_v63  ;;  %v493_v15 = vunpack.c.h.b16 %v133_v2  ;;  %s4060_s6 = sshll.u32 %s6668_s4, 4  ;;  %s4061_s6 = int_to_ptr.vmem [resolvable:$true] %s4060_s6 }
  0x40   :  { %1974 = vmatpush.bf16.msra.mxu0 %v4078_v31  ;;  %v4957_v7 = vld [vmem:[#allocation5 + $0x6e0] sm:$0xf]  ;;  %v490_v9 = vunpack.c.l.b16 %v132_v3  ;;  %v491_v10 = vunpack.c.h.b16 %v132_v3  ;;  %v6185_v12 = vld [vmem:[#allocation5 + $0x6f0] sm:$0xf0]  ;;  %v5983_v16 = vld [vmem:[#allocation5 + $0xa4] sm:$0xf]  ;;  %v4798_v20 = vor.u32 %v6145_v6, %v4797_v5 }
  0x41   :  { %1987 = vmatpush.bf16.msra.mxu1 %v4238_v35  ;;  %v5117_v13 = vld [vmem:[#allocation5 + $0x820] sm:$0xf]  ;;  %v6225_v14 = vld [vmem:[#allocation5 + $0x830] sm:$0xf0]  ;;  %v4159_v17 = vld [vmem:[#allocation5 + $0xb4] sm:$0xf0]  ;;  %v6730_v18 = vpack.c.b16 %v492_v8, %v492_v8  ;;  %v6736_v22 = vpack.c.b16 %v493_v15, %v493_v15  ;;  %v4958_v23 = vor.u32 %v6185_v12, %v4957_v7 }
  0x42   :  { %2000 = vmatpush.bf16.msra.mxu2 %v4398_v36  ;;  %v6732_v19 = vpack.c.b16 %v490_v9, %v490_v9  ;;  %v6734_v21 = vpack.c.b16 %v491_v10, %v491_v10  ;;  %v5118_v24 = vor.u32 %v6225_v14, %v5117_v13  ;;  %v4777_v25 = vld [vmem:[#allocation5 + $0x578] sm:$0xf]  ;;  %v6140_v26 = vld [vmem:[#allocation5 + $0x588] sm:$0xf0]  ;;  %v4162_v28 = vor.u32 %v5983_v16, %v4159_v17  ;;  %v5978_v32 = vld [vmem:[#allocation5 + $0x7c] sm:$0xf] }
  0x43   :  { %2013 = vmatpush.bf16.msra.mxu3 %v4558_v39  ;;  %v4937_v27 = vld [vmem:[#allocation5 + $0x6b8] sm:$0xf]  ;;  %v6180_v29 = vld [vmem:[#allocation5 + $0x6c8] sm:$0xf0]  ;;  %v4139_v33 = vld [vmem:[#allocation5 + $0x8c] sm:$0xf0]  ;;  %v4778_v34 = vor.u32 %v6140_v26, %v4777_v25 }
  0x44   :  { %2019 = vmatpush.bf16.msrb.mxu0 %v4858_v40  ;;  %v5097_v30 = vld [vmem:[#allocation5 + $0x7f8] sm:$0xf]  ;;  %v6220_v31 = vld [vmem:[#allocation5 + $0x808] sm:$0xf0]  ;;  %1988 = vmatmul.bf16.vlgmr.msra.gmra.mxu1 %v6734_v21  ;;  %v4938_v35 = vor.u32 %v6180_v29, %v4937_v27  ;;  %v4757_v37 = vld [vmem:[#allocation5 + $0x550] sm:$0xf]  ;;  %v4142_v40 = vor.u32 %v5978_v32, %v4139_v33 }
  0x45   :  { %2032 = vmatpush.bf16.msrb.mxu1 %v5018_v41  ;;  %2001 = vmatmul.bf16.vlgmr.msra.gmra.mxu2 %v6730_v18  ;;  %v5098_v36 = vor.u32 %v6220_v31, %v5097_v30  ;;  %v6135_v38 = vld [vmem:[#allocation5 + $0x560] sm:$0xf0]  ;;  %v4917_v39 = vld [vmem:[#allocation5 + $0x690] sm:$0xf]  ;;  %v5973_v44 = vld [vmem:[#allocation5 + $0x54] sm:$0xf] }
  0x46   :  { %2045 = vmatpush.bf16.msrb.mxu2 %v5178_v42  ;;  %1975 = vmatmul.bf16.vlgmr.msra.gmra.mxu0 %v6732_v19  ;;  %v6175_v41 = vld [vmem:[#allocation5 + $0x6a0] sm:$0xf0]  ;;  %v5077_v42 = vld [vmem:[#allocation5 + $0x7d0] sm:$0xf]  ;;  %v4119_v45 = vld [vmem:[#allocation5 + $0x64] sm:$0xf0] }
  0x47   :  { %2058 = vmatpush.bf16.msrb.mxu3 %v4222_v46  ;;  %v6215_v43 = vld [vmem:[#allocation5 + $0x7e0] sm:$0xf0]  ;;  %v4758_v46 = vor.u32 %v6135_v38, %v4757_v37  ;;  %v4918_v47 = vor.u32 %v6175_v41, %v4917_v39  ;;  %v4737_v49 = vld [vmem:[#allocation5 + $0x528] sm:$0xf]  ;;  %v6130_v50 = vld [vmem:[#allocation5 + $0x538] sm:$0xf0] }
  0x48   :  { %2020 = vmatpush.bf16.msrb.mxu0 %v4838_v52  ;;  %2014 = vmatmul.bf16.vlgmr.msra.gmra.mxu3 %v6736_v22  ;;  %v5078_v48 = vor.u32 %v6215_v43, %v5077_v42  ;;  %v4897_v51 = vld [vmem:[#allocation5 + $0x668] sm:$0xf]  ;;  %v4122_v52 = vor.u32 %v5973_v44, %v4119_v45  ;;  %v6170_v53 = vld [vmem:[#allocation5 + $0x678] sm:$0xf0]  ;;  %v5968_v56 = vld [vmem:[#allocation5 + $0x2c] sm:$0xf] }
  0x49   :  { %2033 = vmatpush.bf16.msrb.mxu1 %v4998_v54  ;;  %v5057_v54 = vld [vmem:[#allocation5 + $0x7a8] sm:$0xf]  ;;  %v4099_v57 = vld [vmem:[#allocation5 + $0x3c] sm:$0xf0]  ;;  %v6125_v60 = vld [vmem:[#allocation5 + $0x510] sm:$0xf0]  ;;  %v4898_v63 = vor.u32 %v6170_v53, %v4897_v51 }
  0x4a   :  { %2046 = vmatpush.bf16.msrb.mxu2 %v5158_v55  ;;  %v6210_v55 = vld [vmem:[#allocation5 + $0x7b8] sm:$0xf0]  ;;  %v4717_v58 = vld [vmem:[#allocation5 + $0x500] sm:$0xf]  ;;  %v6165_v62 = vld [vmem:[#allocation5 + $0x650] sm:$0xf0] }
  0x4b   :  { %2059 = vmatpush.bf16.msrb.mxu3 %v4202_v59  ;;  %v4738_v59 = vor.u32 %v6130_v50, %v4737_v49  ;;  %v4877_v61 = vld [vmem:[#allocation5 + $0x640] sm:$0xf]  ;;  %v6205_v2 = vld [vmem:[#allocation5 + $0x790] sm:$0xf0]  ;;  %v135_v3 = vld [vmem:[#allocation2 + $0x18] sm:$0xf] }
  0x4c   :  { %2021 = vmatpush.bf16.msrb.mxu0 %v4818_v0  ;;  %v5058_v0 = vor.u32 %v6210_v55, %v5057_v54  ;;  %v5963_v5 = vld [vmem:[#allocation5 + $0x4] sm:$0xf]  ;;  %v4079_v6 = vld [vmem:[#allocation5 + $0x14] sm:$0xf0]  ;;  %v6038_v8 = vld [vmem:[#allocation5 + $0x25c] sm:$0xf]  ;;  %v496_v15 = vunpack.c.l.b16 %v135_v3  ;;  %v4878_v16 = vor.u32 %v6165_v62, %v4877_v61 }
  0x4d   :  { %2034 = vmatpush.bf16.msrb.mxu1 %v4978_v1  ;;  %v5037_v1 = vld [vmem:[#allocation5 + $0x780] sm:$0xf]  ;;  %v134_v7 = vld [vmem:[#allocation2 + $0x10] sm:$0xff]  ;;  %v4379_v9 = vld [vmem:[#allocation5 + $0x26c] sm:$0xf0]  ;;  %v4082_v26 = vor.u32 %v5963_v5, %v4079_v6  ;;  %s4062_s17 = sshll.u32 %s6887_s7, 4  ;;  %s4063_s17 = int_to_ptr.hbm [resolvable:$true] %s4062_s17 }
  0x4e   :  { %2047 = vmatpush.bf16.msrb.mxu2 %v5138_v4  ;;  %v4102_v4 = vor.u32 %v5968_v56, %v4099_v57  ;;  %v6078_v10 = vld [vmem:[#allocation5 + $0x39c] sm:$0xf]  ;;  %v4539_v12 = vld [vmem:[#allocation5 + $0x3ac] sm:$0xf0]  ;;  %v5038_v17 = vor.u32 %v6205_v2, %v5037_v1  ;;  %v495_v25 = vunpack.c.h.b16 %v134_v7  ;;  %v4382_v27 = vor.u32 %v6038_v8, %v4379_v9  ;;  %v6033_v30 = vld [vmem:[#allocation5 + $0x234] sm:$0xf] }
  0x4f   :  { %2060 = vmatpush.bf16.msrb.mxu3 %v4182_v11  ;;  %v4718_v11 = vor.u32 %v6125_v60, %v4717_v58  ;;  %v6118_v13 = vld [vmem:[#allocation5 + $0x4dc] sm:$0xf]  ;;  %v4699_v14 = vld [vmem:[#allocation5 + $0x4ec] sm:$0xf0]  ;;  %v4359_v31 = vld [vmem:[#allocation5 + $0x244] sm:$0xf0]  ;;  %v6742_v37 = vpack.c.b16 %v496_v15, %v496_v15 }
  0x50   :  { %2022 = vmatpush.bf16.msrb.mxu0 %v4798_v20  ;;  %v6158_v20 = vld [vmem:[#allocation5 + $0x61c] sm:$0xf]  ;;  %v4702_v29 = vor.u32 %v6118_v13, %v4699_v14  ;;  %v6073_v32 = vld [vmem:[#allocation5 + $0x374] sm:$0xf]  ;;  %v4839_v39 = vld [vmem:[#allocation5 + $0x604] sm:$0xf0]  ;;  %v6746_v41 = vpack.c.b16 %v495_v25, %v495_v25  ;;  %v4362_v42 = vor.u32 %v6033_v30, %v4359_v31 }
  0x51   :  { %2035 = vmatpush.bf16.msrb.mxu1 %v4958_v23  ;;  %v4859_v23 = vld [vmem:[#allocation5 + $0x62c] sm:$0xf0]  ;;  %v6153_v38 = vld [vmem:[#allocation5 + $0x5f4] sm:$0xf]  ;;  %v6028_v45 = vld [vmem:[#allocation5 + $0x20c] sm:$0xf] }
  0x52   :  { %2048 = vmatpush.bf16.msrb.mxu2 %v5118_v24  ;;  %v494_v24 = vunpack.c.l.b16 %v134_v7  ;;  %v4862_v33 = vor.u32 %v6158_v20, %v4859_v23  ;;  %v4499_v49 = vld [vmem:[#allocation5 + $0x35c] sm:$0xf0]  ;;  %v6108_v50 = vld [vmem:[#allocation5 + $0x48c] sm:$0xf]  ;;  %v6023_v57 = vld [vmem:[#allocation5 + $0x1e4] sm:$0xf] }
  0x53   :  { %2061 = vmatpush.bf16.msrb.mxu3 %v4162_v28  ;;  %v4542_v28 = vor.u32 %v6078_v10, %v4539_v12  ;;  %v4659_v51 = vld [vmem:[#allocation5 + $0x49c] sm:$0xf0]  ;;  %v4319_v58 = vld [vmem:[#allocation5 + $0x1f4] sm:$0xf0]  ;;  %v6103_v62 = vld [vmem:[#allocation5 + $0x464] sm:$0xf] }
  0x54   :  { %2023 = vmatpush.bf16.msrb.mxu0 %v4778_v34  ;;  %v4519_v34 = vld [vmem:[#allocation5 + $0x384] sm:$0xf0]  ;;  %v4819_v53 = vld [vmem:[#allocation5 + $0x5dc] sm:$0xf0]  ;;  %v4662_v56 = vor.u32 %v6108_v50, %v4659_v51  ;;  %v4479_v61 = vld [vmem:[#allocation5 + $0x334] sm:$0xf0]  ;;  %v4322_v2 = vor.u32 %v6023_v57, %v4319_v58 }
  0x55   :  { %2036 = vmatpush.bf16.msrb.mxu1 %v4938_v35  ;;  %v6113_v35 = vld [vmem:[#allocation5 + $0x4b4] sm:$0xf]  ;;  %v4522_v43 = vor.u32 %v6073_v32, %v4519_v34  ;;  %v4799_v1 = vld [vmem:[#allocation5 + $0x5b4] sm:$0xf0]  ;;  %v6018_v5 = vld [vmem:[#allocation5 + $0x1bc] sm:$0xf] }
  0x56   :  { %2049 = vmatpush.bf16.msrb.mxu2 %v5098_v36  ;;  %v4679_v36 = vld [vmem:[#allocation5 + $0x4c4] sm:$0xf0]  ;;  %v4299_v6 = vld [vmem:[#allocation5 + $0x1cc] sm:$0xf0]  ;;  %v6058_v7 = vld [vmem:[#allocation5 + $0x2fc] sm:$0xf] }
  0x57   :  { %2062 = vmatpush.bf16.msrb.mxu3 %v4142_v40  ;;  %v6744_v40 = vpack.c.b16 %v494_v24, %v494_v24  ;;  %v4682_v44 = vor.u32 %v6113_v35, %v4679_v36  ;;  %v4459_v9 = vld [vmem:[#allocation5 + $0x30c] sm:$0xf0]  ;;  %v6098_v10 = vld [vmem:[#allocation5 + $0x43c] sm:$0xf]  ;;  %v4302_v14 = vor.u32 %v6018_v5, %v4299_v6  ;;  %v4279_v20 = vld [vmem:[#allocation5 + $0x1a4] sm:$0xf0] }
  0x58   :  { %2024 = vmatpush.bf16.msrb.mxu0 %v4758_v46  ;;  %v4339_v46 = vld [vmem:[#allocation5 + $0x21c] sm:$0xf0]  ;;  %v6138_v12 = vld [vmem:[#allocation5 + $0x57c] sm:$0xf]  ;;  %v4779_v13 = vld [vmem:[#allocation5 + $0x58c] sm:$0xf0]  ;;  %v4462_v15 = vor.u32 %v6058_v7, %v4459_v9 }
  0x59   :  { %2037 = vmatpush.bf16.msrb.mxu1 %v4918_v47  ;;  %v6068_v47 = vld [vmem:[#allocation5 + $0x34c] sm:$0xf]  ;;  %v4342_v54 = vor.u32 %v6028_v45, %v4339_v46  ;;  %v6053_v23 = vld [vmem:[#allocation5 + $0x2d4] sm:$0xf]  ;;  %v4782_v24 = vor.u32 %v6138_v12, %v4779_v13  ;;  %v4439_v25 = vld [vmem:[#allocation5 + $0x2e4] sm:$0xf0] }
  0x5a   :  { %2050 = vmatpush.bf16.msrb.mxu2 %v5078_v48  ;;  %v4842_v48 = vor.u32 %v6153_v38, %v4839_v39  ;;  %v4502_v55 = vor.u32 %v6068_v47, %v4499_v49  ;;  %v4442_v31 = vor.u32 %v6053_v23, %v4439_v25  ;;  %v4259_v34 = vld [vmem:[#allocation5 + $0x17c] sm:$0xf0]  ;;  %v6048_v35 = vld [vmem:[#allocation5 + $0x2ac] sm:$0xf]  ;;  %v6003_v46 = vld [vmem:[#allocation5 + $0x144] sm:$0xf] }
  0x5b   :  { %2063 = vmatpush.bf16.msrb.mxu3 %v4122_v52  ;;  %v6148_v52 = vld [vmem:[#allocation5 + $0x5cc] sm:$0xf]  ;;  %v4419_v38 = vld [vmem:[#allocation5 + $0x2bc] sm:$0xf0]  ;;  %v4239_v47 = vld [vmem:[#allocation5 + $0x154] sm:$0xf0] }
  0x5c   :  { %2025 = vmatpush.bf16.msrb.mxu0 %v4738_v59  ;;  %v6063_v59 = vld [vmem:[#allocation5 + $0x324] sm:$0xf]  ;;  %v4822_v60 = vor.u32 %v6148_v52, %v4819_v53  ;;  %v6088_v39 = vld [vmem:[#allocation5 + $0x3ec] sm:$0xf]  ;;  %v4399_v51 = vld [vmem:[#allocation5 + $0x294] sm:$0xf0] }
  0x5d   :  { %2038 = vmatpush.bf16.msrb.mxu1 %v4898_v63  ;;  %v4639_v63 = vld [vmem:[#allocation5 + $0x474] sm:$0xf0]  ;;  %v4482_v3 = vor.u32 %v6063_v59, %v4479_v61  ;;  %v6043_v50 = vld [vmem:[#allocation5 + $0x284] sm:$0xf]  ;;  %v6198_v57 = vld [vmem:[#allocation5 + $0x75c] sm:$0xf] }
  0x5e   :  { %2051 = vmatpush.bf16.msrb.mxu2 %v5058_v0  ;;  %v6143_v0 = vld [vmem:[#allocation5 + $0x5a4] sm:$0xf]  ;;  %v5019_v58 = vld [vmem:[#allocation5 + $0x76c] sm:$0xf0]  ;;  %v6238_v59 = vld [vmem:[#allocation5 + $0x89c] sm:$0xf] }
  0x5f   :  { %2064 = vmatpush.bf16.msrb.mxu3 %v4102_v4  ;;  %v4642_v4 = vor.u32 %v6103_v62, %v4639_v63  ;;  %v4802_v8 = vor.u32 %v6143_v0, %v4799_v1  ;;  %v6083_v52 = vld [vmem:[#allocation5 + $0x3c4] sm:$0xf]  ;;  %v5179_v61 = vld [vmem:[#allocation5 + $0x8ac] sm:$0xf0]  ;;  %v4225_v62 = vld [vmem:[#allocation5 + $0x120] sm:$0xf]  ;;  %v4402_v0 = vor.u32 %v6043_v50, %v4399_v51  ;;  %v5022_v5 = vor.u32 %v6198_v57, %v5019_v58 }
  0x60   :  { %2026 = vmatpush.bf16.msrb.mxu0 %v4718_v11  ;;  %v4619_v11 = vld [vmem:[#allocation5 + $0x44c] sm:$0xf0]  ;;  %v6001_v63 = vld [vmem:[#allocation5 + $0x130] sm:$0xf0]  ;;  %v5182_v6 = vor.u32 %v6238_v59, %v5179_v61  ;;  %v4999_v9 = vld [vmem:[#allocation5 + $0x744] sm:$0xf0] }
  0x61   :  { %2039 = vmatpush.bf16.msrb.mxu1 %v4878_v16  ;;  %v4622_v16 = vor.u32 %v6098_v10, %v4619_v11  ;;  %v4226_v7 = vor.u32 %v6001_v63, %v4225_v62  ;;  %v6233_v10 = vld [vmem:[#allocation5 + $0x874] sm:$0xf]  ;;  %v5159_v12 = vld [vmem:[#allocation5 + $0x884] sm:$0xf0]  ;;  %v4205_v13 = vld [vmem:[#allocation5 + $0xf8] sm:$0xf] }
  0x62   :  { %2052 = vmatpush.bf16.msrb.mxu2 %v5038_v17  ;;  %v6013_v17 = vld [vmem:[#allocation5 + $0x194] sm:$0xf]  ;;  %v4979_v25 = vld [vmem:[#allocation5 + $0x71c] sm:$0xf0]  ;;  %v6178_v51 = vld [vmem:[#allocation5 + $0x6bc] sm:$0xf] }
  0x63   :  { %2065 = vmatpush.bf16.msrb.mxu3 %v4082_v26  ;;  %2027 = vmatmul.bf16.vlgmr.msrb.gmra.mxu0 %v6744_v40  ;;  %v6093_v26 = vld [vmem:[#allocation5 + $0x414] sm:$0xf]  ;;  %v4282_v30 = vor.u32 %v6013_v17, %v4279_v20  ;;  %v5162_v20 = vor.u32 %v6233_v10, %v5159_v12  ;;  %v4305_v58 = vld [vmem:[#allocation5 + $0x1c0] sm:$0xf] }
  0x64   :  { %2071 = vmatpush.bf16.msra.mxu0 %v4382_v27  ;;  %2040 = vmatmul.bf16.vlgmr.msrb.gmra.mxu1 %v6746_v41  ;;  %v4599_v27 = vld [vmem:[#allocation5 + $0x424] sm:$0xf0]  ;;  %v5981_v57 = vld [vmem:[#allocation5 + $0x90] sm:$0xf0]  ;;  %v4899_v12 = vld [vmem:[#allocation5 + $0x67c] sm:$0xf0] }
  0x65   :  { %2084 = vmatpush.bf16.msra.mxu1 %v4542_v28  ;;  %2053 = vmatmul.bf16.vlgmr.msrb.gmra.mxu2 %v6742_v37  ;;  %v6133_v28 = vld [vmem:[#allocation5 + $0x554] sm:$0xf]  ;;  %v4602_v32 = vor.u32 %v6093_v26, %v4599_v27  ;;  %v6228_v26 = vld [vmem:[#allocation5 + $0x84c] sm:$0xf] }
  0x66   :  { %2097 = vmatpush.bf16.msra.mxu2 %v4702_v29  ;;  %2066 = vmatmul.bf16.vlgmr.msrb.gmra.mxu3 %v6732_v19  ;;  %v4759_v29 = vld [vmem:[#allocation5 + $0x564] sm:$0xf0]  ;;  %v6021_v59 = vld [vmem:[#allocation5 + $0x1d0] sm:$0xf0] }
  0x67   :  { %2110 = vmatpush.bf16.msra.mxu3 %v4862_v33  ;;  %v6008_v33 = vld [vmem:[#allocation5 + $0x16c] sm:$0xf]  ;;  %v4762_v36 = vor.u32 %v6133_v28, %v4759_v29  ;;  %v5139_v28 = vld [vmem:[#allocation5 + $0x85c] sm:$0xf0]  ;;  %v4185_v29 = vld [vmem:[#allocation5 + $0xd0] sm:$0xf] }
  0x68   :  { %2072 = vmatpush.bf16.msra.mxu0 %v4362_v42  ;;  %v4579_v42 = vld [vmem:[#allocation5 + $0x3fc] sm:$0xf0]  ;;  %v4262_v45 = vor.u32 %v6008_v33, %v4259_v34  ;;  %v5142_v34 = vor.u32 %v6228_v26, %v5139_v28  ;;  %v6173_v63 = vld [vmem:[#allocation5 + $0x694] sm:$0xf]  ;;  %v4879_v26 = vld [vmem:[#allocation5 + $0x654] sm:$0xf0] }
  0x69   :  { %2085 = vmatpush.bf16.msra.mxu1 %v4522_v43  ;;  %v6128_v43 = vld [vmem:[#allocation5 + $0x52c] sm:$0xf]  ;;  %v4582_v49 = vor.u32 %v6088_v39, %v4579_v42  ;;  %v6223_v39 = vld [vmem:[#allocation5 + $0x824] sm:$0xf] }
  0x6a   :  { %2098 = vmatpush.bf16.msra.mxu2 %v4682_v44  ;;  %v4739_v44 = vld [vmem:[#allocation5 + $0x53c] sm:$0xf0] }
  0x6b   :  { %2111 = vmatpush.bf16.msra.mxu3 %v4842_v48  ;;  %v4422_v48 = vor.u32 %v6048_v35, %v4419_v38  ;;  %v4742_v53 = vor.u32 %v6128_v43, %v4739_v44  ;;  %v4959_v38 = vld [vmem:[#allocation5 + $0x6f4] sm:$0xf0]  ;;  %v4165_v44 = vld [vmem:[#allocation5 + $0xa8] sm:$0xf] }
  0x6c   :  { %2073 = vmatpush.bf16.msra.mxu0 %v4342_v54  ;;  %v4559_v54 = vld [vmem:[#allocation5 + $0x3d4] sm:$0xf0] }
  0x6d   :  { %2086 = vmatpush.bf16.msra.mxu1 %v4502_v55  ;;  %v6123_v55 = vld [vmem:[#allocation5 + $0x504] sm:$0xf]  ;;  %v4562_v1 = vor.u32 %v6083_v52, %v4559_v54  ;;  %v5119_v43 = vld [vmem:[#allocation5 + $0x834] sm:$0xf0]  ;;  %v4939_v52 = vld [vmem:[#allocation5 + $0x6cc] sm:$0xf0] }
  0x6e   :  { %2099 = vmatpush.bf16.msra.mxu2 %v4662_v56  ;;  %v4719_v56 = vld [vmem:[#allocation5 + $0x514] sm:$0xf0] }
  0x6f   :  { %2112 = vmatpush.bf16.msra.mxu3 %v4822_v60  ;;  %v4242_v60 = vor.u32 %v6003_v46, %v4239_v47  ;;  %v4325_v46 = vld [vmem:[#allocation5 + $0x1e8] sm:$0xf]  ;;  %v6026_v47 = vld [vmem:[#allocation5 + $0x1f8] sm:$0xf0] }
  0x70   :  { %2074 = vmatpush.bf16.msra.mxu0 %v4322_v2  ;;  %v4385_v2 = vld [vmem:[#allocation5 + $0x260] sm:$0xf]  ;;  %v4326_v54 = vor.u32 %v6026_v47, %v4325_v46 }
  0x71   :  { %2087 = vmatpush.bf16.msra.mxu1 %v4482_v3  ;;  %v6041_v3 = vld [vmem:[#allocation5 + $0x270] sm:$0xf0] }
  0x72   :  { %2100 = vmatpush.bf16.msra.mxu2 %v4642_v4  ;;  %v4722_v4 = vor.u32 %v6123_v55, %v4719_v56  ;;  %v4386_v11 = vor.u32 %v6041_v3, %v4385_v2  ;;  %v5099_v55 = vld [vmem:[#allocation5 + $0x80c] sm:$0xf0]  ;;  %v4145_v56 = vld [vmem:[#allocation5 + $0x80] sm:$0xf]  ;;  %v4306_v2 = vor.u32 %v6021_v59, %v4305_v58  ;;  %v5079_v3 = vld [vmem:[#allocation5 + $0x7e4] sm:$0xf0] }
  0x73   :  { %2113 = vmatpush.bf16.msra.mxu3 %v4802_v8  ;;  %v6193_v8 = vld [vmem:[#allocation5 + $0x734] sm:$0xf]  ;;  %v4146_v62 = vor.u32 %v5981_v57, %v4145_v56  ;;  %v4685_v56 = vld [vmem:[#allocation5 + $0x4b8] sm:$0xf]  ;;  %v6116_v58 = vld [vmem:[#allocation5 + $0x4c8] sm:$0xf0] }
  0x74   :  { %2075 = vmatpush.bf16.msra.mxu0 %v4302_v14  ;;  %v5996_v14 = vld [vmem:[#allocation5 + $0x108] sm:$0xf0]  ;;  %v5002_v17 = vor.u32 %v6193_v8, %v4999_v9  ;;  %v4845_v59 = vld [vmem:[#allocation5 + $0x5f8] sm:$0xf] }
  0x75   :  { %2088 = vmatpush.bf16.msra.mxu1 %v4462_v15  ;;  %v4365_v15 = vld [vmem:[#allocation5 + $0x238] sm:$0xf]  ;;  %v4206_v23 = vor.u32 %v5996_v14, %v4205_v13  ;;  %v6208_v13 = vld [vmem:[#allocation5 + $0x7ac] sm:$0xf] }
  0x76   :  { %2101 = vmatpush.bf16.msra.mxu2 %v4622_v16  ;;  %v6036_v16 = vld [vmem:[#allocation5 + $0x248] sm:$0xf0] }
  0x77   :  { %2114 = vmatpush.bf16.msra.mxu3 %v4782_v24  ;;  %v6188_v24 = vld [vmem:[#allocation5 + $0x70c] sm:$0xf]  ;;  %v4366_v27 = vor.u32 %v6036_v16, %v4365_v15  ;;  %v5059_v15 = vld [vmem:[#allocation5 + $0x7bc] sm:$0xf0]  ;;  %v4105_v16 = vld [vmem:[#allocation5 + $0x30] sm:$0xf] }
  0x78   :  { %2076 = vmatpush.bf16.msra.mxu0 %v4282_v30  ;;  %v5991_v30 = vld [vmem:[#allocation5 + $0xe0] sm:$0xf0]  ;;  %v4982_v33 = vor.u32 %v6188_v24, %v4979_v25 }
  0x79   :  { %2089 = vmatpush.bf16.msra.mxu1 %v4442_v31  ;;  %v4345_v31 = vld [vmem:[#allocation5 + $0x210] sm:$0xf]  ;;  %v4186_v35 = vor.u32 %v5991_v30, %v4185_v29  ;;  %v6163_v25 = vld [vmem:[#allocation5 + $0x644] sm:$0xf]  ;;  %v5039_v30 = vld [vmem:[#allocation5 + $0x794] sm:$0xf0] }
  0x7a   :  { %2102 = vmatpush.bf16.msra.mxu2 %v4602_v32  ;;  %v6031_v32 = vld [vmem:[#allocation5 + $0x220] sm:$0xf0] }
  0x7b   :  { %2115 = vmatpush.bf16.msra.mxu3 %v4762_v36  ;;  %v6183_v36 = vld [vmem:[#allocation5 + $0x6e4] sm:$0xf]  ;;  %v4346_v42 = vor.u32 %v6031_v32, %v4345_v31  ;;  %v4085_v31 = vld [vmem:[#allocation5 + $0x8] sm:$0xf] }
  0x7c   :  { %2077 = vmatpush.bf16.msra.mxu0 %v4262_v45  ;;  %v5986_v45 = vld [vmem:[#allocation5 + $0xb8] sm:$0xf0]  ;;  %v6203_v29 = vld [vmem:[#allocation5 + $0x784] sm:$0xf] }
  0x7d   :  { %2090 = vmatpush.bf16.msra.mxu1 %v4422_v48  ;;  %v4962_v48 = vor.u32 %v6183_v36, %v4959_v38  ;;  %v4166_v50 = vor.u32 %v5986_v45, %v4165_v44  ;;  %v4545_v36 = vld [vmem:[#allocation5 + $0x3a0] sm:$0xf]  ;;  %v6081_v38 = vld [vmem:[#allocation5 + $0x3b0] sm:$0xf0]  ;;  %v5042_v46 = vor.u32 %v6203_v29, %v5039_v30 }
  0x7e   :  { %2103 = vmatpush.bf16.msra.mxu2 %v4582_v49  ;;  %v5122_v49 = vor.u32 %v6223_v39, %v5119_v43  ;;  %v4705_v39 = vld [vmem:[#allocation5 + $0x4e0] sm:$0xf]  ;;  %v6121_v43 = vld [vmem:[#allocation5 + $0x4f0] sm:$0xf0] }
  0x7f   :  { %2116 = vmatpush.bf16.msra.mxu3 %v4742_v53  ;;  %v6218_v53 = vld [vmem:[#allocation5 + $0x7fc] sm:$0xf]  ;;  %v4865_v44 = vld [vmem:[#allocation5 + $0x620] sm:$0xf]  ;;  %v6161_v45 = vld [vmem:[#allocation5 + $0x630] sm:$0xf0] }
  0x80   :  { %2078 = vmatpush.bf16.msra.mxu0 %v4242_v60  ;;  %v4942_v60 = vor.u32 %v6178_v51, %v4939_v52  ;;  %v5102_v61 = vor.u32 %v6218_v53, %v5099_v55  ;;  %v4546_v51 = vor.u32 %v6081_v38, %v4545_v36  ;;  %v4706_v52 = vor.u32 %v6121_v43, %v4705_v39  ;;  %v6076_v55 = vld [vmem:[#allocation5 + $0x388] sm:$0xf0]  ;;  %v4465_v30 = vld [vmem:[#allocation5 + $0x300] sm:$0xf]  ;;  %v6141_v36 = vld [vmem:[#allocation5 + $0x590] sm:$0xf0] }
  0x81   :  { %2091 = vmatpush.bf16.msra.mxu1 %v4402_v0  ;;  %v4919_v0 = vld [vmem:[#allocation5 + $0x6a4] sm:$0xf0]  ;;  %v4866_v53 = vor.u32 %v6161_v45, %v4865_v44  ;;  %v4945_v38 = vld [vmem:[#allocation5 + $0x6c0] sm:$0xf]  ;;  %v6181_v39 = vld [vmem:[#allocation5 + $0x6d0] sm:$0xf0] }
  0x82   :  { %2104 = vmatpush.bf16.msra.mxu2 %v4562_v1  ;;  %v6213_v1 = vld [vmem:[#allocation5 + $0x7d4] sm:$0xf]  ;;  %v4922_v8 = vor.u32 %v6173_v63, %v4919_v0  ;;  %v4686_v0 = vor.u32 %v6116_v58, %v4685_v56  ;;  %v4445_v45 = vld [vmem:[#allocation5 + $0x2d8] sm:$0xf]  ;;  %v6051_v58 = vld [vmem:[#allocation5 + $0x2c0] sm:$0xf0] }
  0x83   :  { %2117 = vmatpush.bf16.msra.mxu3 %v4722_v4  ;;  %2079 = vmatmul.bf16.vlgmr.msra.gmra.mxu0 %v6734_v21  ;;  %v4125_v4 = vld [vmem:[#allocation5 + $0x58] sm:$0xf]  ;;  %v5082_v9 = vor.u32 %v6213_v1, %v5079_v3  ;;  %v6071_v3 = vld [vmem:[#allocation5 + $0x360] sm:$0xf0] }
  0x84   :  { %2123 = vmatpush.bf16.msrb.mxu0 %v5022_v5  ;;  %2092 = vmatmul.bf16.vlgmr.msra.gmra.mxu1 %v6730_v18  ;;  %v5976_v5 = vld [vmem:[#allocation5 + $0x68] sm:$0xf0] }
  0x85   :  { %2136 = vmatpush.bf16.msrb.mxu1 %v5182_v6  ;;  %2105 = vmatmul.bf16.vlgmr.msra.gmra.mxu2 %v6736_v22  ;;  %v4285_v6 = vld [vmem:[#allocation5 + $0x198] sm:$0xf]  ;;  %v4126_v10 = vor.u32 %v5976_v5, %v4125_v4  ;;  %v4665_v4 = vld [vmem:[#allocation5 + $0x490] sm:$0xf] }
  0x86   :  { %2149 = vmatpush.bf16.msrb.mxu2 %v4226_v7  ;;  %2118 = vmatmul.bf16.vlgmr.msra.gmra.mxu3 %v6744_v40  ;;  %v6016_v7 = vld [vmem:[#allocation5 + $0x1a8] sm:$0xf0] }
  0x87   :  { %2162 = vmatpush.bf16.msrb.mxu3 %v4386_v11  ;;  %v6168_v11 = vld [vmem:[#allocation5 + $0x66c] sm:$0xf]  ;;  %v4286_v14 = vor.u32 %v6016_v7, %v4285_v6  ;;  %v6111_v6 = vld [vmem:[#allocation5 + $0x4a0] sm:$0xf0]  ;;  %v4825_v7 = vld [vmem:[#allocation5 + $0x5d0] sm:$0xf] }
  0x88   :  { %2124 = vmatpush.bf16.msrb.mxu0 %v5002_v17  ;;  %v5971_v17 = vld [vmem:[#allocation5 + $0x40] sm:$0xf0]  ;;  %v4902_v24 = vor.u32 %v6168_v11, %v4899_v12  ;;  %v4666_v12 = vor.u32 %v6111_v6, %v4665_v4  ;;  %v6046_v4 = vld [vmem:[#allocation5 + $0x298] sm:$0xf0] }
  0x89   :  { %2137 = vmatpush.bf16.msrb.mxu1 %v5162_v20  ;;  %v4265_v20 = vld [vmem:[#allocation5 + $0x170] sm:$0xf]  ;;  %v4106_v28 = vor.u32 %v5971_v17, %v4105_v16  ;;  %v4645_v16 = vld [vmem:[#allocation5 + $0x468] sm:$0xf] }
  0x8a   :  { %2150 = vmatpush.bf16.msrb.mxu2 %v4206_v23  ;;  %v6011_v23 = vld [vmem:[#allocation5 + $0x180] sm:$0xf0] }
  0x8b   :  { %2163 = vmatpush.bf16.msrb.mxu3 %v4366_v27  ;;  %v5062_v27 = vor.u32 %v6208_v13, %v5059_v15  ;;  %v4266_v32 = vor.u32 %v6011_v23, %v4265_v20  ;;  %v6066_v15 = vld [vmem:[#allocation5 + $0x338] sm:$0xf0]  ;;  %v4805_v23 = vld [vmem:[#allocation5 + $0x5a8] sm:$0xf] }
  0x8c   :  { %2125 = vmatpush.bf16.msrb.mxu0 %v4982_v33  ;;  %v5966_v33 = vld [vmem:[#allocation5 + $0x18] sm:$0xf0] }
  0x8d   :  { %2138 = vmatpush.bf16.msrb.mxu1 %v5142_v34  ;;  %v4245_v34 = vld [vmem:[#allocation5 + $0x148] sm:$0xf]  ;;  %v4086_v47 = vor.u32 %v5966_v33, %v4085_v31  ;;  %v6106_v20 = vld [vmem:[#allocation5 + $0x478] sm:$0xf0]  ;;  %v6061_v31 = vld [vmem:[#allocation5 + $0x310] sm:$0xf0] }
  0x8e   :  { %2151 = vmatpush.bf16.msrb.mxu2 %v4186_v35  ;;  %v6006_v35 = vld [vmem:[#allocation5 + $0x158] sm:$0xf0] }
  0x8f   :  { %2164 = vmatpush.bf16.msrb.mxu3 %v4346_v42  ;;  %v4882_v42 = vor.u32 %v6163_v25, %v4879_v26  ;;  %v4965_v25 = vld [vmem:[#allocation5 + $0x6e8] sm:$0xf]  ;;  %v6186_v26 = vld [vmem:[#allocation5 + $0x6f8] sm:$0xf0] }
  0x90   :  { %2126 = vmatpush.bf16.msrb.mxu0 %v4962_v48  ;;  %v5025_v48 = vld [vmem:[#allocation5 + $0x760] sm:$0xf]  ;;  %v4966_v33 = vor.u32 %v6186_v26, %v4965_v25 }
  0x91   :  { %2139 = vmatpush.bf16.msrb.mxu1 %v5122_v49  ;;  %v6201_v49 = vld [vmem:[#allocation5 + $0x770] sm:$0xf0] }
  0x92   :  { %2152 = vmatpush.bf16.msrb.mxu2 %v4166_v50  ;;  %v4246_v50 = vor.u32 %v6006_v35, %v4245_v34  ;;  %v5026_v57 = vor.u32 %v6201_v49, %v5025_v48  ;;  %v6101_v34 = vld [vmem:[#allocation5 + $0x450] sm:$0xf0]  ;;  %v4785_v35 = vld [vmem:[#allocation5 + $0x580] sm:$0xf]  ;;  %v4946_v48 = vor.u32 %v6181_v39, %v4945_v38  ;;  %v6096_v49 = vld [vmem:[#allocation5 + $0x428] sm:$0xf0] }
  0x93   :  { %2165 = vmatpush.bf16.msrb.mxu3 %v4326_v54  ;;  %v4525_v54 = vld [vmem:[#allocation5 + $0x378] sm:$0xf]  ;;  %v4786_v44 = vor.u32 %v6141_v36, %v4785_v35  ;;  %v5994_v35 = vld [vmem:[#allocation5 + $0xfc] sm:$0xf]  ;;  %v4207_v38 = vld [vmem:[#allocation5 + $0x10c] sm:$0xf0] }
  0x94   :  { %2127 = vmatpush.bf16.msrb.mxu0 %v4942_v60  ;;  %v6156_v60 = vld [vmem:[#allocation5 + $0x608] sm:$0xf0]  ;;  %v4526_v63 = vor.u32 %v6076_v55, %v4525_v54  ;;  %v6034_v39 = vld [vmem:[#allocation5 + $0x23c] sm:$0xf] }
  0x95   :  { %2140 = vmatpush.bf16.msrb.mxu1 %v5102_v61  ;;  %v5005_v61 = vld [vmem:[#allocation5 + $0x738] sm:$0xf]  ;;  %v4846_v1 = vor.u32 %v6156_v60, %v4845_v59  ;;  %v4585_v59 = vld [vmem:[#allocation5 + $0x3f0] sm:$0xf] }
  0x96   :  { %2153 = vmatpush.bf16.msrb.mxu2 %v4146_v62  ;;  %v6196_v62 = vld [vmem:[#allocation5 + $0x748] sm:$0xf0] }
  0x97   :  { %2166 = vmatpush.bf16.msrb.mxu3 %v4306_v2  ;;  %v4505_v2 = vld [vmem:[#allocation5 + $0x350] sm:$0xf]  ;;  %v5006_v5 = vor.u32 %v6196_v62, %v5005_v61  ;;  %v6091_v61 = vld [vmem:[#allocation5 + $0x400] sm:$0xf0] }
  0x98   :  { %2128 = vmatpush.bf16.msrb.mxu0 %v4922_v8  ;;  %v6151_v8 = vld [vmem:[#allocation5 + $0x5e0] sm:$0xf0]  ;;  %v4506_v11 = vor.u32 %v6071_v3, %v4505_v2  ;;  %v4745_v62 = vld [vmem:[#allocation5 + $0x530] sm:$0xf]  ;;  %v4405_v3 = vld [vmem:[#allocation5 + $0x288] sm:$0xf] }
  0x99   :  { %2141 = vmatpush.bf16.msrb.mxu1 %v5082_v9  ;;  %v4985_v9 = vld [vmem:[#allocation5 + $0x710] sm:$0xf]  ;;  %v4826_v13 = vor.u32 %v6151_v8, %v4825_v7  ;;  %v4565_v7 = vld [vmem:[#allocation5 + $0x3c8] sm:$0xf]  ;;  %v6086_v8 = vld [vmem:[#allocation5 + $0x3d8] sm:$0xf0] }
  0x9a   :  { %2154 = vmatpush.bf16.msrb.mxu2 %v4126_v10  ;;  %v6191_v10 = vld [vmem:[#allocation5 + $0x720] sm:$0xf0]  ;;  %v4566_v25 = vor.u32 %v6086_v8, %v4565_v7 }
  0x9b   :  { %2167 = vmatpush.bf16.msrb.mxu3 %v4286_v14  ;;  %v4485_v14 = vld [vmem:[#allocation5 + $0x328] sm:$0xf]  ;;  %v4986_v17 = vor.u32 %v6191_v10, %v4985_v9 }
  0x9c   :  { %2129 = vmatpush.bf16.msrb.mxu0 %v4902_v24  ;;  %v6146_v24 = vld [vmem:[#allocation5 + $0x5b8] sm:$0xf0]  ;;  %v4725_v9 = vld [vmem:[#allocation5 + $0x508] sm:$0xf] }
  0x9d   :  { %2142 = vmatpush.bf16.msrb.mxu1 %v5062_v27  ;;  %v4486_v27 = vor.u32 %v6066_v15, %v4485_v14  ;;  %v4806_v29 = vor.u32 %v6146_v24, %v4805_v23  ;;  %v5185_v14 = vld [vmem:[#allocation5 + $0x8a0] sm:$0xf]  ;;  %v6241_v15 = vld [vmem:[#allocation5 + $0x8b0] sm:$0xf0]  ;;  %v6039_v23 = vld [vmem:[#allocation5 + $0x264] sm:$0xf] }
  0x9e   :  { %2155 = vmatpush.bf16.msrb.mxu2 %v4106_v28  ;;  %v4646_v28 = vor.u32 %v6106_v20, %v4645_v16  ;;  %v5999_v16 = vld [vmem:[#allocation5 + $0x124] sm:$0xf]  ;;  %v4227_v20 = vld [vmem:[#allocation5 + $0x134] sm:$0xf0] }
  0x9f   :  { %2168 = vmatpush.bf16.msrb.mxu3 %v4266_v32  ;;  %v4625_v32 = vld [vmem:[#allocation5 + $0x440] sm:$0xf]  ;;  %v4387_v24 = vld [vmem:[#allocation5 + $0x274] sm:$0xf0] }
  0xa0   :  { %2130 = vmatpush.bf16.msrb.mxu0 %v4882_v42  ;;  %v4466_v42 = vor.u32 %v6061_v31, %v4465_v30  ;;  %v4626_v43 = vor.u32 %v6101_v34, %v4625_v32  ;;  %v5186_v30 = vor.u32 %v6241_v15, %v5185_v14  ;;  %v4230_v31 = vor.u32 %v5999_v16, %v4227_v20  ;;  %v6236_v34 = vld [vmem:[#allocation5 + $0x888] sm:$0xf0]  ;;  %v4147_v15 = vld [vmem:[#allocation5 + $0x94] sm:$0xf0]  ;;  %v6019_v16 = vld [vmem:[#allocation5 + $0x1c4] sm:$0xf] }
  0xa1   :  { %2143 = vmatpush.bf16.msrb.mxu1 %v5042_v46  ;;  %v6056_v46 = vld [vmem:[#allocation5 + $0x2e8] sm:$0xf0]  ;;  %v4390_v32 = vor.u32 %v6039_v23, %v4387_v24  ;;  %v6059_v20 = vld [vmem:[#allocation5 + $0x304] sm:$0xf]  ;;  %v4467_v23 = vld [vmem:[#allocation5 + $0x314] sm:$0xf0] }
  0xa2   :  { %2156 = vmatpush.bf16.msrb.mxu2 %v4086_v47  ;;  %v4605_v47 = vld [vmem:[#allocation5 + $0x418] sm:$0xf]  ;;  %v4446_v54 = vor.u32 %v6056_v46, %v4445_v45  ;;  %v4210_v46 = vor.u32 %v5994_v35, %v4207_v38  ;;  %v6054_v35 = vld [vmem:[#allocation5 + $0x2dc] sm:$0xf] }
  0xa3   :  { %2169 = vmatpush.bf16.msrb.mxu3 %v4246_v50  ;;  %2131 = vmatmul.bf16.vlgmr.msrb.gmra.mxu0 %v6746_v41  ;;  %v4765_v50 = vld [vmem:[#allocation5 + $0x558] sm:$0xf]  ;;  %v4606_v55 = vor.u32 %v6096_v49, %v4605_v47  ;;  %v6231_v49 = vld [vmem:[#allocation5 + $0x860] sm:$0xf0] }
  0xa4   :  { %2175 = vmatpush.bf16.msra.mxu0 %v4546_v51  ;;  %2144 = vmatmul.bf16.vlgmr.msrb.gmra.mxu1 %v6742_v37  ;;  %v6136_v51 = vld [vmem:[#allocation5 + $0x568] sm:$0xf0] }
  0xa5   :  { %2188 = vmatpush.bf16.msra.mxu1 %v4706_v52  ;;  %2157 = vmatmul.bf16.vlgmr.msrb.gmra.mxu2 %v6732_v19  ;;  %v4925_v52 = vld [vmem:[#allocation5 + $0x698] sm:$0xf]  ;;  %v4766_v56 = vor.u32 %v6136_v51, %v4765_v50  ;;  %v5989_v50 = vld [vmem:[#allocation5 + $0xd4] sm:$0xf] }
  0xa6   :  { %2201 = vmatpush.bf16.msra.mxu2 %v4866_v53  ;;  %2170 = vmatmul.bf16.vlgmr.msrb.gmra.mxu3 %v6734_v21  ;;  %v6176_v53 = vld [vmem:[#allocation5 + $0x6a8] sm:$0xf0] }
  0xa7   :  { %2214 = vmatpush.bf16.msra.mxu3 %v5026_v57  ;;  %v4425_v57 = vld [vmem:[#allocation5 + $0x2b0] sm:$0xf]  ;;  %v4926_v60 = vor.u32 %v6176_v53, %v4925_v52  ;;  %v4187_v52 = vld [vmem:[#allocation5 + $0xe4] sm:$0xf0]  ;;  %v6029_v53 = vld [vmem:[#allocation5 + $0x214] sm:$0xf] }
  0xa8   :  { %2176 = vmatpush.bf16.msra.mxu0 %v4526_v63  ;;  %v6131_v63 = vld [vmem:[#allocation5 + $0x540] sm:$0xf0]  ;;  %v4426_v2 = vor.u32 %v6051_v58, %v4425_v57  ;;  %v5125_v58 = vld [vmem:[#allocation5 + $0x828] sm:$0xf] }
  0xa9   :  { %2189 = vmatpush.bf16.msra.mxu1 %v4686_v0  ;;  %v4905_v0 = vld [vmem:[#allocation5 + $0x670] sm:$0xf]  ;;  %v4746_v6 = vor.u32 %v6131_v63, %v4745_v62  ;;  %v4167_v63 = vld [vmem:[#allocation5 + $0xbc] sm:$0xf0] }
  0xaa   :  { %2202 = vmatpush.bf16.msra.mxu2 %v4846_v1  ;;  %v6171_v1 = vld [vmem:[#allocation5 + $0x680] sm:$0xf0] }
  0xab   :  { %2215 = vmatpush.bf16.msra.mxu3 %v5006_v5  ;;  %v4586_v5 = vor.u32 %v6091_v61, %v4585_v59  ;;  %v4906_v10 = vor.u32 %v6171_v1, %v4905_v0  ;;  %v6226_v59 = vld [vmem:[#allocation5 + $0x838] sm:$0xf0]  ;;  %v4190_v61 = vor.u32 %v5989_v50, %v4187_v52  ;;  %v6024_v0 = vld [vmem:[#allocation5 + $0x1ec] sm:$0xf]  ;;  %v4327_v1 = vld [vmem:[#allocation5 + $0x1fc] sm:$0xf0] }
  0xac   :  { %2177 = vmatpush.bf16.msra.mxu0 %v4506_v11  ;;  %v6126_v11 = vld [vmem:[#allocation5 + $0x518] sm:$0xf0]  ;;  %v5126_v7 = vor.u32 %v6226_v59, %v5125_v58  ;;  %v4107_v50 = vld [vmem:[#allocation5 + $0x44] sm:$0xf0] }
  0xad   :  { %2190 = vmatpush.bf16.msra.mxu1 %v4666_v12  ;;  %v4885_v12 = vld [vmem:[#allocation5 + $0x648] sm:$0xf]  ;;  %v4726_v26 = vor.u32 %v6126_v11, %v4725_v9  ;;  %v4330_v9 = vor.u32 %v6024_v0, %v4327_v1  ;;  %v6221_v11 = vld [vmem:[#allocation5 + $0x810] sm:$0xf0]  ;;  %v6206_v58 = vld [vmem:[#allocation5 + $0x798] sm:$0xf0] }
  0xae   :  { %2203 = vmatpush.bf16.msra.mxu2 %v4826_v13  ;;  %v6166_v13 = vld [vmem:[#allocation5 + $0x658] sm:$0xf0]  ;;  %v4267_v52 = vld [vmem:[#allocation5 + $0x184] sm:$0xf0] }
  0xaf   :  { %2216 = vmatpush.bf16.msra.mxu3 %v4986_v17  ;;  %v4406_v17 = vor.u32 %v6046_v4, %v4405_v3  ;;  %v472_v3 = vld [vmem:[#allocation13] ss:$8 sm:$0xf] }
  0xb0   :  { %2178 = vmatpush.bf16.msra.mxu0 %v4486_v27  ;;  %v6079_v27 = vld [vmem:[#allocation5 + $0x3a4] sm:$0xf]  ;;  %v473_v4 = vld [vmem:[#allocation13] ss:$8 sm:$0x10] }
  0xb1   :  { %2191 = vmatpush.bf16.msra.mxu1 %v4646_v28  ;;  %v4547_v28 = vld [vmem:[#allocation5 + $0x3b4] sm:$0xf0] }
  0xb2   :  { %2204 = vmatpush.bf16.msra.mxu2 %v4806_v29  ;;  %v4886_v29 = vor.u32 %v6166_v13, %v4885_v12  ;;  %v4550_v36 = vor.u32 %v6079_v27, %v4547_v28  ;;  %v5979_v12 = vld [vmem:[#allocation5 + $0x84] sm:$0xf]  ;;  %v6764_v13 = vor.u32 %v473_v4, %v472_v3  ;;  %v6216_v28 = vld [vmem:[#allocation5 + $0x7e8] sm:$0xf0]  ;;  %v4407_v4 = vld [vmem:[#allocation5 + $0x29c] sm:$0xf0] }
  0xb3   :  { %2217 = vmatpush.bf16.msra.mxu3 %v4966_v33  ;;  %v5165_v33 = vld [vmem:[#allocation5 + $0x878] sm:$0xf]  ;;  %v6044_v3 = vld [vmem:[#allocation5 + $0x28c] sm:$0xf] }
  0xb4   :  { %2179 = vmatpush.bf16.msra.mxu0 %v4466_v42  ;;  %v4367_v42 = vld [vmem:[#allocation5 + $0x24c] sm:$0xf0]  ;;  %v5166_v45 = vor.u32 %v6236_v34, %v5165_v33  ;;  %v6014_v33 = vld [vmem:[#allocation5 + $0x19c] sm:$0xf] }
  0xb5   :  { %2192 = vmatpush.bf16.msra.mxu1 %v4626_v43  ;;  %v6074_v43 = vld [vmem:[#allocation5 + $0x37c] sm:$0xf]  ;;  %v4370_v47 = vor.u32 %v6034_v39, %v4367_v42  ;;  %v4287_v34 = vld [vmem:[#allocation5 + $0x1ac] sm:$0xf0] }
  0xb6   :  { %2205 = vmatpush.bf16.msra.mxu2 %v4786_v44  ;;  %v4527_v44 = vld [vmem:[#allocation5 + $0x38c] sm:$0xf0] }
  0xb7   :  { %2218 = vmatpush.bf16.msra.mxu3 %v4946_v48  ;;  %v5145_v48 = vld [vmem:[#allocation5 + $0x850] sm:$0xf]  ;;  %v4530_v51 = vor.u32 %v6074_v43, %v4527_v44  ;;  %v4290_v44 = vor.u32 %v6014_v33, %v4287_v34 }
  0xb8   :  { %2180 = vmatpush.bf16.msra.mxu0 %v4446_v54  ;;  %v4347_v54 = vld [vmem:[#allocation5 + $0x224] sm:$0xf0]  ;;  %v5146_v57 = vor.u32 %v6231_v49, %v5145_v48  ;;  %v4847_v34 = vld [vmem:[#allocation5 + $0x60c] sm:$0xf0] }
  0xb9   :  { %2193 = vmatpush.bf16.msra.mxu1 %v4606_v55  ;;  %v6069_v55 = vld [vmem:[#allocation5 + $0x354] sm:$0xf]  ;;  %v4350_v62 = vor.u32 %v6029_v53, %v4347_v54  ;;  %v4427_v54 = vld [vmem:[#allocation5 + $0x2c4] sm:$0xf0] }
  0xba   :  { %2206 = vmatpush.bf16.msra.mxu2 %v4766_v56  ;;  %v4507_v56 = vld [vmem:[#allocation5 + $0x364] sm:$0xf0]  ;;  %v6049_v53 = vld [vmem:[#allocation5 + $0x2b4] sm:$0xf] }
  0xbb   :  { %2219 = vmatpush.bf16.msra.mxu3 %v4926_v60  ;;  %v5984_v60 = vld [vmem:[#allocation5 + $0xac] sm:$0xf]  ;;  %v4430_v1 = vor.u32 %v6049_v53, %v4427_v54  ;;  %v4987_v53 = vld [vmem:[#allocation5 + $0x724] sm:$0xf0]  ;;  %v6229_v54 = vld [vmem:[#allocation5 + $0x854] sm:$0xf] }
  0xbc   :  { %2181 = vmatpush.bf16.msra.mxu0 %v4426_v2  ;;  %v4510_v2 = vor.u32 %v6069_v55, %v4507_v56  ;;  %v4170_v8 = vor.u32 %v5984_v60, %v4167_v63  ;;  %v6004_v63 = vld [vmem:[#allocation5 + $0x14c] sm:$0xf] }
  0xbd   :  { %2194 = vmatpush.bf16.msra.mxu1 %v4586_v5  ;;  %v6064_v5 = vld [vmem:[#allocation5 + $0x32c] sm:$0xf] }
  0xbe   :  { %2207 = vmatpush.bf16.msra.mxu2 %v4746_v6  ;;  %v4487_v6 = vld [vmem:[#allocation5 + $0x33c] sm:$0xf0] }
  0xbf   :  { %2220 = vmatpush.bf16.msra.mxu3 %v4906_v10  ;;  %v5105_v10 = vld [vmem:[#allocation5 + $0x800] sm:$0xf]  ;;  %v4490_v14 = vor.u32 %v6064_v5, %v4487_v6  ;;  %v6119_v6 = vld [vmem:[#allocation5 + $0x4e4] sm:$0xf] }
  0xc0   :  { %2182 = vmatpush.bf16.msra.mxu0 %v4406_v17  ;;  %v4307_v17 = vld [vmem:[#allocation5 + $0x1d4] sm:$0xf0]  ;;  %v5106_v24 = vor.u32 %v6221_v11, %v5105_v10 }
  0xc1   :  { %2195 = vmatpush.bf16.msra.mxu1 %v4566_v25  ;;  %v5085_v25 = vld [vmem:[#allocation5 + $0x7d8] sm:$0xf]  ;;  %v4310_v27 = vor.u32 %v6019_v16, %v4307_v17  ;;  %v1989_v42 = vpop.f32.mrf.mxu1 }
  0xc2   :  { %2208 = vmatpush.bf16.msra.mxu2 %v4726_v26  ;;  %v4150_v26 = vor.u32 %v5979_v12, %v4147_v15  ;;  %v5086_v38 = vor.u32 %v6216_v28, %v5085_v25  ;;  %v4867_v11 = vld [vmem:[#allocation5 + $0x634] sm:$0xf0]  ;;  %v6199_v12 = vld [vmem:[#allocation5 + $0x764] sm:$0xf] }
  0xc3   :  { %2221 = vmatpush.bf16.msra.mxu3 %v4886_v29  ;;  %2183 = vmatmul.bf16.vlgmr.msra.gmra.mxu0 %v6730_v18  ;;  %v5974_v29 = vld [vmem:[#allocation5 + $0x5c] sm:$0xf]  ;;  %v1976_v39 = vpop.f32.mrf.mxu0  ;;  %v5187_v25 = vld [vmem:[#allocation5 + $0x8b4] sm:$0xf0] }
  0xc4   :  { %2227 = vmatpush.bf16.msrb.mxu0 %v5186_v30  ;;  %2196 = vmatmul.bf16.vlgmr.msra.gmra.mxu1 %v6736_v22  ;;  %v476_v30 = vperm.slane %v6764_v13, 0 }
  0xc5   :  { %2240 = vmatpush.bf16.msrb.mxu1 %v4230_v31  ;;  %2209 = vmatmul.bf16.vlgmr.msra.gmra.mxu2 %v6744_v40  ;;  %v4470_v31 = vor.u32 %v6059_v20, %v4467_v23 }
  0xc6   :  { %2253 = vmatpush.bf16.msrb.mxu2 %v4390_v32  ;;  %2222 = vmatmul.bf16.vlgmr.msra.gmra.mxu3 %v6746_v41  ;;  %v4127_v32 = vld [vmem:[#allocation5 + $0x6c] sm:$0xf0]  ;;  %v1977_v48 = vadd.f32 %v1976_v39, %v476_v30  ;;  %v6114_v30 = vld [vmem:[#allocation5 + $0x4bc] sm:$0xf] }
  0xc7   :  { %2266 = vmatpush.bf16.msrb.mxu3 %v4550_v36  ;;  %v4447_v36 = vld [vmem:[#allocation5 + $0x2ec] sm:$0xf0]  ;;  %v4130_v43 = vor.u32 %v5974_v29, %v4127_v32  ;;  %v6154_v32 = vld [vmem:[#allocation5 + $0x5fc] sm:$0xf] }
  0xc8   :  { %2228 = vmatpush.bf16.msrb.mxu0 %v5166_v45  ;;  %v5065_v45 = vld [vmem:[#allocation5 + $0x7b0] sm:$0xf]  ;;  %v4450_v49 = vor.u32 %v6054_v35, %v4447_v36  ;;  %v1990_v55 = vadd.f32 %v1989_v42, %v1977_v48  ;;  %v2002_v0 = vpop.f32.mrf.mxu2  ;;  %v6194_v35 = vld [vmem:[#allocation5 + $0x73c] sm:$0xf]  ;;  %v6149_v48 = vld [vmem:[#allocation5 + $0x5d4] sm:$0xf] }
  0xc9   :  { %2241 = vmatpush.bf16.msrb.mxu1 %v4210_v46  ;;  %v6211_v46 = vld [vmem:[#allocation5 + $0x7c0] sm:$0xf0]  ;;  %v1991_v16 = vpop.f32.mrf.mxu1  ;;  %v5007_v36 = vld [vmem:[#allocation5 + $0x74c] sm:$0xf0] }
  0xca   :  { %2254 = vmatpush.bf16.msrb.mxu2 %v4370_v47  ;;  %v5969_v47 = vld [vmem:[#allocation5 + $0x34] sm:$0xf]  ;;  %v5066_v56 = vor.u32 %v6211_v46, %v5065_v45  ;;  %v2003_v5 = vadd.f32 %v2002_v0, %v1990_v55  ;;  %v5167_v39 = vld [vmem:[#allocation5 + $0x88c] sm:$0xf0]  ;;  %v5010_v45 = vor.u32 %v6194_v35, %v5007_v36  ;;  %v5147_v55 = vld [vmem:[#allocation5 + $0x864] sm:$0xf0] }
  0xcb   :  { %2267 = vmatpush.bf16.msrb.mxu3 %v4530_v51  ;;  %v6009_v51 = vld [vmem:[#allocation5 + $0x174] sm:$0xf]  ;;  %v4110_v59 = vor.u32 %v5969_v47, %v4107_v50  ;;  %v1978_v15 = vpop.f32.mrf.mxu0  ;;  %v4667_v47 = vld [vmem:[#allocation5 + $0x4a4] sm:$0xf0]  ;;  %v6184_v0 = vld [vmem:[#allocation5 + $0x6ec] sm:$0xf] }
  0xcc   :  { %2229 = vmatpush.bf16.msrb.mxu0 %v5146_v57  ;;  %v5045_v57 = vld [vmem:[#allocation5 + $0x788] sm:$0xf]  ;;  %v4270_v60 = vor.u32 %v6009_v51, %v4267_v52  ;;  %v6109_v46 = vld [vmem:[#allocation5 + $0x494] sm:$0xf]  ;;  %v4787_v15 = vld [vmem:[#allocation5 + $0x594] sm:$0xf0] }
  0xcd   :  { %2242 = vmatpush.bf16.msrb.mxu1 %v4190_v61  ;;  %v5964_v61 = vld [vmem:[#allocation5 + $0xc] sm:$0xf]  ;;  %v5046_v10 = vor.u32 %v6206_v58, %v5045_v57  ;;  %v4827_v51 = vld [vmem:[#allocation5 + $0x5e4] sm:$0xf0]  ;;  %v6189_v52 = vld [vmem:[#allocation5 + $0x714] sm:$0xf] }
  0xce   :  { %2255 = vmatpush.bf16.msrb.mxu2 %v4350_v62  ;;  %v4087_v62 = vld [vmem:[#allocation5 + $0x1c] sm:$0xf0]  ;;  %v4830_v57 = vor.u32 %v6149_v48, %v4827_v51  ;;  %v4990_v58 = vor.u32 %v6189_v52, %v4987_v53  ;;  %v6179_v16 = vld [vmem:[#allocation5 + $0x6c4] sm:$0xf]  ;;  %v4927_v35 = vld [vmem:[#allocation5 + $0x6ac] sm:$0xf0] }
  0xcf   :  { %2268 = vmatpush.bf16.msrb.mxu3 %v4510_v2  ;;  %v4247_v2 = vld [vmem:[#allocation5 + $0x15c] sm:$0xf0]  ;;  %v4090_v20 = vor.u32 %v5964_v61, %v4087_v62  ;;  %v6144_v61 = vld [vmem:[#allocation5 + $0x5ac] sm:$0xf]  ;;  %v5150_v62 = vor.u32 %v6229_v54, %v5147_v55  ;;  %v4587_v48 = vld [vmem:[#allocation5 + $0x404] sm:$0xf0] }
  0xd0   :  { %2230 = vmatpush.bf16.msrb.mxu0 %v5126_v7  ;;  %v4707_v7 = vld [vmem:[#allocation5 + $0x4f4] sm:$0xf0]  ;;  %v4250_v23 = vor.u32 %v6004_v63, %v4247_v2  ;;  %v2004_v42 = vpop.f32.mrf.mxu2  ;;  %v4807_v63 = vld [vmem:[#allocation5 + $0x5bc] sm:$0xf0]  ;;  %v6224_v2 = vld [vmem:[#allocation5 + $0x82c] sm:$0xf] }
  0xd1   :  { %2243 = vmatpush.bf16.msrb.mxu1 %v4170_v8  ;;  %v6159_v8 = vld [vmem:[#allocation5 + $0x624] sm:$0xf]  ;;  %v4747_v51 = vld [vmem:[#allocation5 + $0x544] sm:$0xf0]  ;;  %v6169_v52 = vld [vmem:[#allocation5 + $0x674] sm:$0xf] }
  0xd2   :  { %2256 = vmatpush.bf16.msrb.mxu2 %v4330_v9  ;;  %v2015_v9 = vpop.f32.mrf.mxu3  ;;  %v4870_v28 = vor.u32 %v6159_v8, %v4867_v11  ;;  %v6139_v11 = vld [vmem:[#allocation5 + $0x584] sm:$0xf]  ;;  %v4907_v53 = vld [vmem:[#allocation5 + $0x684] sm:$0xf0]  ;;  %v6209_v54 = vld [vmem:[#allocation5 + $0x7b4] sm:$0xf] }
  0xd3   :  { %2269 = vmatpush.bf16.msrb.mxu3 %v4490_v14  ;;  %v5027_v14 = vld [vmem:[#allocation5 + $0x774] sm:$0xf0]  ;;  %v6767_v17 = vadd.f32 %v2015_v9, %v2003_v5  ;;  %v6099_v9 = vld [vmem:[#allocation5 + $0x444] sm:$0xf]  ;;  %v5067_v55 = vld [vmem:[#allocation5 + $0x7c4] sm:$0xf0] }
  0xd4   :  { %2231 = vmatpush.bf16.msrb.mxu0 %v5106_v24  ;;  %v6239_v24 = vld [vmem:[#allocation5 + $0x8a4] sm:$0xf]  ;;  %v5030_v29 = vor.u32 %v6199_v12, %v5027_v14 }
  0xd5   :  { %2244 = vmatpush.bf16.msrb.mxu1 %v4150_v26  ;;  %v4410_v26 = vor.u32 %v6044_v3, %v4407_v4  ;;  %v5190_v33 = vor.u32 %v6239_v24, %v5187_v25  ;;  %v5127_v3 = vld [vmem:[#allocation5 + $0x83c] sm:$0xf0]  ;;  %v5107_v24 = vld [vmem:[#allocation5 + $0x814] sm:$0xf0] }
  0xd6   :  { %2257 = vmatpush.bf16.msrb.mxu2 %v4310_v27  ;;  %v4710_v27 = vor.u32 %v6119_v6, %v4707_v7  ;;  %v4810_v7 = vor.u32 %v6144_v61, %v4807_v63  ;;  %v5130_v14 = vor.u32 %v6224_v2, %v5127_v3  ;;  %v6124_v61 = vld [vmem:[#allocation5 + $0x50c] sm:$0xf]  ;;  %v4887_v2 = vld [vmem:[#allocation5 + $0x65c] sm:$0xf0] }
  0xd7   :  { %2270 = vmatpush.bf16.msrb.mxu3 %v4470_v31  ;;  %v4687_v31 = vld [vmem:[#allocation5 + $0x4cc] sm:$0xf0]  ;;  %v6164_v63 = vld [vmem:[#allocation5 + $0x64c] sm:$0xf] }
  0xd8   :  { %2232 = vmatpush.bf16.msrb.mxu0 %v5086_v38  ;;  %v6234_v38 = vld [vmem:[#allocation5 + $0x87c] sm:$0xf]  ;;  %v6204_v3 = vld [vmem:[#allocation5 + $0x78c] sm:$0xf] }
  0xd9   :  { %2245 = vmatpush.bf16.msrb.mxu1 %v4130_v43  ;;  %v4690_v43 = vor.u32 %v6114_v30, %v4687_v31  ;;  %v5170_v50 = vor.u32 %v6234_v38, %v5167_v39  ;;  %v4607_v30 = vld [vmem:[#allocation5 + $0x42c] sm:$0xf0]  ;;  %v6134_v31 = vld [vmem:[#allocation5 + $0x55c] sm:$0xf] }
  0xda   :  { %2258 = vmatpush.bf16.msrb.mxu2 %v4290_v44  ;;  %v4850_v44 = vor.u32 %v6154_v32, %v4847_v34  ;;  %v6174_v34 = vld [vmem:[#allocation5 + $0x69c] sm:$0xf]  ;;  %v5087_v39 = vld [vmem:[#allocation5 + $0x7ec] sm:$0xf0] }
  0xdb   :  { %2271 = vmatpush.bf16.msrb.mxu3 %v4450_v49  ;;  %v2017_v49 = vpop.f32.mrf.mxu3  ;;  %v6214_v38 = vld [vmem:[#allocation5 + $0x7dc] sm:$0xf] }
  0xdc   :  { %2233 = vmatpush.bf16.msrb.mxu0 %v5066_v56  ;;  %v4670_v56 = vor.u32 %v6109_v46, %v4667_v47  ;;  %v4930_v46 = vor.u32 %v6174_v34, %v4927_v35  ;;  %v6089_v47 = vld [vmem:[#allocation5 + $0x3f4] sm:$0xf]  ;;  %v4193_v35 = vld [vmem:[#allocation5 + $0xd8] sm:$0xf] }
  0xdd   :  { %2246 = vmatpush.bf16.msrb.mxu1 %v4110_v59  ;;  %v6104_v59 = vld [vmem:[#allocation5 + $0x46c] sm:$0xf]  ;;  %v6129_v49 = vld [vmem:[#allocation5 + $0x534] sm:$0xf] }
  0xde   :  { %2259 = vmatpush.bf16.msrb.mxu2 %v4270_v60  ;;  %v4647_v60 = vld [vmem:[#allocation5 + $0x47c] sm:$0xf0] }
  0xdf   :  { %2272 = vmatpush.bf16.msrb.mxu3 %v4430_v1  ;;  %v4967_v1 = vld [vmem:[#allocation5 + $0x6fc] sm:$0xf0]  ;;  %v4650_v4 = vor.u32 %v6104_v59, %v4647_v60  ;;  %v4750_v59 = vor.u32 %v6129_v49, %v4747_v51  ;;  %v4910_v60 = vor.u32 %v6169_v52, %v4907_v53  ;;  %v6072_v49 = vld [vmem:[#allocation5 + $0x368] sm:$0xf0] }
  0xe0   :  { %2234 = vmatpush.bf16.msrb.mxu0 %v5046_v10  ;;  %v2028_v5 = vpop.f32.mrf.mxu0  ;;  %v4970_v8 = vor.u32 %v6184_v0, %v4967_v1  ;;  %v4627_v10 = vld [vmem:[#allocation5 + $0x454] sm:$0xf0]  ;;  %v5070_v1 = vor.u32 %v6209_v54, %v5067_v55  ;;  %v6112_v51 = vld [vmem:[#allocation5 + $0x4a8] sm:$0xf0]  ;;  %v4173_v55 = vld [vmem:[#allocation5 + $0xb0] sm:$0xf] }
  0xe1   :  { %2247 = vmatpush.bf16.msrb.mxu1 %v4090_v20  ;;  %v2041_v6 = vpop.f32.mrf.mxu1  ;;  %v2029_v12 = vadd.f32 %v2028_v5, %v6767_v17  ;;  %v4947_v20 = vld [vmem:[#allocation5 + $0x6d4] sm:$0xf0]  ;;  %v4233_v5 = vld [vmem:[#allocation5 + $0x128] sm:$0xf] }
  0xe2   :  { %2260 = vmatpush.bf16.msrb.mxu2 %v4250_v23  ;;  %v6219_v23 = vld [vmem:[#allocation5 + $0x804] sm:$0xf] }
  0xe3   :  { %2273 = vmatpush.bf16.msrb.mxu3 %v4410_v26  ;;  %2235 = vmatmul.bf16.vlgmr.msrb.gmra.mxu0 %v6742_v37  ;;  %v2042_v25 = vadd.f32 %v2041_v6, %v2029_v12  ;;  %v4630_v26 = vor.u32 %v6099_v9, %v4627_v10  ;;  %v5110_v17 = vor.u32 %v6219_v23, %v5107_v24  ;;  %v6002_v6 = vld [vmem:[#allocation5 + $0x138] sm:$0xf0]  ;;  %v4553_v10 = vld [vmem:[#allocation5 + $0x3a8] sm:$0xf] }
  0xe4   :  { %2279 = vmatpush.bf16.msra.mxu0 %v4710_v27  ;;  %2248 = vmatmul.bf16.vlgmr.msrb.gmra.mxu1 %v6732_v19  ;;  %v4790_v27 = vor.u32 %v6139_v11, %v4787_v15  ;;  %v6042_v9 = vld [vmem:[#allocation5 + $0x278] sm:$0xf0]  ;;  %v4713_v15 = vld [vmem:[#allocation5 + $0x4e8] sm:$0xf]  ;;  %v4234_v23 = vor.u32 %v6002_v6, %v4233_v5 }
  0xe5   :  { %2292 = vmatpush.bf16.msra.mxu1 %v4870_v28  ;;  %2261 = vmatmul.bf16.vlgmr.msrb.gmra.mxu2 %v6734_v21  ;;  %v4950_v28 = vor.u32 %v6179_v16, %v4947_v20  ;;  %v6082_v11 = vld [vmem:[#allocation5 + $0x3b8] sm:$0xf0]  ;;  %v4153_v6 = vld [vmem:[#allocation5 + $0x88] sm:$0xf] }
  0xe6   :  { %2305 = vmatpush.bf16.msra.mxu2 %v5030_v29  ;;  %2274 = vmatmul.bf16.vlgmr.msrb.gmra.mxu3 %v6730_v18  ;;  %v6094_v29 = vld [vmem:[#allocation5 + $0x41c] sm:$0xf] }
  0xe7   :  { %2318 = vmatpush.bf16.msra.mxu3 %v5190_v33  ;;  %v4767_v33 = vld [vmem:[#allocation5 + $0x56c] sm:$0xf0]  ;;  %v4610_v42 = vor.u32 %v6094_v29, %v4607_v30  ;;  %v6122_v16 = vld [vmem:[#allocation5 + $0x4f8] sm:$0xf0]  ;;  %v6037_v30 = vld [vmem:[#allocation5 + $0x250] sm:$0xf0] }
  0xe8   :  { %2280 = vmatpush.bf16.msra.mxu0 %v4690_v43  ;;  %v2054_v32 = vpop.f32.mrf.mxu2  ;;  %v2030_v43 = vpop.f32.mrf.mxu0  ;;  %v4714_v29 = vor.u32 %v6122_v16, %v4713_v15  ;;  %v6062_v15 = vld [vmem:[#allocation5 + $0x318] sm:$0xf0]  ;;  %v4633_v16 = vld [vmem:[#allocation5 + $0x448] sm:$0xf] }
  0xe9   :  { %2293 = vmatpush.bf16.msra.mxu1 %v4850_v44  ;;  %v6774_v36 = vadd.f32 %v2054_v32, %v2042_v25  ;;  %v2043_v44 = vpop.f32.mrf.mxu1  ;;  %v4554_v25 = vor.u32 %v6082_v11, %v4553_v10  ;;  %v6077_v32 = vld [vmem:[#allocation5 + $0x390] sm:$0xf0]  ;;  %v5992_v43 = vld [vmem:[#allocation5 + $0xe8] sm:$0xf0] }
  0xea   :  { %2306 = vmatpush.bf16.msra.mxu2 %v5010_v45  ;;  %v4770_v45 = vor.u32 %v6134_v31, %v4767_v33  ;;  %v4533_v31 = vld [vmem:[#allocation5 + $0x380] sm:$0xf]  ;;  %v6117_v33 = vld [vmem:[#allocation5 + $0x4d0] sm:$0xf0]  ;;  %v4353_v44 = vld [vmem:[#allocation5 + $0x218] sm:$0xf]  ;;  %v4194_v52 = vor.u32 %v5992_v43, %v4193_v35 }
  0xeb   :  { %2319 = vmatpush.bf16.msra.mxu3 %v5170_v50  ;;  %v5090_v50 = vor.u32 %v6214_v38, %v5087_v39  ;;  %v2067_v38 = vpop.f32.mrf.mxu3  ;;  %v4613_v35 = vld [vmem:[#allocation5 + $0x420] sm:$0xf] }
  0xec   :  { %2281 = vmatpush.bf16.msra.mxu0 %v4670_v56  ;;  %v4590_v56 = vor.u32 %v6089_v47, %v4587_v48  ;;  %v6032_v47 = vld [vmem:[#allocation5 + $0x228] sm:$0xf0]  ;;  %v4513_v48 = vld [vmem:[#allocation5 + $0x358] sm:$0xf] }
  0xed   :  { %2294 = vmatpush.bf16.msra.mxu1 %v4830_v57  ;;  %v6084_v57 = vld [vmem:[#allocation5 + $0x3cc] sm:$0xf]  ;;  %v4354_v53 = vor.u32 %v6032_v47, %v4353_v44  ;;  %v4514_v54 = vor.u32 %v6072_v49, %v4513_v48  ;;  %v4273_v48 = vld [vmem:[#allocation5 + $0x178] sm:$0xf] }
  0xee   :  { %2307 = vmatpush.bf16.msra.mxu2 %v4990_v58  ;;  %v4567_v58 = vld [vmem:[#allocation5 + $0x3dc] sm:$0xf0]  ;;  %v5972_v47 = vld [vmem:[#allocation5 + $0x48] sm:$0xf0] }
  0xef   :  { %2320 = vmatpush.bf16.msra.mxu3 %v5150_v62  ;;  %v4727_v62 = vld [vmem:[#allocation5 + $0x51c] sm:$0xf0] }
  0xf0   :  { %2282 = vmatpush.bf16.msra.mxu0 %v4650_v4  ;;  %v2056_v0 = vpop.f32.mrf.mxu2  ;;  %v5047_v4 = vld [vmem:[#allocation5 + $0x79c] sm:$0xf0]  ;;  %v4730_v12 = vor.u32 %v6124_v61, %v4727_v62  ;;  %v4493_v61 = vld [vmem:[#allocation5 + $0x330] sm:$0xf]  ;;  %v6067_v62 = vld [vmem:[#allocation5 + $0x340] sm:$0xf0] }
  0xf1   :  { %2295 = vmatpush.bf16.msra.mxu1 %v4810_v7  ;;  %v4393_v7 = vld [vmem:[#allocation5 + $0x268] sm:$0xf]  ;;  %v5050_v20 = vor.u32 %v6204_v3, %v5047_v4  ;;  %v6107_v0 = vld [vmem:[#allocation5 + $0x480] sm:$0xf0]  ;;  %v4494_v5 = vor.u32 %v6067_v62, %v4493_v61  ;;  %v4253_v61 = vld [vmem:[#allocation5 + $0x150] sm:$0xf] }
  0xf2   :  { %2308 = vmatpush.bf16.msra.mxu2 %v4970_v8  ;;  %v4570_v8 = vor.u32 %v6084_v57, %v4567_v58  ;;  %v4394_v24 = vor.u32 %v6042_v9, %v4393_v7  ;;  %v4333_v57 = vld [vmem:[#allocation5 + $0x1f0] sm:$0xf]  ;;  %v5982_v7 = vld [vmem:[#allocation5 + $0x98] sm:$0xf0]  ;;  %v6007_v62 = vld [vmem:[#allocation5 + $0x160] sm:$0xf0] }
  0xf3   :  { %2321 = vmatpush.bf16.msra.mxu3 %v5130_v14  ;;  %v4890_v14 = vor.u32 %v6164_v63, %v4887_v2  ;;  %v4653_v63 = vld [vmem:[#allocation5 + $0x470] sm:$0xf]  ;;  %v2069_v10 = vpop.f32.mrf.mxu3 }
  0xf4   :  { %2283 = vmatpush.bf16.msra.mxu0 %v4630_v26  ;;  %v4213_v26 = vld [vmem:[#allocation5 + $0x100] sm:$0xf]  ;;  %v4654_v11 = vor.u32 %v6107_v0, %v4653_v63  ;;  %v4413_v63 = vld [vmem:[#allocation5 + $0x290] sm:$0xf]  ;;  %v5193_v10 = vld [vmem:[#allocation5 + $0x8a8] sm:$0xf] }
  0xf5   :  { %2296 = vmatpush.bf16.msra.mxu1 %v4790_v27  ;;  %v5997_v27 = vld [vmem:[#allocation5 + $0x110] sm:$0xf0] }
  0xf6   :  { %2309 = vmatpush.bf16.msra.mxu2 %v4950_v28  ;;  %v4373_v28 = vld [vmem:[#allocation5 + $0x240] sm:$0xf]  ;;  %v4214_v34 = vor.u32 %v5997_v27, %v4213_v26 }
  0xf7   :  { %2322 = vmatpush.bf16.msra.mxu3 %v5110_v17  ;;  %v4693_v17 = vld [vmem:[#allocation5 + $0x4c0] sm:$0xf]  ;;  %v4374_v39 = vor.u32 %v6037_v30, %v4373_v28  ;;  %v5977_v28 = vld [vmem:[#allocation5 + $0x70] sm:$0xf0] }
  0xf8   :  { %2284 = vmatpush.bf16.msra.mxu0 %v4610_v42  ;;  %v4534_v42 = vor.u32 %v6077_v32, %v4533_v31  ;;  %v4133_v27 = vld [vmem:[#allocation5 + $0x60] sm:$0xf]  ;;  %v6017_v32 = vld [vmem:[#allocation5 + $0x1b0] sm:$0xf0] }
  0xf9   :  { %2297 = vmatpush.bf16.msra.mxu1 %v4770_v45  ;;  %v477_v45 = vperm.slane %v6764_v13, 1 }
  0xfa   :  { %2310 = vmatpush.bf16.msra.mxu2 %v4930_v46  ;;  %v4694_v46 = vor.u32 %v6117_v33, %v4693_v17  ;;  %v4453_v17 = vld [vmem:[#allocation5 + $0x2e0] sm:$0xf]  ;;  %v6057_v33 = vld [vmem:[#allocation5 + $0x2f0] sm:$0xf0] }
  0xfb   :  { %2323 = vmatpush.bf16.msra.mxu3 %v5090_v50  ;;  %v4673_v50 = vld [vmem:[#allocation5 + $0x498] sm:$0xf]  ;;  %v2068_v58 = vadd.f32 %v2067_v38, %v477_v45  ;;  %v6097_v38 = vld [vmem:[#allocation5 + $0x430] sm:$0xf0]  ;;  %v4454_v45 = vor.u32 %v6057_v33, %v4453_v17  ;;  %v5269_v33 = vld [vmem:[#allocation7 + $0x90] sm:$0xf] }
  0xfc   :  { %2285 = vmatpush.bf16.msra.mxu0 %v4590_v56  ;;  %v5987_v56 = vld [vmem:[#allocation5 + $0xc0] sm:$0xf0]  ;;  %v6237_v17 = vld [vmem:[#allocation5 + $0x890] sm:$0xf0] }
  0xfd   :  { %2298 = vmatpush.bf16.msra.mxu1 %v4750_v59  ;;  %v4674_v59 = vor.u32 %v6112_v51, %v4673_v50  ;;  %v4614_v50 = vor.u32 %v6097_v38, %v4613_v35  ;;  %v6012_v51 = vld [vmem:[#allocation5 + $0x188] sm:$0xf0]  ;;  %v6262_v35 = vld [vmem:[#allocation7 + $0x98] sm:$0xf0] }
  0xfe   :  { %2311 = vmatpush.bf16.msra.mxu2 %v4910_v60  ;;  %v6027_v60 = vld [vmem:[#allocation5 + $0x200] sm:$0xf0] }
  0xff   :  { %2324 = vmatpush.bf16.msra.mxu3 %v5070_v1  ;;  %v4174_v1 = vor.u32 %v5987_v56, %v4173_v55  ;;  %v4334_v4 = vor.u32 %v6027_v60, %v4333_v57  ;;  %v6092_v55 = vld [vmem:[#allocation5 + $0x408] sm:$0xf0]  ;;  %v4093_v57 = vld [vmem:[#allocation5 + $0x10] sm:$0xf] }
 0x100   :  { %2286 = vmatpush.bf16.msra.mxu0 %v4570_v8  ;;  %v2080_v2 = vpop.f32.mrf.mxu0  ;;  %v4313_v8 = vld [vmem:[#allocation5 + $0x1c8] sm:$0xf] }
 0x101   :  { %2299 = vmatpush.bf16.msra.mxu1 %v4730_v12  ;;  %v2093_v3 = vpop.f32.mrf.mxu1  ;;  %v2081_v9 = vadd.f32 %v2080_v2, %v2068_v58  ;;  %v6022_v12 = vld [vmem:[#allocation5 + $0x1d8] sm:$0xf0]  ;;  %v5967_v58 = vld [vmem:[#allocation5 + $0x20] sm:$0xf0] }
 0x102   :  { %2312 = vmatpush.bf16.msra.mxu2 %v4890_v14  ;;  %v4473_v14 = vld [vmem:[#allocation5 + $0x308] sm:$0xf]  ;;  %v6047_v2 = vld [vmem:[#allocation5 + $0x2a0] sm:$0xf0] }
 0x103   :  { %2325 = vmatpush.bf16.msra.mxu3 %v5050_v20  ;;  %2287 = vmatmul.bf16.vlgmr.msra.gmra.mxu0 %v6736_v22  ;;  %v6102_v20 = vld [vmem:[#allocation5 + $0x458] sm:$0xf0]  ;;  %v4474_v26 = vor.u32 %v6062_v15, %v4473_v14  ;;  %v4414_v14 = vor.u32 %v6047_v2, %v4413_v63  ;;  %v5281_v15 = vld [vmem:[#allocation7 + $0xa8] sm:$0xf] }
 0x104   :  { %2331 = vmatpush.bf16.msrb.mxu0 %v4234_v23  ;;  %2300 = vmatmul.bf16.vlgmr.msra.gmra.mxu1 %v6744_v40  ;;  %v2094_v23 = vadd.f32 %v2093_v3, %v2081_v9  ;;  %v4634_v31 = vor.u32 %v6102_v20, %v4633_v16  ;;  %v4573_v3 = vld [vmem:[#allocation5 + $0x3d0] sm:$0xf]  ;;  %v6202_v9 = vld [vmem:[#allocation5 + $0x778] sm:$0xf0]  ;;  %v6265_v16 = vld [vmem:[#allocation7 + $0xb0] sm:$0xf0] }
 0x105   :  { %2344 = vmatpush.bf16.msrb.mxu1 %v4394_v24  ;;  %2313 = vmatmul.bf16.vlgmr.msra.gmra.mxu2 %v6746_v41  ;;  %v4154_v24 = vor.u32 %v5982_v7, %v4153_v6  ;;  %v6162_v6 = vld [vmem:[#allocation5 + $0x638] sm:$0xf0]  ;;  %v5033_v7 = vld [vmem:[#allocation5 + $0x768] sm:$0xf] }
 0x106   :  { %2357 = vmatpush.bf16.msrb.mxu2 %v4554_v25  ;;  %2326 = vmatmul.bf16.vlgmr.msra.gmra.mxu3 %v6742_v37  ;;  %v4314_v25 = vor.u32 %v6022_v12, %v4313_v8  ;;  %v4094_v8 = vor.u32 %v5967_v58, %v4093_v57  ;;  %v4254_v12 = vor.u32 %v6007_v62, %v4253_v61  ;;  %v6147_v57 = vld [vmem:[#allocation5 + $0x5c0] sm:$0xf0]  ;;  %v5245_v62 = vld [vmem:[#allocation7 + $0x60] sm:$0xf]  ;;  %v4793_v2 = vld [vmem:[#allocation5 + $0x588] sm:$0xf] }
 0x107   :  { %2370 = vmatpush.bf16.msrb.mxu3 %v4714_v29  ;;  %v4293_v29 = vld [vmem:[#allocation5 + $0x1a0] sm:$0xf]  ;;  %v6227_v61 = vld [vmem:[#allocation5 + $0x840] sm:$0xf0] }
 0x108   :  { %2332 = vmatpush.bf16.msrb.mxu0 %v4214_v34  ;;  %v2106_v30 = vpop.f32.mrf.mxu2  ;;  %v4294_v44 = vor.u32 %v6017_v32, %v4293_v29  ;;  %v5013_v29 = vld [vmem:[#allocation5 + $0x740] sm:$0xf] }
 0x109   :  { %2345 = vmatpush.bf16.msrb.mxu1 %v4374_v39  ;;  %v6781_v34 = vadd.f32 %v2106_v30, %v2094_v23  ;;  %v4134_v39 = vor.u32 %v5977_v28, %v4133_v27  ;;  %v2095_v43 = vpop.f32.mrf.mxu1  ;;  %v6783_v49 = vpop.f32.mrf.mxu3  ;;  %v4853_v27 = vld [vmem:[#allocation5 + $0x600] sm:$0xf]  ;;  %v6157_v28 = vld [vmem:[#allocation5 + $0x610] sm:$0xf0]  ;;  %v5282_v30 = vor.u32 %v6265_v16, %v5281_v15 }
 0x10a   :  { %2358 = vmatpush.bf16.msrb.mxu2 %v4534_v42  ;;  %v2082_v42 = vpop.f32.mrf.mxu0  ;;  %v5173_v32 = vld [vmem:[#allocation5 + $0x880] sm:$0xf]  ;;  %v4854_v38 = vor.u32 %v6157_v28, %v4853_v27  ;;  %v4833_v43 = vld [vmem:[#allocation5 + $0x5d8] sm:$0xf]  ;;  %v6137_v16 = vld [vmem:[#allocation5 + $0x570] sm:$0xf0] }
 0x10b   :  { %2371 = vmatpush.bf16.msrb.mxu3 %v4694_v46  ;;  %v4113_v46 = vld [vmem:[#allocation5 + $0x38] sm:$0xf]  ;;  %v5174_v42 = vor.u32 %v6237_v17, %v5173_v32  ;;  %v4773_v15 = vld [vmem:[#allocation5 + $0x560] sm:$0xf]  ;;  %v5221_v28 = vld [vmem:[#allocation7 + $0x30] sm:$0xf] }
 0x10c   :  { %2333 = vmatpush.bf16.msrb.mxu0 %v4194_v52  ;;  %v4433_v52 = vld [vmem:[#allocation5 + $0x2b8] sm:$0xf]  ;;  %v4114_v56 = vor.u32 %v5972_v47, %v4113_v46  ;;  %v5270_v46 = vor.u32 %v6262_v35, %v5269_v33  ;;  %v6192_v47 = vld [vmem:[#allocation5 + $0x728] sm:$0xf0]  ;;  %v4774_v32 = vor.u32 %v6137_v16, %v4773_v15  ;;  %v6310_v15 = vld [vmem:[#allocation7 + $0x218] sm:$0xf0] }
 0x10d   :  { %2346 = vmatpush.bf16.msrb.mxu1 %v4354_v53  ;;  %v6052_v53 = vld [vmem:[#allocation5 + $0x2c8] sm:$0xf0] }
 0x10e   :  { %2359 = vmatpush.bf16.msrb.mxu2 %v4514_v54  ;;  %v4593_v54 = vld [vmem:[#allocation5 + $0x3f8] sm:$0xf]  ;;  %v4434_v60 = vor.u32 %v6052_v53, %v4433_v52  ;;  %v6259_v52 = vld [vmem:[#allocation7 + $0x80] sm:$0xf0] }
 0x10f   :  { %2372 = vmatpush.bf16.msrb.mxu3 %v4674_v59  ;;  %v4274_v59 = vor.u32 %v6012_v51, %v4273_v48  ;;  %v5153_v48 = vld [vmem:[#allocation5 + $0x858] sm:$0xf] }
 0x110   :  { %2334 = vmatpush.bf16.msrb.mxu0 %v4174_v1  ;;  %v2108_v0 = vpop.f32.mrf.mxu2  ;;  %v4594_v1 = vor.u32 %v6092_v55, %v4593_v54  ;;  %v5257_v51 = vld [vmem:[#allocation7 + $0x78] sm:$0xf] }
 0x111   :  { %2347 = vmatpush.bf16.msrb.mxu1 %v4334_v4  ;;  %v6087_v4 = vld [vmem:[#allocation5 + $0x3e0] sm:$0xf0]  ;;  %v2121_v20 = vpop.f32.mrf.mxu3  ;;  %v5258_v58 = vor.u32 %v6259_v52, %v5257_v51  ;;  %v4733_v51 = vld [vmem:[#allocation5 + $0x510] sm:$0xf] }
 0x112   :  { %2360 = vmatpush.bf16.msrb.mxu2 %v4494_v5  ;;  %v4873_v5 = vld [vmem:[#allocation5 + $0x628] sm:$0xf]  ;;  %v4574_v23 = vor.u32 %v6087_v4, %v4573_v3  ;;  %v6142_v3 = vld [vmem:[#allocation5 + $0x598] sm:$0xf0]  ;;  %v4933_v20 = vld [vmem:[#allocation5 + $0x6a0] sm:$0xf] }
 0x113   :  { %2373 = vmatpush.bf16.msrb.mxu3 %v4654_v11  ;;  %v6242_v11 = vld [vmem:[#allocation5 + $0x8b8] sm:$0xf0]  ;;  %v4953_v4 = vld [vmem:[#allocation5 + $0x6c8] sm:$0xf] }
 0x114   :  { %2335 = vmatpush.bf16.msrb.mxu0 %v4154_v24  ;;  %v4874_v24 = vor.u32 %v6162_v6, %v4873_v5  ;;  %v6182_v6 = vld [vmem:[#allocation5 + $0x6d8] sm:$0xf0] }
 0x115   :  { %2348 = vmatpush.bf16.msrb.mxu1 %v4314_v25  ;;  %v5034_v25 = vor.u32 %v6202_v9, %v5033_v7  ;;  %v5113_v7 = vld [vmem:[#allocation5 + $0x808] sm:$0xf] }
 0x116   :  { %2361 = vmatpush.bf16.msrb.mxu2 %v4474_v26  ;;  %v5194_v26 = vor.u32 %v6242_v11, %v5193_v10  ;;  %v5233_v9 = vld [vmem:[#allocation7 + $0x48] sm:$0xf]  ;;  %v6253_v10 = vld [vmem:[#allocation7 + $0x50] sm:$0xf0]  ;;  %v4794_v11 = vor.u32 %v6142_v3, %v4793_v2 }
 0x117   :  { %2374 = vmatpush.bf16.msrb.mxu3 %v4634_v31  ;;  %v6197_v31 = vld [vmem:[#allocation5 + $0x750] sm:$0xf0] }
 0x118   :  { %2336 = vmatpush.bf16.msrb.mxu0 %v4134_v39  ;;  %v5014_v39 = vor.u32 %v6197_v31, %v5013_v29  ;;  %v6250_v29 = vld [vmem:[#allocation7 + $0x38] sm:$0xf0]  ;;  %v6313_v2 = vld [vmem:[#allocation7 + $0x230] sm:$0xf0] }
 0x119   :  { %2349 = vmatpush.bf16.msrb.mxu1 %v4294_v44  ;;  %v6152_v44 = vld [vmem:[#allocation5 + $0x5e8] sm:$0xf0] }
 0x11a   :  { %2362 = vmatpush.bf16.msrb.mxu2 %v4454_v45  ;;  %v4993_v45 = vld [vmem:[#allocation5 + $0x718] sm:$0xf]  ;;  %v4834_v53 = vor.u32 %v6152_v44, %v4833_v43  ;;  %v5222_v43 = vor.u32 %v6250_v29, %v5221_v28  ;;  %v6172_v44 = vld [vmem:[#allocation5 + $0x688] sm:$0xf0]  ;;  %v6283_v28 = vld [vmem:[#allocation7 + $0x140] sm:$0xf0] }
 0x11b   :  { %2375 = vmatpush.bf16.msrb.mxu3 %v4614_v50  ;;  %v6232_v50 = vld [vmem:[#allocation5 + $0x868] sm:$0xf0]  ;;  %v4994_v54 = vor.u32 %v6192_v47, %v4993_v45  ;;  %v5073_v45 = vld [vmem:[#allocation5 + $0x7b8] sm:$0xf] }
 0x11c   :  { %2337 = vmatpush.bf16.msrb.mxu0 %v4114_v56  ;;  %v5154_v55 = vor.u32 %v6232_v50, %v5153_v48  ;;  %v4813_v56 = vld [vmem:[#allocation5 + $0x5b0] sm:$0xf]  ;;  %v5209_v47 = vld [vmem:[#allocation7 + $0x18] sm:$0xf]  ;;  %v6247_v48 = vld [vmem:[#allocation7 + $0x20] sm:$0xf0] }
 0x11d   :  { %2350 = vmatpush.bf16.msrb.mxu1 %v4274_v59  ;;  %v6187_v59 = vld [vmem:[#allocation5 + $0x700] sm:$0xf0]  ;;  %v5449_v29 = vld [vmem:[#allocation7 + $0x1f8] sm:$0xf] }
 0x11e   :  { %2363 = vmatpush.bf16.msrb.mxu2 %v4434_v60  ;;  %v5133_v60 = vld [vmem:[#allocation5 + $0x830] sm:$0xf] }
 0x11f   :  { %2376 = vmatpush.bf16.msrb.mxu3 %v4594_v1  ;;  %v5134_v1 = vor.u32 %v6227_v61, %v5133_v60  ;;  %v6244_v61 = vld [vmem:[#allocation7 + $0x8] sm:$0xf0] }
 0x120   :  { %2338 = vmatpush.bf16.msrb.mxu0 %v4094_v8  ;;  %v6789_v63 = vpop.f32.mrf.mxu0  ;;  %v6222_v8 = vld [vmem:[#allocation5 + $0x818] sm:$0xf0] }
 0x121   :  { %2351 = vmatpush.bf16.msrb.mxu1 %v4254_v12  ;;  %v6791_v0 = vpop.f32.mrf.mxu1  ;;  %v4954_v12 = vor.u32 %v6182_v6, %v4953_v4 }
 0x122   :  { %2364 = vmatpush.bf16.msrb.mxu2 %v4414_v14  ;;  %v5114_v14 = vor.u32 %v6222_v8, %v5113_v7  ;;  %v5569_v7 = vld [vmem:[#allocation7 + $0x2e8] sm:$0xf]  ;;  %v6337_v8 = vld [vmem:[#allocation7 + $0x2f0] sm:$0xf0] }
 0x123   :  { %2377 = vmatpush.bf16.msrb.mxu3 %v4574_v23  ;;  %2339 = vmatmul.bf16.vlgmr.msrb.gmra.mxu0 %v6732_v19  ;;  %v6256_v19 = vld [vmem:[#allocation7 + $0x68] sm:$0xf0]  ;;  %v5234_v23 = vor.u32 %v6253_v10, %v5233_v9  ;;  %v2422_v9 = vmax.f32 %v6774_v36, 0.0  ;;  %v5570_v16 = vor.u32 %v6337_v8, %v5569_v7  ;;  %v5305_v7 = vld [vmem:[#allocation7 + $0xd8] sm:$0xf] }
 0x124   :  { %2383 = vmatpush.bf16.msra.mxu0 %v4874_v24  ;;  %2352 = vmatmul.bf16.vlgmr.msrb.gmra.mxu1 %v6734_v21  ;;  %v4814_v21 = vor.u32 %v6147_v57, %v4813_v56  ;;  %v5246_v5 = vor.u32 %v6256_v19, %v5245_v62  ;;  %v6177_v24 = vld [vmem:[#allocation5 + $0x6b0] sm:$0xf0]  ;;  %v6167_v56 = vld [vmem:[#allocation5 + $0x660] sm:$0xf0]  ;;  %v5210_v57 = vor.u32 %v6247_v48, %v5209_v47  ;;  %v5377_v62 = vld [vmem:[#allocation7 + $0x168] sm:$0xf] }
 0x125   :  { %2396 = vmatpush.bf16.msra.mxu1 %v5034_v25  ;;  %2365 = vmatmul.bf16.vlgmr.msrb.gmra.mxu2 %v6730_v18  ;;  %v4973_v18 = vld [vmem:[#allocation5 + $0x6f0] sm:$0xf]  ;;  %v5093_v25 = vld [vmem:[#allocation5 + $0x7e0] sm:$0xf]  ;;  %v4934_v33 = vor.u32 %v6177_v24, %v4933_v20  ;;  %v6289_v19 = vld [vmem:[#allocation7 + $0x170] sm:$0xf0] }
 0x126   :  { %2409 = vmatpush.bf16.msra.mxu2 %v5194_v26  ;;  %2378 = vmatmul.bf16.vlgmr.msrb.gmra.mxu3 %v6736_v22  ;;  %v4974_v22 = vor.u32 %v6187_v59, %v4973_v18  ;;  %v6217_v26 = vld [vmem:[#allocation5 + $0x7f0] sm:$0xf0]  ;;  %v5053_v18 = vld [vmem:[#allocation5 + $0x790] sm:$0xf]  ;;  %v5197_v59 = vld [vmem:[#allocation7] sm:$0xf]  ;;  %v5378_v6 = vor.u32 %v6289_v19, %v5377_v62 }
 0x127   :  { %3241 = vmatpush.bf16.msra.mxu3 %v5282_v30  ;;  %v5094_v35 = vor.u32 %v6217_v26, %v5093_v25  ;;  %v6334_v24 = vld [vmem:[#allocation7 + $0x2d8] sm:$0xf0]  ;;  %v6798_v25 = vpack.c.bf16 %v2422_v9, %v2422_v9  ;;  %v5353_v26 = vld [vmem:[#allocation7 + $0x138] sm:$0xf]  ;;  %v5329_v48 = vld [vmem:[#allocation7 + $0x108] sm:$0xf] }
 0x128   :  { %2384 = vmatpush.bf16.msra.mxu0 %v4854_v38  ;;  %v6793_v27 = vpop.f32.mrf.mxu2  ;;  %v2134_v31 = vpop.f32.mrf.mxu0  ;;  %v4753_v38 = vld [vmem:[#allocation5 + $0x538] sm:$0xf]  ;;  %v5413_v19 = vld [vmem:[#allocation7 + $0x1b0] sm:$0xf]  ;;  %v6271_v8 = vld [vmem:[#allocation7 + $0xe0] sm:$0xf0] }
 0x129   :  { %2397 = vmatpush.bf16.msra.mxu1 %v5014_v39  ;;  %v6795_v30 = vpop.f32.mrf.mxu3  ;;  %v2147_v17 = vpop.f32.mrf.mxu1  ;;  %v6132_v39 = vld [vmem:[#allocation5 + $0x548] sm:$0xf0]  ;;  %v6307_v31 = vld [vmem:[#allocation7 + $0x200] sm:$0xf0] }
 0x12a   :  { %2410 = vmatpush.bf16.msra.mxu2 %v5174_v42  ;;  %v4913_v42 = vld [vmem:[#allocation5 + $0x678] sm:$0xf]  ;;  %v4754_v50 = vor.u32 %v6132_v39, %v4753_v38  ;;  %v5354_v17 = vor.u32 %v6283_v28, %v5353_v26  ;;  %v5450_v38 = vor.u32 %v6307_v31, %v5449_v29  ;;  %v6280_v39 = vld [vmem:[#allocation7 + $0x128] sm:$0xf0] }
 0x12b   :  { %3242 = vmatpush.bf16.msra.mxu3 %v5270_v46  ;;  %v6212_v46 = vld [vmem:[#allocation5 + $0x7c8] sm:$0xf0]  ;;  %v4914_v52 = vor.u32 %v6172_v44, %v4913_v42  ;;  %v5437_v42 = vld [vmem:[#allocation7 + $0x1e0] sm:$0xf]  ;;  %v5283_v31 = vld [vmem:[#allocation7 + $0xb4] sm:$0xf0] }
 0x12c   :  { %2385 = vmatpush.bf16.msra.mxu0 %v4834_v53  ;;  %v5074_v53 = vor.u32 %v6212_v46, %v5073_v45  ;;  %v5533_v45 = vld [vmem:[#allocation7 + $0x2a0] sm:$0xf]  ;;  %v6328_v46 = vld [vmem:[#allocation7 + $0x2a8] sm:$0xf0] }
 0x12d   :  { %2398 = vmatpush.bf16.msra.mxu1 %v4994_v54  ;;  %v6127_v54 = vld [vmem:[#allocation5 + $0x520] sm:$0xf0]  ;;  %v6292_v28 = vld [vmem:[#allocation7 + $0x188] sm:$0xf0] }
 0x12e   :  { %2411 = vmatpush.bf16.msra.mxu2 %v5154_v55  ;;  %v4893_v55 = vld [vmem:[#allocation5 + $0x650] sm:$0xf]  ;;  %v6264_v29 = vld [vmem:[#allocation7 + $0xac] sm:$0xf] }
 0x12f   :  { %3243 = vmatpush.bf16.msra.mxu3 %v5258_v58  ;;  %v6207_v58 = vld [vmem:[#allocation5 + $0x7a0] sm:$0xf0]  ;;  %v4894_v3 = vor.u32 %v6167_v56, %v4893_v55  ;;  %v478_v55 = vperm.slane %v6764_v13, 2 }
 0x130   :  { %2386 = vmatpush.bf16.msra.mxu0 %v4814_v21  ;;  %v2160_v60 = vpop.f32.mrf.mxu2  ;;  %v5054_v4 = vor.u32 %v6207_v58, %v5053_v18  ;;  %v6325_v18 = vld [vmem:[#allocation7 + $0x290] sm:$0xf0]  ;;  %v2120_v58 = vadd.f32 %v6783_v49, %v6781_v34 }
 0x131   :  { %2399 = vmatpush.bf16.msra.mxu1 %v4974_v22  ;;  %v2173_v21 = vpop.f32.mrf.mxu3  ;;  %v4734_v22 = vor.u32 %v6127_v54, %v4733_v51  ;;  %v5534_v54 = vor.u32 %v6328_v46, %v5533_v45  ;;  %v5317_v60 = vld [vmem:[#allocation7 + $0xf0] sm:$0xf]  ;;  %v6261_v46 = vld [vmem:[#allocation7 + $0x94] sm:$0xf] }
 0x132   :  { %2412 = vmatpush.bf16.msra.mxu2 %v5134_v1  ;;  %v5473_v1 = vld [vmem:[#allocation7 + $0x228] sm:$0xf]  ;;  %v6298_v21 = vld [vmem:[#allocation7 + $0x1b8] sm:$0xf0]  ;;  %v2133_v34 = vadd.f32 %v6789_v63, %v2120_v58  ;;  %v5293_v63 = vld [vmem:[#allocation7 + $0xc0] sm:$0xf] }
 0x133   :  { %3244 = vmatpush.bf16.msra.mxu3 %v5246_v5  ;;  %v5198_v5 = vor.u32 %v6244_v61, %v5197_v59  ;;  %v5474_v10 = vor.u32 %v6313_v2, %v5473_v1  ;;  %v6274_v61 = vld [vmem:[#allocation7 + $0xf8] sm:$0xf0]  ;;  %v2159_v2 = vadd.f32 %v6793_v27, %v478_v55  ;;  %v5414_v49 = vor.u32 %v6298_v21, %v5413_v19 }
 0x134   :  { %2387 = vmatpush.bf16.msra.mxu0 %v4794_v11  ;;  %v5365_v11 = vld [vmem:[#allocation7 + $0x150] sm:$0xf]  ;;  %v5306_v27 = vor.u32 %v6271_v8, %v5305_v7  ;;  %v6258_v58 = vld [vmem:[#allocation7 + $0x7c] sm:$0xf] }
 0x135   :  { %2400 = vmatpush.bf16.msra.mxu1 %v4954_v12  ;;  %v6286_v12 = vld [vmem:[#allocation7 + $0x158] sm:$0xf0] }
 0x136   :  { %2413 = vmatpush.bf16.msra.mxu2 %v5114_v14  ;;  %v5461_v14 = vld [vmem:[#allocation7 + $0x210] sm:$0xf]  ;;  %v5366_v20 = vor.u32 %v6286_v12, %v5365_v11  ;;  %v6295_v11 = vld [vmem:[#allocation7 + $0x1a0] sm:$0xf0] }
 0x137   :  { %3245 = vmatpush.bf16.msra.mxu3 %v5234_v23  ;;  %v5557_v23 = vld [vmem:[#allocation7 + $0x2d0] sm:$0xf]  ;;  %v5462_v36 = vor.u32 %v6310_v15, %v5461_v14  ;;  %v2172_v14 = vadd.f32 %v6795_v30, %v2159_v2  ;;  %v5497_v15 = vld [vmem:[#allocation7 + $0x258] sm:$0xf]  ;;  %v5451_v2 = vld [vmem:[#allocation7 + $0x204] sm:$0xf0] }
 0x138   :  { %2388 = vmatpush.bf16.msra.mxu0 %v4774_v32  ;;  %v5558_v32 = vor.u32 %v6334_v24, %v5557_v23  ;;  %v6268_v24 = vld [vmem:[#allocation7 + $0xc8] sm:$0xf0] }
 0x139   :  { %2401 = vmatpush.bf16.msra.mxu1 %v4934_v33  ;;  %v5545_v33 = vld [vmem:[#allocation7 + $0x2b8] sm:$0xf] }
 0x13a   :  { %2414 = vmatpush.bf16.msra.mxu2 %v5094_v35  ;;  %v6331_v35 = vld [vmem:[#allocation7 + $0x2c0] sm:$0xf0] }
 0x13b   :  { %3246 = vmatpush.bf16.msra.mxu3 %v5222_v43  ;;  %v6304_v43 = vld [vmem:[#allocation7 + $0x1e8] sm:$0xf0] }
 0x13c   :  { %2389 = vmatpush.bf16.msra.mxu0 %v4754_v50  ;;  %v5438_v47 = vor.u32 %v6304_v43, %v5437_v42  ;;  %v6277_v50 = vld [vmem:[#allocation7 + $0x110] sm:$0xf0]  ;;  %v5286_v43 = vor.u32 %v6264_v29, %v5283_v31  ;;  %v5223_v31 = vld [vmem:[#allocation7 + $0x3c] sm:$0xf0] }
 0x13d   :  { %2402 = vmatpush.bf16.msra.mxu1 %v4914_v52  ;;  %v5425_v52 = vld [vmem:[#allocation7 + $0x1c8] sm:$0xf]  ;;  %v5330_v56 = vor.u32 %v6277_v50, %v5329_v48  ;;  %v6285_v48 = vld [vmem:[#allocation7 + $0x154] sm:$0xf]  ;;  %v5367_v50 = vld [vmem:[#allocation7 + $0x15c] sm:$0xf0] }
 0x13e   :  { %2415 = vmatpush.bf16.msra.mxu2 %v5074_v53  ;;  %v6301_v53 = vld [vmem:[#allocation7 + $0x1d0] sm:$0xf0] }
 0x13f   :  { %3247 = vmatpush.bf16.msra.mxu3 %v5210_v57  ;;  %v5521_v57 = vld [vmem:[#allocation7 + $0x288] sm:$0xf]  ;;  %v5426_v59 = vor.u32 %v6301_v53, %v5425_v52  ;;  %v6249_v29 = vld [vmem:[#allocation7 + $0x34] sm:$0xf] }
 0x140   :  { %2390 = vmatpush.bf16.msra.mxu0 %v4734_v22  ;;  %v6804_v44 = vpop.f32.mrf.mxu0  ;;  %v5522_v1 = vor.u32 %v6325_v18, %v5521_v57  ;;  %v5463_v57 = vld [vmem:[#allocation7 + $0x21c] sm:$0xf0]  ;;  %v5370_v18 = vor.u32 %v6285_v48, %v5367_v50  ;;  %v6294_v48 = vld [vmem:[#allocation7 + $0x19c] sm:$0xf] }
 0x141   :  { %2403 = vmatpush.bf16.msra.mxu1 %v4894_v3  ;;  %v6806_v51 = vpop.f32.mrf.mxu1  ;;  %v5318_v3 = vor.u32 %v6274_v61, %v5317_v60  ;;  %v6282_v60 = vld [vmem:[#allocation7 + $0x13c] sm:$0xf]  ;;  %v5355_v61 = vld [vmem:[#allocation7 + $0x144] sm:$0xf0] }
 0x142   :  { %2416 = vmatpush.bf16.msra.mxu2 %v5054_v4 }
 0x143   :  { %3248 = vmatpush.bf16.msra.mxu3 %v5198_v5  ;;  %2391 = vmatmul.bf16.vlgmr.msra.gmra.mxu0 %v6744_v40  ;;  %v5341_v40 = vld [vmem:[#allocation7 + $0x120] sm:$0xf]  ;;  %v5509_v5 = vld [vmem:[#allocation7 + $0x270] sm:$0xf] }
 0x144   :  { %3254 = vmatpush.bf16.msrb.mxu0 %v5378_v6  ;;  %2404 = vmatmul.bf16.vlgmr.msra.gmra.mxu1 %v6746_v41  ;;  %v5546_v41 = vor.u32 %v6331_v35, %v5545_v33  ;;  %v6322_v6 = vld [vmem:[#allocation7 + $0x278] sm:$0xf0]  ;;  %v5379_v33 = vld [vmem:[#allocation7 + $0x174] sm:$0xf0]  ;;  %v2185_v35 = vadd.f32 %v6804_v44, %v2172_v14  ;;  %v6252_v14 = vld [vmem:[#allocation7 + $0x4c] sm:$0xf] }
 0x145   :  { %3267 = vmatpush.bf16.msrb.mxu1 %v5474_v10  ;;  %2417 = vmatmul.bf16.vlgmr.msra.gmra.mxu2 %v6742_v37  ;;  %v5342_v37 = vor.u32 %v6280_v39, %v5341_v40  ;;  %v5401_v10 = vld [vmem:[#allocation7 + $0x198] sm:$0xf]  ;;  %v5510_v12 = vor.u32 %v6322_v6, %v5509_v5  ;;  %v5485_v40 = vld [vmem:[#allocation7 + $0x240] sm:$0xf]  ;;  %v5247_v5 = vld [vmem:[#allocation7 + $0x6c] sm:$0xf0] }
 0x146   :  { %3249 = vmatmul.bf16.vlgmr.msra.gmra.mxu3 %v6798_v25  ;;  %3280 = vmatpush.bf16.msrb.mxu2 %v5570_v16  ;;  %v6319_v16 = vld [vmem:[#allocation7 + $0x260] sm:$0xf0]  ;;  %v5402_v23 = vor.u32 %v6295_v11, %v5401_v10  ;;  %v2198_v53 = vadd.f32 %v6806_v51, %v2185_v35  ;;  %v5439_v10 = vld [vmem:[#allocation7 + $0x1ec] sm:$0xf0] }
 0x147   :  { %v5498_v30 = vor.u32 %v6319_v16, %v5497_v15  ;;  %v6279_v6 = vld [vmem:[#allocation7 + $0x124] sm:$0xf]  ;;  %v6276_v15 = vld [vmem:[#allocation7 + $0x10c] sm:$0xf]  ;;  %v5331_v16 = vld [vmem:[#allocation7 + $0x114] sm:$0xf0] }
 0x148   :  { %3255 = vmatpush.bf16.msrb.mxu0 %v5366_v20  ;;  %v6811_v62 = vpop.f32.mrf.mxu2  ;;  %v2186_v4 = vpop.f32.mrf.mxu0  ;;  %v2146_v20 = vadd.f32 %v6791_v0, %v2133_v34  ;;  %v6316_v0 = vld [vmem:[#allocation7 + $0x248] sm:$0xf0]  ;;  %v5343_v34 = vld [vmem:[#allocation7 + $0x12c] sm:$0xf0] }
 0x149   :  { %3268 = vmatpush.bf16.msrb.mxu1 %v5462_v36  ;;  %v6813_v22 = vpop.f32.mrf.mxu3  ;;  %v2199_v9 = vpop.f32.mrf.mxu1  ;;  %v5389_v36 = vld [vmem:[#allocation7 + $0x180] sm:$0xf]  ;;  %v5486_v52 = vor.u32 %v6316_v0, %v5485_v40  ;;  %v2211_v51 = vadd.f32 %v6811_v62, %v2198_v53  ;;  %v6255_v4 = vld [vmem:[#allocation7 + $0x64] sm:$0xf]  ;;  %v6297_v0 = vld [vmem:[#allocation7 + $0x1b4] sm:$0xf] }
 0x14a   :  { %3281 = vmatpush.bf16.msrb.mxu2 %v5558_v32  ;;  %v2423_v39 = vmax.f32 %v2146_v20, 0.0  ;;  %v5390_v42 = vor.u32 %v6292_v28, %v5389_v36  ;;  %v5250_v9 = vor.u32 %v6255_v4, %v5247_v5  ;;  %v6303_v62 = vld [vmem:[#allocation7 + $0x1e4] sm:$0xf]  ;;  %v5427_v36 = vld [vmem:[#allocation7 + $0x1d4] sm:$0xf0]  ;;  %v5334_v28 = vor.u32 %v6276_v15, %v5331_v16 }
 0x14b   :  { %v5665_v53 = vld [vmem:[#allocation7 + $0x3a8] sm:$0xf]  ;;  %v5391_v4 = vld [vmem:[#allocation7 + $0x18c] sm:$0xf0]  ;;  %v5629_v15 = vld [vmem:[#allocation7 + $0x360] sm:$0xf] }
 0x14c   :  { %3256 = vmatpush.bf16.msrb.mxu0 %v5354_v17  ;;  %v6288_v17 = vld [vmem:[#allocation7 + $0x16c] sm:$0xf]  ;;  %v5653_v5 = vld [vmem:[#allocation7 + $0x390] sm:$0xf] }
 0x14d   :  { %3269 = vmatpush.bf16.msrb.mxu1 %v5450_v38  ;;  %v5294_v38 = vor.u32 %v6268_v24, %v5293_v63  ;;  %v5382_v45 = vor.u32 %v6288_v17, %v5379_v33  ;;  %v5442_v63 = vor.u32 %v6303_v62, %v5439_v10  ;;  %v6300_v24 = vld [vmem:[#allocation7 + $0x1cc] sm:$0xf]  ;;  %v5319_v17 = vld [vmem:[#allocation7 + $0xfc] sm:$0xf0] }
 0x14e   :  { %3282 = vmatpush.bf16.msrb.mxu2 %v5546_v41  ;;  %v6312_v41 = vld [vmem:[#allocation7 + $0x22c] sm:$0xf]  ;;  %v5430_v35 = vor.u32 %v6300_v24, %v5427_v36  ;;  %v5667_v24 = vld [vmem:[#allocation7 + $0x3b4] sm:$0xf0] }
 0x14f   :  { %v6352_v16 = vld [vmem:[#allocation7 + $0x368] sm:$0xf0] }
 0x150   :  { %3257 = vmatpush.bf16.msrb.mxu0 %v5342_v37  ;;  %v2212_v26 = vpop.f32.mrf.mxu2  ;;  %v5475_v37 = vld [vmem:[#allocation7 + $0x234] sm:$0xf0] }
 0x151   :  { %3270 = vmatpush.bf16.msrb.mxu1 %v5438_v47  ;;  %v2225_v32 = vpop.f32.mrf.mxu3  ;;  %v5271_v47 = vld [vmem:[#allocation7 + $0x9c] sm:$0xf0]  ;;  %v5478_v44 = vor.u32 %v6312_v41, %v5475_v37  ;;  %v5211_v41 = vld [vmem:[#allocation7 + $0x24] sm:$0xf0]  ;;  %v6270_v37 = vld [vmem:[#allocation7 + $0xdc] sm:$0xf] }
 0x152   :  { %3283 = vmatpush.bf16.msrb.mxu2 %v5534_v54  ;;  %v6821_v54 = vpack.c.bf16 %v2423_v39, %v2423_v39  ;;  %v5274_v55 = vor.u32 %v6261_v46, %v5271_v47  ;;  %v6273_v32 = vld [vmem:[#allocation7 + $0xf4] sm:$0xf]  ;;  %v5415_v39 = vld [vmem:[#allocation7 + $0x1bc] sm:$0xf0] }
 0x153   :  { %v5418_v47 = vor.u32 %v6297_v0, %v5415_v39  ;;  %v6357_v0 = vld [vmem:[#allocation7 + $0x394] sm:$0xf]  ;;  %v5655_v39 = vld [vmem:[#allocation7 + $0x39c] sm:$0xf0] }
 0x154   :  { %3258 = vmatpush.bf16.msrb.mxu0 %v5330_v56  ;;  %v6309_v56 = vld [vmem:[#allocation7 + $0x214] sm:$0xf] }
 0x155   :  { %3271 = vmatpush.bf16.msrb.mxu1 %v5426_v59  ;;  %v5259_v59 = vld [vmem:[#allocation7 + $0x84] sm:$0xf0]  ;;  %v5466_v19 = vor.u32 %v6309_v56, %v5463_v57  ;;  %v6243_v56 = vld [vmem:[#allocation7 + $0x4] sm:$0xf]  ;;  %v5199_v57 = vld [vmem:[#allocation7 + $0xc] sm:$0xf0] }
 0x156   :  { %3284 = vmatpush.bf16.msrb.mxu2 %v5522_v1  ;;  %v5262_v21 = vor.u32 %v6258_v58, %v5259_v59  ;;  %v6306_v1 = vld [vmem:[#allocation7 + $0x1fc] sm:$0xf]  ;;  %v479_v58 = vperm.slane %v6764_v13, 3  ;;  %v6267_v59 = vld [vmem:[#allocation7 + $0xc4] sm:$0xf] }
 0x157   :  { %v5454_v7 = vor.u32 %v6306_v1, %v5451_v2  ;;  %v6291_v2 = vld [vmem:[#allocation7 + $0x184] sm:$0xf] }
 0x158   :  { %3259 = vmatpush.bf16.msrb.mxu0 %v5318_v3  ;;  %v5358_v3 = vor.u32 %v6282_v60, %v5355_v61  ;;  %v5295_v60 = vld [vmem:[#allocation7 + $0xcc] sm:$0xf0]  ;;  %v5394_v62 = vor.u32 %v6291_v2, %v5391_v4  ;;  %v5217_v2 = vld [vmem:[#allocation7 + $0x20] sm:$0xf] }
 0x159   :  { %3272 = vmatpush.bf16.msrb.mxu1 %v5414_v49  ;;  %v2224_v49 = vadd.f32 %v6813_v22, %v2211_v51  ;;  %v5289_v61 = vld [vmem:[#allocation7 + $0xb0] sm:$0xf]  ;;  %v6266_v51 = vld [vmem:[#allocation7 + $0xb8] sm:$0xf0] }
 0x15a   :  { %3285 = vmatpush.bf16.msrb.mxu2 %v5510_v12  ;;  %v5346_v12 = vor.u32 %v6279_v6, %v5343_v34  ;;  %v6358_v6 = vld [vmem:[#allocation7 + $0x398] sm:$0xf0]  ;;  %v5298_v34 = vor.u32 %v6267_v59, %v5295_v60  ;;  %v6251_v59 = vld [vmem:[#allocation7 + $0x40] sm:$0xf0]  ;;  %v5631_v60 = vld [vmem:[#allocation7 + $0x36c] sm:$0xf0] }
 0x15c   :  { %3260 = vmatpush.bf16.msrb.mxu0 %v5306_v27  ;;  %v5235_v27 = vld [vmem:[#allocation7 + $0x54] sm:$0xf0] }
 0x15d   :  { %3273 = vmatpush.bf16.msrb.mxu1 %v5402_v23  ;;  %v5238_v22 = vor.u32 %v6252_v14, %v5235_v27 }
 0x15e   :  { %3286 = vmatpush.bf16.msrb.mxu2 %v5498_v30 }
 0x160   :  { %3261 = vmatpush.bf16.msrb.mxu0 %v5294_v38  ;;  %v2236_v8 = vpop.f32.mrf.mxu0  ;;  %v5226_v38 = vor.u32 %v6249_v29, %v5223_v31  ;;  %v5617_v31 = vld [vmem:[#allocation7 + $0x348] sm:$0xf] }
 0x161   :  { %3274 = vmatpush.bf16.msrb.mxu1 %v5390_v42  ;;  %v2237_v11 = vadd.f32 %v2236_v8, %v2224_v49  ;;  %v6826_v20 = vpop.f32.mrf.mxu1  ;;  %v5322_v42 = vor.u32 %v6273_v32, %v5319_v17  ;;  %v5654_v49 = vor.u32 %v6358_v6, %v5653_v5  ;;  %v5277_v8 = vld [vmem:[#allocation7 + $0x98] sm:$0xf]  ;;  %v6349_v32 = vld [vmem:[#allocation7 + $0x350] sm:$0xf0]  ;;  %v5253_v17 = vld [vmem:[#allocation7 + $0x68] sm:$0xf] }
 0x162   :  { %3287 = vmatpush.bf16.msrb.mxu2 %v5486_v52  ;;  %v5403_v52 = vld [vmem:[#allocation7 + $0x1a4] sm:$0xf0]  ;;  %v2250_v10 = vadd.f32 %v6826_v20, %v479_v58  ;;  %v5630_v20 = vor.u32 %v6352_v16, %v5629_v15  ;;  %v5229_v58 = vld [vmem:[#allocation7 + $0x38] sm:$0xf]  ;;  %v5385_v5 = vld [vmem:[#allocation7 + $0x170] sm:$0xf] }
 0x163   :  { %3262 = vmatmul.bf16.vlgmr.msrb.gmra.mxu0 %v6821_v54  ;;  %v2424_v23 = vmax.f32 %v2237_v11, 0.0  ;;  %v5406_v1 = vor.u32 %v6294_v48, %v5403_v52  ;;  %v5641_v11 = vld [vmem:[#allocation7 + $0x378] sm:$0xf]  ;;  %v5643_v48 = vld [vmem:[#allocation7 + $0x384] sm:$0xf0]  ;;  %v5230_v4 = vor.u32 %v6251_v59, %v5229_v58 }
 0x164   :  { %3306 = vmatpush.bf16.msra.mxu0 %v5286_v43  ;;  %v6246_v43 = vld [vmem:[#allocation7 + $0x1c] sm:$0xf]  ;;  %v5205_v15 = vld [vmem:[#allocation7 + $0x8] sm:$0xf]  ;;  %v6245_v16 = vld [vmem:[#allocation7 + $0x10] sm:$0xf0] }
 0x165   :  { %3319 = vmatpush.bf16.msra.mxu1 %v5382_v45  ;;  %v6828_v26 = vpack.c.bf16 %v2424_v23, %v2424_v23  ;;  %v5307_v45 = vld [vmem:[#allocation7 + $0xe4] sm:$0xf0]  ;;  %v5214_v50 = vor.u32 %v6246_v43, %v5211_v41  ;;  %v6360_v23 = vld [vmem:[#allocation7 + $0x3ac] sm:$0xf]  ;;  %v5658_v43 = vor.u32 %v6357_v0, %v5655_v39  ;;  %v5605_v41 = vld [vmem:[#allocation7 + $0x330] sm:$0xf] }
 0x166   :  { %3332 = vmatpush.bf16.msra.mxu2 %v5478_v44  ;;  %v6361_v44 = vld [vmem:[#allocation7 + $0x3b0] sm:$0xf0]  ;;  %v6290_v6 = vld [vmem:[#allocation7 + $0x178] sm:$0xf0]  ;;  %v5535_v58 = vld [vmem:[#allocation7 + $0x2ac] sm:$0xf0] }
 0x167   :  { %3275 = vmatmul.bf16.vlgmr.msrb.gmra.mxu1 %v6828_v26  ;;  %v5577_v59 = vld [vmem:[#allocation7 + $0x2f0] sm:$0xf] }
 0x168   :  { %3307 = vmatpush.bf16.msra.mxu0 %v5274_v55  ;;  %v6831_v33 = vpop.f32.mrf.mxu2  ;;  %v2238_v40 = vpop.f32.mrf.mxu0  ;;  %v5310_v55 = vor.u32 %v6270_v37, %v5307_v45  ;;  %v6346_v37 = vld [vmem:[#allocation7 + $0x338] sm:$0xf0] }
 0x169   :  { %3320 = vmatpush.bf16.msra.mxu1 %v5370_v18  ;;  %v6833_v30 = vpop.f32.mrf.mxu3  ;;  %v2251_v46 = vpop.f32.mrf.mxu1  ;;  %v5666_v18 = vor.u32 %v6361_v44, %v5665_v53  ;;  %v2263_v36 = vadd.f32 %v6831_v33, %v2250_v10  ;;  %v5618_v40 = vor.u32 %v6349_v32, %v5617_v31  ;;  %v5606_v53 = vor.u32 %v6346_v37, %v5605_v41  ;;  %v5559_v31 = vld [vmem:[#allocation7 + $0x2dc] sm:$0xf0]  ;;  %v6345_v32 = vld [vmem:[#allocation7 + $0x334] sm:$0xf]  ;;  %v5547_v37 = vld [vmem:[#allocation7 + $0x2c4] sm:$0xf0] }
 0x16a   :  { %3333 = vmatpush.bf16.msra.mxu2 %v5466_v19  ;;  %v6254_v46 = vld [vmem:[#allocation7 + $0x58] sm:$0xf0] }
 0x16b   :  { %3293 = vmatpush.bf16.msrb.mxu3 %v5666_v18  ;;  %v6351_v18 = vld [vmem:[#allocation7 + $0x364] sm:$0xf] }
 0x16c   :  { %3308 = vmatpush.bf16.msra.mxu0 %v5262_v21 }
 0x16d   :  { %3321 = vmatpush.bf16.msra.mxu1 %v5358_v3  ;;  %v5202_v3 = vor.u32 %v6243_v56, %v5199_v57  ;;  %v5593_v56 = vld [vmem:[#allocation7 + $0x318] sm:$0xf]  ;;  %v6343_v57 = vld [vmem:[#allocation7 + $0x320] sm:$0xf0] }
 0x16e   :  { %3334 = vmatpush.bf16.msra.mxu2 %v5454_v7  ;;  %v5290_v7 = vor.u32 %v6266_v51, %v5289_v61  ;;  %v5594_v51 = vor.u32 %v6343_v57, %v5593_v56  ;;  %v6339_v56 = vld [vmem:[#allocation7 + $0x304] sm:$0xf]  ;;  %v5583_v57 = vld [vmem:[#allocation7 + $0x30c] sm:$0xf0] }
 0x16f   :  { %3294 = vmatpush.bf16.msrb.mxu3 %v5654_v49 }
 0x170   :  { %3309 = vmatpush.bf16.msra.mxu0 %v5250_v9  ;;  %v2264_v19 = vpop.f32.mrf.mxu2  ;;  %v6263_v9 = vld [vmem:[#allocation7 + $0xa0] sm:$0xf0] }
 0x171   :  { %3322 = vmatpush.bf16.msra.mxu1 %v5346_v12  ;;  %v2277_v21 = vpop.f32.mrf.mxu3  ;;  %v6355_v12 = vld [vmem:[#allocation7 + $0x380] sm:$0xf0]  ;;  %v5278_v27 = vor.u32 %v6263_v9, %v5277_v8  ;;  %v5634_v19 = vor.u32 %v6351_v18, %v5631_v60  ;;  %v6340_v8 = vld [vmem:[#allocation7 + $0x308] sm:$0xf0]  ;;  %v6338_v60 = vld [vmem:[#allocation7 + $0x2f8] sm:$0xf0] }
 0x172   :  { %3335 = vmatpush.bf16.msra.mxu2 %v5442_v63  ;;  %v5642_v14 = vor.u32 %v6355_v12, %v5641_v11  ;;  %v5265_v63 = vld [vmem:[#allocation7 + $0x80] sm:$0xf]  ;;  %v6336_v9 = vld [vmem:[#allocation7 + $0x2ec] sm:$0xf] }
 0x173   :  { %v6348_v12 = vld [vmem:[#allocation7 + $0x34c] sm:$0xf] }
 0x174   :  { %3310 = vmatpush.bf16.msra.mxu0 %v5238_v22  ;;  %v6260_v22 = vld [vmem:[#allocation7 + $0x88] sm:$0xf0]  ;;  %3295 = vmatpush.bf16.msrb.mxu3 %v5642_v14  ;;  %v5619_v14 = vld [vmem:[#allocation7 + $0x354] sm:$0xf0] }
 0x175   :  { %3323 = vmatpush.bf16.msra.mxu1 %v5334_v28  ;;  %v5670_v28 = vor.u32 %v6360_v23, %v5667_v24  ;;  %v5266_v29 = vor.u32 %v6260_v22, %v5265_v63  ;;  %v5622_v63 = vor.u32 %v6348_v12, %v5619_v14  ;;  %v5386_v24 = vor.u32 %v6290_v6, %v5385_v5  ;;  %v5337_v6 = vld [vmem:[#allocation7 + $0x110] sm:$0xf]  ;;  %v6335_v12 = vld [vmem:[#allocation7 + $0x2e0] sm:$0xf0]  ;;  %v5325_v14 = vld [vmem:[#allocation7 + $0xf8] sm:$0xf] }
 0x176   :  { %3336 = vmatpush.bf16.msra.mxu2 %v5430_v35  ;;  %v6257_v35 = vld [vmem:[#allocation7 + $0x70] sm:$0xf0] }
 0x177   :  { %v5254_v33 = vor.u32 %v6257_v35, %v5253_v17  ;;  %v5607_v17 = vld [vmem:[#allocation7 + $0x33c] sm:$0xf0] }
 0x178   :  { %3311 = vmatpush.bf16.msra.mxu0 %v5226_v38  ;;  %v2276_v38 = vadd.f32 %v6833_v30, %v2263_v36  ;;  %3296 = vmatpush.bf16.msrb.mxu3 %v5630_v20  ;;  %v5373_v36 = vld [vmem:[#allocation7 + $0x158] sm:$0xf]  ;;  %v6287_v20 = vld [vmem:[#allocation7 + $0x160] sm:$0xf0]  ;;  %v5610_v0 = vor.u32 %v6345_v32, %v5607_v17  ;;  %v5553_v32 = vld [vmem:[#allocation7 + $0x2c0] sm:$0xf] }
 0x179   :  { %3324 = vmatpush.bf16.msra.mxu1 %v5322_v42  ;;  %v5241_v42 = vld [vmem:[#allocation7 + $0x50] sm:$0xf]  ;;  %v5374_v41 = vor.u32 %v6287_v20, %v5373_v36  ;;  %v6332_v17 = vld [vmem:[#allocation7 + $0x2c8] sm:$0xf0] }
 0x17a   :  { %3337 = vmatpush.bf16.msra.mxu2 %v5418_v47  ;;  %v6354_v47 = vld [vmem:[#allocation7 + $0x37c] sm:$0xf] }
 0x17b   :  { %v5646_v30 = vor.u32 %v6354_v47, %v5643_v48  ;;  %v5361_v47 = vld [vmem:[#allocation7 + $0x140] sm:$0xf]  ;;  %v6284_v48 = vld [vmem:[#allocation7 + $0x148] sm:$0xf0] }
 0x17c   :  { %3312 = vmatpush.bf16.msra.mxu0 %v5214_v50  ;;  %3297 = vmatpush.bf16.msrb.mxu3 %v5618_v40  ;;  %v6362_v40 = vld [vmem:[#allocation7 + $0x3b8] sm:$0xf0]  ;;  %v5362_v18 = vor.u32 %v6284_v48, %v5361_v47  ;;  %v6329_v47 = vld [vmem:[#allocation7 + $0x2b0] sm:$0xf0]  ;;  %v5301_v48 = vld [vmem:[#allocation7 + $0xc8] sm:$0xf] }
 0x17d   :  { %3325 = vmatpush.bf16.msra.mxu1 %v5310_v55  ;;  %v5242_v55 = vor.u32 %v6254_v46, %v5241_v42  ;;  %v6330_v42 = vld [vmem:[#allocation7 + $0x2bc] sm:$0xf]  ;;  %v5595_v46 = vld [vmem:[#allocation7 + $0x324] sm:$0xf0] }
 0x17e   :  { %3338 = vmatpush.bf16.msra.mxu2 %v5406_v1 }
 0x180   :  { %3313 = vmatpush.bf16.msra.mxu0 %v5202_v3  ;;  %v2288_v45 = vpop.f32.mrf.mxu0  ;;  %3298 = vmatpush.bf16.msrb.mxu3 %v5606_v53  ;;  %v6248_v3 = vld [vmem:[#allocation7 + $0x28] sm:$0xf0]  ;;  %v6359_v53 = vld [vmem:[#allocation7 + $0x3a0] sm:$0xf0] }
 0x181   :  { %3326 = vmatpush.bf16.msra.mxu1 %v5298_v34  ;;  %v2289_v50 = vadd.f32 %v2288_v45, %v2276_v38  ;;  %v2301_v52 = vpop.f32.mrf.mxu1  ;;  %v5581_v34 = vld [vmem:[#allocation7 + $0x300] sm:$0xf]  ;;  %v5218_v22 = vor.u32 %v6248_v3, %v5217_v2  ;;  %v5673_v38 = vld [vmem:[#allocation7 + $0x3b0] sm:$0xf]  ;;  %v6342_v45 = vld [vmem:[#allocation7 + $0x31c] sm:$0xf]  ;;  %v5586_v2 = vor.u32 %v6339_v56, %v5583_v57 }
 0x182   :  { %3339 = vmatpush.bf16.msra.mxu2 %v5394_v62  ;;  %v5571_v62 = vld [vmem:[#allocation7 + $0x2f4] sm:$0xf0]  ;;  %v5582_v11 = vor.u32 %v6340_v8, %v5581_v34  ;;  %v6278_v34 = vld [vmem:[#allocation7 + $0x118] sm:$0xf0]  ;;  %v6353_v8 = vld [vmem:[#allocation7 + $0x370] sm:$0xf0] }
 0x183   :  { %3314 = vmatmul.bf16.vlgmr.msra.gmra.mxu0 %v6798_v25  ;;  %v2302_v44 = vadd.f32 %v2301_v52, %v2289_v50  ;;  %v5574_v23 = vor.u32 %v6336_v9, %v5571_v62  ;;  %v5674_v50 = vor.u32 %v6362_v40, %v5673_v38  ;;  %v5661_v52 = vld [vmem:[#allocation7 + $0x398] sm:$0xf]  ;;  %v6324_v9 = vld [vmem:[#allocation7 + $0x28c] sm:$0xf] }
 0x184   :  { %3327 = vmatmul.bf16.vlgmr.msra.gmra.mxu1 %v6821_v54  ;;  %3358 = vmatpush.bf16.msrb.mxu0 %v5670_v28  ;;  %v6333_v28 = vld [vmem:[#allocation7 + $0x2d4] sm:$0xf]  ;;  %v5523_v62 = vld [vmem:[#allocation7 + $0x294] sm:$0xf0]  ;;  %v6272_v38 = vld [vmem:[#allocation7 + $0xe8] sm:$0xf0] }
 0x185   :  { %3371 = vmatpush.bf16.msrb.mxu1 %v5290_v7  ;;  %3299 = vmatpush.bf16.msrb.mxu3 %v5594_v51  ;;  %v6281_v51 = vld [vmem:[#allocation7 + $0x130] sm:$0xf0] }
 0x188   :  { %3359 = vmatpush.bf16.msrb.mxu0 %v5658_v43  ;;  %v2314_v61 = vpop.f32.mrf.mxu2  ;;  %v2290_v7 = vpop.f32.mrf.mxu0  ;;  %v5206_v43 = vor.u32 %v6245_v16, %v5205_v15  ;;  %v5625_v16 = vld [vmem:[#allocation7 + $0x350] sm:$0xf] }
 0x189   :  { %3372 = vmatpush.bf16.msrb.mxu1 %v5278_v27  ;;  %v2315_v21 = vadd.f32 %v2314_v61, %v2302_v44  ;;  %v2327_v1 = vpop.f32.mrf.mxu3  ;;  %v2303_v10 = vpop.f32.mrf.mxu1  ;;  %3300 = vmatpush.bf16.msrb.mxu3 %v5582_v11  ;;  %v5550_v44 = vor.u32 %v6330_v42, %v5547_v37  ;;  %v5349_v61 = vld [vmem:[#allocation7 + $0x128] sm:$0xf]  ;;  %v5526_v11 = vor.u32 %v6324_v9, %v5523_v62  ;;  %v6318_v42 = vld [vmem:[#allocation7 + $0x25c] sm:$0xf]  ;;  %v5505_v9 = vld [vmem:[#allocation7 + $0x260] sm:$0xf] }
 0x18a   :  { %v5350_v5 = vor.u32 %v6281_v51, %v5349_v61  ;;  %v5637_v7 = vld [vmem:[#allocation7 + $0x368] sm:$0xf]  ;;  %v5338_v10 = vor.u32 %v6278_v34, %v5337_v6  ;;  %v5529_v61 = vld [vmem:[#allocation7 + $0x290] sm:$0xf]  ;;  %v6323_v6 = vld [vmem:[#allocation7 + $0x280] sm:$0xf0] }
 0x18b   :  { %v2328_v49 = vadd.f32 %v2327_v1, %v2315_v21  ;;  %v5649_v21 = vld [vmem:[#allocation7 + $0x380] sm:$0xf]  ;;  %v6356_v1 = vld [vmem:[#allocation7 + $0x388] sm:$0xf0]  ;;  %v5638_v15 = vor.u32 %v6353_v8, %v5637_v7 }
 0x18c   :  { %3360 = vmatpush.bf16.msrb.mxu0 %v5646_v30  ;;  %v5598_v30 = vor.u32 %v6342_v45, %v5595_v46  ;;  %v5541_v46 = vld [vmem:[#allocation7 + $0x2a8] sm:$0xf]  ;;  %v6320_v62 = vld [vmem:[#allocation7 + $0x268] sm:$0xf0] }
 0x18d   :  { %3373 = vmatpush.bf16.msrb.mxu1 %v5266_v29  ;;  %v2425_v27 = vmax.f32 %v2328_v49, 0.0  ;;  %3345 = vmatpush.bf16.msra.mxu3 %v5574_v23  ;;  %v5650_v49 = vor.u32 %v6356_v1, %v5649_v21  ;;  %v5589_v21 = vld [vmem:[#allocation7 + $0x308] sm:$0xf]  ;;  %v6341_v1 = vld [vmem:[#allocation7 + $0x310] sm:$0xf0] }
 0x18e   :  { %v5590_v34 = vor.u32 %v6341_v1, %v5589_v21 }
 0x18f   :  { %v6841_v29 = vpack.c.bf16 %v2425_v27, %v2425_v27  ;;  %v6275_v27 = vld [vmem:[#allocation7 + $0x100] sm:$0xf0] }
 0x190   :  { %3361 = vmatpush.bf16.msrb.mxu0 %v5634_v19  ;;  %v2316_v35 = vpop.f32.mrf.mxu2  ;;  %v5662_v19 = vor.u32 %v6359_v53, %v5661_v52  ;;  %v5542_v53 = vor.u32 %v6329_v47, %v5541_v46  ;;  %v6851_v46 = vld [vmem:[#allocation13 + $0x1] ss:$8 sm:$0x7] }
 0x191   :  { %3374 = vmatpush.bf16.msrb.mxu1 %v5254_v33  ;;  %3288 = vmatmul.bf16.vlgmr.msrb.gmra.mxu2 %v6841_v29  ;;  %v2329_v39 = vpop.f32.mrf.mxu3  ;;  %v5562_v33 = vor.u32 %v6333_v28, %v5559_v31  ;;  %v5326_v31 = vor.u32 %v6275_v27, %v5325_v14  ;;  %v5313_v35 = vld [vmem:[#allocation7 + $0xe0] sm:$0xf] }
 0x192   :  { %3384 = vmatpush.bf16.msrb.mxu2 %v5386_v24  ;;  %v5511_v24 = vld [vmem:[#allocation7 + $0x27c] sm:$0xf0]  ;;  %v5613_v39 = vld [vmem:[#allocation7 + $0x338] sm:$0xf]  ;;  %v5314_v37 = vor.u32 %v6272_v38, %v5313_v35 }
 0x193   :  { %3346 = vmatpush.bf16.msra.mxu3 %v5562_v33  ;;  %v6347_v33 = vld [vmem:[#allocation7 + $0x340] sm:$0xf0]  ;;  %v5469_v38 = vld [vmem:[#allocation7 + $0x218] sm:$0xf] }
 0x194   :  { %3362 = vmatpush.bf16.msrb.mxu0 %v5622_v63  ;;  %v6350_v63 = vld [vmem:[#allocation7 + $0x358] sm:$0xf0]  ;;  %v5614_v52 = vor.u32 %v6347_v33, %v5613_v39 }
 0x195   :  { %3375 = vmatpush.bf16.msrb.mxu1 %v5242_v55  ;;  %v6327_v55 = vld [vmem:[#allocation7 + $0x2a4] sm:$0xf]  ;;  %v5626_v40 = vor.u32 %v6350_v63, %v5625_v16 }
 0x196   :  { %3385 = vmatpush.bf16.msrb.mxu2 %v5374_v41  ;;  %v5538_v3 = vor.u32 %v6327_v55, %v5535_v58  ;;  %v6344_v55 = vld [vmem:[#allocation7 + $0x328] sm:$0xf0]  ;;  %v5487_v58 = vld [vmem:[#allocation7 + $0x24c] sm:$0xf0] }
 0x197   :  { %3347 = vmatpush.bf16.msra.mxu3 %v5550_v44  ;;  %v5601_v44 = vld [vmem:[#allocation7 + $0x320] sm:$0xf] }
 0x198   :  { %3363 = vmatpush.bf16.msrb.mxu0 %v5610_v0  ;;  %v5554_v0 = vor.u32 %v6332_v17, %v5553_v32  ;;  %v5602_v51 = vor.u32 %v6344_v55, %v5601_v44  ;;  %v6299_v44 = vld [vmem:[#allocation7 + $0x1c0] sm:$0xf0] }
 0x199   :  { %3376 = vmatpush.bf16.msrb.mxu1 %v5230_v4  ;;  %v5578_v4 = vor.u32 %v6338_v60, %v5577_v59 }
 0x19a   :  { %3386 = vmatpush.bf16.msrb.mxu2 %v5362_v18  ;;  %v6315_v18 = vld [vmem:[#allocation7 + $0x244] sm:$0xf] }
 0x19b   :  { %3348 = vmatpush.bf16.msra.mxu3 %v5538_v3  ;;  %v5490_v60 = vor.u32 %v6315_v18, %v5487_v58  ;;  %v480_v3 = vperm.slane %v6764_v13, 4  ;;  %v5409_v58 = vld [vmem:[#allocation7 + $0x1a0] sm:$0xf] }
 0x19c   :  { %3364 = vmatpush.bf16.msrb.mxu0 %v5598_v30 }
 0x19d   :  { %3377 = vmatpush.bf16.msrb.mxu1 %v5218_v22  ;;  %v6321_v22 = vld [vmem:[#allocation7 + $0x274] sm:$0xf] }
 0x19e   :  { %3387 = vmatpush.bf16.msrb.mxu2 %v5350_v5  ;;  %v5514_v28 = vor.u32 %v6321_v22, %v5511_v24  ;;  %v5517_v5 = vld [vmem:[#allocation7 + $0x278] sm:$0xf] }
 0x19f   :  { %3349 = vmatpush.bf16.msra.mxu3 %v5526_v11  ;;  %v5493_v11 = vld [vmem:[#allocation7 + $0x248] sm:$0xf] }
 0x1a0   :  { %3365 = vmatpush.bf16.msrb.mxu0 %v5586_v2  ;;  %v2340_v36 = vpop.f32.mrf.mxu0 }
 0x1a1   :  { %3378 = vmatpush.bf16.msrb.mxu1 %v5206_v43  ;;  %3340 = vmatmul.bf16.vlgmr.msra.gmra.mxu2 %v6828_v26  ;;  %v6846_v20 = vpop.f32.mrf.mxu1  ;;  %v5499_v43 = vld [vmem:[#allocation7 + $0x264] sm:$0xf0]  ;;  %v2341_v8 = vadd.f32 %v2340_v36, %v480_v3 }
 0x1a2   :  { %3388 = vmatpush.bf16.msrb.mxu2 %v5338_v10  ;;  %v5502_v45 = vor.u32 %v6318_v42, %v5499_v43  ;;  %v5506_v10 = vor.u32 %v6320_v62, %v5505_v9  ;;  %v5457_v42 = vld [vmem:[#allocation7 + $0x200] sm:$0xf]  ;;  %v6308_v43 = vld [vmem:[#allocation7 + $0x208] sm:$0xf0]  ;;  %v6378_v9 = vld [vmem:[#allocation8 + $0x74] sm:$0xf0] }
 0x1a3   :  { %3350 = vmatpush.bf16.msra.mxu3 %v5514_v28  ;;  %v2354_v13 = vadd.f32 %v6846_v20, %v2341_v8  ;;  %v5481_v28 = vld [vmem:[#allocation7 + $0x230] sm:$0xf] }
 0x1a4   :  { %3379 = vmatmul.bf16.vlgmr.msrb.gmra.mxu1 %v6798_v25  ;;  %3410 = vmatpush.bf16.msra.mxu0 %v5578_v4  ;;  %v5565_v25 = vld [vmem:[#allocation7 + $0x2d8] sm:$0xf]  ;;  %v5733_v8 = vld [vmem:[#allocation8 + $0x70] sm:$0xf] }
 0x1a5   :  { %3423 = vmatpush.bf16.msra.mxu1 %v5674_v50  ;;  %v5566_v23 = vor.u32 %v6335_v12, %v5565_v25  ;;  %v6269_v50 = vld [vmem:[#allocation7 + $0xd0] sm:$0xf0]  ;;  %v5734_v62 = vor.u32 %v6378_v9, %v5733_v8  ;;  %v6391_v9 = vld [vmem:[#allocation8 + $0xe4] sm:$0xf] }
 0x1a6   :  { %3389 = vmatpush.bf16.msrb.mxu2 %v5326_v31  ;;  %v5302_v59 = vor.u32 %v6269_v50, %v5301_v48  ;;  %v6317_v25 = vld [vmem:[#allocation7 + $0x250] sm:$0xf0]  ;;  %v6314_v31 = vld [vmem:[#allocation7 + $0x238] sm:$0xf0]  ;;  %v5433_v48 = vld [vmem:[#allocation7 + $0x1d0] sm:$0xf] }
 0x1a7   :  { %3351 = vmatpush.bf16.msra.mxu3 %v5502_v45  ;;  %v5494_v12 = vor.u32 %v6317_v25, %v5493_v11  ;;  %v5482_v20 = vor.u32 %v6314_v31, %v5481_v28  ;;  %v6305_v45 = vld [vmem:[#allocation7 + $0x1f0] sm:$0xf0]  ;;  %v6302_v50 = vld [vmem:[#allocation7 + $0x1d8] sm:$0xf0]  ;;  %v5717_v11 = vld [vmem:[#allocation8 + $0x50] sm:$0xf] }
 0x1a8   :  { %3411 = vmatpush.bf16.msra.mxu0 %v5566_v23  ;;  %v2366_v41 = vpop.f32.mrf.mxu2  ;;  %v2342_v56 = vpop.f32.mrf.mxu0  ;;  %v5701_v28 = vld [vmem:[#allocation8 + $0x30] sm:$0xf]  ;;  %v6370_v31 = vld [vmem:[#allocation8 + $0x34] sm:$0xf0] }
 0x1a9   :  { %3424 = vmatpush.bf16.msra.mxu1 %v5662_v19  ;;  %v2379_v30 = vpop.f32.mrf.mxu3  ;;  %v2355_v57 = vpop.f32.mrf.mxu1  ;;  %v6326_v19 = vld [vmem:[#allocation7 + $0x298] sm:$0xf0]  ;;  %v2367_v14 = vadd.f32 %v2366_v41, %v2354_v13  ;;  %v5458_v41 = vor.u32 %v6308_v43, %v5457_v42  ;;  %v6376_v13 = vld [vmem:[#allocation8 + $0x64] sm:$0xf0] }
 0x1aa   :  { %3390 = vmatpush.bf16.msrb.mxu2 %v5314_v37  ;;  %v5530_v2 = vor.u32 %v6326_v19, %v5529_v61  ;;  %v5445_v37 = vld [vmem:[#allocation7 + $0x1e8] sm:$0xf] }
 0x1ab   :  { %3352 = vmatpush.bf16.msra.mxu3 %v5490_v60  ;;  %v2380_v27 = vadd.f32 %v2379_v30, %v2367_v14  ;;  %v5446_v47 = vor.u32 %v6305_v45, %v5445_v37  ;;  %v5421_v30 = vld [vmem:[#allocation7 + $0x1b8] sm:$0xf]  ;;  %v5397_v61 = vld [vmem:[#allocation7 + $0x188] sm:$0xf] }
 0x1ac   :  { %3412 = vmatpush.bf16.msra.mxu0 %v5554_v0  ;;  %v5422_v18 = vor.u32 %v6299_v44, %v5421_v30  ;;  %v6368_v43 = vld [vmem:[#allocation8 + $0x24] sm:$0xf0]  ;;  %v6366_v44 = vld [vmem:[#allocation8 + $0x14] sm:$0xf0] }
 0x1ad   :  { %3425 = vmatpush.bf16.msra.mxu1 %v5650_v49  ;;  %v5518_v49 = vor.u32 %v6323_v6, %v5517_v5  ;;  %v6392_v37 = vld [vmem:[#allocation8 + $0xe4] sm:$0xf0] }
 0x1ae   :  { %3391 = vmatpush.bf16.msrb.mxu2 %v5302_v59  ;;  %v6296_v59 = vld [vmem:[#allocation7 + $0x1a8] sm:$0xf0] }
 0x1af   :  { %v5410_v60 = vor.u32 %v6296_v59, %v5409_v58  ;;  %v6369_v58 = vld [vmem:[#allocation8 + $0x34] sm:$0xf]  ;;  %v5703_v59 = vld [vmem:[#allocation8 + $0x38] sm:$0xf0] }
 0x1b0   :  { %3413 = vmatpush.bf16.msra.mxu0 %v5542_v53  ;;  %v2368_v4 = vpop.f32.mrf.mxu2  ;;  %v5434_v53 = vor.u32 %v6302_v50, %v5433_v48  ;;  %v6371_v50 = vld [vmem:[#allocation8 + $0x44] sm:$0xf] }
 0x1b1   :  { %3426 = vmatpush.bf16.msra.mxu1 %v5638_v15  ;;  %v2381_v7 = vpop.f32.mrf.mxu3  ;;  %3392 = vmatmul.bf16.vlgmr.msrb.gmra.mxu2 %v6821_v54 }
 0x1b2   :  { %3737 = vmatpush.bf16.msra.mxu2 %v5734_v62  ;;  %v5791_v62 = vld [vmem:[#allocation8 + $0xe8] sm:$0xf0] }
 0x1b4   :  { %3414 = vmatpush.bf16.msra.mxu0 %v5530_v2 }
 0x1b5   :  { %3427 = vmatpush.bf16.msra.mxu1 %v5626_v40  ;;  %v6311_v40 = vld [vmem:[#allocation7 + $0x220] sm:$0xf0] }
 0x1b6   :  { %v5470_v39 = vor.u32 %v6311_v40, %v5469_v38 }
 0x1b8   :  { %3415 = vmatpush.bf16.msra.mxu0 %v5518_v49 }
 0x1b9   :  { %3428 = vmatpush.bf16.msra.mxu1 %v5614_v52  ;;  %v2595_v52 = vperm.slane %v6851_v46, 0 }
 0x1bc   :  { %3416 = vmatpush.bf16.msra.mxu0 %v5506_v10  ;;  %v5725_v10 = vld [vmem:[#allocation8 + $0x60] sm:$0xf] }
 0x1bd   :  { %3429 = vmatpush.bf16.msra.mxu1 %v5602_v51  ;;  %v6293_v51 = vld [vmem:[#allocation7 + $0x190] sm:$0xf0]  ;;  %v5726_v25 = vor.u32 %v6376_v13, %v5725_v10  ;;  %v5765_v10 = vld [vmem:[#allocation8 + $0xb0] sm:$0xf]  ;;  %v5794_v13 = vor.u32 %v6391_v9, %v5791_v62  ;;  %v5743_v9 = vld [vmem:[#allocation8 + $0x88] sm:$0xf0] }
 0x1be   :  { %v5398_v21 = vor.u32 %v6293_v51, %v5397_v61  ;;  %v6364_v61 = vld [vmem:[#allocation8 + $0x4] sm:$0xf0]  ;;  %v5706_v51 = vor.u32 %v6369_v58, %v5703_v59  ;;  %v6407_v59 = vld [vmem:[#allocation8 + $0x164] sm:$0xf] }
 0x1bf   :  { %3738 = vmatpush.bf16.msra.mxu2 %v5726_v25  ;;  %v6408_v58 = vld [vmem:[#allocation8 + $0x164] sm:$0xf0] }
 0x1c0   :  { %3417 = vmatpush.bf16.msra.mxu0 %v5494_v12  ;;  %v2392_v15 = vpop.f32.mrf.mxu0  ;;  %v6374_v12 = vld [vmem:[#allocation8 + $0x54] sm:$0xf0] }
 0x1c1   :  { %3430 = vmatpush.bf16.msra.mxu1 %v5590_v34  ;;  %v2405_v16 = vpop.f32.mrf.mxu1  ;;  %v2393_v23 = vadd.f32 %v2392_v15, %v2380_v27  ;;  %v6377_v27 = vld [vmem:[#allocation8 + $0x74] sm:$0xf]  ;;  %v5735_v15 = vld [vmem:[#allocation8 + $0x78] sm:$0xf0] }
 0x1c3   :  { %v2406_v63 = vadd.f32 %v2405_v16, %v2393_v23  ;;  %v5738_v16 = vor.u32 %v6377_v27, %v5735_v15  ;;  %v5709_v23 = vld [vmem:[#allocation8 + $0x40] sm:$0xf]  ;;  %v5687_v27 = vld [vmem:[#allocation8 + $0x18] sm:$0xf0] }
 0x1c5   :  { %3776 = vmatpush.bf16.msrb.mxu1 %v5738_v16  ;;  %v6389_v16 = vld [vmem:[#allocation8 + $0xd4] sm:$0xf] }
 0x1c8   :  { %v2418_v22 = vpop.f32.mrf.mxu2  ;;  %v2394_v36 = vpop.f32.mrf.mxu0 }
 0x1c9   :  { %v2419_v54 = vadd.f32 %v2418_v22, %v2406_v63  ;;  %v3250_v24 = vpop.f32.mrf.mxu3  ;;  %v2407_v32 = vpop.f32.mrf.mxu1  ;;  %v6372_v63 = vld [vmem:[#allocation8 + $0x44] sm:$0xf0]  ;;  %v6375_v22 = vld [vmem:[#allocation8 + $0x64] sm:$0xf]  ;;  %v5727_v36 = vld [vmem:[#allocation8 + $0x68] sm:$0xf0] }
 0x1ca   :  { %v3251_v55 = vadd.f32 %v3250_v24, %v2595_v52  ;;  %v5710_v24 = vor.u32 %v6372_v63, %v5709_v23  ;;  %v5730_v32 = vor.u32 %v6375_v22, %v5727_v36  ;;  %v5711_v52 = vld [vmem:[#allocation8 + $0x48] sm:$0xf0]  ;;  %v5783_v23 = vld [vmem:[#allocation8 + $0xd8] sm:$0xf0]  ;;  %v5757_v22 = vld [vmem:[#allocation8 + $0xa0] sm:$0xf] }
 0x1cb   :  { %v2426_v17 = vmax.f32 %v2419_v54, 0.0  ;;  %v5714_v30 = vor.u32 %v6371_v50, %v5711_v52  ;;  %v5786_v63 = vor.u32 %v6389_v16, %v5783_v23  ;;  %v6409_v50 = vld [vmem:[#allocation8 + $0x174] sm:$0xf] }
 0x1cc   :  { %3777 = vmatpush.bf16.msrb.mxu1 %v5730_v32  ;;  %v6401_v16 = vld [vmem:[#allocation8 + $0x134] sm:$0xf] }
 0x1cd   :  { %v2431_v35 = vpack.c.bf16 %v2426_v17, %v2426_v17  ;;  %v5797_v17 = vld [vmem:[#allocation8 + $0xf0] sm:$0xf] }
 0x1cf   :  { %3301 = vmatmul.bf16.vlgmr.msrb.gmra.mxu3 %v2431_v35  ;;  %3366 = vmatmul.bf16.vlgmr.msrb.gmra.mxu0 %v2431_v35 }
 0x1d0   :  { %3431 = vmatmul.bf16.vlgmr.msra.gmra.mxu1 %v2431_v35  ;;  %v2420_v0 = vpop.f32.mrf.mxu2  ;;  %3397 = vmatpush.bf16.msrb.mxu3 %v5482_v20  ;;  %v6394_v20 = vld [vmem:[#allocation8 + $0xf4] sm:$0xf0]  ;;  %v5702_v35 = vor.u32 %v6370_v31, %v5701_v28  ;;  %v6363_v28 = vld [vmem:[#allocation8 + $0x4] sm:$0xf]  ;;  %v5679_v31 = vld [vmem:[#allocation8 + $0x8] sm:$0xf0] }
 0x1d1   :  { %v3252_v33 = vpop.f32.mrf.mxu3  ;;  %v5798_v38 = vor.u32 %v6394_v20, %v5797_v17  ;;  %v6373_v0 = vld [vmem:[#allocation8 + $0x54] sm:$0xf]  ;;  %v5682_v32 = vor.u32 %v6363_v28, %v5679_v31  ;;  %v6387_v17 = vld [vmem:[#allocation8 + $0xc4] sm:$0xf]  ;;  %v5775_v20 = vld [vmem:[#allocation8 + $0xc8] sm:$0xf0] }
 0x1d2   :  { %v5693_v33 = vld [vmem:[#allocation8 + $0x20] sm:$0xf]  ;;  %v6400_v31 = vld [vmem:[#allocation8 + $0x124] sm:$0xf0] }
 0x1d3   :  { %v5821_v28 = vld [vmem:[#allocation8 + $0x120] sm:$0xf] }
 0x1d4   :  { %3398 = vmatpush.bf16.msrb.mxu3 %v5470_v39  ;;  %v5719_v39 = vld [vmem:[#allocation8 + $0x58] sm:$0xf0] }
 0x1d5   :  { %v5722_v42 = vor.u32 %v6373_v0, %v5719_v39 }
 0x1d7   :  { %3778 = vmatpush.bf16.msrb.mxu1 %v5722_v42  ;;  %v5767_v42 = vld [vmem:[#allocation8 + $0xb8] sm:$0xf0] }
 0x1d8   :  { %3399 = vmatpush.bf16.msrb.mxu3 %v5458_v41  ;;  %v5789_v41 = vld [vmem:[#allocation8 + $0xe0] sm:$0xf] }
 0x1d9   :  { %v5790_v48 = vor.u32 %v6392_v37, %v5789_v41  ;;  %v5741_v41 = vld [vmem:[#allocation8 + $0x80] sm:$0xf]  ;;  %v6380_v37 = vld [vmem:[#allocation8 + $0x84] sm:$0xf0] }
 0x1db   :  { %3779 = vmatpush.bf16.msrb.mxu1 %v5714_v30  ;;  %v6383_v30 = vld [vmem:[#allocation8 + $0xa4] sm:$0xf] }
 0x1dc   :  { %3400 = vmatpush.bf16.msrb.mxu3 %v5446_v47  ;;  %v5694_v47 = vor.u32 %v6368_v43, %v5693_v33  ;;  %v6385_v33 = vld [vmem:[#allocation8 + $0xb4] sm:$0xf] }
 0x1dd   :  { %v5770_v43 = vor.u32 %v6385_v33, %v5767_v42  ;;  %v5813_v42 = vld [vmem:[#allocation8 + $0x110] sm:$0xf] }
 0x1df   :  { %3353 = vmatmul.bf16.vlgmr.msra.gmra.mxu3 %v6841_v29  ;;  %3418 = vmatmul.bf16.vlgmr.msra.gmra.mxu0 %v6841_v29  ;;  %v2596_v29 = vperm.slane %v6851_v46, 1 }
 0x1e0   :  { %v3263_v56 = vpop.f32.mrf.mxu0  ;;  %3401 = vmatpush.bf16.msrb.mxu3 %v5434_v53  ;;  %v5685_v53 = vld [vmem:[#allocation8 + $0x10] sm:$0xf]  ;;  %3780 = vmatpush.bf16.msrb.mxu1 %v5706_v51 }
 0x1e1   :  { %v3264_v57 = vadd.f32 %v3263_v56, %v3251_v55  ;;  %v5781_v55 = vld [vmem:[#allocation8 + $0xd0] sm:$0xf]  ;;  %v6390_v56 = vld [vmem:[#allocation8 + $0xd4] sm:$0xf0] }
 0x1e4   :  { %3402 = vmatpush.bf16.msrb.mxu3 %v5422_v18  ;;  %v3276_v1 = vpop.f32.mrf.mxu1  ;;  %v5782_v18 = vor.u32 %v6390_v56, %v5781_v55 }
 0x1e5   :  { %v6856_v2 = vadd.f32 %v3276_v1, %v3264_v57  ;;  %v5686_v57 = vor.u32 %v6366_v44, %v5685_v53  ;;  %v6393_v1 = vld [vmem:[#allocation8 + $0xf4] sm:$0xf]  ;;  %v5863_v53 = vld [vmem:[#allocation8 + $0x178] sm:$0xf0]  ;;  %v5759_v44 = vld [vmem:[#allocation8 + $0xa8] sm:$0xf0] }
 0x1e6   :  { %v5866_v55 = vor.u32 %v6409_v50, %v5863_v53  ;;  %v5762_v56 = vor.u32 %v6383_v30, %v5759_v44  ;;  %v6395_v53 = vld [vmem:[#allocation8 + $0x104] sm:$0xf]  ;;  %v5807_v44 = vld [vmem:[#allocation8 + $0x108] sm:$0xf0] }
 0x1e8   :  { %v3265_v19 = vpop.f32.mrf.mxu0  ;;  %3403 = vmatpush.bf16.msrb.mxu3 %v5410_v60  ;;  %v5677_v60 = vld [vmem:[#allocation8] sm:$0xf] }
 0x1ec   :  { %3404 = vmatpush.bf16.msrb.mxu3 %v5398_v21  ;;  %v3278_v3 = vpop.f32.mrf.mxu1  ;;  %v5678_v21 = vor.u32 %v6364_v61, %v5677_v60  ;;  %v5855_v61 = vld [vmem:[#allocation8 + $0x168] sm:$0xf0] }
 0x1ed   :  { %v5799_v3 = vld [vmem:[#allocation8 + $0xf8] sm:$0xf0]  ;;  %v5858_v51 = vor.u32 %v6407_v59, %v5855_v61 }
 0x1ef   :  { %3405 = vmatmul.bf16.vlgmr.msrb.gmra.mxu3 %v6828_v26  ;;  %v5718_v26 = vor.u32 %v6374_v12, %v5717_v11  ;;  %v6386_v11 = vld [vmem:[#allocation8 + $0xb4] sm:$0xf0] }
 0x1f0   :  { %3750 = vmatpush.bf16.msra.mxu3 %v5798_v38  ;;  %v5766_v25 = vor.u32 %v6386_v11, %v5765_v10  ;;  %v5749_v38 = vld [vmem:[#allocation8 + $0x90] sm:$0xf]  ;;  %v5837_v10 = vld [vmem:[#allocation8 + $0x140] sm:$0xf]  ;;  %v6403_v11 = vld [vmem:[#allocation8 + $0x144] sm:$0xf] }
 0x1f1   :  { %3739 = vmatpush.bf16.msra.mxu2 %v5718_v26  ;;  %v6365_v26 = vld [vmem:[#allocation8 + $0x14] sm:$0xf] }
 0x1f2   :  { %v5690_v15 = vor.u32 %v6365_v26, %v5687_v27  ;;  %v5829_v27 = vld [vmem:[#allocation8 + $0x130] sm:$0xf] }
 0x1f4   :  { %3751 = vmatpush.bf16.msra.mxu3 %v5790_v48  ;;  %v6410_v48 = vld [vmem:[#allocation8 + $0x174] sm:$0xf0] }
 0x1f5   :  { %3740 = vmatpush.bf16.msra.mxu2 %v5710_v24  ;;  %v6384_v24 = vld [vmem:[#allocation8 + $0xa4] sm:$0xf0] }
 0x1f6   :  { %v5758_v36 = vor.u32 %v6384_v24, %v5757_v22  ;;  %v5831_v22 = vld [vmem:[#allocation8 + $0x138] sm:$0xf0] }
 0x1f8   :  { %3752 = vmatpush.bf16.msra.mxu3 %v5782_v18  ;;  %v5853_v18 = vld [vmem:[#allocation8 + $0x160] sm:$0xf] }
 0x1f9   :  { %3741 = vmatpush.bf16.msra.mxu2 %v5702_v35  ;;  %v5778_v35 = vor.u32 %v6387_v17, %v5775_v20  ;;  %v5854_v60 = vor.u32 %v6408_v58, %v5853_v18  ;;  %v5822_v20 = vor.u32 %v6400_v31, %v5821_v28  ;;  %v6434_v31 = vld [vmem:[#allocation11 + $0x38] sm:$0xff] }
 0x1fd   :  { %3742 = vmatpush.bf16.msra.mxu2 %v5694_v47  ;;  %v5861_v47 = vld [vmem:[#allocation8 + $0x170] sm:$0xf] }
 0x1fe   :  { %v5862_v52 = vor.u32 %v6410_v48, %v5861_v47  ;;  %v5815_v48 = vld [vmem:[#allocation8 + $0x118] sm:$0xf0] }
 0x200   :  { %v3315_v4 = vpop.f32.mrf.mxu0  ;;  %3763 = vmatpush.bf16.msrb.mxu0 %v5862_v52 }
 0x201   :  { %v3316_v5 = vadd.f32 %v3315_v4, %v2596_v29  ;;  %v3328_v6 = vpop.f32.mrf.mxu1  ;;  %3743 = vmatpush.bf16.msra.mxu2 %v5686_v57  ;;  %v5802_v29 = vor.u32 %v6393_v1, %v5799_v3  ;;  %v5773_v4 = vld [vmem:[#allocation8 + $0xc0] sm:$0xf]  ;;  %v5751_v1 = vld [vmem:[#allocation8 + $0x98] sm:$0xf0] }
 0x203   :  { %v6860_v34 = vadd.f32 %v3328_v6, %v3316_v5  ;;  %v6388_v5 = vld [vmem:[#allocation8 + $0xc4] sm:$0xf0] }
 0x204   :  { %v5774_v6 = vor.u32 %v6388_v5, %v5773_v4  ;;  %3764 = vmatpush.bf16.msrb.mxu0 %v5854_v60  ;;  %v6406_v4 = vld [vmem:[#allocation8 + $0x154] sm:$0xf0]  ;;  %v6405_v5 = vld [vmem:[#allocation8 + $0x154] sm:$0xf] }
 0x205   :  { %3744 = vmatpush.bf16.msra.mxu2 %v5678_v21  ;;  %v6381_v21 = vld [vmem:[#allocation8 + $0x94] sm:$0xf] }
 0x206   :  { %3753 = vmatpush.bf16.msra.mxu3 %v5774_v6  ;;  %v5754_v3 = vor.u32 %v6381_v21, %v5751_v1 }
 0x208   :  { %v3317_v49 = vpop.f32.mrf.mxu0 }
 0x209   :  { %v3330_v7 = vpop.f32.mrf.mxu1  ;;  %v6367_v49 = vld [vmem:[#allocation8 + $0x24] sm:$0xf]  ;;  %3789 = vmatpush.bf16.msrb.mxu2 %v5802_v29  ;;  %v5845_v29 = vld [vmem:[#allocation8 + $0x150] sm:$0xf] }
 0x20a   :  { %v5695_v7 = vld [vmem:[#allocation8 + $0x28] sm:$0xf0]  ;;  %3754 = vmatpush.bf16.msra.mxu3 %v5766_v25  ;;  %v5846_v6 = vor.u32 %v6406_v4, %v5845_v29 }
 0x20b   :  { %v5698_v8 = vor.u32 %v6367_v49, %v5695_v7  ;;  %v5847_v49 = vld [vmem:[#allocation8 + $0x158] sm:$0xf0] }
 0x20c   :  { %v5850_v7 = vor.u32 %v6405_v5, %v5847_v49  ;;  %3765 = vmatpush.bf16.msrb.mxu0 %v5846_v6 }
 0x20d   :  { %3781 = vmatpush.bf16.msrb.mxu1 %v5698_v8  ;;  %3790 = vmatpush.bf16.msrb.mxu2 %v5794_v13  ;;  %v6379_v8 = vld [vmem:[#allocation8 + $0x84] sm:$0xf]  ;;  %v6404_v13 = vld [vmem:[#allocation8 + $0x144] sm:$0xf0] }
 0x20e   :  { %3755 = vmatpush.bf16.msra.mxu3 %v5758_v36  ;;  %v5746_v62 = vor.u32 %v6379_v8, %v5743_v9  ;;  %v5838_v25 = vor.u32 %v6404_v13, %v5837_v10  ;;  %v5834_v36 = vor.u32 %v6401_v16, %v5831_v22  ;;  %v6418_v9 = vld [vmem:[#allocation10 + $0x38] sm:$0xff]  ;;  %v6425_v13 = vld [vmem:[#allocation10 + $0x70] sm:$0xff] }
 0x20f   :  { %v6426_v10 = vld [vmem:[#allocation10 + $0x78] sm:$0xff]  ;;  %v6421_v16 = vld [vmem:[#allocation10 + $0x50] sm:$0xff] }
 0x210   :  { %3766 = vmatpush.bf16.msrb.mxu0 %v5838_v25  ;;  %v6423_v25 = vld [vmem:[#allocation10 + $0x60] sm:$0xff] }
 0x211   :  { %3782 = vmatpush.bf16.msrb.mxu1 %v5690_v15  ;;  %3791 = vmatpush.bf16.msrb.mxu2 %v5786_v63  ;;  %v6402_v15 = vld [vmem:[#allocation8 + $0x134] sm:$0xf0] }
 0x212   :  { %v5830_v63 = vor.u32 %v6402_v15, %v5829_v27  ;;  %v6422_v27 = vld [vmem:[#allocation10 + $0x58] sm:$0xff]  ;;  %v6412_v15 = vld [vmem:[#allocation10 + $0x8] sm:$0xff] }
 0x214   :  { %v6862_v14 = vpop.f32.mrf.mxu2  ;;  %3767 = vmatpush.bf16.msrb.mxu0 %v5830_v63  ;;  %v6411_v63 = vld [vmem:[#allocation10] sm:$0xff] }
 0x215   :  { %3783 = vmatpush.bf16.msrb.mxu1 %v5682_v32  ;;  %3792 = vmatpush.bf16.msrb.mxu2 %v5778_v35  ;;  %v6399_v32 = vld [vmem:[#allocation8 + $0x124] sm:$0xf]  ;;  %v3290_v17 = vadd.f32 %v6862_v14, %v6856_v2  ;;  %v5823_v35 = vld [vmem:[#allocation8 + $0x128] sm:$0xf0]  ;;  %v5805_v2 = vld [vmem:[#allocation8 + $0x100] sm:$0xf] }
 0x216   :  { %v6396_v14 = vld [vmem:[#allocation8 + $0x104] sm:$0xf0] }
 0x217   :  { %v5806_v30 = vor.u32 %v6396_v14, %v5805_v2 }
 0x218   :  { %3768 = vmatpush.bf16.msrb.mxu0 %v5822_v20 }
 0x219   :  { %3793 = vmatpush.bf16.msrb.mxu2 %v5770_v43  ;;  %v6398_v43 = vld [vmem:[#allocation8 + $0x114] sm:$0xf0]  ;;  %3961 = vmatpush.bf16.msra.mxu1 %v6426_v10 }
 0x21a   :  { %v5814_v47 = vor.u32 %v6398_v43, %v5813_v42  ;;  %v6430_v43 = vld [vmem:[#allocation11 + $0x18] sm:$0xff] }
 0x21c   :  { %v3291_v40 = vpop.f32.mrf.mxu2  ;;  %3769 = vmatpush.bf16.msrb.mxu0 %v5814_v47 }
 0x21d   :  { %v6382_v40 = vld [vmem:[#allocation8 + $0x94] sm:$0xf0]  ;;  %3794 = vmatpush.bf16.msrb.mxu2 %v5762_v56  ;;  %v5810_v56 = vor.u32 %v6395_v53, %v5807_v44  ;;  %3962 = vmatpush.bf16.msra.mxu1 %v6425_v13 }
 0x21e   :  { %v5750_v39 = vor.u32 %v6382_v40, %v5749_v38  ;;  %v5826_v40 = vor.u32 %v6399_v32, %v5823_v35  ;;  %v6433_v32 = vld [vmem:[#allocation11 + $0x30] sm:$0xff]  ;;  %v6432_v35 = vld [vmem:[#allocation11 + $0x28] sm:$0xff] }
 0x220   :  { %3756 = vmatpush.bf16.msra.mxu3 %v5750_v39  ;;  %3770 = vmatpush.bf16.msrb.mxu0 %v5806_v30 }
 0x221   :  { %v6864_v54 = vpop.f32.mrf.mxu1  ;;  %3795 = vmatpush.bf16.msrb.mxu2 %v5754_v3  ;;  %v2597_v3 = vperm.slane %v6851_v46, 2  ;;  %v6416_v46 = vld [vmem:[#allocation10 + $0x28] sm:$0xff] }
 0x223   :  { %v3381_v29 = vadd.f32 %v6864_v54, %v2597_v3  ;;  %v6415_v54 = vld [vmem:[#allocation10 + $0x20] sm:$0xff] }
 0x224   :  { %v6866_v19 = vpop.f32.mrf.mxu2  ;;  %3948 = vmatpush.bf16.msra.mxu0 %v6418_v9 }
 0x225   :  { %3796 = vmatpush.bf16.msrb.mxu2 %v5746_v62  ;;  %v3342_v18 = vadd.f32 %v6866_v19, %v6860_v34  ;;  %v6417_v62 = vld [vmem:[#allocation10 + $0x30] sm:$0xff] }
 0x228   :  { %3949 = vmatpush.bf16.msra.mxu0 %v6417_v62 }
 0x229   :  { %v3382_v45 = vpop.f32.mrf.mxu1 }
 0x22a   :  { %v5742_v45 = vor.u32 %v6380_v37, %v5741_v41  ;;  %v6397_v41 = vld [vmem:[#allocation8 + $0x114] sm:$0xf] }
 0x22b   :  { %v5818_v50 = vor.u32 %v6397_v41, %v5815_v48 }
 0x22c   :  { %v3343_v12 = vpop.f32.mrf.mxu2  ;;  %3757 = vmatpush.bf16.msra.mxu3 %v5742_v45  ;;  %3950 = vmatpush.bf16.msra.mxu0 %v6416_v46 }
 0x22d   :  { %v5839_v12 = vld [vmem:[#allocation8 + $0x148] sm:$0xf0] }
 0x22e   :  { %v5842_v26 = vor.u32 %v6403_v11, %v5839_v12  ;;  %v6414_v11 = vld [vmem:[#allocation10 + $0x18] sm:$0xff]  ;;  %v6413_v12 = vld [vmem:[#allocation10 + $0x10] sm:$0xff] }
 0x230   :  { %3802 = vmatpush.bf16.msrb.mxu3 %v5866_v55  ;;  %3951 = vmatpush.bf16.msra.mxu0 %v6415_v54 }
 0x234   :  { %v6868_v0 = vpop.f32.mrf.mxu2  ;;  %3803 = vmatpush.bf16.msrb.mxu3 %v5858_v51  ;;  %3952 = vmatpush.bf16.msra.mxu0 %v6414_v11 }
 0x235   :  { %v3394_v4 = vadd.f32 %v6868_v0, %v3381_v29  ;;  %v6424_v0 = vld [vmem:[#allocation10 + $0x68] sm:$0xff] }
 0x236   :  { %3963 = vmatpush.bf16.msra.mxu1 %v6424_v0 }
 0x238   :  { %3804 = vmatpush.bf16.msrb.mxu3 %v5850_v7  ;;  %3953 = vmatpush.bf16.msra.mxu0 %v6413_v12 }
 0x23a   :  { %3964 = vmatpush.bf16.msra.mxu1 %v6423_v25 }
 0x23c   :  { %v3395_v57 = vpop.f32.mrf.mxu2  ;;  %3805 = vmatpush.bf16.msrb.mxu3 %v5842_v26  ;;  %3954 = vmatpush.bf16.msra.mxu0 %v6412_v15 }
 0x23e   :  { %3965 = vmatpush.bf16.msra.mxu1 %v6422_v27 }
 0x240   :  { %3806 = vmatpush.bf16.msrb.mxu3 %v5834_v36  ;;  %3955 = vmatpush.bf16.msra.mxu0 %v6411_v63  ;;  %v6419_v36 = vld [vmem:[#allocation10 + $0x40] sm:$0xff] }
 0x242   :  { %3966 = vmatpush.bf16.msra.mxu1 %v6421_v16 }
 0x244   :  { %3807 = vmatpush.bf16.msrb.mxu3 %v5826_v40  ;;  %v6431_v40 = vld [vmem:[#allocation11 + $0x20] sm:$0xff] }
 0x248   :  { %3808 = vmatpush.bf16.msrb.mxu3 %v5818_v50 }
 0x24c   :  { %v3367_v23 = vpop.f32.mrf.mxu0  ;;  %3809 = vmatpush.bf16.msrb.mxu3 %v5810_v56 }
 0x24d   :  { %v3432_v24 = vpop.f32.mrf.mxu1 }
 0x252   :  { %v3302_v38 = vpop.f32.mrf.mxu3 }
 0x253   :  { %v3303_v39 = vadd.f32 %v3302_v38, %v3290_v17  ;;  %v3491_v38 = vld [vmem:[#allocation13 + $0x2] ss:$8 sm:$0x3] }
 0x254   :  { %v3369_v33 = vpop.f32.mrf.mxu0 }
 0x255   :  { %v3436_v37 = vmax.f32 %v3303_v39, 0.0  ;;  %v3434_v45 = vpop.f32.mrf.mxu1  ;;  %v3493_v39 = vperm.slane %v3491_v38, 0 }
 0x257   :  { %v3439_v52 = vpack.c.bf16 %v3436_v37, %v3436_v37  ;;  %v3494_v37 = vperm.slane %v3491_v38, 1 }
 0x259   :  { %3745 = vmatmul.bf16.vlgmr.msra.gmra.mxu2 %v3439_v52  ;;  %3784 = vmatmul.bf16.vlgmr.msrb.gmra.mxu1 %v3439_v52 }
 0x25a   :  { %v3304_v55 = vpop.f32.mrf.mxu3  ;;  %4041 = vmatpush.bf16.msra.mxu2 %v6434_v31 }
 0x25c   :  { %v3419_v57 = vpop.f32.mrf.mxu0 }
 0x25e   :  { %4042 = vmatpush.bf16.msra.mxu2 %v6433_v32 }
 0x262   :  { %v3354_v58 = vpop.f32.mrf.mxu3  ;;  %4043 = vmatpush.bf16.msra.mxu2 %v6432_v35 }
 0x263   :  { %v3355_v59 = vadd.f32 %v3354_v58, %v3342_v18  ;;  %v6429_v18 = vld [vmem:[#allocation11 + $0x10] sm:$0xff]  ;;  %v6428_v58 = vld [vmem:[#allocation11 + $0x8] sm:$0xff] }
 0x264   :  { %v3421_v60 = vpop.f32.mrf.mxu0 }
 0x265   :  { %v3368_v61 = vadd.f32 %v3367_v23, %v3355_v59  ;;  %v6427_v59 = vld [vmem:[#allocation11] sm:$0xff] }
 0x266   :  { %4044 = vmatpush.bf16.msra.mxu2 %v6431_v40 }
 0x267   :  { %v3437_v51 = vmax.f32 %v3368_v61, 0.0  ;;  %v3851_v61 = vld [vmem:[#allocation13 + $0x3] ss:$0 sm:$0xff] }
 0x269   :  { %v3440_v21 = vpack.c.bf16 %v3437_v51, %v3437_v51 }
 0x26a   :  { %v3356_v1 = vpop.f32.mrf.mxu3  ;;  %4045 = vmatpush.bf16.msra.mxu2 %v6430_v43 }
 0x26b   :  { %3758 = vmatmul.bf16.vlgmr.msra.gmra.mxu3 %v3440_v21  ;;  %3797 = vmatmul.bf16.vlgmr.msrb.gmra.mxu2 %v3440_v21 }
 0x26e   :  { %4046 = vmatpush.bf16.msra.mxu2 %v6429_v18 }
 0x272   :  { %v3406_v5 = vpop.f32.mrf.mxu3  ;;  %4047 = vmatpush.bf16.msra.mxu2 %v6428_v58 }
 0x273   :  { %v3407_v6 = vadd.f32 %v3406_v5, %v3394_v4 }
 0x275   :  { %v3420_v49 = vadd.f32 %v3419_v57, %v3407_v6  ;;  %v3992_v6 = vld [vmem:[#allocation13 + $0x4] ss:$0 sm:$0xff] }
 0x276   :  { %4048 = vmatpush.bf16.msra.mxu2 %v6427_v59 }
 0x277   :  { %v3433_v7 = vadd.f32 %v3432_v24, %v3420_v49  ;;  %v6420_v24 = vld [vmem:[#allocation10 + $0x48] sm:$0xff] }
 0x278   :  { %3967 = vmatpush.bf16.msra.mxu1 %v6420_v24 }
 0x279   :  { %v3438_v34 = vmax.f32 %v3433_v7, 0.0 }
 0x27a   :  { %v3408_v19 = vpop.f32.mrf.mxu3 }
 0x27b   :  { %v3441_v8 = vpack.c.bf16 %v3438_v34, %v3438_v34 }
 0x27c   :  { %3968 = vmatpush.bf16.msra.mxu1 %v6419_v36 }
 0x27d   :  { %3771 = vmatmul.bf16.vlgmr.msrb.gmra.mxu0 %v3441_v8  ;;  %3810 = vmatmul.bf16.vlgmr.msrb.gmra.mxu3 %v3441_v8 }
 0x2d6   :  { %v3785_v26 = vpop.f32.mrf.mxu1 }
 0x2d7   :  { %v3786_v50 = vadd.f32 %v3785_v26, %v3494_v37 }
 0x2dc   :  { %v3746_v23 = vpop.f32.mrf.mxu2 }
 0x2dd   :  { %v3747_v41 = vadd.f32 %v3746_v23, %v3493_v39 }
 0x2de   :  { %v3787_v22 = vpop.f32.mrf.mxu1 }
 0x2e4   :  { %v3748_v28 = vpop.f32.mrf.mxu2 }
 0x2ee   :  { %v3759_v17 = vpop.f32.mrf.mxu3  ;;  %v3798_v20 = vpop.f32.mrf.mxu2 }
 0x2ef   :  { %v3760_v45 = vadd.f32 %v3759_v17, %v3747_v41  ;;  %v3799_v2 = vadd.f32 %v3798_v20, %v3786_v50 }
 0x2f6   :  { %v3761_v33 = vpop.f32.mrf.mxu3  ;;  %v3800_v42 = vpop.f32.mrf.mxu2 }
 0x2fa   :  { %v3772_v47 = vpop.f32.mrf.mxu0 }
 0x2fb   :  { %v3773_v48 = vadd.f32 %v3772_v47, %v3760_v45 }
 0x2fd   :  { %v3815_v52 = vmax.f32 %v3773_v48, 0.0 }
 0x2ff   :  { %v3817_v14 = vpack.c.bf16 %v3815_v52, %v3815_v52 }
 0x300   :  { %v3811_v53 = vpop.f32.mrf.mxu3 }
 0x301   :  { %v3812_v30 = vadd.f32 %v3811_v53, %v3799_v2  ;;  %3956 = vmatmul.bf16.vlgmr.msra.gmra.mxu0 %v3817_v14 }
 0x302   :  { %v3774_v44 = vpop.f32.mrf.mxu0 }
 0x303   :  { %v3816_v55 = vmax.f32 %v3812_v30, 0.0 }
 0x305   :  { %v3818_v56 = vpack.c.bf16 %v3816_v55, %v3816_v55 }
 0x307   :  { %3969 = vmatmul.bf16.vlgmr.msra.gmra.mxu1 %v3818_v56 }
 0x308   :  { %v3813_v57 = vpop.f32.mrf.mxu3 }
 0x37e   :  { %v3957_v60 = vpop.f32.mrf.mxu0 }
 0x37f   :  { %v3958_v51 = vadd.f32 %v3957_v60, %v3851_v61 }
 0x384   :  { %v3970_v21 = vpop.f32.mrf.mxu1 }
 0x385   :  { %v3971_v1 = vadd.f32 %v3970_v21, %v3958_v51 }
 0x386   :  { %v3959_v3 = vpop.f32.mrf.mxu0 }
 0x387   :  { %v3974_v29 = vmax.f32 %v3971_v1, 0.0 }
 0x389   :  { %v3975_v4 = vpack.c.bf16 %v3974_v29, %v3974_v29 }
 0x38b   :  { %4049 = vmatmul.bf16.vlgmr.msra.gmra.mxu2 %v3975_v4 }
 0x38c   :  { %v3972_v5 = vpop.f32.mrf.mxu1 }
 0x40e   :  { %v4050_v49 = vpop.f32.mrf.mxu2 }
 0x40f   :  { %v4051_v7 = vadd.f32 %v4050_v49, %v3992_v6 }
 0x411   :  { %4054 = vst [vmem:[#allocation14] sm:$0xff] %v4051_v7 }
 0x412   :  { %4065 = dma.vmem_to_hbm [thread:$0]  %s4061_s6, 128, %s4063_s17, [#allocation4]  }
 0x416   :  { %v4052_v34 = vpop.f32.mrf.mxu2 }
 0x417   :  { %6651 = dma.done.wait [#allocation4], 128  }
 0x418   :  { %6652 = vsyncadd [#allocation4], 4294967168 }
 0x419   :  { %4070 = vsyncpa [#allocation3], 1 }
 0x41a   :  { %4071 = vsyncpa [#allocation6], 1 }
 0x41b   :  { %4072 = vsyncpa [#allocation9], 1 }
 0x41c   :  { %4073 = vsyncpa [#allocation12], 1 }
 0x41d   :  { %4074 = vsyncpa [#allocation4], 1 }

// kernel: tpu_custom_call.1
= control target key start
LH: loop header
LB: loop body
LE: loop exit
PB: predicated region body
PF: predicated region fallthrough
CT: control target
= control target key end

     0   :  { %12 = vsyncpa [#allocation3], 0  ;;  %s6880_s0 = inlined_call_operand.hbm [shape: bf16[8,896], index: 0, kind: input, shape index: {}]   ;;  %s6881_s1 = inlined_call_operand.hbm [shape: bf16[896,640], index: 1, kind: input, shape index: {}]   ;;  %s6882_s2 = inlined_call_operand.hbm [shape: bf16[640,384], index: 2, kind: input, shape index: {}]   ;;  %s6883_s3 = inlined_call_operand.hbm [shape: bf16[384,256], index: 3, kind: input, shape index: {}]   ;;  %s6884_s4 = inlined_call_operand.hbm [shape: bf16[256,128], index: 4, kind: input, shape index: {}]   ;;  %s6885_s5 = inlined_call_operand.hbm [shape: bf16[128,128], index: 5, kind: input, shape index: {}]   ;;  %s6886_s6 = inlined_call_operand.hbm [shape: f32[8,640], index: 6, kind: input, shape index: {}]   ;;  %s6887_s7 = inlined_call_operand.hbm [shape: f32[8,128], index: 7, kind: output, shape index: {}]  }
   0x1   :  { %13 = vsyncpa [#allocation6], 0 }
   0x2   :  { %14 = vsyncpa [#allocation9], 0 }
   0x3   :  { %15 = vsyncpa [#allocation12], 0  ;;  %s32_s26 = sshll.u32 %s6881_s1, 4  ;;  %s33_s26 = int_to_ptr.hbm [resolvable:$true] %s32_s26 }
   0x4   :  { %16 = vsyncpa [#allocation4], 0  ;;  %s6653_s27 = smov [#allocation5]   ;;  %s58_s8 = sshll.u32 %s6883_s3, 4  ;;  %s59_s8 = int_to_ptr.hbm [resolvable:$true] %s58_s8 }
   0x5   :  { %s34_s28 = sshll.u32 %s6653_s27, 4  ;;  %s6654_s9 = smov 320   ;;  %s35_s28 = int_to_ptr.vmem [resolvable:$true] %s34_s28 }
   0x6   :  { %s6655_s10 = smov 20   ;;  %s6656_s11 = smov [#allocation8]  }
   0x7   :  { %40 = dma.hbm_to_vmem [thread:$0]  %s33_s26, 35840, %s35_s28, [#allocation6], %s6654_s9, %s6654_s9, %s6655_s10  }
   0x8   :  { %s60_s12 = sshll.u32 %s6656_s11, 4  ;;  %s6657_s13 = smov 128   ;;  %s61_s12 = int_to_ptr.vmem [resolvable:$true] %s60_s12 }
   0x9   :  { %s6658_s14 = smov 8   ;;  %s84_s16 = sshll.u32 %s6885_s5, 4  ;;  %s85_s16 = int_to_ptr.hbm [resolvable:$true] %s84_s16 }
   0xa   :  { %66 = dma.hbm_to_vmem [thread:$0]  %s59_s8, 6144, %s61_s12, [#allocation9], %s6657_s13, %s6657_s13, %s6658_s14  }
   0xb   :  { %s6659_s17 = smov [#allocation11]   ;;  %s22_s20 = sshll.u32 %s6880_s0, 4  ;;  %s23_s20 = int_to_ptr.hbm [resolvable:$true] %s22_s20 }
   0xc   :  { %s86_s18 = sshll.u32 %s6659_s17, 4  ;;  %s6660_s21 = smov 64   ;;  %s87_s18 = int_to_ptr.vmem [resolvable:$true] %s86_s18 }
   0xd   :  { %s6661_s22 = smov 4   ;;  %s6662_s23 = smov [#allocation2]  }
   0xe   :  { %92 = dma.hbm_to_vmem [thread:$0]  %s85_s16, 1024, %s87_s18, [#allocation12], %s6660_s21, %s6660_s21, %s6661_s22  }
   0xf   :  { %s24_s24 = sshll.u32 %s6662_s23, 4  ;;  %s45_s27 = sshll.u32 %s6882_s2, 4  ;;  %s25_s24 = int_to_ptr.vmem [resolvable:$true] %s24_s24  ;;  %s46_s27 = int_to_ptr.hbm [resolvable:$true] %s45_s27 }
  0x10   :  { %27 = dma.hbm_to_vmem [thread:$0]  %s23_s20, 448, %s25_s24, [#allocation3]  }
  0x11   :  { %s6663_s5 = smov [#allocation7]   ;;  %s71_s0 = sshll.u32 %s6884_s4, 4  ;;  %s72_s0 = int_to_ptr.hbm [resolvable:$true] %s71_s0 }
  0x12   :  { %s47_s28 = sshll.u32 %s6663_s5, 4  ;;  %s6664_s8 = smov 192   ;;  %s48_s28 = int_to_ptr.vmem [resolvable:$true] %s47_s28 }
  0x13   :  { %s6665_s9 = smov 12   ;;  %s6666_s10 = smov [#allocation10]  }
  0x14   :  { %53 = dma.hbm_to_vmem [thread:$0]  %s46_s27, 15360, %s48_s28, [#allocation6], %s6664_s8, %s6664_s8, %s6665_s9  }
  0x15   :  { %s73_s11 = sshll.u32 %s6666_s10, 4  ;;  %s98_s2 = sshll.u32 %s6886_s6, 4  ;;  %s74_s11 = int_to_ptr.vmem [resolvable:$true] %s73_s11  ;;  %s99_s2 = int_to_ptr.hbm [resolvable:$true] %s98_s2 }
  0x16   :  { %79 = dma.hbm_to_vmem [thread:$0]  %s72_s0, 2048, %s74_s11, [#allocation9], %s6660_s21, %s6660_s21, %s6661_s22  }
  0x17   :  { %s6667_s14 = smov [#allocation13]  }
  0x18   :  { %s100_s1 = sshll.u32 %s6667_s14, 4  ;;  %s101_s1 = int_to_ptr.vmem [resolvable:$true] %s100_s1 }
  0x19   :  { %103 = dma.hbm_to_vmem [thread:$0]  %s99_s2, 640, %s101_s1, [#allocation12]  }
  0x1a   :  { %6643 = dma.done.wait [#allocation3], 448  }
  0x1b   :  { %6644 = vsyncadd [#allocation3], 4294966848 }
  0x1c   :  { %6645 = dma.done.wait [#allocation6], 51200  }
  0x1d   :  { %6646 = vsyncadd [#allocation6], 4294916096 }
  0x1e   :  { %6647 = dma.done.wait [#allocation9], 8192  }
  0x1f   :  { %6648 = vsyncadd [#allocation9], 4294959104 }
  0x20   :  { %6649 = dma.done.wait [#allocation12], 1664  }
  0x21   :  { %6650 = vsyncadd [#allocation12], 4294965632  ;;  %v4217_v0 = vld [vmem:[#allocation5 + $0x118] sm:$0xf]  ;;  %v6000_v1 = vld [vmem:[#allocation5 + $0x128] sm:$0xf0] }
  0x22   :  { %v4377_v2 = vld [vmem:[#allocation5 + $0x258] sm:$0xf]  ;;  %v4218_v3 = vor.u32 %v6000_v1, %v4217_v0  ;;  %v6040_v4 = vld [vmem:[#allocation5 + $0x268] sm:$0xf0]  ;;  %v4197_v11 = vld [vmem:[#allocation5 + $0xf0] sm:$0xf] }
  0x23   :  { %v4537_v5 = vld [vmem:[#allocation5 + $0x398] sm:$0xf]  ;;  %v6080_v6 = vld [vmem:[#allocation5 + $0x3a8] sm:$0xf0]  ;;  %v4378_v7 = vor.u32 %v6040_v4, %v4377_v2  ;;  %v5995_v13 = vld [vmem:[#allocation5 + $0x100] sm:$0xf0] }
  0x24   :  { %v4538_v8 = vor.u32 %v6080_v6, %v4537_v5  ;;  %v4697_v9 = vld [vmem:[#allocation5 + $0x4d8] sm:$0xf]  ;;  %v6120_v10 = vld [vmem:[#allocation5 + $0x4e8] sm:$0xf0]  ;;  %1967 = vmatpush.bf16.msra.mxu0 %v4218_v3  ;;  %v4357_v14 = vld [vmem:[#allocation5 + $0x230] sm:$0xf]  ;;  %v4198_v16 = vor.u32 %v5995_v13, %v4197_v11 }
  0x25   :  { %v4698_v12 = vor.u32 %v6120_v10, %v4697_v9  ;;  %v6035_v15 = vld [vmem:[#allocation5 + $0x240] sm:$0xf0]  ;;  %1980 = vmatpush.bf16.msra.mxu1 %v4378_v7  ;;  %v4517_v18 = vld [vmem:[#allocation5 + $0x370] sm:$0xf]  ;;  %v4177_v23 = vld [vmem:[#allocation5 + $0xc8] sm:$0xf] }
  0x26   :  { %1993 = vmatpush.bf16.msra.mxu2 %v4538_v8  ;;  %v4358_v17 = vor.u32 %v6035_v15, %v4357_v14  ;;  %v6075_v19 = vld [vmem:[#allocation5 + $0x380] sm:$0xf0]  ;;  %v4677_v20 = vld [vmem:[#allocation5 + $0x4b0] sm:$0xf]  ;;  %v5990_v24 = vld [vmem:[#allocation5 + $0xd8] sm:$0xf0] }
  0x27   :  { %2006 = vmatpush.bf16.msra.mxu3 %v4698_v12  ;;  %v4518_v21 = vor.u32 %v6075_v19, %v4517_v18  ;;  %v6115_v22 = vld [vmem:[#allocation5 + $0x4c0] sm:$0xf0]  ;;  %v4337_v26 = vld [vmem:[#allocation5 + $0x208] sm:$0xf]  ;;  %v6030_v27 = vld [vmem:[#allocation5 + $0x218] sm:$0xf0]  ;;  %v4178_v29 = vor.u32 %v5990_v24, %v4177_v23 }
  0x28   :  { %v4678_v25 = vor.u32 %v6115_v22, %v4677_v20  ;;  %v4497_v28 = vld [vmem:[#allocation5 + $0x348] sm:$0xf]  ;;  %1968 = vmatpush.bf16.msra.mxu0 %v4198_v16  ;;  %v6070_v30 = vld [vmem:[#allocation5 + $0x358] sm:$0xf0]  ;;  %v4338_v33 = vor.u32 %v6030_v27, %v4337_v26  ;;  %v4157_v35 = vld [vmem:[#allocation5 + $0xa0] sm:$0xf] }
  0x29   :  { %v4657_v31 = vld [vmem:[#allocation5 + $0x488] sm:$0xf]  ;;  %v6110_v32 = vld [vmem:[#allocation5 + $0x498] sm:$0xf0]  ;;  %1981 = vmatpush.bf16.msra.mxu1 %v4358_v17  ;;  %v4498_v34 = vor.u32 %v6070_v30, %v4497_v28  ;;  %v5985_v36 = vld [vmem:[#allocation5 + $0xb0] sm:$0xf0] }
  0x2a   :  { %1994 = vmatpush.bf16.msra.mxu2 %v4518_v21  ;;  %v4317_v37 = vld [vmem:[#allocation5 + $0x1e0] sm:$0xf]  ;;  %v4658_v38 = vor.u32 %v6110_v32, %v4657_v31  ;;  %v6025_v39 = vld [vmem:[#allocation5 + $0x1f0] sm:$0xf0]  ;;  %v4158_v44 = vor.u32 %v5985_v36, %v4157_v35  ;;  %v4137_v47 = vld [vmem:[#allocation5 + $0x78] sm:$0xf] }
  0x2b   :  { %2007 = vmatpush.bf16.msra.mxu3 %v4678_v25  ;;  %v4477_v40 = vld [vmem:[#allocation5 + $0x320] sm:$0xf]  ;;  %v6065_v41 = vld [vmem:[#allocation5 + $0x330] sm:$0xf0]  ;;  %v4318_v45 = vor.u32 %v6025_v39, %v4317_v37  ;;  %v5980_v48 = vld [vmem:[#allocation5 + $0x88] sm:$0xf0] }
  0x2c   :  { %v4637_v42 = vld [vmem:[#allocation5 + $0x460] sm:$0xf]  ;;  %v6105_v43 = vld [vmem:[#allocation5 + $0x470] sm:$0xf0]  ;;  %1969 = vmatpush.bf16.msra.mxu0 %v4178_v29  ;;  %v4478_v46 = vor.u32 %v6065_v41, %v4477_v40  ;;  %v4297_v49 = vld [vmem:[#allocation5 + $0x1b8] sm:$0xf]  ;;  %v4138_v56 = vor.u32 %v5980_v48, %v4137_v47 }
  0x2d   :  { %1982 = vmatpush.bf16.msra.mxu1 %v4338_v33  ;;  %v4638_v50 = vor.u32 %v6105_v43, %v4637_v42  ;;  %v6020_v51 = vld [vmem:[#allocation5 + $0x1c8] sm:$0xf0]  ;;  %v4457_v52 = vld [vmem:[#allocation5 + $0x2f8] sm:$0xf]  ;;  %v4117_v59 = vld [vmem:[#allocation5 + $0x50] sm:$0xf] }
  0x2e   :  { %1995 = vmatpush.bf16.msra.mxu2 %v4498_v34  ;;  %v6060_v53 = vld [vmem:[#allocation5 + $0x308] sm:$0xf0]  ;;  %v4617_v54 = vld [vmem:[#allocation5 + $0x438] sm:$0xf]  ;;  %v4298_v57 = vor.u32 %v6020_v51, %v4297_v49  ;;  %v5975_v60 = vld [vmem:[#allocation5 + $0x60] sm:$0xf0] }
  0x2f   :  { %2008 = vmatpush.bf16.msra.mxu3 %v4658_v38  ;;  %v6100_v55 = vld [vmem:[#allocation5 + $0x448] sm:$0xf0]  ;;  %v4458_v58 = vor.u32 %v6060_v53, %v4457_v52  ;;  %v4277_v61 = vld [vmem:[#allocation5 + $0x190] sm:$0xf]  ;;  %v6015_v63 = vld [vmem:[#allocation5 + $0x1a0] sm:$0xf0]  ;;  %v4118_v4 = vor.u32 %v5975_v60, %v4117_v59 }
  0x30   :  { %1970 = vmatpush.bf16.msra.mxu0 %v4158_v44  ;;  %v4618_v62 = vor.u32 %v6100_v55, %v4617_v54  ;;  %v4437_v0 = vld [vmem:[#allocation5 + $0x2d0] sm:$0xf]  ;;  %v6055_v1 = vld [vmem:[#allocation5 + $0x2e0] sm:$0xf0]  ;;  %v4278_v5 = vor.u32 %v6015_v63, %v4277_v61  ;;  %v4097_v7 = vld [vmem:[#allocation5 + $0x28] sm:$0xf] }
  0x31   :  { %1983 = vmatpush.bf16.msra.mxu1 %v4318_v45  ;;  %v4597_v2 = vld [vmem:[#allocation5 + $0x410] sm:$0xf]  ;;  %v6095_v3 = vld [vmem:[#allocation5 + $0x420] sm:$0xf0]  ;;  %v4438_v6 = vor.u32 %v6055_v1, %v4437_v0  ;;  %v5970_v8 = vld [vmem:[#allocation5 + $0x38] sm:$0xf0] }
  0x32   :  { %1996 = vmatpush.bf16.msra.mxu2 %v4478_v46  ;;  %v4257_v9 = vld [vmem:[#allocation5 + $0x168] sm:$0xf]  ;;  %v4598_v10 = vor.u32 %v6095_v3, %v4597_v2  ;;  %v6010_v11 = vld [vmem:[#allocation5 + $0x178] sm:$0xf0]  ;;  %v4098_v16 = vor.u32 %v5970_v8, %v4097_v7  ;;  %v4077_v17 = vld [vmem:[#allocation5] sm:$0xf] }
  0x33   :  { %2009 = vmatpush.bf16.msra.mxu3 %v4638_v50  ;;  %v4417_v12 = vld [vmem:[#allocation5 + $0x2a8] sm:$0xf]  ;;  %v6050_v13 = vld [vmem:[#allocation5 + $0x2b8] sm:$0xf0]  ;;  %v5965_v18 = vld [vmem:[#allocation5 + $0x10] sm:$0xf0]  ;;  %v4258_v19 = vor.u32 %v6010_v11, %v4257_v9 }
  0x34   :  { %1971 = vmatpush.bf16.msra.mxu0 %v4138_v56  ;;  %v4577_v14 = vld [vmem:[#allocation5 + $0x3e8] sm:$0xf]  ;;  %v6090_v15 = vld [vmem:[#allocation5 + $0x3f8] sm:$0xf0]  ;;  %v4418_v20 = vor.u32 %v6050_v13, %v4417_v12  ;;  %v4237_v21 = vld [vmem:[#allocation5 + $0x140] sm:$0xf]  ;;  %v4078_v31 = vor.u32 %v5965_v18, %v4077_v17 }
  0x35   :  { %1984 = vmatpush.bf16.msra.mxu1 %v4298_v57  ;;  %v6005_v22 = vld [vmem:[#allocation5 + $0x150] sm:$0xf0]  ;;  %v4397_v23 = vld [vmem:[#allocation5 + $0x280] sm:$0xf]  ;;  %v4578_v24 = vor.u32 %v6090_v15, %v4577_v14  ;;  %v4857_v28 = vld [vmem:[#allocation5 + $0x618] sm:$0xf] }
  0x36   :  { %1997 = vmatpush.bf16.msra.mxu2 %v4458_v58  ;;  %v6045_v25 = vld [vmem:[#allocation5 + $0x290] sm:$0xf0]  ;;  %v4557_v26 = vld [vmem:[#allocation5 + $0x3c0] sm:$0xf]  ;;  %v6160_v29 = vld [vmem:[#allocation5 + $0x628] sm:$0xf0]  ;;  %v4238_v35 = vor.u32 %v6005_v22, %v4237_v21 }
  0x37   :  { %2010 = vmatpush.bf16.msra.mxu3 %v4618_v62  ;;  %v6085_v27 = vld [vmem:[#allocation5 + $0x3d0] sm:$0xf0]  ;;  %v5017_v30 = vld [vmem:[#allocation5 + $0x758] sm:$0xf]  ;;  %v6200_v32 = vld [vmem:[#allocation5 + $0x768] sm:$0xf0]  ;;  %v4398_v36 = vor.u32 %v6045_v25, %v4397_v23  ;;  %v4858_v40 = vor.u32 %v6160_v29, %v4857_v28 }
  0x38   :  { %1972 = vmatpush.bf16.msra.mxu0 %v4118_v4  ;;  %v5177_v33 = vld [vmem:[#allocation5 + $0x898] sm:$0xf]  ;;  %v6240_v34 = vld [vmem:[#allocation5 + $0x8a8] sm:$0xf0]  ;;  %v5998_v37 = vld [vmem:[#allocation5 + $0x11c] sm:$0xf]  ;;  %v4558_v39 = vor.u32 %v6085_v27, %v4557_v26  ;;  %v5018_v41 = vor.u32 %v6200_v32, %v5017_v30 }
  0x39   :  { %1985 = vmatpush.bf16.msra.mxu1 %v4278_v5  ;;  %v4219_v38 = vld [vmem:[#allocation5 + $0x12c] sm:$0xf0]  ;;  %v5178_v42 = vor.u32 %v6240_v34, %v5177_v33  ;;  %v6155_v44 = vld [vmem:[#allocation5 + $0x600] sm:$0xf0]  ;;  %v5993_v50 = vld [vmem:[#allocation5 + $0xf4] sm:$0xf] }
  0x3a   :  { %1998 = vmatpush.bf16.msra.mxu2 %v4438_v6  ;;  %v4837_v43 = vld [vmem:[#allocation5 + $0x5f0] sm:$0xf]  ;;  %v4222_v46 = vor.u32 %v5998_v37, %v4219_v38  ;;  %v6195_v47 = vld [vmem:[#allocation5 + $0x740] sm:$0xf0]  ;;  %v4199_v51 = vld [vmem:[#allocation5 + $0x104] sm:$0xf0] }
  0x3b   :  { %2011 = vmatpush.bf16.msra.mxu3 %v4598_v10  ;;  %v4997_v45 = vld [vmem:[#allocation5 + $0x730] sm:$0xf]  ;;  %v6235_v49 = vld [vmem:[#allocation5 + $0x880] sm:$0xf0]  ;;  %v4838_v52 = vor.u32 %v6155_v44, %v4837_v43  ;;  %v4817_v53 = vld [vmem:[#allocation5 + $0x5c8] sm:$0xf]  ;;  %v4202_v59 = vor.u32 %v5993_v50, %v4199_v51 }
  0x3c   :  { %1973 = vmatpush.bf16.msra.mxu0 %v4098_v16  ;;  %v5157_v48 = vld [vmem:[#allocation5 + $0x870] sm:$0xf]  ;;  %v4998_v54 = vor.u32 %v6195_v47, %v4997_v45  ;;  %v6150_v56 = vld [vmem:[#allocation5 + $0x5d8] sm:$0xf0]  ;;  %v4977_v57 = vld [vmem:[#allocation5 + $0x708] sm:$0xf] }
  0x3d   :  { %1986 = vmatpush.bf16.msra.mxu1 %v4258_v19  ;;  %v5158_v55 = vor.u32 %v6235_v49, %v5157_v48  ;;  %v6190_v58 = vld [vmem:[#allocation5 + $0x718] sm:$0xf0]  ;;  %v5137_v60 = vld [vmem:[#allocation5 + $0x848] sm:$0xf]  ;;  %v5988_v62 = vld [vmem:[#allocation5 + $0xcc] sm:$0xf]  ;;  %v4818_v0 = vor.u32 %v6150_v56, %v4817_v53 }
  0x3e   :  { %1999 = vmatpush.bf16.msra.mxu2 %v4418_v20  ;;  %v6230_v61 = vld [vmem:[#allocation5 + $0x858] sm:$0xf0]  ;;  %v4179_v63 = vld [vmem:[#allocation5 + $0xdc] sm:$0xf0]  ;;  %v4978_v1 = vor.u32 %v6190_v58, %v4977_v57  ;;  %v133_v2 = vld [vmem:[#allocation2 + $0x8] sm:$0xff]  ;;  %s6668_s4 = smov [#allocation14]  }
  0x3f   :  { %2012 = vmatpush.bf16.msra.mxu3 %v4578_v24  ;;  %v132_v3 = vld [vmem:[#allocation2] sm:$0xff]  ;;  %v5138_v4 = vor.u32 %v6230_v61, %v5137_v60  ;;  %v4797_v5 = vld [vmem:[#allocation5 + $0x5a0] sm:$0xf]  ;;  %v6145_v6 = vld [vmem:[#allocation5 + $0x5b0] sm:$0xf0]  ;;  %v492_v8 = vunpack.c.l.b16 %v133_v2  ;;  %v4182_v11 = vor.u32 %v5988_v62, %v4179_v63  ;;  %v493_v15 = vunpack.c.h.b16 %v133_v2  ;;  %s4060_s6 = sshll.u32 %s6668_s4, 4  ;;  %s4061_s6 = int_to_ptr.vmem [resolvable:$true] %s4060_s6 }
  0x40   :  { %1974 = vmatpush.bf16.msra.mxu0 %v4078_v31  ;;  %v4957_v7 = vld [vmem:[#allocation5 + $0x6e0] sm:$0xf]  ;;  %v490_v9 = vunpack.c.l.b16 %v132_v3  ;;  %v491_v10 = vunpack.c.h.b16 %v132_v3  ;;  %v6185_v12 = vld [vmem:[#allocation5 + $0x6f0] sm:$0xf0]  ;;  %v5983_v16 = vld [vmem:[#allocation5 + $0xa4] sm:$0xf]  ;;  %v4798_v20 = vor.u32 %v6145_v6, %v4797_v5 }
  0x41   :  { %1987 = vmatpush.bf16.msra.mxu1 %v4238_v35  ;;  %v5117_v13 = vld [vmem:[#allocation5 + $0x820] sm:$0xf]  ;;  %v6225_v14 = vld [vmem:[#allocation5 + $0x830] sm:$0xf0]  ;;  %v4159_v17 = vld [vmem:[#allocation5 + $0xb4] sm:$0xf0]  ;;  %v6730_v18 = vpack.c.b16 %v492_v8, %v492_v8  ;;  %v6736_v22 = vpack.c.b16 %v493_v15, %v493_v15  ;;  %v4958_v23 = vor.u32 %v6185_v12, %v4957_v7 }
  0x42   :  { %2000 = vmatpush.bf16.msra.mxu2 %v4398_v36  ;;  %v6732_v19 = vpack.c.b16 %v490_v9, %v490_v9  ;;  %v6734_v21 = vpack.c.b16 %v491_v10, %v491_v10  ;;  %v5118_v24 = vor.u32 %v6225_v14, %v5117_v13  ;;  %v4777_v25 = vld [vmem:[#allocation5 + $0x578] sm:$0xf]  ;;  %v6140_v26 = vld [vmem:[#allocation5 + $0x588] sm:$0xf0]  ;;  %v4162_v28 = vor.u32 %v5983_v16, %v4159_v17  ;;  %v5978_v32 = vld [vmem:[#allocation5 + $0x7c] sm:$0xf] }
  0x43   :  { %2013 = vmatpush.bf16.msra.mxu3 %v4558_v39  ;;  %v4937_v27 = vld [vmem:[#allocation5 + $0x6b8] sm:$0xf]  ;;  %v6180_v29 = vld [vmem:[#allocation5 + $0x6c8] sm:$0xf0]  ;;  %v4139_v33 = vld [vmem:[#allocation5 + $0x8c] sm:$0xf0]  ;;  %v4778_v34 = vor.u32 %v6140_v26, %v4777_v25 }
  0x44   :  { %2019 = vmatpush.bf16.msrb.mxu0 %v4858_v40  ;;  %v5097_v30 = vld [vmem:[#allocation5 + $0x7f8] sm:$0xf]  ;;  %v6220_v31 = vld [vmem:[#allocation5 + $0x808] sm:$0xf0]  ;;  %1988 = vmatmul.bf16.vlgmr.msra.gmra.mxu1 %v6734_v21  ;;  %v4938_v35 = vor.u32 %v6180_v29, %v4937_v27  ;;  %v4757_v37 = vld [vmem:[#allocation5 + $0x550] sm:$0xf]  ;;  %v4142_v40 = vor.u32 %v5978_v32, %v4139_v33 }
  0x45   :  { %2032 = vmatpush.bf16.msrb.mxu1 %v5018_v41  ;;  %2001 = vmatmul.bf16.vlgmr.msra.gmra.mxu2 %v6730_v18  ;;  %v5098_v36 = vor.u32 %v6220_v31, %v5097_v30  ;;  %v6135_v38 = vld [vmem:[#allocation5 + $0x560] sm:$0xf0]  ;;  %v4917_v39 = vld [vmem:[#allocation5 + $0x690] sm:$0xf]  ;;  %v5973_v44 = vld [vmem:[#allocation5 + $0x54] sm:$0xf] }
  0x46   :  { %2045 = vmatpush.bf16.msrb.mxu2 %v5178_v42  ;;  %1975 = vmatmul.bf16.vlgmr.msra.gmra.mxu0 %v6732_v19  ;;  %v6175_v41 = vld [vmem:[#allocation5 + $0x6a0] sm:$0xf0]  ;;  %v5077_v42 = vld [vmem:[#allocation5 + $0x7d0] sm:$0xf]  ;;  %v4119_v45 = vld [vmem:[#allocation5 + $0x64] sm:$0xf0] }
  0x47   :  { %2058 = vmatpush.bf16.msrb.mxu3 %v4222_v46  ;;  %v6215_v43 = vld [vmem:[#allocation5 + $0x7e0] sm:$0xf0]  ;;  %v4758_v46 = vor.u32 %v6135_v38, %v4757_v37  ;;  %v4918_v47 = vor.u32 %v6175_v41, %v4917_v39  ;;  %v4737_v49 = vld [vmem:[#allocation5 + $0x528] sm:$0xf]  ;;  %v6130_v50 = vld [vmem:[#allocation5 + $0x538] sm:$0xf0] }
  0x48   :  { %2020 = vmatpush.bf16.msrb.mxu0 %v4838_v52  ;;  %2014 = vmatmul.bf16.vlgmr.msra.gmra.mxu3 %v6736_v22  ;;  %v5078_v48 = vor.u32 %v6215_v43, %v5077_v42  ;;  %v4897_v51 = vld [vmem:[#allocation5 + $0x668] sm:$0xf]  ;;  %v4122_v52 = vor.u32 %v5973_v44, %v4119_v45  ;;  %v6170_v53 = vld [vmem:[#allocation5 + $0x678] sm:$0xf0]  ;;  %v5968_v56 = vld [vmem:[#allocation5 + $0x2c] sm:$0xf] }
  0x49   :  { %2033 = vmatpush.bf16.msrb.mxu1 %v4998_v54  ;;  %v5057_v54 = vld [vmem:[#allocation5 + $0x7a8] sm:$0xf]  ;;  %v4099_v57 = vld [vmem:[#allocation5 + $0x3c] sm:$0xf0]  ;;  %v6125_v60 = vld [vmem:[#allocation5 + $0x510] sm:$0xf0]  ;;  %v4898_v63 = vor.u32 %v6170_v53, %v4897_v51 }
  0x4a   :  { %2046 = vmatpush.bf16.msrb.mxu2 %v5158_v55  ;;  %v6210_v55 = vld [vmem:[#allocation5 + $0x7b8] sm:$0xf0]  ;;  %v4717_v58 = vld [vmem:[#allocation5 + $0x500] sm:$0xf]  ;;  %v6165_v62 = vld [vmem:[#allocation5 + $0x650] sm:$0xf0] }
  0x4b   :  { %2059 = vmatpush.bf16.msrb.mxu3 %v4202_v59  ;;  %v4738_v59 = vor.u32 %v6130_v50, %v4737_v49  ;;  %v4877_v61 = vld [vmem:[#allocation5 + $0x640] sm:$0xf]  ;;  %v6205_v2 = vld [vmem:[#allocation5 + $0x790] sm:$0xf0]  ;;  %v135_v3 = vld [vmem:[#allocation2 + $0x18] sm:$0xf] }
  0x4c   :  { %2021 = vmatpush.bf16.msrb.mxu0 %v4818_v0  ;;  %v5058_v0 = vor.u32 %v6210_v55, %v5057_v54  ;;  %v5963_v5 = vld [vmem:[#allocation5 + $0x4] sm:$0xf]  ;;  %v4079_v6 = vld [vmem:[#allocation5 + $0x14] sm:$0xf0]  ;;  %v6038_v8 = vld [vmem:[#allocation5 + $0x25c] sm:$0xf]  ;;  %v496_v15 = vunpack.c.l.b16 %v135_v3  ;;  %v4878_v16 = vor.u32 %v6165_v62, %v4877_v61 }
  0x4d   :  { %2034 = vmatpush.bf16.msrb.mxu1 %v4978_v1  ;;  %v5037_v1 = vld [vmem:[#allocation5 + $0x780] sm:$0xf]  ;;  %v134_v7 = vld [vmem:[#allocation2 + $0x10] sm:$0xff]  ;;  %v4379_v9 = vld [vmem:[#allocation5 + $0x26c] sm:$0xf0]  ;;  %v4082_v26 = vor.u32 %v5963_v5, %v4079_v6  ;;  %s4062_s17 = sshll.u32 %s6887_s7, 4  ;;  %s4063_s17 = int_to_ptr.hbm [resolvable:$true] %s4062_s17 }
  0x4e   :  { %2047 = vmatpush.bf16.msrb.mxu2 %v5138_v4  ;;  %v4102_v4 = vor.u32 %v5968_v56, %v4099_v57  ;;  %v6078_v10 = vld [vmem:[#allocation5 + $0x39c] sm:$0xf]  ;;  %v4539_v12 = vld [vmem:[#allocation5 + $0x3ac] sm:$0xf0]  ;;  %v5038_v17 = vor.u32 %v6205_v2, %v5037_v1  ;;  %v495_v25 = vunpack.c.h.b16 %v134_v7  ;;  %v4382_v27 = vor.u32 %v6038_v8, %v4379_v9  ;;  %v6033_v30 = vld [vmem:[#allocation5 + $0x234] sm:$0xf] }
  0x4f   :  { %2060 = vmatpush.bf16.msrb.mxu3 %v4182_v11  ;;  %v4718_v11 = vor.u32 %v6125_v60, %v4717_v58  ;;  %v6118_v13 = vld [vmem:[#allocation5 + $0x4dc] sm:$0xf]  ;;  %v4699_v14 = vld [vmem:[#allocation5 + $0x4ec] sm:$0xf0]  ;;  %v4359_v31 = vld [vmem:[#allocation5 + $0x244] sm:$0xf0]  ;;  %v6742_v37 = vpack.c.b16 %v496_v15, %v496_v15 }
  0x50   :  { %2022 = vmatpush.bf16.msrb.mxu0 %v4798_v20  ;;  %v6158_v20 = vld [vmem:[#allocation5 + $0x61c] sm:$0xf]  ;;  %v4702_v29 = vor.u32 %v6118_v13, %v4699_v14  ;;  %v6073_v32 = vld [vmem:[#allocation5 + $0x374] sm:$0xf]  ;;  %v4839_v39 = vld [vmem:[#allocation5 + $0x604] sm:$0xf0]  ;;  %v6746_v41 = vpack.c.b16 %v495_v25, %v495_v25  ;;  %v4362_v42 = vor.u32 %v6033_v30, %v4359_v31 }
  0x51   :  { %2035 = vmatpush.bf16.msrb.mxu1 %v4958_v23  ;;  %v4859_v23 = vld [vmem:[#allocation5 + $0x62c] sm:$0xf0]  ;;  %v6153_v38 = vld [vmem:[#allocation5 + $0x5f4] sm:$0xf]  ;;  %v6028_v45 = vld [vmem:[#allocation5 + $0x20c] sm:$0xf] }
  0x52   :  { %2048 = vmatpush.bf16.msrb.mxu2 %v5118_v24  ;;  %v494_v24 = vunpack.c.l.b16 %v134_v7  ;;  %v4862_v33 = vor.u32 %v6158_v20, %v4859_v23  ;;  %v4499_v49 = vld [vmem:[#allocation5 + $0x35c] sm:$0xf0]  ;;  %v6108_v50 = vld [vmem:[#allocation5 + $0x48c] sm:$0xf]  ;;  %v6023_v57 = vld [vmem:[#allocation5 + $0x1e4] sm:$0xf] }
  0x53   :  { %2061 = vmatpush.bf16.msrb.mxu3 %v4162_v28  ;;  %v4542_v28 = vor.u32 %v6078_v10, %v4539_v12  ;;  %v4659_v51 = vld [vmem:[#allocation5 + $0x49c] sm:$0xf0]  ;;  %v4319_v58 = vld [vmem:[#allocation5 + $0x1f4] sm:$0xf0]  ;;  %v6103_v62 = vld [vmem:[#allocation5 + $0x464] sm:$0xf] }
  0x54   :  { %2023 = vmatpush.bf16.msrb.mxu0 %v4778_v34  ;;  %v4519_v34 = vld [vmem:[#allocation5 + $0x384] sm:$0xf0]  ;;  %v4819_v53 = vld [vmem:[#allocation5 + $0x5dc] sm:$0xf0]  ;;  %v4662_v56 = vor.u32 %v6108_v50, %v4659_v51  ;;  %v4479_v61 = vld [vmem:[#allocation5 + $0x334] sm:$0xf0]  ;;  %v4322_v2 = vor.u32 %v6023_v57, %v4319_v58 }
  0x55   :  { %2036 = vmatpush.bf16.msrb.mxu1 %v4938_v35  ;;  %v6113_v35 = vld [vmem:[#allocation5 + $0x4b4] sm:$0xf]  ;;  %v4522_v43 = vor.u32 %v6073_v32, %v4519_v34  ;;  %v4799_v1 = vld [vmem:[#allocation5 + $0x5b4] sm:$0xf0]  ;;  %v6018_v5 = vld [vmem:[#allocation5 + $0x1bc] sm:$0xf] }
  0x56   :  { %2049 = vmatpush.bf16.msrb.mxu2 %v5098_v36  ;;  %v4679_v36 = vld [vmem:[#allocation5 + $0x4c4] sm:$0xf0]  ;;  %v4299_v6 = vld [vmem:[#allocation5 + $0x1cc] sm:$0xf0]  ;;  %v6058_v7 = vld [vmem:[#allocation5 + $0x2fc] sm:$0xf] }
  0x57   :  { %2062 = vmatpush.bf16.msrb.mxu3 %v4142_v40  ;;  %v6744_v40 = vpack.c.b16 %v494_v24, %v494_v24  ;;  %v4682_v44 = vor.u32 %v6113_v35, %v4679_v36  ;;  %v4459_v9 = vld [vmem:[#allocation5 + $0x30c] sm:$0xf0]  ;;  %v6098_v10 = vld [vmem:[#allocation5 + $0x43c] sm:$0xf]  ;;  %v4302_v14 = vor.u32 %v6018_v5, %v4299_v6  ;;  %v4279_v20 = vld [vmem:[#allocation5 + $0x1a4] sm:$0xf0] }
  0x58   :  { %2024 = vmatpush.bf16.msrb.mxu0 %v4758_v46  ;;  %v4339_v46 = vld [vmem:[#allocation5 + $0x21c] sm:$0xf0]  ;;  %v6138_v12 = vld [vmem:[#allocation5 + $0x57c] sm:$0xf]  ;;  %v4779_v13 = vld [vmem:[#allocation5 + $0x58c] sm:$0xf0]  ;;  %v4462_v15 = vor.u32 %v6058_v7, %v4459_v9 }
  0x59   :  { %2037 = vmatpush.bf16.msrb.mxu1 %v4918_v47  ;;  %v6068_v47 = vld [vmem:[#allocation5 + $0x34c] sm:$0xf]  ;;  %v4342_v54 = vor.u32 %v6028_v45, %v4339_v46  ;;  %v6053_v23 = vld [vmem:[#allocation5 + $0x2d4] sm:$0xf]  ;;  %v4782_v24 = vor.u32 %v6138_v12, %v4779_v13  ;;  %v4439_v25 = vld [vmem:[#allocation5 + $0x2e4] sm:$0xf0] }
  0x5a   :  { %2050 = vmatpush.bf16.msrb.mxu2 %v5078_v48  ;;  %v4842_v48 = vor.u32 %v6153_v38, %v4839_v39  ;;  %v4502_v55 = vor.u32 %v6068_v47, %v4499_v49  ;;  %v4442_v31 = vor.u32 %v6053_v23, %v4439_v25  ;;  %v4259_v34 = vld [vmem:[#allocation5 + $0x17c] sm:$0xf0]  ;;  %v6048_v35 = vld [vmem:[#allocation5 + $0x2ac] sm:$0xf]  ;;  %v6003_v46 = vld [vmem:[#allocation5 + $0x144] sm:$0xf] }
  0x5b   :  { %2063 = vmatpush.bf16.msrb.mxu3 %v4122_v52  ;;  %v6148_v52 = vld [vmem:[#allocation5 + $0x5cc] sm:$0xf]  ;;  %v4419_v38 = vld [vmem:[#allocation5 + $0x2bc] sm:$0xf0]  ;;  %v4239_v47 = vld [vmem:[#allocation5 + $0x154] sm:$0xf0] }
  0x5c   :  { %2025 = vmatpush.bf16.msrb.mxu0 %v4738_v59  ;;  %v6063_v59 = vld [vmem:[#allocation5 + $0x324] sm:$0xf]  ;;  %v4822_v60 = vor.u32 %v6148_v52, %v4819_v53  ;;  %v6088_v39 = vld [vmem:[#allocation5 + $0x3ec] sm:$0xf]  ;;  %v4399_v51 = vld [vmem:[#allocation5 + $0x294] sm:$0xf0] }
  0x5d   :  { %2038 = vmatpush.bf16.msrb.mxu1 %v4898_v63  ;;  %v4639_v63 = vld [vmem:[#allocation5 + $0x474] sm:$0xf0]  ;;  %v4482_v3 = vor.u32 %v6063_v59, %v4479_v61  ;;  %v6043_v50 = vld [vmem:[#allocation5 + $0x284] sm:$0xf]  ;;  %v6198_v57 = vld [vmem:[#allocation5 + $0x75c] sm:$0xf] }
  0x5e   :  { %2051 = vmatpush.bf16.msrb.mxu2 %v5058_v0  ;;  %v6143_v0 = vld [vmem:[#allocation5 + $0x5a4] sm:$0xf]  ;;  %v5019_v58 = vld [vmem:[#allocation5 + $0x76c] sm:$0xf0]  ;;  %v6238_v59 = vld [vmem:[#allocation5 + $0x89c] sm:$0xf] }
  0x5f   :  { %2064 = vmatpush.bf16.msrb.mxu3 %v4102_v4  ;;  %v4642_v4 = vor.u32 %v6103_v62, %v4639_v63  ;;  %v4802_v8 = vor.u32 %v6143_v0, %v4799_v1  ;;  %v6083_v52 = vld [vmem:[#allocation5 + $0x3c4] sm:$0xf]  ;;  %v5179_v61 = vld [vmem:[#allocation5 + $0x8ac] sm:$0xf0]  ;;  %v4225_v62 = vld [vmem:[#allocation5 + $0x120] sm:$0xf]  ;;  %v4402_v0 = vor.u32 %v6043_v50, %v4399_v51  ;;  %v5022_v5 = vor.u32 %v6198_v57, %v5019_v58 }
  0x60   :  { %2026 = vmatpush.bf16.msrb.mxu0 %v4718_v11  ;;  %v4619_v11 = vld [vmem:[#allocation5 + $0x44c] sm:$0xf0]  ;;  %v6001_v63 = vld [vmem:[#allocation5 + $0x130] sm:$0xf0]  ;;  %v5182_v6 = vor.u32 %v6238_v59, %v5179_v61  ;;  %v4999_v9 = vld [vmem:[#allocation5 + $0x744] sm:$0xf0] }
  0x61   :  { %2039 = vmatpush.bf16.msrb.mxu1 %v4878_v16  ;;  %v4622_v16 = vor.u32 %v6098_v10, %v4619_v11  ;;  %v4226_v7 = vor.u32 %v6001_v63, %v4225_v62  ;;  %v6233_v10 = vld [vmem:[#allocation5 + $0x874] sm:$0xf]  ;;  %v5159_v12 = vld [vmem:[#allocation5 + $0x884] sm:$0xf0]  ;;  %v4205_v13 = vld [vmem:[#allocation5 + $0xf8] sm:$0xf] }
  0x62   :  { %2052 = vmatpush.bf16.msrb.mxu2 %v5038_v17  ;;  %v6013_v17 = vld [vmem:[#allocation5 + $0x194] sm:$0xf]  ;;  %v4979_v25 = vld [vmem:[#allocation5 + $0x71c] sm:$0xf0]  ;;  %v6178_v51 = vld [vmem:[#allocation5 + $0x6bc] sm:$0xf] }
  0x63   :  { %2065 = vmatpush.bf16.msrb.mxu3 %v4082_v26  ;;  %2027 = vmatmul.bf16.vlgmr.msrb.gmra.mxu0 %v6744_v40  ;;  %v6093_v26 = vld [vmem:[#allocation5 + $0x414] sm:$0xf]  ;;  %v4282_v30 = vor.u32 %v6013_v17, %v4279_v20  ;;  %v5162_v20 = vor.u32 %v6233_v10, %v5159_v12  ;;  %v4305_v58 = vld [vmem:[#allocation5 + $0x1c0] sm:$0xf] }
  0x64   :  { %2071 = vmatpush.bf16.msra.mxu0 %v4382_v27  ;;  %2040 = vmatmul.bf16.vlgmr.msrb.gmra.mxu1 %v6746_v41  ;;  %v4599_v27 = vld [vmem:[#allocation5 + $0x424] sm:$0xf0]  ;;  %v5981_v57 = vld [vmem:[#allocation5 + $0x90] sm:$0xf0]  ;;  %v4899_v12 = vld [vmem:[#allocation5 + $0x67c] sm:$0xf0] }
  0x65   :  { %2084 = vmatpush.bf16.msra.mxu1 %v4542_v28  ;;  %2053 = vmatmul.bf16.vlgmr.msrb.gmra.mxu2 %v6742_v37  ;;  %v6133_v28 = vld [vmem:[#allocation5 + $0x554] sm:$0xf]  ;;  %v4602_v32 = vor.u32 %v6093_v26, %v4599_v27  ;;  %v6228_v26 = vld [vmem:[#allocation5 + $0x84c] sm:$0xf] }
  0x66   :  { %2097 = vmatpush.bf16.msra.mxu2 %v4702_v29  ;;  %2066 = vmatmul.bf16.vlgmr.msrb.gmra.mxu3 %v6732_v19  ;;  %v4759_v29 = vld [vmem:[#allocation5 + $0x564] sm:$0xf0]  ;;  %v6021_v59 = vld [vmem:[#allocation5 + $0x1d0] sm:$0xf0] }
  0x67   :  { %2110 = vmatpush.bf16.msra.mxu3 %v4862_v33  ;;  %v6008_v33 = vld [vmem:[#allocation5 + $0x16c] sm:$0xf]  ;;  %v4762_v36 = vor.u32 %v6133_v28, %v4759_v29  ;;  %v5139_v28 = vld [vmem:[#allocation5 + $0x85c] sm:$0xf0]  ;;  %v4185_v29 = vld [vmem:[#allocation5 + $0xd0] sm:$0xf] }
  0x68   :  { %2072 = vmatpush.bf16.msra.mxu0 %v4362_v42  ;;  %v4579_v42 = vld [vmem:[#allocation5 + $0x3fc] sm:$0xf0]  ;;  %v4262_v45 = vor.u32 %v6008_v33, %v4259_v34  ;;  %v5142_v34 = vor.u32 %v6228_v26, %v5139_v28  ;;  %v6173_v63 = vld [vmem:[#allocation5 + $0x694] sm:$0xf]  ;;  %v4879_v26 = vld [vmem:[#allocation5 + $0x654] sm:$0xf0] }
  0x69   :  { %2085 = vmatpush.bf16.msra.mxu1 %v4522_v43  ;;  %v6128_v43 = vld [vmem:[#allocation5 + $0x52c] sm:$0xf]  ;;  %v4582_v49 = vor.u32 %v6088_v39, %v4579_v42  ;;  %v6223_v39 = vld [vmem:[#allocation5 + $0x824] sm:$0xf] }
  0x6a   :  { %2098 = vmatpush.bf16.msra.mxu2 %v4682_v44  ;;  %v4739_v44 = vld [vmem:[#allocation5 + $0x53c] sm:$0xf0] }
  0x6b   :  { %2111 = vmatpush.bf16.msra.mxu3 %v4842_v48  ;;  %v4422_v48 = vor.u32 %v6048_v35, %v4419_v38  ;;  %v4742_v53 = vor.u32 %v6128_v43, %v4739_v44  ;;  %v4959_v38 = vld [vmem:[#allocation5 + $0x6f4] sm:$0xf0]  ;;  %v4165_v44 = vld [vmem:[#allocation5 + $0xa8] sm:$0xf] }
  0x6c   :  { %2073 = vmatpush.bf16.msra.mxu0 %v4342_v54  ;;  %v4559_v54 = vld [vmem:[#allocation5 + $0x3d4] sm:$0xf0] }
  0x6d   :  { %2086 = vmatpush.bf16.msra.mxu1 %v4502_v55  ;;  %v6123_v55 = vld [vmem:[#allocation5 + $0x504] sm:$0xf]  ;;  %v4562_v1 = vor.u32 %v6083_v52, %v4559_v54  ;;  %v5119_v43 = vld [vmem:[#allocation5 + $0x834] sm:$0xf0]  ;;  %v4939_v52 = vld [vmem:[#allocation5 + $0x6cc] sm:$0xf0] }
  0x6e   :  { %2099 = vmatpush.bf16.msra.mxu2 %v4662_v56  ;;  %v4719_v56 = vld [vmem:[#allocation5 + $0x514] sm:$0xf0] }
  0x6f   :  { %2112 = vmatpush.bf16.msra.mxu3 %v4822_v60  ;;  %v4242_v60 = vor.u32 %v6003_v46, %v4239_v47  ;;  %v4325_v46 = vld [vmem:[#allocation5 + $0x1e8] sm:$0xf]  ;;  %v6026_v47 = vld [vmem:[#allocation5 + $0x1f8] sm:$0xf0] }
  0x70   :  { %2074 = vmatpush.bf16.msra.mxu0 %v4322_v2  ;;  %v4385_v2 = vld [vmem:[#allocation5 + $0x260] sm:$0xf]  ;;  %v4326_v54 = vor.u32 %v6026_v47, %v4325_v46 }
  0x71   :  { %2087 = vmatpush.bf16.msra.mxu1 %v4482_v3  ;;  %v6041_v3 = vld [vmem:[#allocation5 + $0x270] sm:$0xf0] }
  0x72   :  { %2100 = vmatpush.bf16.msra.mxu2 %v4642_v4  ;;  %v4722_v4 = vor.u32 %v6123_v55, %v4719_v56  ;;  %v4386_v11 = vor.u32 %v6041_v3, %v4385_v2  ;;  %v5099_v55 = vld [vmem:[#allocation5 + $0x80c] sm:$0xf0]  ;;  %v4145_v56 = vld [vmem:[#allocation5 + $0x80] sm:$0xf]  ;;  %v4306_v2 = vor.u32 %v6021_v59, %v4305_v58  ;;  %v5079_v3 = vld [vmem:[#allocation5 + $0x7e4] sm:$0xf0] }
  0x73   :  { %2113 = vmatpush.bf16.msra.mxu3 %v4802_v8  ;;  %v6193_v8 = vld [vmem:[#allocation5 + $0x734] sm:$0xf]  ;;  %v4146_v62 = vor.u32 %v5981_v57, %v4145_v56  ;;  %v4685_v56 = vld [vmem:[#allocation5 + $0x4b8] sm:$0xf]  ;;  %v6116_v58 = vld [vmem:[#allocation5 + $0x4c8] sm:$0xf0] }
  0x74   :  { %2075 = vmatpush.bf16.msra.mxu0 %v4302_v14  ;;  %v5996_v14 = vld [vmem:[#allocation5 + $0x108] sm:$0xf0]  ;;  %v5002_v17 = vor.u32 %v6193_v8, %v4999_v9  ;;  %v4845_v59 = vld [vmem:[#allocation5 + $0x5f8] sm:$0xf] }
  0x75   :  { %2088 = vmatpush.bf16.msra.mxu1 %v4462_v15  ;;  %v4365_v15 = vld [vmem:[#allocation5 + $0x238] sm:$0xf]  ;;  %v4206_v23 = vor.u32 %v5996_v14, %v4205_v13  ;;  %v6208_v13 = vld [vmem:[#allocation5 + $0x7ac] sm:$0xf] }
  0x76   :  { %2101 = vmatpush.bf16.msra.mxu2 %v4622_v16  ;;  %v6036_v16 = vld [vmem:[#allocation5 + $0x248] sm:$0xf0] }
  0x77   :  { %2114 = vmatpush.bf16.msra.mxu3 %v4782_v24  ;;  %v6188_v24 = vld [vmem:[#allocation5 + $0x70c] sm:$0xf]  ;;  %v4366_v27 = vor.u32 %v6036_v16, %v4365_v15  ;;  %v5059_v15 = vld [vmem:[#allocation5 + $0x7bc] sm:$0xf0]  ;;  %v4105_v16 = vld [vmem:[#allocation5 + $0x30] sm:$0xf] }
  0x78   :  { %2076 = vmatpush.bf16.msra.mxu0 %v4282_v30  ;;  %v5991_v30 = vld [vmem:[#allocation5 + $0xe0] sm:$0xf0]  ;;  %v4982_v33 = vor.u32 %v6188_v24, %v4979_v25 }
  0x79   :  { %2089 = vmatpush.bf16.msra.mxu1 %v4442_v31  ;;  %v4345_v31 = vld [vmem:[#allocation5 + $0x210] sm:$0xf]  ;;  %v4186_v35 = vor.u32 %v5991_v30, %v4185_v29  ;;  %v6163_v25 = vld [vmem:[#allocation5 + $0x644] sm:$0xf]  ;;  %v5039_v30 = vld [vmem:[#allocation5 + $0x794] sm:$0xf0] }
  0x7a   :  { %2102 = vmatpush.bf16.msra.mxu2 %v4602_v32  ;;  %v6031_v32 = vld [vmem:[#allocation5 + $0x220] sm:$0xf0] }
  0x7b   :  { %2115 = vmatpush.bf16.msra.mxu3 %v4762_v36  ;;  %v6183_v36 = vld [vmem:[#allocation5 + $0x6e4] sm:$0xf]  ;;  %v4346_v42 = vor.u32 %v6031_v32, %v4345_v31  ;;  %v4085_v31 = vld [vmem:[#allocation5 + $0x8] sm:$0xf] }
  0x7c   :  { %2077 = vmatpush.bf16.msra.mxu0 %v4262_v45  ;;  %v5986_v45 = vld [vmem:[#allocation5 + $0xb8] sm:$0xf0]  ;;  %v6203_v29 = vld [vmem:[#allocation5 + $0x784] sm:$0xf] }
  0x7d   :  { %2090 = vmatpush.bf16.msra.mxu1 %v4422_v48  ;;  %v4962_v48 = vor.u32 %v6183_v36, %v4959_v38  ;;  %v4166_v50 = vor.u32 %v5986_v45, %v4165_v44  ;;  %v4545_v36 = vld [vmem:[#allocation5 + $0x3a0] sm:$0xf]  ;;  %v6081_v38 = vld [vmem:[#allocation5 + $0x3b0] sm:$0xf0]  ;;  %v5042_v46 = vor.u32 %v6203_v29, %v5039_v30 }
  0x7e   :  { %2103 = vmatpush.bf16.msra.mxu2 %v4582_v49  ;;  %v5122_v49 = vor.u32 %v6223_v39, %v5119_v43  ;;  %v4705_v39 = vld [vmem:[#allocation5 + $0x4e0] sm:$0xf]  ;;  %v6121_v43 = vld [vmem:[#allocation5 + $0x4f0] sm:$0xf0] }
  0x7f   :  { %2116 = vmatpush.bf16.msra.mxu3 %v4742_v53  ;;  %v6218_v53 = vld [vmem:[#allocation5 + $0x7fc] sm:$0xf]  ;;  %v4865_v44 = vld [vmem:[#allocation5 + $0x620] sm:$0xf]  ;;  %v6161_v45 = vld [vmem:[#allocation5 + $0x630] sm:$0xf0] }
  0x80   :  { %2078 = vmatpush.bf16.msra.mxu0 %v4242_v60  ;;  %v4942_v60 = vor.u32 %v6178_v51, %v4939_v52  ;;  %v5102_v61 = vor.u32 %v6218_v53, %v5099_v55  ;;  %v4546_v51 = vor.u32 %v6081_v38, %v4545_v36  ;;  %v4706_v52 = vor.u32 %v6121_v43, %v4705_v39  ;;  %v6076_v55 = vld [vmem:[#allocation5 + $0x388] sm:$0xf0]  ;;  %v4465_v30 = vld [vmem:[#allocation5 + $0x300] sm:$0xf]  ;;  %v6141_v36 = vld [vmem:[#allocation5 + $0x590] sm:$0xf0] }
  0x81   :  { %2091 = vmatpush.bf16.msra.mxu1 %v4402_v0  ;;  %v4919_v0 = vld [vmem:[#allocation5 + $0x6a4] sm:$0xf0]  ;;  %v4866_v53 = vor.u32 %v6161_v45, %v4865_v44  ;;  %v4945_v38 = vld [vmem:[#allocation5 + $0x6c0] sm:$0xf]  ;;  %v6181_v39 = vld [vmem:[#allocation5 + $0x6d0] sm:$0xf0] }
  0x82   :  { %2104 = vmatpush.bf16.msra.mxu2 %v4562_v1  ;;  %v6213_v1 = vld [vmem:[#allocation5 + $0x7d4] sm:$0xf]  ;;  %v4922_v8 = vor.u32 %v6173_v63, %v4919_v0  ;;  %v4686_v0 = vor.u32 %v6116_v58, %v4685_v56  ;;  %v4445_v45 = vld [vmem:[#allocation5 + $0x2d8] sm:$0xf]  ;;  %v6051_v58 = vld [vmem:[#allocation5 + $0x2c0] sm:$0xf0] }
  0x83   :  { %2117 = vmatpush.bf16.msra.mxu3 %v4722_v4  ;;  %2079 = vmatmul.bf16.vlgmr.msra.gmra.mxu0 %v6734_v21  ;;  %v4125_v4 = vld [vmem:[#allocation5 + $0x58] sm:$0xf]  ;;  %v5082_v9 = vor.u32 %v6213_v1, %v5079_v3  ;;  %v6071_v3 = vld [vmem:[#allocation5 + $0x360] sm:$0xf0] }
  0x84   :  { %2123 = vmatpush.bf16.msrb.mxu0 %v5022_v5  ;;  %2092 = vmatmul.bf16.vlgmr.msra.gmra.mxu1 %v6730_v18  ;;  %v5976_v5 = vld [vmem:[#allocation5 + $0x68] sm:$0xf0] }
  0x85   :  { %2136 = vmatpush.bf16.msrb.mxu1 %v5182_v6  ;;  %2105 = vmatmul.bf16.vlgmr.msra.gmra.mxu2 %v6736_v22  ;;  %v4285_v6 = vld [vmem:[#allocation5 + $0x198] sm:$0xf]  ;;  %v4126_v10 = vor.u32 %v5976_v5, %v4125_v4  ;;  %v4665_v4 = vld [vmem:[#allocation5 + $0x490] sm:$0xf] }
  0x86   :  { %2149 = vmatpush.bf16.msrb.mxu2 %v4226_v7  ;;  %2118 = vmatmul.bf16.vlgmr.msra.gmra.mxu3 %v6744_v40  ;;  %v6016_v7 = vld [vmem:[#allocation5 + $0x1a8] sm:$0xf0] }
  0x87   :  { %2162 = vmatpush.bf16.msrb.mxu3 %v4386_v11  ;;  %v6168_v11 = vld [vmem:[#allocation5 + $0x66c] sm:$0xf]  ;;  %v4286_v14 = vor.u32 %v6016_v7, %v4285_v6  ;;  %v6111_v6 = vld [vmem:[#allocation5 + $0x4a0] sm:$0xf0]  ;;  %v4825_v7 = vld [vmem:[#allocation5 + $0x5d0] sm:$0xf] }
  0x88   :  { %2124 = vmatpush.bf16.msrb.mxu0 %v5002_v17  ;;  %v5971_v17 = vld [vmem:[#allocation5 + $0x40] sm:$0xf0]  ;;  %v4902_v24 = vor.u32 %v6168_v11, %v4899_v12  ;;  %v4666_v12 = vor.u32 %v6111_v6, %v4665_v4  ;;  %v6046_v4 = vld [vmem:[#allocation5 + $0x298] sm:$0xf0] }
  0x89   :  { %2137 = vmatpush.bf16.msrb.mxu1 %v5162_v20  ;;  %v4265_v20 = vld [vmem:[#allocation5 + $0x170] sm:$0xf]  ;;  %v4106_v28 = vor.u32 %v5971_v17, %v4105_v16  ;;  %v4645_v16 = vld [vmem:[#allocation5 + $0x468] sm:$0xf] }
  0x8a   :  { %2150 = vmatpush.bf16.msrb.mxu2 %v4206_v23  ;;  %v6011_v23 = vld [vmem:[#allocation5 + $0x180] sm:$0xf0] }
  0x8b   :  { %2163 = vmatpush.bf16.msrb.mxu3 %v4366_v27  ;;  %v5062_v27 = vor.u32 %v6208_v13, %v5059_v15  ;;  %v4266_v32 = vor.u32 %v6011_v23, %v4265_v20  ;;  %v6066_v15 = vld [vmem:[#allocation5 + $0x338] sm:$0xf0]  ;;  %v4805_v23 = vld [vmem:[#allocation5 + $0x5a8] sm:$0xf] }
  0x8c   :  { %2125 = vmatpush.bf16.msrb.mxu0 %v4982_v33  ;;  %v5966_v33 = vld [vmem:[#allocation5 + $0x18] sm:$0xf0] }
  0x8d   :  { %2138 = vmatpush.bf16.msrb.mxu1 %v5142_v34  ;;  %v4245_v34 = vld [vmem:[#allocation5 + $0x148] sm:$0xf]  ;;  %v4086_v47 = vor.u32 %v5966_v33, %v4085_v31  ;;  %v6106_v20 = vld [vmem:[#allocation5 + $0x478] sm:$0xf0]  ;;  %v6061_v31 = vld [vmem:[#allocation5 + $0x310] sm:$0xf0] }
  0x8e   :  { %2151 = vmatpush.bf16.msrb.mxu2 %v4186_v35  ;;  %v6006_v35 = vld [vmem:[#allocation5 + $0x158] sm:$0xf0] }
  0x8f   :  { %2164 = vmatpush.bf16.msrb.mxu3 %v4346_v42  ;;  %v4882_v42 = vor.u32 %v6163_v25, %v4879_v26  ;;  %v4965_v25 = vld [vmem:[#allocation5 + $0x6e8] sm:$0xf]  ;;  %v6186_v26 = vld [vmem:[#allocation5 + $0x6f8] sm:$0xf0] }
  0x90   :  { %2126 = vmatpush.bf16.msrb.mxu0 %v4962_v48  ;;  %v5025_v48 = vld [vmem:[#allocation5 + $0x760] sm:$0xf]  ;;  %v4966_v33 = vor.u32 %v6186_v26, %v4965_v25 }
  0x91   :  { %2139 = vmatpush.bf16.msrb.mxu1 %v5122_v49  ;;  %v6201_v49 = vld [vmem:[#allocation5 + $0x770] sm:$0xf0] }
  0x92   :  { %2152 = vmatpush.bf16.msrb.mxu2 %v4166_v50  ;;  %v4246_v50 = vor.u32 %v6006_v35, %v4245_v34  ;;  %v5026_v57 = vor.u32 %v6201_v49, %v5025_v48  ;;  %v6101_v34 = vld [vmem:[#allocation5 + $0x450] sm:$0xf0]  ;;  %v4785_v35 = vld [vmem:[#allocation5 + $0x580] sm:$0xf]  ;;  %v4946_v48 = vor.u32 %v6181_v39, %v4945_v38  ;;  %v6096_v49 = vld [vmem:[#allocation5 + $0x428] sm:$0xf0] }
  0x93   :  { %2165 = vmatpush.bf16.msrb.mxu3 %v4326_v54  ;;  %v4525_v54 = vld [vmem:[#allocation5 + $0x378] sm:$0xf]  ;;  %v4786_v44 = vor.u32 %v6141_v36, %v4785_v35  ;;  %v5994_v35 = vld [vmem:[#allocation5 + $0xfc] sm:$0xf]  ;;  %v4207_v38 = vld [vmem:[#allocation5 + $0x10c] sm:$0xf0] }
  0x94   :  { %2127 = vmatpush.bf16.msrb.mxu0 %v4942_v60  ;;  %v6156_v60 = vld [vmem:[#allocation5 + $0x608] sm:$0xf0]  ;;  %v4526_v63 = vor.u32 %v6076_v55, %v4525_v54  ;;  %v6034_v39 = vld [vmem:[#allocation5 + $0x23c] sm:$0xf] }
  0x95   :  { %2140 = vmatpush.bf16.msrb.mxu1 %v5102_v61  ;;  %v5005_v61 = vld [vmem:[#allocation5 + $0x738] sm:$0xf]  ;;  %v4846_v1 = vor.u32 %v6156_v60, %v4845_v59  ;;  %v4585_v59 = vld [vmem:[#allocation5 + $0x3f0] sm:$0xf] }
  0x96   :  { %2153 = vmatpush.bf16.msrb.mxu2 %v4146_v62  ;;  %v6196_v62 = vld [vmem:[#allocation5 + $0x748] sm:$0xf0] }
  0x97   :  { %2166 = vmatpush.bf16.msrb.mxu3 %v4306_v2  ;;  %v4505_v2 = vld [vmem:[#allocation5 + $0x350] sm:$0xf]  ;;  %v5006_v5 = vor.u32 %v6196_v62, %v5005_v61  ;;  %v6091_v61 = vld [vmem:[#allocation5 + $0x400] sm:$0xf0] }
  0x98   :  { %2128 = vmatpush.bf16.msrb.mxu0 %v4922_v8  ;;  %v6151_v8 = vld [vmem:[#allocation5 + $0x5e0] sm:$0xf0]  ;;  %v4506_v11 = vor.u32 %v6071_v3, %v4505_v2  ;;  %v4745_v62 = vld [vmem:[#allocation5 + $0x530] sm:$0xf]  ;;  %v4405_v3 = vld [vmem:[#allocation5 + $0x288] sm:$0xf] }
  0x99   :  { %2141 = vmatpush.bf16.msrb.mxu1 %v5082_v9  ;;  %v4985_v9 = vld [vmem:[#allocation5 + $0x710] sm:$0xf]  ;;  %v4826_v13 = vor.u32 %v6151_v8, %v4825_v7  ;;  %v4565_v7 = vld [vmem:[#allocation5 + $0x3c8] sm:$0xf]  ;;  %v6086_v8 = vld [vmem:[#allocation5 + $0x3d8] sm:$0xf0] }
  0x9a   :  { %2154 = vmatpush.bf16.msrb.mxu2 %v4126_v10  ;;  %v6191_v10 = vld [vmem:[#allocation5 + $0x720] sm:$0xf0]  ;;  %v4566_v25 = vor.u32 %v6086_v8, %v4565_v7 }
  0x9b   :  { %2167 = vmatpush.bf16.msrb.mxu3 %v4286_v14  ;;  %v4485_v14 = vld [vmem:[#allocation5 + $0x328] sm:$0xf]  ;;  %v4986_v17 = vor.u32 %v6191_v10, %v4985_v9 }
  0x9c   :  { %2129 = vmatpush.bf16.msrb.mxu0 %v4902_v24  ;;  %v6146_v24 = vld [vmem:[#allocation5 + $0x5b8] sm:$0xf0]  ;;  %v4725_v9 = vld [vmem:[#allocation5 + $0x508] sm:$0xf] }
  0x9d   :  { %2142 = vmatpush.bf16.msrb.mxu1 %v5062_v27  ;;  %v4486_v27 = vor.u32 %v6066_v15, %v4485_v14  ;;  %v4806_v29 = vor.u32 %v6146_v24, %v4805_v23  ;;  %v5185_v14 = vld [vmem:[#allocation5 + $0x8a0] sm:$0xf]  ;;  %v6241_v15 = vld [vmem:[#allocation5 + $0x8b0] sm:$0xf0]  ;;  %v6039_v23 = vld [vmem:[#allocation5 + $0x264] sm:$0xf] }
  0x9e   :  { %2155 = vmatpush.bf16.msrb.mxu2 %v4106_v28  ;;  %v4646_v28 = vor.u32 %v6106_v20, %v4645_v16  ;;  %v5999_v16 = vld [vmem:[#allocation5 + $0x124] sm:$0xf]  ;;  %v4227_v20 = vld [vmem:[#allocation5 + $0x134] sm:$0xf0] }
  0x9f   :  { %2168 = vmatpush.bf16.msrb.mxu3 %v4266_v32  ;;  %v4625_v32 = vld [vmem:[#allocation5 + $0x440] sm:$0xf]  ;;  %v4387_v24 = vld [vmem:[#allocation5 + $0x274] sm:$0xf0] }
  0xa0   :  { %2130 = vmatpush.bf16.msrb.mxu0 %v4882_v42  ;;  %v4466_v42 = vor.u32 %v6061_v31, %v4465_v30  ;;  %v4626_v43 = vor.u32 %v6101_v34, %v4625_v32  ;;  %v5186_v30 = vor.u32 %v6241_v15, %v5185_v14  ;;  %v4230_v31 = vor.u32 %v5999_v16, %v4227_v20  ;;  %v6236_v34 = vld [vmem:[#allocation5 + $0x888] sm:$0xf0]  ;;  %v4147_v15 = vld [vmem:[#allocation5 + $0x94] sm:$0xf0]  ;;  %v6019_v16 = vld [vmem:[#allocation5 + $0x1c4] sm:$0xf] }
  0xa1   :  { %2143 = vmatpush.bf16.msrb.mxu1 %v5042_v46  ;;  %v6056_v46 = vld [vmem:[#allocation5 + $0x2e8] sm:$0xf0]  ;;  %v4390_v32 = vor.u32 %v6039_v23, %v4387_v24  ;;  %v6059_v20 = vld [vmem:[#allocation5 + $0x304] sm:$0xf]  ;;  %v4467_v23 = vld [vmem:[#allocation5 + $0x314] sm:$0xf0] }
  0xa2   :  { %2156 = vmatpush.bf16.msrb.mxu2 %v4086_v47  ;;  %v4605_v47 = vld [vmem:[#allocation5 + $0x418] sm:$0xf]  ;;  %v4446_v54 = vor.u32 %v6056_v46, %v4445_v45  ;;  %v4210_v46 = vor.u32 %v5994_v35, %v4207_v38  ;;  %v6054_v35 = vld [vmem:[#allocation5 + $0x2dc] sm:$0xf] }
  0xa3   :  { %2169 = vmatpush.bf16.msrb.mxu3 %v4246_v50  ;;  %2131 = vmatmul.bf16.vlgmr.msrb.gmra.mxu0 %v6746_v41  ;;  %v4765_v50 = vld [vmem:[#allocation5 + $0x558] sm:$0xf]  ;;  %v4606_v55 = vor.u32 %v6096_v49, %v4605_v47  ;;  %v6231_v49 = vld [vmem:[#allocation5 + $0x860] sm:$0xf0] }
  0xa4   :  { %2175 = vmatpush.bf16.msra.mxu0 %v4546_v51  ;;  %2144 = vmatmul.bf16.vlgmr.msrb.gmra.mxu1 %v6742_v37  ;;  %v6136_v51 = vld [vmem:[#allocation5 + $0x568] sm:$0xf0] }
  0xa5   :  { %2188 = vmatpush.bf16.msra.mxu1 %v4706_v52  ;;  %2157 = vmatmul.bf16.vlgmr.msrb.gmra.mxu2 %v6732_v19  ;;  %v4925_v52 = vld [vmem:[#allocation5 + $0x698] sm:$0xf]  ;;  %v4766_v56 = vor.u32 %v6136_v51, %v4765_v50  ;;  %v5989_v50 = vld [vmem:[#allocation5 + $0xd4] sm:$0xf] }
  0xa6   :  { %2201 = vmatpush.bf16.msra.mxu2 %v4866_v53  ;;  %2170 = vmatmul.bf16.vlgmr.msrb.gmra.mxu3 %v6734_v21  ;;  %v6176_v53 = vld [vmem:[#allocation5 + $0x6a8] sm:$0xf0] }
  0xa7   :  { %2214 = vmatpush.bf16.msra.mxu3 %v5026_v57  ;;  %v4425_v57 = vld [vmem:[#allocation5 + $0x2b0] sm:$0xf]  ;;  %v4926_v60 = vor.u32 %v6176_v53, %v4925_v52  ;;  %v4187_v52 = vld [vmem:[#allocation5 + $0xe4] sm:$0xf0]  ;;  %v6029_v53 = vld [vmem:[#allocation5 + $0x214] sm:$0xf] }
  0xa8   :  { %2176 = vmatpush.bf16.msra.mxu0 %v4526_v63  ;;  %v6131_v63 = vld [vmem:[#allocation5 + $0x540] sm:$0xf0]  ;;  %v4426_v2 = vor.u32 %v6051_v58, %v4425_v57  ;;  %v5125_v58 = vld [vmem:[#allocation5 + $0x828] sm:$0xf] }
  0xa9   :  { %2189 = vmatpush.bf16.msra.mxu1 %v4686_v0  ;;  %v4905_v0 = vld [vmem:[#allocation5 + $0x670] sm:$0xf]  ;;  %v4746_v6 = vor.u32 %v6131_v63, %v4745_v62  ;;  %v4167_v63 = vld [vmem:[#allocation5 + $0xbc] sm:$0xf0] }
  0xaa   :  { %2202 = vmatpush.bf16.msra.mxu2 %v4846_v1  ;;  %v6171_v1 = vld [vmem:[#allocation5 + $0x680] sm:$0xf0] }
  0xab   :  { %2215 = vmatpush.bf16.msra.mxu3 %v5006_v5  ;;  %v4586_v5 = vor.u32 %v6091_v61, %v4585_v59  ;;  %v4906_v10 = vor.u32 %v6171_v1, %v4905_v0  ;;  %v6226_v59 = vld [vmem:[#allocation5 + $0x838] sm:$0xf0]  ;;  %v4190_v61 = vor.u32 %v5989_v50, %v4187_v52  ;;  %v6024_v0 = vld [vmem:[#allocation5 + $0x1ec] sm:$0xf]  ;;  %v4327_v1 = vld [vmem:[#allocation5 + $0x1fc] sm:$0xf0] }
  0xac   :  { %2177 = vmatpush.bf16.msra.mxu0 %v4506_v11  ;;  %v6126_v11 = vld [vmem:[#allocation5 + $0x518] sm:$0xf0]  ;;  %v5126_v7 = vor.u32 %v6226_v59, %v5125_v58  ;;  %v4107_v50 = vld [vmem:[#allocation5 + $0x44] sm:$0xf0] }
  0xad   :  { %2190 = vmatpush.bf16.msra.mxu1 %v4666_v12  ;;  %v4885_v12 = vld [vmem:[#allocation5 + $0x648] sm:$0xf]  ;;  %v4726_v26 = vor.u32 %v6126_v11, %v4725_v9  ;;  %v4330_v9 = vor.u32 %v6024_v0, %v4327_v1  ;;  %v6221_v11 = vld [vmem:[#allocation5 + $0x810] sm:$0xf0]  ;;  %v6206_v58 = vld [vmem:[#allocation5 + $0x798] sm:$0xf0] }
  0xae   :  { %2203 = vmatpush.bf16.msra.mxu2 %v4826_v13  ;;  %v6166_v13 = vld [vmem:[#allocation5 + $0x658] sm:$0xf0]  ;;  %v4267_v52 = vld [vmem:[#allocation5 + $0x184] sm:$0xf0] }
  0xaf   :  { %2216 = vmatpush.bf16.msra.mxu3 %v4986_v17  ;;  %v4406_v17 = vor.u32 %v6046_v4, %v4405_v3  ;;  %v472_v3 = vld [vmem:[#allocation13] ss:$8 sm:$0xf] }
  0xb0   :  { %2178 = vmatpush.bf16.msra.mxu0 %v4486_v27  ;;  %v6079_v27 = vld [vmem:[#allocation5 + $0x3a4] sm:$0xf]  ;;  %v473_v4 = vld [vmem:[#allocation13] ss:$8 sm:$0x10] }
  0xb1   :  { %2191 = vmatpush.bf16.msra.mxu1 %v4646_v28  ;;  %v4547_v28 = vld [vmem:[#allocation5 + $0x3b4] sm:$0xf0] }
  0xb2   :  { %2204 = vmatpush.bf16.msra.mxu2 %v4806_v29  ;;  %v4886_v29 = vor.u32 %v6166_v13, %v4885_v12  ;;  %v4550_v36 = vor.u32 %v6079_v27, %v4547_v28  ;;  %v5979_v12 = vld [vmem:[#allocation5 + $0x84] sm:$0xf]  ;;  %v6764_v13 = vor.u32 %v473_v4, %v472_v3  ;;  %v6216_v28 = vld [vmem:[#allocation5 + $0x7e8] sm:$0xf0]  ;;  %v4407_v4 = vld [vmem:[#allocation5 + $0x29c] sm:$0xf0] }
  0xb3   :  { %2217 = vmatpush.bf16.msra.mxu3 %v4966_v33  ;;  %v5165_v33 = vld [vmem:[#allocation5 + $0x878] sm:$0xf]  ;;  %v6044_v3 = vld [vmem:[#allocation5 + $0x28c] sm:$0xf] }
  0xb4   :  { %2179 = vmatpush.bf16.msra.mxu0 %v4466_v42  ;;  %v4367_v42 = vld [vmem:[#allocation5 + $0x24c] sm:$0xf0]  ;;  %v5166_v45 = vor.u32 %v6236_v34, %v5165_v33  ;;  %v6014_v33 = vld [vmem:[#allocation5 + $0x19c] sm:$0xf] }
  0xb5   :  { %2192 = vmatpush.bf16.msra.mxu1 %v4626_v43  ;;  %v6074_v43 = vld [vmem:[#allocation5 + $0x37c] sm:$0xf]  ;;  %v4370_v47 = vor.u32 %v6034_v39, %v4367_v42  ;;  %v4287_v34 = vld [vmem:[#allocation5 + $0x1ac] sm:$0xf0] }
  0xb6   :  { %2205 = vmatpush.bf16.msra.mxu2 %v4786_v44  ;;  %v4527_v44 = vld [vmem:[#allocation5 + $0x38c] sm:$0xf0] }
  0xb7   :  { %2218 = vmatpush.bf16.msra.mxu3 %v4946_v48  ;;  %v5145_v48 = vld [vmem:[#allocation5 + $0x850] sm:$0xf]  ;;  %v4530_v51 = vor.u32 %v6074_v43, %v4527_v44  ;;  %v4290_v44 = vor.u32 %v6014_v33, %v4287_v34 }
  0xb8   :  { %2180 = vmatpush.bf16.msra.mxu0 %v4446_v54  ;;  %v4347_v54 = vld [vmem:[#allocation5 + $0x224] sm:$0xf0]  ;;  %v5146_v57 = vor.u32 %v6231_v49, %v5145_v48  ;;  %v4847_v34 = vld [vmem:[#allocation5 + $0x60c] sm:$0xf0] }
  0xb9   :  { %2193 = vmatpush.bf16.msra.mxu1 %v4606_v55  ;;  %v6069_v55 = vld [vmem:[#allocation5 + $0x354] sm:$0xf]  ;;  %v4350_v62 = vor.u32 %v6029_v53, %v4347_v54  ;;  %v4427_v54 = vld [vmem:[#allocation5 + $0x2c4] sm:$0xf0] }
  0xba   :  { %2206 = vmatpush.bf16.msra.mxu2 %v4766_v56  ;;  %v4507_v56 = vld [vmem:[#allocation5 + $0x364] sm:$0xf0]  ;;  %v6049_v53 = vld [vmem:[#allocation5 + $0x2b4] sm:$0xf] }
  0xbb   :  { %2219 = vmatpush.bf16.msra.mxu3 %v4926_v60  ;;  %v5984_v60 = vld [vmem:[#allocation5 + $0xac] sm:$0xf]  ;;  %v4430_v1 = vor.u32 %v6049_v53, %v4427_v54  ;;  %v4987_v53 = vld [vmem:[#allocation5 + $0x724] sm:$0xf0]  ;;  %v6229_v54 = vld [vmem:[#allocation5 + $0x854] sm:$0xf] }
  0xbc   :  { %2181 = vmatpush.bf16.msra.mxu0 %v4426_v2  ;;  %v4510_v2 = vor.u32 %v6069_v55, %v4507_v56  ;;  %v4170_v8 = vor.u32 %v5984_v60, %v4167_v63  ;;  %v6004_v63 = vld [vmem:[#allocation5 + $0x14c] sm:$0xf] }
  0xbd   :  { %2194 = vmatpush.bf16.msra.mxu1 %v4586_v5  ;;  %v6064_v5 = vld [vmem:[#allocation5 + $0x32c] sm:$0xf] }
  0xbe   :  { %2207 = vmatpush.bf16.msra.mxu2 %v4746_v6  ;;  %v4487_v6 = vld [vmem:[#allocation5 + $0x33c] sm:$0xf0] }
  0xbf   :  { %2220 = vmatpush.bf16.msra.mxu3 %v4906_v10  ;;  %v5105_v10 = vld [vmem:[#allocation5 + $0x800] sm:$0xf]  ;;  %v4490_v14 = vor.u32 %v6064_v5, %v4487_v6  ;;  %v6119_v6 = vld [vmem:[#allocation5 + $0x4e4] sm:$0xf] }
  0xc0   :  { %2182 = vmatpush.bf16.msra.mxu0 %v4406_v17  ;;  %v4307_v17 = vld [vmem:[#allocation5 + $0x1d4] sm:$0xf0]  ;;  %v5106_v24 = vor.u32 %v6221_v11, %v5105_v10 }
  0xc1   :  { %2195 = vmatpush.bf16.msra.mxu1 %v4566_v25  ;;  %v5085_v25 = vld [vmem:[#allocation5 + $0x7d8] sm:$0xf]  ;;  %v4310_v27 = vor.u32 %v6019_v16, %v4307_v17  ;;  %v1989_v42 = vpop.f32.mrf.mxu1 }
  0xc2   :  { %2208 = vmatpush.bf16.msra.mxu2 %v4726_v26  ;;  %v4150_v26 = vor.u32 %v5979_v12, %v4147_v15  ;;  %v5086_v38 = vor.u32 %v6216_v28, %v5085_v25  ;;  %v4867_v11 = vld [vmem:[#allocation5 + $0x634] sm:$0xf0]  ;;  %v6199_v12 = vld [vmem:[#allocation5 + $0x764] sm:$0xf] }
  0xc3   :  { %2221 = vmatpush.bf16.msra.mxu3 %v4886_v29  ;;  %2183 = vmatmul.bf16.vlgmr.msra.gmra.mxu0 %v6730_v18  ;;  %v5974_v29 = vld [vmem:[#allocation5 + $0x5c] sm:$0xf]  ;;  %v1976_v39 = vpop.f32.mrf.mxu0  ;;  %v5187_v25 = vld [vmem:[#allocation5 + $0x8b4] sm:$0xf0] }
  0xc4   :  { %2227 = vmatpush.bf16.msrb.mxu0 %v5186_v30  ;;  %2196 = vmatmul.bf16.vlgmr.msra.gmra.mxu1 %v6736_v22  ;;  %v476_v30 = vperm.slane %v6764_v13, 0 }
  0xc5   :  { %2240 = vmatpush.bf16.msrb.mxu1 %v4230_v31  ;;  %2209 = vmatmul.bf16.vlgmr.msra.gmra.mxu2 %v6744_v40  ;;  %v4470_v31 = vor.u32 %v6059_v20, %v4467_v23 }
  0xc6   :  { %2253 = vmatpush.bf16.msrb.mxu2 %v4390_v32  ;;  %2222 = vmatmul.bf16.vlgmr.msra.gmra.mxu3 %v6746_v41  ;;  %v4127_v32 = vld [vmem:[#allocation5 + $0x6c] sm:$0xf0]  ;;  %v1977_v48 = vadd.f32 %v1976_v39, %v476_v30  ;;  %v6114_v30 = vld [vmem:[#allocation5 + $0x4bc] sm:$0xf] }
  0xc7   :  { %2266 = vmatpush.bf16.msrb.mxu3 %v4550_v36  ;;  %v4447_v36 = vld [vmem:[#allocation5 + $0x2ec] sm:$0xf0]  ;;  %v4130_v43 = vor.u32 %v5974_v29, %v4127_v32  ;;  %v6154_v32 = vld [vmem:[#allocation5 + $0x5fc] sm:$0xf] }
  0xc8   :  { %2228 = vmatpush.bf16.msrb.mxu0 %v5166_v45  ;;  %v5065_v45 = vld [vmem:[#allocation5 + $0x7b0] sm:$0xf]  ;;  %v4450_v49 = vor.u32 %v6054_v35, %v4447_v36  ;;  %v1990_v55 = vadd.f32 %v1989_v42, %v1977_v48  ;;  %v2002_v0 = vpop.f32.mrf.mxu2  ;;  %v6194_v35 = vld [vmem:[#allocation5 + $0x73c] sm:$0xf]  ;;  %v6149_v48 = vld [vmem:[#allocation5 + $0x5d4] sm:$0xf] }
  0xc9   :  { %2241 = vmatpush.bf16.msrb.mxu1 %v4210_v46  ;;  %v6211_v46 = vld [vmem:[#allocation5 + $0x7c0] sm:$0xf0]  ;;  %v1991_v16 = vpop.f32.mrf.mxu1  ;;  %v5007_v36 = vld [vmem:[#allocation5 + $0x74c] sm:$0xf0] }
  0xca   :  { %2254 = vmatpush.bf16.msrb.mxu2 %v4370_v47  ;;  %v5969_v47 = vld [vmem:[#allocation5 + $0x34] sm:$0xf]  ;;  %v5066_v56 = vor.u32 %v6211_v46, %v5065_v45  ;;  %v2003_v5 = vadd.f32 %v2002_v0, %v1990_v55  ;;  %v5167_v39 = vld [vmem:[#allocation5 + $0x88c] sm:$0xf0]  ;;  %v5010_v45 = vor.u32 %v6194_v35, %v5007_v36  ;;  %v5147_v55 = vld [vmem:[#allocation5 + $0x864] sm:$0xf0] }
  0xcb   :  { %2267 = vmatpush.bf16.msrb.mxu3 %v4530_v51  ;;  %v6009_v51 = vld [vmem:[#allocation5 + $0x174] sm:$0xf]  ;;  %v4110_v59 = vor.u32 %v5969_v47, %v4107_v50  ;;  %v1978_v15 = vpop.f32.mrf.mxu0  ;;  %v4667_v47 = vld [vmem:[#allocation5 + $0x4a4] sm:$0xf0]  ;;  %v6184_v0 = vld [vmem:[#allocation5 + $0x6ec] sm:$0xf] }
  0xcc   :  { %2229 = vmatpush.bf16.msrb.mxu0 %v5146_v57  ;;  %v5045_v57 = vld [vmem:[#allocation5 + $0x788] sm:$0xf]  ;;  %v4270_v60 = vor.u32 %v6009_v51, %v4267_v52  ;;  %v6109_v46 = vld [vmem:[#allocation5 + $0x494] sm:$0xf]  ;;  %v4787_v15 = vld [vmem:[#allocation5 + $0x594] sm:$0xf0] }
  0xcd   :  { %2242 = vmatpush.bf16.msrb.mxu1 %v4190_v61  ;;  %v5964_v61 = vld [vmem:[#allocation5 + $0xc] sm:$0xf]  ;;  %v5046_v10 = vor.u32 %v6206_v58, %v5045_v57  ;;  %v4827_v51 = vld [vmem:[#allocation5 + $0x5e4] sm:$0xf0]  ;;  %v6189_v52 = vld [vmem:[#allocation5 + $0x714] sm:$0xf] }
  0xce   :  { %2255 = vmatpush.bf16.msrb.mxu2 %v4350_v62  ;;  %v4087_v62 = vld [vmem:[#allocation5 + $0x1c] sm:$0xf0]  ;;  %v4830_v57 = vor.u32 %v6149_v48, %v4827_v51  ;;  %v4990_v58 = vor.u32 %v6189_v52, %v4987_v53  ;;  %v6179_v16 = vld [vmem:[#allocation5 + $0x6c4] sm:$0xf]  ;;  %v4927_v35 = vld [vmem:[#allocation5 + $0x6ac] sm:$0xf0] }
  0xcf   :  { %2268 = vmatpush.bf16.msrb.mxu3 %v4510_v2  ;;  %v4247_v2 = vld [vmem:[#allocation5 + $0x15c] sm:$0xf0]  ;;  %v4090_v20 = vor.u32 %v5964_v61, %v4087_v62  ;;  %v6144_v61 = vld [vmem:[#allocation5 + $0x5ac] sm:$0xf]  ;;  %v5150_v62 = vor.u32 %v6229_v54, %v5147_v55  ;;  %v4587_v48 = vld [vmem:[#allocation5 + $0x404] sm:$0xf0] }
  0xd0   :  { %2230 = vmatpush.bf16.msrb.mxu0 %v5126_v7  ;;  %v4707_v7 = vld [vmem:[#allocation5 + $0x4f4] sm:$0xf0]  ;;  %v4250_v23 = vor.u32 %v6004_v63, %v4247_v2  ;;  %v2004_v42 = vpop.f32.mrf.mxu2  ;;  %v4807_v63 = vld [vmem:[#allocation5 + $0x5bc] sm:$0xf0]  ;;  %v6224_v2 = vld [vmem:[#allocation5 + $0x82c] sm:$0xf] }
  0xd1   :  { %2243 = vmatpush.bf16.msrb.mxu1 %v4170_v8  ;;  %v6159_v8 = vld [vmem:[#allocation5 + $0x624] sm:$0xf]  ;;  %v4747_v51 = vld [vmem:[#allocation5 + $0x544] sm:$0xf0]  ;;  %v6169_v52 = vld [vmem:[#allocation5 + $0x674] sm:$0xf] }
  0xd2   :  { %2256 = vmatpush.bf16.msrb.mxu2 %v4330_v9  ;;  %v2015_v9 = vpop.f32.mrf.mxu3  ;;  %v4870_v28 = vor.u32 %v6159_v8, %v4867_v11  ;;  %v6139_v11 = vld [vmem:[#allocation5 + $0x584] sm:$0xf]  ;;  %v4907_v53 = vld [vmem:[#allocation5 + $0x684] sm:$0xf0]  ;;  %v6209_v54 = vld [vmem:[#allocation5 + $0x7b4] sm:$0xf] }
  0xd3   :  { %2269 = vmatpush.bf16.msrb.mxu3 %v4490_v14  ;;  %v5027_v14 = vld [vmem:[#allocation5 + $0x774] sm:$0xf0]  ;;  %v6767_v17 = vadd.f32 %v2015_v9, %v2003_v5  ;;  %v6099_v9 = vld [vmem:[#allocation5 + $0x444] sm:$0xf]  ;;  %v5067_v55 = vld [vmem:[#allocation5 + $0x7c4] sm:$0xf0] }
  0xd4   :  { %2231 = vmatpush.bf16.msrb.mxu0 %v5106_v24  ;;  %v6239_v24 = vld [vmem:[#allocation5 + $0x8a4] sm:$0xf]  ;;  %v5030_v29 = vor.u32 %v6199_v12, %v5027_v14 }
  0xd5   :  { %2244 = vmatpush.bf16.msrb.mxu1 %v4150_v26  ;;  %v4410_v26 = vor.u32 %v6044_v3, %v4407_v4  ;;  %v5190_v33 = vor.u32 %v6239_v24, %v5187_v25  ;;  %v5127_v3 = vld [vmem:[#allocation5 + $0x83c] sm:$0xf0]  ;;  %v5107_v24 = vld [vmem:[#allocation5 + $0x814] sm:$0xf0] }
  0xd6   :  { %2257 = vmatpush.bf16.msrb.mxu2 %v4310_v27  ;;  %v4710_v27 = vor.u32 %v6119_v6, %v4707_v7  ;;  %v4810_v7 = vor.u32 %v6144_v61, %v4807_v63  ;;  %v5130_v14 = vor.u32 %v6224_v2, %v5127_v3  ;;  %v6124_v61 = vld [vmem:[#allocation5 + $0x50c] sm:$0xf]  ;;  %v4887_v2 = vld [vmem:[#allocation5 + $0x65c] sm:$0xf0] }
  0xd7   :  { %2270 = vmatpush.bf16.msrb.mxu3 %v4470_v31  ;;  %v4687_v31 = vld [vmem:[#allocation5 + $0x4cc] sm:$0xf0]  ;;  %v6164_v63 = vld [vmem:[#allocation5 + $0x64c] sm:$0xf] }
  0xd8   :  { %2232 = vmatpush.bf16.msrb.mxu0 %v5086_v38  ;;  %v6234_v38 = vld [vmem:[#allocation5 + $0x87c] sm:$0xf]  ;;  %v6204_v3 = vld [vmem:[#allocation5 + $0x78c] sm:$0xf] }
  0xd9   :  { %2245 = vmatpush.bf16.msrb.mxu1 %v4130_v43  ;;  %v4690_v43 = vor.u32 %v6114_v30, %v4687_v31  ;;  %v5170_v50 = vor.u32 %v6234_v38, %v5167_v39  ;;  %v4607_v30 = vld [vmem:[#allocation5 + $0x42c] sm:$0xf0]  ;;  %v6134_v31 = vld [vmem:[#allocation5 + $0x55c] sm:$0xf] }
  0xda   :  { %2258 = vmatpush.bf16.msrb.mxu2 %v4290_v44  ;;  %v4850_v44 = vor.u32 %v6154_v32, %v4847_v34  ;;  %v6174_v34 = vld [vmem:[#allocation5 + $0x69c] sm:$0xf]  ;;  %v5087_v39 = vld [vmem:[#allocation5 + $0x7ec] sm:$0xf0] }
  0xdb   :  { %2271 = vmatpush.bf16.msrb.mxu3 %v4450_v49  ;;  %v2017_v49 = vpop.f32.mrf.mxu3  ;;  %v6214_v38 = vld [vmem:[#allocation5 + $0x7dc] sm:$0xf] }
  0xdc   :  { %2233 = vmatpush.bf16.msrb.mxu0 %v5066_v56  ;;  %v4670_v56 = vor.u32 %v6109_v46, %v4667_v47  ;;  %v4930_v46 = vor.u32 %v6174_v34, %v4927_v35  ;;  %v6089_v47 = vld [vmem:[#allocation5 + $0x3f4] sm:$0xf]  ;;  %v4193_v35 = vld [vmem:[#allocation5 + $0xd8] sm:$0xf] }
  0xdd   :  { %2246 = vmatpush.bf16.msrb.mxu1 %v4110_v59  ;;  %v6104_v59 = vld [vmem:[#allocation5 + $0x46c] sm:$0xf]  ;;  %v6129_v49 = vld [vmem:[#allocation5 + $0x534] sm:$0xf] }
  0xde   :  { %2259 = vmatpush.bf16.msrb.mxu2 %v4270_v60  ;;  %v4647_v60 = vld [vmem:[#allocation5 + $0x47c] sm:$0xf0] }
  0xdf   :  { %2272 = vmatpush.bf16.msrb.mxu3 %v4430_v1  ;;  %v4967_v1 = vld [vmem:[#allocation5 + $0x6fc] sm:$0xf0]  ;;  %v4650_v4 = vor.u32 %v6104_v59, %v4647_v60  ;;  %v4750_v59 = vor.u32 %v6129_v49, %v4747_v51  ;;  %v4910_v60 = vor.u32 %v6169_v52, %v4907_v53  ;;  %v6072_v49 = vld [vmem:[#allocation5 + $0x368] sm:$0xf0] }
  0xe0   :  { %2234 = vmatpush.bf16.msrb.mxu0 %v5046_v10  ;;  %v2028_v5 = vpop.f32.mrf.mxu0  ;;  %v4970_v8 = vor.u32 %v6184_v0, %v4967_v1  ;;  %v4627_v10 = vld [vmem:[#allocation5 + $0x454] sm:$0xf0]  ;;  %v5070_v1 = vor.u32 %v6209_v54, %v5067_v55  ;;  %v6112_v51 = vld [vmem:[#allocation5 + $0x4a8] sm:$0xf0]  ;;  %v4173_v55 = vld [vmem:[#allocation5 + $0xb0] sm:$0xf] }
  0xe1   :  { %2247 = vmatpush.bf16.msrb.mxu1 %v4090_v20  ;;  %v2041_v6 = vpop.f32.mrf.mxu1  ;;  %v2029_v12 = vadd.f32 %v2028_v5, %v6767_v17  ;;  %v4947_v20 = vld [vmem:[#allocation5 + $0x6d4] sm:$0xf0]  ;;  %v4233_v5 = vld [vmem:[#allocation5 + $0x128] sm:$0xf] }
  0xe2   :  { %2260 = vmatpush.bf16.msrb.mxu2 %v4250_v23  ;;  %v6219_v23 = vld [vmem:[#allocation5 + $0x804] sm:$0xf] }
  0xe3   :  { %2273 = vmatpush.bf16.msrb.mxu3 %v4410_v26  ;;  %2235 = vmatmul.bf16.vlgmr.msrb.gmra.mxu0 %v6742_v37  ;;  %v2042_v25 = vadd.f32 %v2041_v6, %v2029_v12  ;;  %v4630_v26 = vor.u32 %v6099_v9, %v4627_v10  ;;  %v5110_v17 = vor.u32 %v6219_v23, %v5107_v24  ;;  %v6002_v6 = vld [vmem:[#allocation5 + $0x138] sm:$0xf0]  ;;  %v4553_v10 = vld [vmem:[#allocation5 + $0x3a8] sm:$0xf] }
  0xe4   :  { %2279 = vmatpush.bf16.msra.mxu0 %v4710_v27  ;;  %2248 = vmatmul.bf16.vlgmr.msrb.gmra.mxu1 %v6732_v19  ;;  %v4790_v27 = vor.u32 %v6139_v11, %v4787_v15  ;;  %v6042_v9 = vld [vmem:[#allocation5 + $0x278] sm:$0xf0]  ;;  %v4713_v15 = vld [vmem:[#allocation5 + $0x4e8] sm:$0xf]  ;;  %v4234_v23 = vor.u32 %v6002_v6, %v4233_v5 }
  0xe5   :  { %2292 = vmatpush.bf16.msra.mxu1 %v4870_v28  ;;  %2261 = vmatmul.bf16.vlgmr.msrb.gmra.mxu2 %v6734_v21  ;;  %v4950_v28 = vor.u32 %v6179_v16, %v4947_v20  ;;  %v6082_v11 = vld [vmem:[#allocation5 + $0x3b8] sm:$0xf0]  ;;  %v4153_v6 = vld [vmem:[#allocation5 + $0x88] sm:$0xf] }
  0xe6   :  { %2305 = vmatpush.bf16.msra.mxu2 %v5030_v29  ;;  %2274 = vmatmul.bf16.vlgmr.msrb.gmra.mxu3 %v6730_v18  ;;  %v6094_v29 = vld [vmem:[#allocation5 + $0x41c] sm:$0xf] }
  0xe7   :  { %2318 = vmatpush.bf16.msra.mxu3 %v5190_v33  ;;  %v4767_v33 = vld [vmem:[#allocation5 + $0x56c] sm:$0xf0]  ;;  %v4610_v42 = vor.u32 %v6094_v29, %v4607_v30  ;;  %v6122_v16 = vld [vmem:[#allocation5 + $0x4f8] sm:$0xf0]  ;;  %v6037_v30 = vld [vmem:[#allocation5 + $0x250] sm:$0xf0] }
  0xe8   :  { %2280 = vmatpush.bf16.msra.mxu0 %v4690_v43  ;;  %v2054_v32 = vpop.f32.mrf.mxu2  ;;  %v2030_v43 = vpop.f32.mrf.mxu0  ;;  %v4714_v29 = vor.u32 %v6122_v16, %v4713_v15  ;;  %v6062_v15 = vld [vmem:[#allocation5 + $0x318] sm:$0xf0]  ;;  %v4633_v16 = vld [vmem:[#allocation5 + $0x448] sm:$0xf] }
  0xe9   :  { %2293 = vmatpush.bf16.msra.mxu1 %v4850_v44  ;;  %v6774_v36 = vadd.f32 %v2054_v32, %v2042_v25  ;;  %v2043_v44 = vpop.f32.mrf.mxu1  ;;  %v4554_v25 = vor.u32 %v6082_v11, %v4553_v10  ;;  %v6077_v32 = vld [vmem:[#allocation5 + $0x390] sm:$0xf0]  ;;  %v5992_v43 = vld [vmem:[#allocation5 + $0xe8] sm:$0xf0] }
  0xea   :  { %2306 = vmatpush.bf16.msra.mxu2 %v5010_v45  ;;  %v4770_v45 = vor.u32 %v6134_v31, %v4767_v33  ;;  %v4533_v31 = vld [vmem:[#allocation5 + $0x380] sm:$0xf]  ;;  %v6117_v33 = vld [vmem:[#allocation5 + $0x4d0] sm:$0xf0]  ;;  %v4353_v44 = vld [vmem:[#allocation5 + $0x218] sm:$0xf]  ;;  %v4194_v52 = vor.u32 %v5992_v43, %v4193_v35 }
  0xeb   :  { %2319 = vmatpush.bf16.msra.mxu3 %v5170_v50  ;;  %v5090_v50 = vor.u32 %v6214_v38, %v5087_v39  ;;  %v2067_v38 = vpop.f32.mrf.mxu3  ;;  %v4613_v35 = vld [vmem:[#allocation5 + $0x420] sm:$0xf] }
  0xec   :  { %2281 = vmatpush.bf16.msra.mxu0 %v4670_v56  ;;  %v4590_v56 = vor.u32 %v6089_v47, %v4587_v48  ;;  %v6032_v47 = vld [vmem:[#allocation5 + $0x228] sm:$0xf0]  ;;  %v4513_v48 = vld [vmem:[#allocation5 + $0x358] sm:$0xf] }
  0xed   :  { %2294 = vmatpush.bf16.msra.mxu1 %v4830_v57  ;;  %v6084_v57 = vld [vmem:[#allocation5 + $0x3cc] sm:$0xf]  ;;  %v4354_v53 = vor.u32 %v6032_v47, %v4353_v44  ;;  %v4514_v54 = vor.u32 %v6072_v49, %v4513_v48  ;;  %v4273_v48 = vld [vmem:[#allocation5 + $0x178] sm:$0xf] }
  0xee   :  { %2307 = vmatpush.bf16.msra.mxu2 %v4990_v58  ;;  %v4567_v58 = vld [vmem:[#allocation5 + $0x3dc] sm:$0xf0]  ;;  %v5972_v47 = vld [vmem:[#allocation5 + $0x48] sm:$0xf0] }
  0xef   :  { %2320 = vmatpush.bf16.msra.mxu3 %v5150_v62  ;;  %v4727_v62 = vld [vmem:[#allocation5 + $0x51c] sm:$0xf0] }
  0xf0   :  { %2282 = vmatpush.bf16.msra.mxu0 %v4650_v4  ;;  %v2056_v0 = vpop.f32.mrf.mxu2  ;;  %v5047_v4 = vld [vmem:[#allocation5 + $0x79c] sm:$0xf0]  ;;  %v4730_v12 = vor.u32 %v6124_v61, %v4727_v62  ;;  %v4493_v61 = vld [vmem:[#allocation5 + $0x330] sm:$0xf]  ;;  %v6067_v62 = vld [vmem:[#allocation5 + $0x340] sm:$0xf0] }
  0xf1   :  { %2295 = vmatpush.bf16.msra.mxu1 %v4810_v7  ;;  %v4393_v7 = vld [vmem:[#allocation5 + $0x268] sm:$0xf]  ;;  %v5050_v20 = vor.u32 %v6204_v3, %v5047_v4  ;;  %v6107_v0 = vld [vmem:[#allocation5 + $0x480] sm:$0xf0]  ;;  %v4494_v5 = vor.u32 %v6067_v62, %v4493_v61  ;;  %v4253_v61 = vld [vmem:[#allocation5 + $0x150] sm:$0xf] }
  0xf2   :  { %2308 = vmatpush.bf16.msra.mxu2 %v4970_v8  ;;  %v4570_v8 = vor.u32 %v6084_v57, %v4567_v58  ;;  %v4394_v24 = vor.u32 %v6042_v9, %v4393_v7  ;;  %v4333_v57 = vld [vmem:[#allocation5 + $0x1f0] sm:$0xf]  ;;  %v5982_v7 = vld [vmem:[#allocation5 + $0x98] sm:$0xf0]  ;;  %v6007_v62 = vld [vmem:[#allocation5 + $0x160] sm:$0xf0] }
  0xf3   :  { %2321 = vmatpush.bf16.msra.mxu3 %v5130_v14  ;;  %v4890_v14 = vor.u32 %v6164_v63, %v4887_v2  ;;  %v4653_v63 = vld [vmem:[#allocation5 + $0x470] sm:$0xf]  ;;  %v2069_v10 = vpop.f32.mrf.mxu3 }
  0xf4   :  { %2283 = vmatpush.bf16.msra.mxu0 %v4630_v26  ;;  %v4213_v26 = vld [vmem:[#allocation5 + $0x100] sm:$0xf]  ;;  %v4654_v11 = vor.u32 %v6107_v0, %v4653_v63  ;;  %v4413_v63 = vld [vmem:[#allocation5 + $0x290] sm:$0xf]  ;;  %v5193_v10 = vld [vmem:[#allocation5 + $0x8a8] sm:$0xf] }
  0xf5   :  { %2296 = vmatpush.bf16.msra.mxu1 %v4790_v27  ;;  %v5997_v27 = vld [vmem:[#allocation5 + $0x110] sm:$0xf0] }
  0xf6   :  { %2309 = vmatpush.bf16.msra.mxu2 %v4950_v28  ;;  %v4373_v28 = vld [vmem:[#allocation5 + $0x240] sm:$0xf]  ;;  %v4214_v34 = vor.u32 %v5997_v27, %v4213_v26 }
  0xf7   :  { %2322 = vmatpush.bf16.msra.mxu3 %v5110_v17  ;;  %v4693_v17 = vld [vmem:[#allocation5 + $0x4c0] sm:$0xf]  ;;  %v4374_v39 = vor.u32 %v6037_v30, %v4373_v28  ;;  %v5977_v28 = vld [vmem:[#allocation5 + $0x70] sm:$0xf0] }
  0xf8   :  { %2284 = vmatpush.bf16.msra.mxu0 %v4610_v42  ;;  %v4534_v42 = vor.u32 %v6077_v32, %v4533_v31  ;;  %v4133_v27 = vld [vmem:[#allocation5 + $0x60] sm:$0xf]  ;;  %v6017_v32 = vld [vmem:[#allocation5 + $0x1b0] sm:$0xf0] }
  0xf9   :  { %2297 = vmatpush.bf16.msra.mxu1 %v4770_v45  ;;  %v477_v45 = vperm.slane %v6764_v13, 1 }
  0xfa   :  { %2310 = vmatpush.bf16.msra.mxu2 %v4930_v46  ;;  %v4694_v46 = vor.u32 %v6117_v33, %v4693_v17  ;;  %v4453_v17 = vld [vmem:[#allocation5 + $0x2e0] sm:$0xf]  ;;  %v6057_v33 = vld [vmem:[#allocation5 + $0x2f0] sm:$0xf0] }
  0xfb   :  { %2323 = vmatpush.bf16.msra.mxu3 %v5090_v50  ;;  %v4673_v50 = vld [vmem:[#allocation5 + $0x498] sm:$0xf]  ;;  %v2068_v58 = vadd.f32 %v2067_v38, %v477_v45  ;;  %v6097_v38 = vld [vmem:[#allocation5 + $0x430] sm:$0xf0]  ;;  %v4454_v45 = vor.u32 %v6057_v33, %v4453_v17  ;;  %v5269_v33 = vld [vmem:[#allocation7 + $0x90] sm:$0xf] }
  0xfc   :  { %2285 = vmatpush.bf16.msra.mxu0 %v4590_v56  ;;  %v5987_v56 = vld [vmem:[#allocation5 + $0xc0] sm:$0xf0]  ;;  %v6237_v17 = vld [vmem:[#allocation5 + $0x890] sm:$0xf0] }
  0xfd   :  { %2298 = vmatpush.bf16.msra.mxu1 %v4750_v59  ;;  %v4674_v59 = vor.u32 %v6112_v51, %v4673_v50  ;;  %v4614_v50 = vor.u32 %v6097_v38, %v4613_v35  ;;  %v6012_v51 = vld [vmem:[#allocation5 + $0x188] sm:$0xf0]  ;;  %v6262_v35 = vld [vmem:[#allocation7 + $0x98] sm:$0xf0] }
  0xfe   :  { %2311 = vmatpush.bf16.msra.mxu2 %v4910_v60  ;;  %v6027_v60 = vld [vmem:[#allocation5 + $0x200] sm:$0xf0] }
  0xff   :  { %2324 = vmatpush.bf16.msra.mxu3 %v5070_v1  ;;  %v4174_v1 = vor.u32 %v5987_v56, %v4173_v55  ;;  %v4334_v4 = vor.u32 %v6027_v60, %v4333_v57  ;;  %v6092_v55 = vld [vmem:[#allocation5 + $0x408] sm:$0xf0]  ;;  %v4093_v57 = vld [vmem:[#allocation5 + $0x10] sm:$0xf] }
 0x100   :  { %2286 = vmatpush.bf16.msra.mxu0 %v4570_v8  ;;  %v2080_v2 = vpop.f32.mrf.mxu0  ;;  %v4313_v8 = vld [vmem:[#allocation5 + $0x1c8] sm:$0xf] }
 0x101   :  { %2299 = vmatpush.bf16.msra.mxu1 %v4730_v12  ;;  %v2093_v3 = vpop.f32.mrf.mxu1  ;;  %v2081_v9 = vadd.f32 %v2080_v2, %v2068_v58  ;;  %v6022_v12 = vld [vmem:[#allocation5 + $0x1d8] sm:$0xf0]  ;;  %v5967_v58 = vld [vmem:[#allocation5 + $0x20] sm:$0xf0] }
 0x102   :  { %2312 = vmatpush.bf16.msra.mxu2 %v4890_v14  ;;  %v4473_v14 = vld [vmem:[#allocation5 + $0x308] sm:$0xf]  ;;  %v6047_v2 = vld [vmem:[#allocation5 + $0x2a0] sm:$0xf0] }
 0x103   :  { %2325 = vmatpush.bf16.msra.mxu3 %v5050_v20  ;;  %2287 = vmatmul.bf16.vlgmr.msra.gmra.mxu0 %v6736_v22  ;;  %v6102_v20 = vld [vmem:[#allocation5 + $0x458] sm:$0xf0]  ;;  %v4474_v26 = vor.u32 %v6062_v15, %v4473_v14  ;;  %v4414_v14 = vor.u32 %v6047_v2, %v4413_v63  ;;  %v5281_v15 = vld [vmem:[#allocation7 + $0xa8] sm:$0xf] }
 0x104   :  { %2331 = vmatpush.bf16.msrb.mxu0 %v4234_v23  ;;  %2300 = vmatmul.bf16.vlgmr.msra.gmra.mxu1 %v6744_v40  ;;  %v2094_v23 = vadd.f32 %v2093_v3, %v2081_v9  ;;  %v4634_v31 = vor.u32 %v6102_v20, %v4633_v16  ;;  %v4573_v3 = vld [vmem:[#allocation5 + $0x3d0] sm:$0xf]  ;;  %v6202_v9 = vld [vmem:[#allocation5 + $0x778] sm:$0xf0]  ;;  %v6265_v16 = vld [vmem:[#allocation7 + $0xb0] sm:$0xf0] }
 0x105   :  { %2344 = vmatpush.bf16.msrb.mxu1 %v4394_v24  ;;  %2313 = vmatmul.bf16.vlgmr.msra.gmra.mxu2 %v6746_v41  ;;  %v4154_v24 = vor.u32 %v5982_v7, %v4153_v6  ;;  %v6162_v6 = vld [vmem:[#allocation5 + $0x638] sm:$0xf0]  ;;  %v5033_v7 = vld [vmem:[#allocation5 + $0x768] sm:$0xf] }
 0x106   :  { %2357 = vmatpush.bf16.msrb.mxu2 %v4554_v25  ;;  %2326 = vmatmul.bf16.vlgmr.msra.gmra.mxu3 %v6742_v37  ;;  %v4314_v25 = vor.u32 %v6022_v12, %v4313_v8  ;;  %v4094_v8 = vor.u32 %v5967_v58, %v4093_v57  ;;  %v4254_v12 = vor.u32 %v6007_v62, %v4253_v61  ;;  %v6147_v57 = vld [vmem:[#allocation5 + $0x5c0] sm:$0xf0]  ;;  %v5245_v62 = vld [vmem:[#allocation7 + $0x60] sm:$0xf]  ;;  %v4793_v2 = vld [vmem:[#allocation5 + $0x588] sm:$0xf] }
 0x107   :  { %2370 = vmatpush.bf16.msrb.mxu3 %v4714_v29  ;;  %v4293_v29 = vld [vmem:[#allocation5 + $0x1a0] sm:$0xf]  ;;  %v6227_v61 = vld [vmem:[#allocation5 + $0x840] sm:$0xf0] }
 0x108   :  { %2332 = vmatpush.bf16.msrb.mxu0 %v4214_v34  ;;  %v2106_v30 = vpop.f32.mrf.mxu2  ;;  %v4294_v44 = vor.u32 %v6017_v32, %v4293_v29  ;;  %v5013_v29 = vld [vmem:[#allocation5 + $0x740] sm:$0xf] }
 0x109   :  { %2345 = vmatpush.bf16.msrb.mxu1 %v4374_v39  ;;  %v6781_v34 = vadd.f32 %v2106_v30, %v2094_v23  ;;  %v4134_v39 = vor.u32 %v5977_v28, %v4133_v27  ;;  %v2095_v43 = vpop.f32.mrf.mxu1  ;;  %v6783_v49 = vpop.f32.mrf.mxu3  ;;  %v4853_v27 = vld [vmem:[#allocation5 + $0x600] sm:$0xf]  ;;  %v6157_v28 = vld [vmem:[#allocation5 + $0x610] sm:$0xf0]  ;;  %v5282_v30 = vor.u32 %v6265_v16, %v5281_v15 }
 0x10a   :  { %2358 = vmatpush.bf16.msrb.mxu2 %v4534_v42  ;;  %v2082_v42 = vpop.f32.mrf.mxu0  ;;  %v5173_v32 = vld [vmem:[#allocation5 + $0x880] sm:$0xf]  ;;  %v4854_v38 = vor.u32 %v6157_v28, %v4853_v27  ;;  %v4833_v43 = vld [vmem:[#allocation5 + $0x5d8] sm:$0xf]  ;;  %v6137_v16 = vld [vmem:[#allocation5 + $0x570] sm:$0xf0] }
 0x10b   :  { %2371 = vmatpush.bf16.msrb.mxu3 %v4694_v46  ;;  %v4113_v46 = vld [vmem:[#allocation5 + $0x38] sm:$0xf]  ;;  %v5174_v42 = vor.u32 %v6237_v17, %v5173_v32  ;;  %v4773_v15 = vld [vmem:[#allocation5 + $0x560] sm:$0xf]  ;;  %v5221_v28 = vld [vmem:[#allocation7 + $0x30] sm:$0xf] }
 0x10c   :  { %2333 = vmatpush.bf16.msrb.mxu0 %v4194_v52  ;;  %v4433_v52 = vld [vmem:[#allocation5 + $0x2b8] sm:$0xf]  ;;  %v4114_v56 = vor.u32 %v5972_v47, %v4113_v46  ;;  %v5270_v46 = vor.u32 %v6262_v35, %v5269_v33  ;;  %v6192_v47 = vld [vmem:[#allocation5 + $0x728] sm:$0xf0]  ;;  %v4774_v32 = vor.u32 %v6137_v16, %v4773_v15  ;;  %v6310_v15 = vld [vmem:[#allocation7 + $0x218] sm:$0xf0] }
 0x10d   :  { %2346 = vmatpush.bf16.msrb.mxu1 %v4354_v53  ;;  %v6052_v53 = vld [vmem:[#allocation5 + $0x2c8] sm:$0xf0] }
 0x10e   :  { %2359 = vmatpush.bf16.msrb.mxu2 %v4514_v54  ;;  %v4593_v54 = vld [vmem:[#allocation5 + $0x3f8] sm:$0xf]  ;;  %v4434_v60 = vor.u32 %v6052_v53, %v4433_v52  ;;  %v6259_v52 = vld [vmem:[#allocation7 + $0x80] sm:$0xf0] }
 0x10f   :  { %2372 = vmatpush.bf16.msrb.mxu3 %v4674_v59  ;;  %v4274_v59 = vor.u32 %v6012_v51, %v4273_v48  ;;  %v5153_v48 = vld [vmem:[#allocation5 + $0x858] sm:$0xf] }
 0x110   :  { %2334 = vmatpush.bf16.msrb.mxu0 %v4174_v1  ;;  %v2108_v0 = vpop.f32.mrf.mxu2  ;;  %v4594_v1 = vor.u32 %v6092_v55, %v4593_v54  ;;  %v5257_v51 = vld [vmem:[#allocation7 + $0x78] sm:$0xf] }
 0x111   :  { %2347 = vmatpush.bf16.msrb.mxu1 %v4334_v4  ;;  %v6087_v4 = vld [vmem:[#allocation5 + $0x3e0] sm:$0xf0]  ;;  %v2121_v20 = vpop.f32.mrf.mxu3  ;;  %v5258_v58 = vor.u32 %v6259_v52, %v5257_v51  ;;  %v4733_v51 = vld [vmem:[#allocation5 + $0x510] sm:$0xf] }
 0x112   :  { %2360 = vmatpush.bf16.msrb.mxu2 %v4494_v5  ;;  %v4873_v5 = vld [vmem:[#allocation5 + $0x628] sm:$0xf]  ;;  %v4574_v23 = vor.u32 %v6087_v4, %v4573_v3  ;;  %v6142_v3 = vld [vmem:[#allocation5 + $0x598] sm:$0xf0]  ;;  %v4933_v20 = vld [vmem:[#allocation5 + $0x6a0] sm:$0xf] }
 0x113   :  { %2373 = vmatpush.bf16.msrb.mxu3 %v4654_v11  ;;  %v6242_v11 = vld [vmem:[#allocation5 + $0x8b8] sm:$0xf0]  ;;  %v4953_v4 = vld [vmem:[#allocation5 + $0x6c8] sm:$0xf] }
 0x114   :  { %2335 = vmatpush.bf16.msrb.mxu0 %v4154_v24  ;;  %v4874_v24 = vor.u32 %v6162_v6, %v4873_v5  ;;  %v6182_v6 = vld [vmem:[#allocation5 + $0x6d8] sm:$0xf0] }
 0x115   :  { %2348 = vmatpush.bf16.msrb.mxu1 %v4314_v25  ;;  %v5034_v25 = vor.u32 %v6202_v9, %v5033_v7  ;;  %v5113_v7 = vld [vmem:[#allocation5 + $0x808] sm:$0xf] }
 0x116   :  { %2361 = vmatpush.bf16.msrb.mxu2 %v4474_v26  ;;  %v5194_v26 = vor.u32 %v6242_v11, %v5193_v10  ;;  %v5233_v9 = vld [vmem:[#allocation7 + $0x48] sm:$0xf]  ;;  %v6253_v10 = vld [vmem:[#allocation7 + $0x50] sm:$0xf0]  ;;  %v4794_v11 = vor.u32 %v6142_v3, %v4793_v2 }
 0x117   :  { %2374 = vmatpush.bf16.msrb.mxu3 %v4634_v31  ;;  %v6197_v31 = vld [vmem:[#allocation5 + $0x750] sm:$0xf0] }
 0x118   :  { %2336 = vmatpush.bf16.msrb.mxu0 %v4134_v39  ;;  %v5014_v39 = vor.u32 %v6197_v31, %v5013_v29  ;;  %v6250_v29 = vld [vmem:[#allocation7 + $0x38] sm:$0xf0]  ;;  %v6313_v2 = vld [vmem:[#allocation7 + $0x230] sm:$0xf0] }
 0x119   :  { %2349 = vmatpush.bf16.msrb.mxu1 %v4294_v44  ;;  %v6152_v44 = vld [vmem:[#allocation5 + $0x5e8] sm:$0xf0] }
 0x11a   :  { %2362 = vmatpush.bf16.msrb.mxu2 %v4454_v45  ;;  %v4993_v45 = vld [vmem:[#allocation5 + $0x718] sm:$0xf]  ;;  %v4834_v53 = vor.u32 %v6152_v44, %v4833_v43  ;;  %v5222_v43 = vor.u32 %v6250_v29, %v5221_v28  ;;  %v6172_v44 = vld [vmem:[#allocation5 + $0x688] sm:$0xf0]  ;;  %v6283_v28 = vld [vmem:[#allocation7 + $0x140] sm:$0xf0] }
 0x11b   :  { %2375 = vmatpush.bf16.msrb.mxu3 %v4614_v50  ;;  %v6232_v50 = vld [vmem:[#allocation5 + $0x868] sm:$0xf0]  ;;  %v4994_v54 = vor.u32 %v6192_v47, %v4993_v45  ;;  %v5073_v45 = vld [vmem:[#allocation5 + $0x7b8] sm:$0xf] }
 0x11c   :  { %2337 = vmatpush.bf16.msrb.mxu0 %v4114_v56  ;;  %v5154_v55 = vor.u32 %v6232_v50, %v5153_v48  ;;  %v4813_v56 = vld [vmem:[#allocation5 + $0x5b0] sm:$0xf]  ;;  %v5209_v47 = vld [vmem:[#allocation7 + $0x18] sm:$0xf]  ;;  %v6247_v48 = vld [vmem:[#allocation7 + $0x20] sm:$0xf0] }
 0x11d   :  { %2350 = vmatpush.bf16.msrb.mxu1 %v4274_v59  ;;  %v6187_v59 = vld [vmem:[#allocation5 + $0x700] sm:$0xf0]  ;;  %v5449_v29 = vld [vmem:[#allocation7 + $0x1f8] sm:$0xf] }
 0x11e   :  { %2363 = vmatpush.bf16.msrb.mxu2 %v4434_v60  ;;  %v5133_v60 = vld [vmem:[#allocation5 + $0x830] sm:$0xf] }
 0x11f   :  { %2376 = vmatpush.bf16.msrb.mxu3 %v4594_v1  ;;  %v5134_v1 = vor.u32 %v6227_v61, %v5133_v60  ;;  %v6244_v61 = vld [vmem:[#allocation7 + $0x8] sm:$0xf0] }
 0x120   :  { %2338 = vmatpush.bf16.msrb.mxu0 %v4094_v8  ;;  %v6789_v63 = vpop.f32.mrf.mxu0  ;;  %v6222_v8 = vld [vmem:[#allocation5 + $0x818] sm:$0xf0] }
 0x121   :  { %2351 = vmatpush.bf16.msrb.mxu1 %v4254_v12  ;;  %v6791_v0 = vpop.f32.mrf.mxu1  ;;  %v4954_v12 = vor.u32 %v6182_v6, %v4953_v4 }
 0x122   :  { %2364 = vmatpush.bf16.msrb.mxu2 %v4414_v14  ;;  %v5114_v14 = vor.u32 %v6222_v8, %v5113_v7  ;;  %v5569_v7 = vld [vmem:[#allocation7 + $0x2e8] sm:$0xf]  ;;  %v6337_v8 = vld [vmem:[#allocation7 + $0x2f0] sm:$0xf0] }
 0x123   :  { %2377 = vmatpush.bf16.msrb.mxu3 %v4574_v23  ;;  %2339 = vmatmul.bf16.vlgmr.msrb.gmra.mxu0 %v6732_v19  ;;  %v6256_v19 = vld [vmem:[#allocation7 + $0x68] sm:$0xf0]  ;;  %v5234_v23 = vor.u32 %v6253_v10, %v5233_v9  ;;  %v2422_v9 = vmax.f32 %v6774_v36, 0.0  ;;  %v5570_v16 = vor.u32 %v6337_v8, %v5569_v7  ;;  %v5305_v7 = vld [vmem:[#allocation7 + $0xd8] sm:$0xf] }
 0x124   :  { %2383 = vmatpush.bf16.msra.mxu0 %v4874_v24  ;;  %2352 = vmatmul.bf16.vlgmr.msrb.gmra.mxu1 %v6734_v21  ;;  %v4814_v21 = vor.u32 %v6147_v57, %v4813_v56  ;;  %v5246_v5 = vor.u32 %v6256_v19, %v5245_v62  ;;  %v6177_v24 = vld [vmem:[#allocation5 + $0x6b0] sm:$0xf0]  ;;  %v6167_v56 = vld [vmem:[#allocation5 + $0x660] sm:$0xf0]  ;;  %v5210_v57 = vor.u32 %v6247_v48, %v5209_v47  ;;  %v5377_v62 = vld [vmem:[#allocation7 + $0x168] sm:$0xf] }
 0x125   :  { %2396 = vmatpush.bf16.msra.mxu1 %v5034_v25  ;;  %2365 = vmatmul.bf16.vlgmr.msrb.gmra.mxu2 %v6730_v18  ;;  %v4973_v18 = vld [vmem:[#allocation5 + $0x6f0] sm:$0xf]  ;;  %v5093_v25 = vld [vmem:[#allocation5 + $0x7e0] sm:$0xf]  ;;  %v4934_v33 = vor.u32 %v6177_v24, %v4933_v20  ;;  %v6289_v19 = vld [vmem:[#allocation7 + $0x170] sm:$0xf0] }
 0x126   :  { %2409 = vmatpush.bf16.msra.mxu2 %v5194_v26  ;;  %2378 = vmatmul.bf16.vlgmr.msrb.gmra.mxu3 %v6736_v22  ;;  %v4974_v22 = vor.u32 %v6187_v59, %v4973_v18  ;;  %v6217_v26 = vld [vmem:[#allocation5 + $0x7f0] sm:$0xf0]  ;;  %v5053_v18 = vld [vmem:[#allocation5 + $0x790] sm:$0xf]  ;;  %v5197_v59 = vld [vmem:[#allocation7] sm:$0xf]  ;;  %v5378_v6 = vor.u32 %v6289_v19, %v5377_v62 }
 0x127   :  { %3241 = vmatpush.bf16.msra.mxu3 %v5282_v30  ;;  %v5094_v35 = vor.u32 %v6217_v26, %v5093_v25  ;;  %v6334_v24 = vld [vmem:[#allocation7 + $0x2d8] sm:$0xf0]  ;;  %v6798_v25 = vpack.c.bf16 %v2422_v9, %v2422_v9  ;;  %v5353_v26 = vld [vmem:[#allocation7 + $0x138] sm:$0xf]  ;;  %v5329_v48 = vld [vmem:[#allocation7 + $0x108] sm:$0xf] }
 0x128   :  { %2384 = vmatpush.bf16.msra.mxu0 %v4854_v38  ;;  %v6793_v27 = vpop.f32.mrf.mxu2  ;;  %v2134_v31 = vpop.f32.mrf.mxu0  ;;  %v4753_v38 = vld [vmem:[#allocation5 + $0x538] sm:$0xf]  ;;  %v5413_v19 = vld [vmem:[#allocation7 + $0x1b0] sm:$0xf]  ;;  %v6271_v8 = vld [vmem:[#allocation7 + $0xe0] sm:$0xf0] }
 0x129   :  { %2397 = vmatpush.bf16.msra.mxu1 %v5014_v39  ;;  %v6795_v30 = vpop.f32.mrf.mxu3  ;;  %v2147_v17 = vpop.f32.mrf.mxu1  ;;  %v6132_v39 = vld [vmem:[#allocation5 + $0x548] sm:$0xf0]  ;;  %v6307_v31 = vld [vmem:[#allocation7 + $0x200] sm:$0xf0] }
 0x12a   :  { %2410 = vmatpush.bf16.msra.mxu2 %v5174_v42  ;;  %v4913_v42 = vld [vmem:[#allocation5 + $0x678] sm:$0xf]  ;;  %v4754_v50 = vor.u32 %v6132_v39, %v4753_v38  ;;  %v5354_v17 = vor.u32 %v6283_v28, %v5353_v26  ;;  %v5450_v38 = vor.u32 %v6307_v31, %v5449_v29  ;;  %v6280_v39 = vld [vmem:[#allocation7 + $0x128] sm:$0xf0] }
 0x12b   :  { %3242 = vmatpush.bf16.msra.mxu3 %v5270_v46  ;;  %v6212_v46 = vld [vmem:[#allocation5 + $0x7c8] sm:$0xf0]  ;;  %v4914_v52 = vor.u32 %v6172_v44, %v4913_v42  ;;  %v5437_v42 = vld [vmem:[#allocation7 + $0x1e0] sm:$0xf]  ;;  %v5283_v31 = vld [vmem:[#allocation7 + $0xb4] sm:$0xf0] }
 0x12c   :  { %2385 = vmatpush.bf16.msra.mxu0 %v4834_v53  ;;  %v5074_v53 = vor.u32 %v6212_v46, %v5073_v45  ;;  %v5533_v45 = vld [vmem:[#allocation7 + $0x2a0] sm:$0xf]  ;;  %v6328_v46 = vld [vmem:[#allocation7 + $0x2a8] sm:$0xf0] }
 0x12d   :  { %2398 = vmatpush.bf16.msra.mxu1 %v4994_v54  ;;  %v6127_v54 = vld [vmem:[#allocation5 + $0x520] sm:$0xf0]  ;;  %v6292_v28 = vld [vmem:[#allocation7 + $0x188] sm:$0xf0] }
 0x12e   :  { %2411 = vmatpush.bf16.msra.mxu2 %v5154_v55  ;;  %v4893_v55 = vld [vmem:[#allocation5 + $0x650] sm:$0xf]  ;;  %v6264_v29 = vld [vmem:[#allocation7 + $0xac] sm:$0xf] }
 0x12f   :  { %3243 = vmatpush.bf16.msra.mxu3 %v5258_v58  ;;  %v6207_v58 = vld [vmem:[#allocation5 + $0x7a0] sm:$0xf0]  ;;  %v4894_v3 = vor.u32 %v6167_v56, %v4893_v55  ;;  %v478_v55 = vperm.slane %v6764_v13, 2 }
 0x130   :  { %2386 = vmatpush.bf16.msra.mxu0 %v4814_v21  ;;  %v2160_v60 = vpop.f32.mrf.mxu2  ;;  %v5054_v4 = vor.u32 %v6207_v58, %v5053_v18  ;;  %v6325_v18 = vld [vmem:[#allocation7 + $0x290] sm:$0xf0]  ;;  %v2120_v58 = vadd.f32 %v6783_v49, %v6781_v34 }
 0x131   :  { %2399 = vmatpush.bf16.msra.mxu1 %v4974_v22  ;;  %v2173_v21 = vpop.f32.mrf.mxu3  ;;  %v4734_v22 = vor.u32 %v6127_v54, %v4733_v51  ;;  %v5534_v54 = vor.u32 %v6328_v46, %v5533_v45  ;;  %v5317_v60 = vld [vmem:[#allocation7 + $0xf0] sm:$0xf]  ;;  %v6261_v46 = vld [vmem:[#allocation7 + $0x94] sm:$0xf] }
 0x132   :  { %2412 = vmatpush.bf16.msra.mxu2 %v5134_v1  ;;  %v5473_v1 = vld [vmem:[#allocation7 + $0x228] sm:$0xf]  ;;  %v6298_v21 = vld [vmem:[#allocation7 + $0x1b8] sm:$0xf0]  ;;  %v2133_v34 = vadd.f32 %v6789_v63, %v2120_v58  ;;  %v5293_v63 = vld [vmem:[#allocation7 + $0xc0] sm:$0xf] }
 0x133   :  { %3244 = vmatpush.bf16.msra.mxu3 %v5246_v5  ;;  %v5198_v5 = vor.u32 %v6244_v61, %v5197_v59  ;;  %v5474_v10 = vor.u32 %v6313_v2, %v5473_v1  ;;  %v6274_v61 = vld [vmem:[#allocation7 + $0xf8] sm:$0xf0]  ;;  %v2159_v2 = vadd.f32 %v6793_v27, %v478_v55  ;;  %v5414_v49 = vor.u32 %v6298_v21, %v5413_v19 }
 0x134   :  { %2387 = vmatpush.bf16.msra.mxu0 %v4794_v11  ;;  %v5365_v11 = vld [vmem:[#allocation7 + $0x150] sm:$0xf]  ;;  %v5306_v27 = vor.u32 %v6271_v8, %v5305_v7  ;;  %v6258_v58 = vld [vmem:[#allocation7 + $0x7c] sm:$0xf] }
 0x135   :  { %2400 = vmatpush.bf16.msra.mxu1 %v4954_v12  ;;  %v6286_v12 = vld [vmem:[#allocation7 + $0x158] sm:$0xf0] }
 0x136   :  { %2413 = vmatpush.bf16.msra.mxu2 %v5114_v14  ;;  %v5461_v14 = vld [vmem:[#allocation7 + $0x210] sm:$0xf]  ;;  %v5366_v20 = vor.u32 %v6286_v12, %v5365_v11  ;;  %v6295_v11 = vld [vmem:[#allocation7 + $0x1a0] sm:$0xf0] }
 0x137   :  { %3245 = vmatpush.bf16.msra.mxu3 %v5234_v23  ;;  %v5557_v23 = vld [vmem:[#allocation7 + $0x2d0] sm:$0xf]  ;;  %v5462_v36 = vor.u32 %v6310_v15, %v5461_v14  ;;  %v2172_v14 = vadd.f32 %v6795_v30, %v2159_v2  ;;  %v5497_v15 = vld [vmem:[#allocation7 + $0x258] sm:$0xf]  ;;  %v5451_v2 = vld [vmem:[#allocation7 + $0x204] sm:$0xf0] }
 0x138   :  { %2388 = vmatpush.bf16.msra.mxu0 %v4774_v32  ;;  %v5558_v32 = vor.u32 %v6334_v24, %v5557_v23  ;;  %v6268_v24 = vld [vmem:[#allocation7 + $0xc8] sm:$0xf0] }
 0x139   :  { %2401 = vmatpush.bf16.msra.mxu1 %v4934_v33  ;;  %v5545_v33 = vld [vmem:[#allocation7 + $0x2b8] sm:$0xf] }
 0x13a   :  { %2414 = vmatpush.bf16.msra.mxu2 %v5094_v35  ;;  %v6331_v35 = vld [vmem:[#allocation7 + $0x2c0] sm:$0xf0] }
 0x13b   :  { %3246 = vmatpush.bf16.msra.mxu3 %v5222_v43  ;;  %v6304_v43 = vld [vmem:[#allocation7 + $0x1e8] sm:$0xf0] }
 0x13c   :  { %2389 = vmatpush.bf16.msra.mxu0 %v4754_v50  ;;  %v5438_v47 = vor.u32 %v6304_v43, %v5437_v42  ;;  %v6277_v50 = vld [vmem:[#allocation7 + $0x110] sm:$0xf0]  ;;  %v5286_v43 = vor.u32 %v6264_v29, %v5283_v31  ;;  %v5223_v31 = vld [vmem:[#allocation7 + $0x3c] sm:$0xf0] }
 0x13d   :  { %2402 = vmatpush.bf16.msra.mxu1 %v4914_v52  ;;  %v5425_v52 = vld [vmem:[#allocation7 + $0x1c8] sm:$0xf]  ;;  %v5330_v56 = vor.u32 %v6277_v50, %v5329_v48  ;;  %v6285_v48 = vld [vmem:[#allocation7 + $0x154] sm:$0xf]  ;;  %v5367_v50 = vld [vmem:[#allocation7 + $0x15c] sm:$0xf0] }
 0x13e   :  { %2415 = vmatpush.bf16.msra.mxu2 %v5074_v53  ;;  %v6301_v53 = vld [vmem:[#allocation7 + $0x1d0] sm:$0xf0] }
 0x13f   :  { %3247 = vmatpush.bf16.msra.mxu3 %v5210_v57  ;;  %v5521_v57 = vld [vmem:[#allocation7 + $0x288] sm:$0xf]  ;;  %v5426_v59 = vor.u32 %v6301_v53, %v5425_v52  ;;  %v6249_v29 = vld [vmem:[#allocation7 + $0x34] sm:$0xf] }
 0x140   :  { %2390 = vmatpush.bf16.msra.mxu0 %v4734_v22  ;;  %v6804_v44 = vpop.f32.mrf.mxu0  ;;  %v5522_v1 = vor.u32 %v6325_v18, %v5521_v57  ;;  %v5463_v57 = vld [vmem:[#allocation7 + $0x21c] sm:$0xf0]  ;;  %v5370_v18 = vor.u32 %v6285_v48, %v5367_v50  ;;  %v6294_v48 = vld [vmem:[#allocation7 + $0x19c] sm:$0xf] }
 0x141   :  { %2403 = vmatpush.bf16.msra.mxu1 %v4894_v3  ;;  %v6806_v51 = vpop.f32.mrf.mxu1  ;;  %v5318_v3 = vor.u32 %v6274_v61, %v5317_v60  ;;  %v6282_v60 = vld [vmem:[#allocation7 + $0x13c] sm:$0xf]  ;;  %v5355_v61 = vld [vmem:[#allocation7 + $0x144] sm:$0xf0] }
 0x142   :  { %2416 = vmatpush.bf16.msra.mxu2 %v5054_v4 }
 0x143   :  { %3248 = vmatpush.bf16.msra.mxu3 %v5198_v5  ;;  %2391 = vmatmul.bf16.vlgmr.msra.gmra.mxu0 %v6744_v40  ;;  %v5341_v40 = vld [vmem:[#allocation7 + $0x120] sm:$0xf]  ;;  %v5509_v5 = vld [vmem:[#allocation7 + $0x270] sm:$0xf] }
 0x144   :  { %3254 = vmatpush.bf16.msrb.mxu0 %v5378_v6  ;;  %2404 = vmatmul.bf16.vlgmr.msra.gmra.mxu1 %v6746_v41  ;;  %v5546_v41 = vor.u32 %v6331_v35, %v5545_v33  ;;  %v6322_v6 = vld [vmem:[#allocation7 + $0x278] sm:$0xf0]  ;;  %v5379_v33 = vld [vmem:[#allocation7 + $0x174] sm:$0xf0]  ;;  %v2185_v35 = vadd.f32 %v6804_v44, %v2172_v14  ;;  %v6252_v14 = vld [vmem:[#allocation7 + $0x4c] sm:$0xf] }
 0x145   :  { %3267 = vmatpush.bf16.msrb.mxu1 %v5474_v10  ;;  %2417 = vmatmul.bf16.vlgmr.msra.gmra.mxu2 %v6742_v37  ;;  %v5342_v37 = vor.u32 %v6280_v39, %v5341_v40  ;;  %v5401_v10 = vld [vmem:[#allocation7 + $0x198] sm:$0xf]  ;;  %v5510_v12 = vor.u32 %v6322_v6, %v5509_v5  ;;  %v5485_v40 = vld [vmem:[#allocation7 + $0x240] sm:$0xf]  ;;  %v5247_v5 = vld [vmem:[#allocation7 + $0x6c] sm:$0xf0] }
 0x146   :  { %3249 = vmatmul.bf16.vlgmr.msra.gmra.mxu3 %v6798_v25  ;;  %3280 = vmatpush.bf16.msrb.mxu2 %v5570_v16  ;;  %v6319_v16 = vld [vmem:[#allocation7 + $0x260] sm:$0xf0]  ;;  %v5402_v23 = vor.u32 %v6295_v11, %v5401_v10  ;;  %v2198_v53 = vadd.f32 %v6806_v51, %v2185_v35  ;;  %v5439_v10 = vld [vmem:[#allocation7 + $0x1ec] sm:$0xf0] }
 0x147   :  { %v5498_v30 = vor.u32 %v6319_v16, %v5497_v15  ;;  %v6279_v6 = vld [vmem:[#allocation7 + $0x124] sm:$0xf]  ;;  %v6276_v15 = vld [vmem:[#allocation7 + $0x10c] sm:$0xf]  ;;  %v5331_v16 = vld [vmem:[#allocation7 + $0x114] sm:$0xf0] }
 0x148   :  { %3255 = vmatpush.bf16.msrb.mxu0 %v5366_v20  ;;  %v6811_v62 = vpop.f32.mrf.mxu2  ;;  %v2186_v4 = vpop.f32.mrf.mxu0  ;;  %v2146_v20 = vadd.f32 %v6791_v0, %v2133_v34  ;;  %v6316_v0 = vld [vmem:[#allocation7 + $0x248] sm:$0xf0]  ;;  %v5343_v34 = vld [vmem:[#allocation7 + $0x12c] sm:$0xf0] }
 0x149   :  { %3268 = vmatpush.bf16.msrb.mxu1 %v5462_v36  ;;  %v6813_v22 = vpop.f32.mrf.mxu3  ;;  %v2199_v9 = vpop.f32.mrf.mxu1  ;;  %v5389_v36 = vld [vmem:[#allocation7 + $0x180] sm:$0xf]  ;;  %v5486_v52 = vor.u32 %v6316_v0, %v5485_v40  ;;  %v2211_v51 = vadd.f32 %v6811_v62, %v2198_v53  ;;  %v6255_v4 = vld [vmem:[#allocation7 + $0x64] sm:$0xf]  ;;  %v6297_v0 = vld [vmem:[#allocation7 + $0x1b4] sm:$0xf] }
 0x14a   :  { %3281 = vmatpush.bf16.msrb.mxu2 %v5558_v32  ;;  %v2423_v39 = vmax.f32 %v2146_v20, 0.0  ;;  %v5390_v42 = vor.u32 %v6292_v28, %v5389_v36  ;;  %v5250_v9 = vor.u32 %v6255_v4, %v5247_v5  ;;  %v6303_v62 = vld [vmem:[#allocation7 + $0x1e4] sm:$0xf]  ;;  %v5427_v36 = vld [vmem:[#allocation7 + $0x1d4] sm:$0xf0]  ;;  %v5334_v28 = vor.u32 %v6276_v15, %v5331_v16 }
 0x14b   :  { %v5665_v53 = vld [vmem:[#allocation7 + $0x3a8] sm:$0xf]  ;;  %v5391_v4 = vld [vmem:[#allocation7 + $0x18c] sm:$0xf0]  ;;  %v5629_v15 = vld [vmem:[#allocation7 + $0x360] sm:$0xf] }
 0x14c   :  { %3256 = vmatpush.bf16.msrb.mxu0 %v5354_v17  ;;  %v6288_v17 = vld [vmem:[#allocation7 + $0x16c] sm:$0xf]  ;;  %v5653_v5 = vld [vmem:[#allocation7 + $0x390] sm:$0xf] }
 0x14d   :  { %3269 = vmatpush.bf16.msrb.mxu1 %v5450_v38  ;;  %v5294_v38 = vor.u32 %v6268_v24, %v5293_v63  ;;  %v5382_v45 = vor.u32 %v6288_v17, %v5379_v33  ;;  %v5442_v63 = vor.u32 %v6303_v62, %v5439_v10  ;;  %v6300_v24 = vld [vmem:[#allocation7 + $0x1cc] sm:$0xf]  ;;  %v5319_v17 = vld [vmem:[#allocation7 + $0xfc] sm:$0xf0] }
 0x14e   :  { %3282 = vmatpush.bf16.msrb.mxu2 %v5546_v41  ;;  %v6312_v41 = vld [vmem:[#allocation7 + $0x22c] sm:$0xf]  ;;  %v5430_v35 = vor.u32 %v6300_v24, %v5427_v36  ;;  %v5667_v24 = vld [vmem:[#allocation7 + $0x3b4] sm:$0xf0] }
 0x14f   :  { %v6352_v16 = vld [vmem:[#allocation7 + $0x368] sm:$0xf0] }
 0x150   :  { %3257 = vmatpush.bf16.msrb.mxu0 %v5342_v37  ;;  %v2212_v26 = vpop.f32.mrf.mxu2  ;;  %v5475_v37 = vld [vmem:[#allocation7 + $0x234] sm:$0xf0] }
 0x151   :  { %3270 = vmatpush.bf16.msrb.mxu1 %v5438_v47  ;;  %v2225_v32 = vpop.f32.mrf.mxu3  ;;  %v5271_v47 = vld [vmem:[#allocation7 + $0x9c] sm:$0xf0]  ;;  %v5478_v44 = vor.u32 %v6312_v41, %v5475_v37  ;;  %v5211_v41 = vld [vmem:[#allocation7 + $0x24] sm:$0xf0]  ;;  %v6270_v37 = vld [vmem:[#allocation7 + $0xdc] sm:$0xf] }
 0x152   :  { %3283 = vmatpush.bf16.msrb.mxu2 %v5534_v54  ;;  %v6821_v54 = vpack.c.bf16 %v2423_v39, %v2423_v39  ;;  %v5274_v55 = vor.u32 %v6261_v46, %v5271_v47  ;;  %v6273_v32 = vld [vmem:[#allocation7 + $0xf4] sm:$0xf]  ;;  %v5415_v39 = vld [vmem:[#allocation7 + $0x1bc] sm:$0xf0] }
 0x153   :  { %v5418_v47 = vor.u32 %v6297_v0, %v5415_v39  ;;  %v6357_v0 = vld [vmem:[#allocation7 + $0x394] sm:$0xf]  ;;  %v5655_v39 = vld [vmem:[#allocation7 + $0x39c] sm:$0xf0] }
 0x154   :  { %3258 = vmatpush.bf16.msrb.mxu0 %v5330_v56  ;;  %v6309_v56 = vld [vmem:[#allocation7 + $0x214] sm:$0xf] }
 0x155   :  { %3271 = vmatpush.bf16.msrb.mxu1 %v5426_v59  ;;  %v5259_v59 = vld [vmem:[#allocation7 + $0x84] sm:$0xf0]  ;;  %v5466_v19 = vor.u32 %v6309_v56, %v5463_v57  ;;  %v6243_v56 = vld [vmem:[#allocation7 + $0x4] sm:$0xf]  ;;  %v5199_v57 = vld [vmem:[#allocation7 + $0xc] sm:$0xf0] }
 0x156   :  { %3284 = vmatpush.bf16.msrb.mxu2 %v5522_v1  ;;  %v5262_v21 = vor.u32 %v6258_v58, %v5259_v59  ;;  %v6306_v1 = vld [vmem:[#allocation7 + $0x1fc] sm:$0xf]  ;;  %v479_v58 = vperm.slane %v6764_v13, 3  ;;  %v6267_v59 = vld [vmem:[#allocation7 + $0xc4] sm:$0xf] }
 0x157   :  { %v5454_v7 = vor.u32 %v6306_v1, %v5451_v2  ;;  %v6291_v2 = vld [vmem:[#allocation7 + $0x184] sm:$0xf] }
 0x158   :  { %3259 = vmatpush.bf16.msrb.mxu0 %v5318_v3  ;;  %v5358_v3 = vor.u32 %v6282_v60, %v5355_v61  ;;  %v5295_v60 = vld [vmem:[#allocation7 + $0xcc] sm:$0xf0]  ;;  %v5394_v62 = vor.u32 %v6291_v2, %v5391_v4  ;;  %v5217_v2 = vld [vmem:[#allocation7 + $0x20] sm:$0xf] }
 0x159   :  { %3272 = vmatpush.bf16.msrb.mxu1 %v5414_v49  ;;  %v2224_v49 = vadd.f32 %v6813_v22, %v2211_v51  ;;  %v5289_v61 = vld [vmem:[#allocation7 + $0xb0] sm:$0xf]  ;;  %v6266_v51 = vld [vmem:[#allocation7 + $0xb8] sm:$0xf0] }
 0x15a   :  { %3285 = vmatpush.bf16.msrb.mxu2 %v5510_v12  ;;  %v5346_v12 = vor.u32 %v6279_v6, %v5343_v34  ;;  %v6358_v6 = vld [vmem:[#allocation7 + $0x398] sm:$0xf0]  ;;  %v5298_v34 = vor.u32 %v6267_v59, %v5295_v60  ;;  %v6251_v59 = vld [vmem:[#allocation7 + $0x40] sm:$0xf0]  ;;  %v5631_v60 = vld [vmem:[#allocation7 + $0x36c] sm:$0xf0] }
 0x15c   :  { %3260 = vmatpush.bf16.msrb.mxu0 %v5306_v27  ;;  %v5235_v27 = vld [vmem:[#allocation7 + $0x54] sm:$0xf0] }
 0x15d   :  { %3273 = vmatpush.bf16.msrb.mxu1 %v5402_v23  ;;  %v5238_v22 = vor.u32 %v6252_v14, %v5235_v27 }
 0x15e   :  { %3286 = vmatpush.bf16.msrb.mxu2 %v5498_v30 }
 0x160   :  { %3261 = vmatpush.bf16.msrb.mxu0 %v5294_v38  ;;  %v2236_v8 = vpop.f32.mrf.mxu0  ;;  %v5226_v38 = vor.u32 %v6249_v29, %v5223_v31  ;;  %v5617_v31 = vld [vmem:[#allocation7 + $0x348] sm:$0xf] }
 0x161   :  { %3274 = vmatpush.bf16.msrb.mxu1 %v5390_v42  ;;  %v2237_v11 = vadd.f32 %v2236_v8, %v2224_v49  ;;  %v6826_v20 = vpop.f32.mrf.mxu1  ;;  %v5322_v42 = vor.u32 %v6273_v32, %v5319_v17  ;;  %v5654_v49 = vor.u32 %v6358_v6, %v5653_v5  ;;  %v5277_v8 = vld [vmem:[#allocation7 + $0x98] sm:$0xf]  ;;  %v6349_v32 = vld [vmem:[#allocation7 + $0x350] sm:$0xf0]  ;;  %v5253_v17 = vld [vmem:[#allocation7 + $0x68] sm:$0xf] }
 0x162   :  { %3287 = vmatpush.bf16.msrb.mxu2 %v5486_v52  ;;  %v5403_v52 = vld [vmem:[#allocation7 + $0x1a4] sm:$0xf0]  ;;  %v2250_v10 = vadd.f32 %v6826_v20, %v479_v58  ;;  %v5630_v20 = vor.u32 %v6352_v16, %v5629_v15  ;;  %v5229_v58 = vld [vmem:[#allocation7 + $0x38] sm:$0xf]  ;;  %v5385_v5 = vld [vmem:[#allocation7 + $0x170] sm:$0xf] }
 0x163   :  { %3262 = vmatmul.bf16.vlgmr.msrb.gmra.mxu0 %v6821_v54  ;;  %v2424_v23 = vmax.f32 %v2237_v11, 0.0  ;;  %v5406_v1 = vor.u32 %v6294_v48, %v5403_v52  ;;  %v5641_v11 = vld [vmem:[#allocation7 + $0x378] sm:$0xf]  ;;  %v5643_v48 = vld [vmem:[#allocation7 + $0x384] sm:$0xf0]  ;;  %v5230_v4 = vor.u32 %v6251_v59, %v5229_v58 }
 0x164   :  { %3306 = vmatpush.bf16.msra.mxu0 %v5286_v43  ;;  %v6246_v43 = vld [vmem:[#allocation7 + $0x1c] sm:$0xf]  ;;  %v5205_v15 = vld [vmem:[#allocation7 + $0x8] sm:$0xf]  ;;  %v6245_v16 = vld [vmem:[#allocation7 + $0x10] sm:$0xf0] }
 0x165   :  { %3319 = vmatpush.bf16.msra.mxu1 %v5382_v45  ;;  %v6828_v26 = vpack.c.bf16 %v2424_v23, %v2424_v23  ;;  %v5307_v45 = vld [vmem:[#allocation7 + $0xe4] sm:$0xf0]  ;;  %v5214_v50 = vor.u32 %v6246_v43, %v5211_v41  ;;  %v6360_v23 = vld [vmem:[#allocation7 + $0x3ac] sm:$0xf]  ;;  %v5658_v43 = vor.u32 %v6357_v0, %v5655_v39  ;;  %v5605_v41 = vld [vmem:[#allocation7 + $0x330] sm:$0xf] }
 0x166   :  { %3332 = vmatpush.bf16.msra.mxu2 %v5478_v44  ;;  %v6361_v44 = vld [vmem:[#allocation7 + $0x3b0] sm:$0xf0]  ;;  %v6290_v6 = vld [vmem:[#allocation7 + $0x178] sm:$0xf0]  ;;  %v5535_v58 = vld [vmem:[#allocation7 + $0x2ac] sm:$0xf0] }
 0x167   :  { %3275 = vmatmul.bf16.vlgmr.msrb.gmra.mxu1 %v6828_v26  ;;  %v5577_v59 = vld [vmem:[#allocation7 + $0x2f0] sm:$0xf] }
 0x168   :  { %3307 = vmatpush.bf16.msra.mxu0 %v5274_v55  ;;  %v6831_v33 = vpop.f32.mrf.mxu2  ;;  %v2238_v40 = vpop.f32.mrf.mxu0  ;;  %v5310_v55 = vor.u32 %v6270_v37, %v5307_v45  ;;  %v6346_v37 = vld [vmem:[#allocation7 + $0x338] sm:$0xf0] }
 0x169   :  { %3320 = vmatpush.bf16.msra.mxu1 %v5370_v18  ;;  %v6833_v30 = vpop.f32.mrf.mxu3  ;;  %v2251_v46 = vpop.f32.mrf.mxu1  ;;  %v5666_v18 = vor.u32 %v6361_v44, %v5665_v53  ;;  %v2263_v36 = vadd.f32 %v6831_v33, %v2250_v10  ;;  %v5618_v40 = vor.u32 %v6349_v32, %v5617_v31  ;;  %v5606_v53 = vor.u32 %v6346_v37, %v5605_v41  ;;  %v5559_v31 = vld [vmem:[#allocation7 + $0x2dc] sm:$0xf0]  ;;  %v6345_v32 = vld [vmem:[#allocation7 + $0x334] sm:$0xf]  ;;  %v5547_v37 = vld [vmem:[#allocation7 + $0x2c4] sm:$0xf0] }
 0x16a   :  { %3333 = vmatpush.bf16.msra.mxu2 %v5466_v19  ;;  %v6254_v46 = vld [vmem:[#allocation7 + $0x58] sm:$0xf0] }
 0x16b   :  { %3293 = vmatpush.bf16.msrb.mxu3 %v5666_v18  ;;  %v6351_v18 = vld [vmem:[#allocation7 + $0x364] sm:$0xf] }
 0x16c   :  { %3308 = vmatpush.bf16.msra.mxu0 %v5262_v21 }
 0x16d   :  { %3321 = vmatpush.bf16.msra.mxu1 %v5358_v3  ;;  %v5202_v3 = vor.u32 %v6243_v56, %v5199_v57  ;;  %v5593_v56 = vld [vmem:[#allocation7 + $0x318] sm:$0xf]  ;;  %v6343_v57 = vld [vmem:[#allocation7 + $0x320] sm:$0xf0] }
 0x16e   :  { %3334 = vmatpush.bf16.msra.mxu2 %v5454_v7  ;;  %v5290_v7 = vor.u32 %v6266_v51, %v5289_v61  ;;  %v5594_v51 = vor.u32 %v6343_v57, %v5593_v56  ;;  %v6339_v56 = vld [vmem:[#allocation7 + $0x304] sm:$0xf]  ;;  %v5583_v57 = vld [vmem:[#allocation7 + $0x30c] sm:$0xf0] }
 0x16f   :  { %3294 = vmatpush.bf16.msrb.mxu3 %v5654_v49 }
 0x170   :  { %3309 = vmatpush.bf16.msra.mxu0 %v5250_v9  ;;  %v2264_v19 = vpop.f32.mrf.mxu2  ;;  %v6263_v9 = vld [vmem:[#allocation7 + $0xa0] sm:$0xf0] }
 0x171   :  { %3322 = vmatpush.bf16.msra.mxu1 %v5346_v12  ;;  %v2277_v21 = vpop.f32.mrf.mxu3  ;;  %v6355_v12 = vld [vmem:[#allocation7 + $0x380] sm:$0xf0]  ;;  %v5278_v27 = vor.u32 %v6263_v9, %v5277_v8  ;;  %v5634_v19 = vor.u32 %v6351_v18, %v5631_v60  ;;  %v6340_v8 = vld [vmem:[#allocation7 + $0x308] sm:$0xf0]  ;;  %v6338_v60 = vld [vmem:[#allocation7 + $0x2f8] sm:$0xf0] }
 0x172   :  { %3335 = vmatpush.bf16.msra.mxu2 %v5442_v63  ;;  %v5642_v14 = vor.u32 %v6355_v12, %v5641_v11  ;;  %v5265_v63 = vld [vmem:[#allocation7 + $0x80] sm:$0xf]  ;;  %v6336_v9 = vld [vmem:[#allocation7 + $0x2ec] sm:$0xf] }
 0x173   :  { %v6348_v12 = vld [vmem:[#allocation7 + $0x34c] sm:$0xf] }
 0x174   :  { %3310 = vmatpush.bf16.msra.mxu0 %v5238_v22  ;;  %v6260_v22 = vld [vmem:[#allocation7 + $0x88] sm:$0xf0]  ;;  %3295 = vmatpush.bf16.msrb.mxu3 %v5642_v14  ;;  %v5619_v14 = vld [vmem:[#allocation7 + $0x354] sm:$0xf0] }
 0x175   :  { %3323 = vmatpush.bf16.msra.mxu1 %v5334_v28  ;;  %v5670_v28 = vor.u32 %v6360_v23, %v5667_v24  ;;  %v5266_v29 = vor.u32 %v6260_v22, %v5265_v63  ;;  %v5622_v63 = vor.u32 %v6348_v12, %v5619_v14  ;;  %v5386_v24 = vor.u32 %v6290_v6, %v5385_v5  ;;  %v5337_v6 = vld [vmem:[#allocation7 + $0x110] sm:$0xf]  ;;  %v6335_v12 = vld [vmem:[#allocation7 + $0x2e0] sm:$0xf0]  ;;  %v5325_v14 = vld [vmem:[#allocation7 + $0xf8] sm:$0xf] }
 0x176   :  { %3336 = vmatpush.bf16.msra.mxu2 %v5430_v35  ;;  %v6257_v35 = vld [vmem:[#allocation7 + $0x70] sm:$0xf0] }
 0x177   :  { %v5254_v33 = vor.u32 %v6257_v35, %v5253_v17  ;;  %v5607_v17 = vld [vmem:[#allocation7 + $0x33c] sm:$0xf0] }
 0x178   :  { %3311 = vmatpush.bf16.msra.mxu0 %v5226_v38  ;;  %v2276_v38 = vadd.f32 %v6833_v30, %v2263_v36  ;;  %3296 = vmatpush.bf16.msrb.mxu3 %v5630_v20  ;;  %v5373_v36 = vld [vmem:[#allocation7 + $0x158] sm:$0xf]  ;;  %v6287_v20 = vld [vmem:[#allocation7 + $0x160] sm:$0xf0]  ;;  %v5610_v0 = vor.u32 %v6345_v32, %v5607_v17  ;;  %v5553_v32 = vld [vmem:[#allocation7 + $0x2c0] sm:$0xf] }
 0x179   :  { %3324 = vmatpush.bf16.msra.mxu1 %v5322_v42  ;;  %v5241_v42 = vld [vmem:[#allocation7 + $0x50] sm:$0xf]  ;;  %v5374_v41 = vor.u32 %v6287_v20, %v5373_v36  ;;  %v6332_v17 = vld [vmem:[#allocation7 + $0x2c8] sm:$0xf0] }
 0x17a   :  { %3337 = vmatpush.bf16.msra.mxu2 %v5418_v47  ;;  %v6354_v47 = vld [vmem:[#allocation7 + $0x37c] sm:$0xf] }
 0x17b   :  { %v5646_v30 = vor.u32 %v6354_v47, %v5643_v48  ;;  %v5361_v47 = vld [vmem:[#allocation7 + $0x140] sm:$0xf]  ;;  %v6284_v48 = vld [vmem:[#allocation7 + $0x148] sm:$0xf0] }
 0x17c   :  { %3312 = vmatpush.bf16.msra.mxu0 %v5214_v50  ;;  %3297 = vmatpush.bf16.msrb.mxu3 %v5618_v40  ;;  %v6362_v40 = vld [vmem:[#allocation7 + $0x3b8] sm:$0xf0]  ;;  %v5362_v18 = vor.u32 %v6284_v48, %v5361_v47  ;;  %v6329_v47 = vld [vmem:[#allocation7 + $0x2b0] sm:$0xf0]  ;;  %v5301_v48 = vld [vmem:[#allocation7 + $0xc8] sm:$0xf] }
 0x17d   :  { %3325 = vmatpush.bf16.msra.mxu1 %v5310_v55  ;;  %v5242_v55 = vor.u32 %v6254_v46, %v5241_v42  ;;  %v6330_v42 = vld [vmem:[#allocation7 + $0x2bc] sm:$0xf]  ;;  %v5595_v46 = vld [vmem:[#allocation7 + $0x324] sm:$0xf0] }
 0x17e   :  { %3338 = vmatpush.bf16.msra.mxu2 %v5406_v1 }
 0x180   :  { %3313 = vmatpush.bf16.msra.mxu0 %v5202_v3  ;;  %v2288_v45 = vpop.f32.mrf.mxu0  ;;  %3298 = vmatpush.bf16.msrb.mxu3 %v5606_v53  ;;  %v6248_v3 = vld [vmem:[#allocation7 + $0x28] sm:$0xf0]  ;;  %v6359_v53 = vld [vmem:[#allocation7 + $0x3a0] sm:$0xf0] }
 0x181   :  { %3326 = vmatpush.bf16.msra.mxu1 %v5298_v34  ;;  %v2289_v50 = vadd.f32 %v2288_v45, %v2276_v38  ;;  %v2301_v52 = vpop.f32.mrf.mxu1  ;;  %v5581_v34 = vld [vmem:[#allocation7 + $0x300] sm:$0xf]  ;;  %v5218_v22 = vor.u32 %v6248_v3, %v5217_v2  ;;  %v5673_v38 = vld [vmem:[#allocation7 + $0x3b0] sm:$0xf]  ;;  %v6342_v45 = vld [vmem:[#allocation7 + $0x31c] sm:$0xf]  ;;  %v5586_v2 = vor.u32 %v6339_v56, %v5583_v57 }
 0x182   :  { %3339 = vmatpush.bf16.msra.mxu2 %v5394_v62  ;;  %v5571_v62 = vld [vmem:[#allocation7 + $0x2f4] sm:$0xf0]  ;;  %v5582_v11 = vor.u32 %v6340_v8, %v5581_v34  ;;  %v6278_v34 = vld [vmem:[#allocation7 + $0x118] sm:$0xf0]  ;;  %v6353_v8 = vld [vmem:[#allocation7 + $0x370] sm:$0xf0] }
 0x183   :  { %3314 = vmatmul.bf16.vlgmr.msra.gmra.mxu0 %v6798_v25  ;;  %v2302_v44 = vadd.f32 %v2301_v52, %v2289_v50  ;;  %v5574_v23 = vor.u32 %v6336_v9, %v5571_v62  ;;  %v5674_v50 = vor.u32 %v6362_v40, %v5673_v38  ;;  %v5661_v52 = vld [vmem:[#allocation7 + $0x398] sm:$0xf]  ;;  %v6324_v9 = vld [vmem:[#allocation7 + $0x28c] sm:$0xf] }
 0x184   :  { %3327 = vmatmul.bf16.vlgmr.msra.gmra.mxu1 %v6821_v54  ;;  %3358 = vmatpush.bf16.msrb.mxu0 %v5670_v28  ;;  %v6333_v28 = vld [vmem:[#allocation7 + $0x2d4] sm:$0xf]  ;;  %v5523_v62 = vld [vmem:[#allocation7 + $0x294] sm:$0xf0]  ;;  %v6272_v38 = vld [vmem:[#allocation7 + $0xe8] sm:$0xf0] }
 0x185   :  { %3371 = vmatpush.bf16.msrb.mxu1 %v5290_v7  ;;  %3299 = vmatpush.bf16.msrb.mxu3 %v5594_v51  ;;  %v6281_v51 = vld [vmem:[#allocation7 + $0x130] sm:$0xf0] }
 0x188   :  { %3359 = vmatpush.bf16.msrb.mxu0 %v5658_v43  ;;  %v2314_v61 = vpop.f32.mrf.mxu2  ;;  %v2290_v7 = vpop.f32.mrf.mxu0  ;;  %v5206_v43 = vor.u32 %v6245_v16, %v5205_v15  ;;  %v5625_v16 = vld [vmem:[#allocation7 + $0x350] sm:$0xf] }
 0x189   :  { %3372 = vmatpush.bf16.msrb.mxu1 %v5278_v27  ;;  %v2315_v21 = vadd.f32 %v2314_v61, %v2302_v44  ;;  %v2327_v1 = vpop.f32.mrf.mxu3  ;;  %v2303_v10 = vpop.f32.mrf.mxu1  ;;  %3300 = vmatpush.bf16.msrb.mxu3 %v5582_v11  ;;  %v5550_v44 = vor.u32 %v6330_v42, %v5547_v37  ;;  %v5349_v61 = vld [vmem:[#allocation7 + $0x128] sm:$0xf]  ;;  %v5526_v11 = vor.u32 %v6324_v9, %v5523_v62  ;;  %v6318_v42 = vld [vmem:[#allocation7 + $0x25c] sm:$0xf]  ;;  %v5505_v9 = vld [vmem:[#allocation7 + $0x260] sm:$0xf] }
 0x18a   :  { %v5350_v5 = vor.u32 %v6281_v51, %v5349_v61  ;;  %v5637_v7 = vld [vmem:[#allocation7 + $0x368] sm:$0xf]  ;;  %v5338_v10 = vor.u32 %v6278_v34, %v5337_v6  ;;  %v5529_v61 = vld [vmem:[#allocation7 + $0x290] sm:$0xf]  ;;  %v6323_v6 = vld [vmem:[#allocation7 + $0x280] sm:$0xf0] }
 0x18b   :  { %v2328_v49 = vadd.f32 %v2327_v1, %v2315_v21  ;;  %v5649_v21 = vld [vmem:[#allocation7 + $0x380] sm:$0xf]  ;;  %v6356_v1 = vld [vmem:[#allocation7 + $0x388] sm:$0xf0]  ;;  %v5638_v15 = vor.u32 %v6353_v8, %v5637_v7 }
 0x18c   :  { %3360 = vmatpush.bf16.msrb.mxu0 %v5646_v30  ;;  %v5598_v30 = vor.u32 %v6342_v45, %v5595_v46  ;;  %v5541_v46 = vld [vmem:[#allocation7 + $0x2a8] sm:$0xf]  ;;  %v6320_v62 = vld [vmem:[#allocation7 + $0x268] sm:$0xf0] }
 0x18d   :  { %3373 = vmatpush.bf16.msrb.mxu1 %v5266_v29  ;;  %v2425_v27 = vmax.f32 %v2328_v49, 0.0  ;;  %3345 = vmatpush.bf16.msra.mxu3 %v5574_v23  ;;  %v5650_v49 = vor.u32 %v6356_v1, %v5649_v21  ;;  %v5589_v21 = vld [vmem:[#allocation7 + $0x308] sm:$0xf]  ;;  %v6341_v1 = vld [vmem:[#allocation7 + $0x310] sm:$0xf0] }
 0x18e   :  { %v5590_v34 = vor.u32 %v6341_v1, %v5589_v21 }
 0x18f   :  { %v6841_v29 = vpack.c.bf16 %v2425_v27, %v2425_v27  ;;  %v6275_v27 = vld [vmem:[#allocation7 + $0x100] sm:$0xf0] }
 0x190   :  { %3361 = vmatpush.bf16.msrb.mxu0 %v5634_v19  ;;  %v2316_v35 = vpop.f32.mrf.mxu2  ;;  %v5662_v19 = vor.u32 %v6359_v53, %v5661_v52  ;;  %v5542_v53 = vor.u32 %v6329_v47, %v5541_v46  ;;  %v6851_v46 = vld [vmem:[#allocation13 + $0x1] ss:$8 sm:$0x7] }
 0x191   :  { %3374 = vmatpush.bf16.msrb.mxu1 %v5254_v33  ;;  %3288 = vmatmul.bf16.vlgmr.msrb.gmra.mxu2 %v6841_v29  ;;  %v2329_v39 = vpop.f32.mrf.mxu3  ;;  %v5562_v33 = vor.u32 %v6333_v28, %v5559_v31  ;;  %v5326_v31 = vor.u32 %v6275_v27, %v5325_v14  ;;  %v5313_v35 = vld [vmem:[#allocation7 + $0xe0] sm:$0xf] }
 0x192   :  { %3384 = vmatpush.bf16.msrb.mxu2 %v5386_v24  ;;  %v5511_v24 = vld [vmem:[#allocation7 + $0x27c] sm:$0xf0]  ;;  %v5613_v39 = vld [vmem:[#allocation7 + $0x338] sm:$0xf]  ;;  %v5314_v37 = vor.u32 %v6272_v38, %v5313_v35 }
 0x193   :  { %3346 = vmatpush.bf16.msra.mxu3 %v5562_v33  ;;  %v6347_v33 = vld [vmem:[#allocation7 + $0x340] sm:$0xf0]  ;;  %v5469_v38 = vld [vmem:[#allocation7 + $0x218] sm:$0xf] }
 0x194   :  { %3362 = vmatpush.bf16.msrb.mxu0 %v5622_v63  ;;  %v6350_v63 = vld [vmem:[#allocation7 + $0x358] sm:$0xf0]  ;;  %v5614_v52 = vor.u32 %v6347_v33, %v5613_v39 }
 0x195   :  { %3375 = vmatpush.bf16.msrb.mxu1 %v5242_v55  ;;  %v6327_v55 = vld [vmem:[#allocation7 + $0x2a4] sm:$0xf]  ;;  %v5626_v40 = vor.u32 %v6350_v63, %v5625_v16 }
 0x196   :  { %3385 = vmatpush.bf16.msrb.mxu2 %v5374_v41  ;;  %v5538_v3 = vor.u32 %v6327_v55, %v5535_v58  ;;  %v6344_v55 = vld [vmem:[#allocation7 + $0x328] sm:$0xf0]  ;;  %v5487_v58 = vld [vmem:[#allocation7 + $0x24c] sm:$0xf0] }
 0x197   :  { %3347 = vmatpush.bf16.msra.mxu3 %v5550_v44  ;;  %v5601_v44 = vld [vmem:[#allocation7 + $0x320] sm:$0xf] }
 0x198   :  { %3363 = vmatpush.bf16.msrb.mxu0 %v5610_v0  ;;  %v5554_v0 = vor.u32 %v6332_v17, %v5553_v32  ;;  %v5602_v51 = vor.u32 %v6344_v55, %v5601_v44  ;;  %v6299_v44 = vld [vmem:[#allocation7 + $0x1c0] sm:$0xf0] }
 0x199   :  { %3376 = vmatpush.bf16.msrb.mxu1 %v5230_v4  ;;  %v5578_v4 = vor.u32 %v6338_v60, %v5577_v59 }
 0x19a   :  { %3386 = vmatpush.bf16.msrb.mxu2 %v5362_v18  ;;  %v6315_v18 = vld [vmem:[#allocation7 + $0x244] sm:$0xf] }
 0x19b   :  { %3348 = vmatpush.bf16.msra.mxu3 %v5538_v3  ;;  %v5490_v60 = vor.u32 %v6315_v18, %v5487_v58  ;;  %v480_v3 = vperm.slane %v6764_v13, 4  ;;  %v5409_v58 = vld [vmem:[#allocation7 + $0x1a0] sm:$0xf] }
 0x19c   :  { %3364 = vmatpush.bf16.msrb.mxu0 %v5598_v30 }
 0x19d   :  { %3377 = vmatpush.bf16.msrb.mxu1 %v5218_v22  ;;  %v6321_v22 = vld [vmem:[#allocation7 + $0x274] sm:$0xf] }
 0x19e   :  { %3387 = vmatpush.bf16.msrb.mxu2 %v5350_v5  ;;  %v5514_v28 = vor.u32 %v6321_v22, %v5511_v24  ;;  %v5517_v5 = vld [vmem:[#allocation7 + $0x278] sm:$0xf] }
 0x19f   :  { %3349 = vmatpush.bf16.msra.mxu3 %v5526_v11  ;;  %v5493_v11 = vld [vmem:[#allocation7 + $0x248] sm:$0xf] }
 0x1a0   :  { %3365 = vmatpush.bf16.msrb.mxu0 %v5586_v2  ;;  %v2340_v36 = vpop.f32.mrf.mxu0 }
 0x1a1   :  { %3378 = vmatpush.bf16.msrb.mxu1 %v5206_v43  ;;  %3340 = vmatmul.bf16.vlgmr.msra.gmra.mxu2 %v6828_v26  ;;  %v6846_v20 = vpop.f32.mrf.mxu1  ;;  %v5499_v43 = vld [vmem:[#allocation7 + $0x264] sm:$0xf0]  ;;  %v2341_v8 = vadd.f32 %v2340_v36, %v480_v3 }
 0x1a2   :  { %3388 = vmatpush.bf16.msrb.mxu2 %v5338_v10  ;;  %v5502_v45 = vor.u32 %v6318_v42, %v5499_v43  ;;  %v5506_v10 = vor.u32 %v6320_v62, %v5505_v9  ;;  %v5457_v42 = vld [vmem:[#allocation7 + $0x200] sm:$0xf]  ;;  %v6308_v43 = vld [vmem:[#allocation7 + $0x208] sm:$0xf0]  ;;  %v6378_v9 = vld [vmem:[#allocation8 + $0x74] sm:$0xf0] }
 0x1a3   :  { %3350 = vmatpush.bf16.msra.mxu3 %v5514_v28  ;;  %v2354_v13 = vadd.f32 %v6846_v20, %v2341_v8  ;;  %v5481_v28 = vld [vmem:[#allocation7 + $0x230] sm:$0xf] }
 0x1a4   :  { %3379 = vmatmul.bf16.vlgmr.msrb.gmra.mxu1 %v6798_v25  ;;  %3410 = vmatpush.bf16.msra.mxu0 %v5578_v4  ;;  %v5565_v25 = vld [vmem:[#allocation7 + $0x2d8] sm:$0xf]  ;;  %v5733_v8 = vld [vmem:[#allocation8 + $0x70] sm:$0xf] }
 0x1a5   :  { %3423 = vmatpush.bf16.msra.mxu1 %v5674_v50  ;;  %v5566_v23 = vor.u32 %v6335_v12, %v5565_v25  ;;  %v6269_v50 = vld [vmem:[#allocation7 + $0xd0] sm:$0xf0]  ;;  %v5734_v62 = vor.u32 %v6378_v9, %v5733_v8  ;;  %v6391_v9 = vld [vmem:[#allocation8 + $0xe4] sm:$0xf] }
 0x1a6   :  { %3389 = vmatpush.bf16.msrb.mxu2 %v5326_v31  ;;  %v5302_v59 = vor.u32 %v6269_v50, %v5301_v48  ;;  %v6317_v25 = vld [vmem:[#allocation7 + $0x250] sm:$0xf0]  ;;  %v6314_v31 = vld [vmem:[#allocation7 + $0x238] sm:$0xf0]  ;;  %v5433_v48 = vld [vmem:[#allocation7 + $0x1d0] sm:$0xf] }
 0x1a7   :  { %3351 = vmatpush.bf16.msra.mxu3 %v5502_v45  ;;  %v5494_v12 = vor.u32 %v6317_v25, %v5493_v11  ;;  %v5482_v20 = vor.u32 %v6314_v31, %v5481_v28  ;;  %v6305_v45 = vld [vmem:[#allocation7 + $0x1f0] sm:$0xf0]  ;;  %v6302_v50 = vld [vmem:[#allocation7 + $0x1d8] sm:$0xf0]  ;;  %v5717_v11 = vld [vmem:[#allocation8 + $0x50] sm:$0xf] }
 0x1a8   :  { %3411 = vmatpush.bf16.msra.mxu0 %v5566_v23  ;;  %v2366_v41 = vpop.f32.mrf.mxu2  ;;  %v2342_v56 = vpop.f32.mrf.mxu0  ;;  %v5701_v28 = vld [vmem:[#allocation8 + $0x30] sm:$0xf]  ;;  %v6370_v31 = vld [vmem:[#allocation8 + $0x34] sm:$0xf0] }
 0x1a9   :  { %3424 = vmatpush.bf16.msra.mxu1 %v5662_v19  ;;  %v2379_v30 = vpop.f32.mrf.mxu3  ;;  %v2355_v57 = vpop.f32.mrf.mxu1  ;;  %v6326_v19 = vld [vmem:[#allocation7 + $0x298] sm:$0xf0]  ;;  %v2367_v14 = vadd.f32 %v2366_v41, %v2354_v13  ;;  %v5458_v41 = vor.u32 %v6308_v43, %v5457_v42  ;;  %v6376_v13 = vld [vmem:[#allocation8 + $0x64] sm:$0xf0] }
 0x1aa   :  { %3390 = vmatpush.bf16.msrb.mxu2 %v5314_v37  ;;  %v5530_v2 = vor.u32 %v6326_v19, %v5529_v61  ;;  %v5445_v37 = vld [vmem:[#allocation7 + $0x1e8] sm:$0xf] }
 0x1ab   :  { %3352 = vmatpush.bf16.msra.mxu3 %v5490_v60  ;;  %v2380_v27 = vadd.f32 %v2379_v30, %v2367_v14  ;;  %v5446_v47 = vor.u32 %v6305_v45, %v5445_v37  ;;  %v5421_v30 = vld [vmem:[#allocation7 + $0x1b8] sm:$0xf]  ;;  %v5397_v61 = vld [vmem:[#allocation7 + $0x188] sm:$0xf] }
 0x1ac   :  { %3412 = vmatpush.bf16.msra.mxu0 %v5554_v0  ;;  %v5422_v18 = vor.u32 %v6299_v44, %v5421_v30  ;;  %v6368_v43 = vld [vmem:[#allocation8 + $0x24] sm:$0xf0]  ;;  %v6366_v44 = vld [vmem:[#allocation8 + $0x14] sm:$0xf0] }
 0x1ad   :  { %3425 = vmatpush.bf16.msra.mxu1 %v5650_v49  ;;  %v5518_v49 = vor.u32 %v6323_v6, %v5517_v5  ;;  %v6392_v37 = vld [vmem:[#allocation8 + $0xe4] sm:$0xf0] }
 0x1ae   :  { %3391 = vmatpush.bf16.msrb.mxu2 %v5302_v59  ;;  %v6296_v59 = vld [vmem:[#allocation7 + $0x1a8] sm:$0xf0] }
 0x1af   :  { %v5410_v60 = vor.u32 %v6296_v59, %v5409_v58  ;;  %v6369_v58 = vld [vmem:[#allocation8 + $0x34] sm:$0xf]  ;;  %v5703_v59 = vld [vmem:[#allocation8 + $0x38] sm:$0xf0] }
 0x1b0   :  { %3413 = vmatpush.bf16.msra.mxu0 %v5542_v53  ;;  %v2368_v4 = vpop.f32.mrf.mxu2  ;;  %v5434_v53 = vor.u32 %v6302_v50, %v5433_v48  ;;  %v6371_v50 = vld [vmem:[#allocation8 + $0x44] sm:$0xf] }
 0x1b1   :  { %3426 = vmatpush.bf16.msra.mxu1 %v5638_v15  ;;  %v2381_v7 = vpop.f32.mrf.mxu3  ;;  %3392 = vmatmul.bf16.vlgmr.msrb.gmra.mxu2 %v6821_v54 }
 0x1b2   :  { %3737 = vmatpush.bf16.msra.mxu2 %v5734_v62  ;;  %v5791_v62 = vld [vmem:[#allocation8 + $0xe8] sm:$0xf0] }
 0x1b4   :  { %3414 = vmatpush.bf16.msra.mxu0 %v5530_v2 }
 0x1b5   :  { %3427 = vmatpush.bf16.msra.mxu1 %v5626_v40  ;;  %v6311_v40 = vld [vmem:[#allocation7 + $0x220] sm:$0xf0] }
 0x1b6   :  { %v5470_v39 = vor.u32 %v6311_v40, %v5469_v38 }
 0x1b8   :  { %3415 = vmatpush.bf16.msra.mxu0 %v5518_v49 }
 0x1b9   :  { %3428 = vmatpush.bf16.msra.mxu1 %v5614_v52  ;;  %v2595_v52 = vperm.slane %v6851_v46, 0 }
 0x1bc   :  { %3416 = vmatpush.bf16.msra.mxu0 %v5506_v10  ;;  %v5725_v10 = vld [vmem:[#allocation8 + $0x60] sm:$0xf] }
 0x1bd   :  { %3429 = vmatpush.bf16.msra.mxu1 %v5602_v51  ;;  %v6293_v51 = vld [vmem:[#allocation7 + $0x190] sm:$0xf0]  ;;  %v5726_v25 = vor.u32 %v6376_v13, %v5725_v10  ;;  %v5765_v10 = vld [vmem:[#allocation8 + $0xb0] sm:$0xf]  ;;  %v5794_v13 = vor.u32 %v6391_v9, %v5791_v62  ;;  %v5743_v9 = vld [vmem:[#allocation8 + $0x88] sm:$0xf0] }
 0x1be   :  { %v5398_v21 = vor.u32 %v6293_v51, %v5397_v61  ;;  %v6364_v61 = vld [vmem:[#allocation8 + $0x4] sm:$0xf0]  ;;  %v5706_v51 = vor.u32 %v6369_v58, %v5703_v59  ;;  %v6407_v59 = vld [vmem:[#allocation8 + $0x164] sm:$0xf] }
 0x1bf   :  { %3738 = vmatpush.bf16.msra.mxu2 %v5726_v25  ;;  %v6408_v58 = vld [vmem:[#allocation8 + $0x164] sm:$0xf0] }
 0x1c0   :  { %3417 = vmatpush.bf16.msra.mxu0 %v5494_v12  ;;  %v2392_v15 = vpop.f32.mrf.mxu0  ;;  %v6374_v12 = vld [vmem:[#allocation8 + $0x54] sm:$0xf0] }
 0x1c1   :  { %3430 = vmatpush.bf16.msra.mxu1 %v5590_v34  ;;  %v2405_v16 = vpop.f32.mrf.mxu1  ;;  %v2393_v23 = vadd.f32 %v2392_v15, %v2380_v27  ;;  %v6377_v27 = vld [vmem:[#allocation8 + $0x74] sm:$0xf]  ;;  %v5735_v15 = vld [vmem:[#allocation8 + $0x78] sm:$0xf0] }
 0x1c3   :  { %v2406_v63 = vadd.f32 %v2405_v16, %v2393_v23  ;;  %v5738_v16 = vor.u32 %v6377_v27, %v5735_v15  ;;  %v5709_v23 = vld [vmem:[#allocation8 + $0x40] sm:$0xf]  ;;  %v5687_v27 = vld [vmem:[#allocation8 + $0x18] sm:$0xf0] }
 0x1c5   :  { %3776 = vmatpush.bf16.msrb.mxu1 %v5738_v16  ;;  %v6389_v16 = vld [vmem:[#allocation8 + $0xd4] sm:$0xf] }
 0x1c8   :  { %v2418_v22 = vpop.f32.mrf.mxu2  ;;  %v2394_v36 = vpop.f32.mrf.mxu0 }
 0x1c9   :  { %v2419_v54 = vadd.f32 %v2418_v22, %v2406_v63  ;;  %v3250_v24 = vpop.f32.mrf.mxu3  ;;  %v2407_v32 = vpop.f32.mrf.mxu1  ;;  %v6372_v63 = vld [vmem:[#allocation8 + $0x44] sm:$0xf0]  ;;  %v6375_v22 = vld [vmem:[#allocation8 + $0x64] sm:$0xf]  ;;  %v5727_v36 = vld [vmem:[#allocation8 + $0x68] sm:$0xf0] }
 0x1ca   :  { %v3251_v55 = vadd.f32 %v3250_v24, %v2595_v52  ;;  %v5710_v24 = vor.u32 %v6372_v63, %v5709_v23  ;;  %v5730_v32 = vor.u32 %v6375_v22, %v5727_v36  ;;  %v5711_v52 = vld [vmem:[#allocation8 + $0x48] sm:$0xf0]  ;;  %v5783_v23 = vld [vmem:[#allocation8 + $0xd8] sm:$0xf0]  ;;  %v5757_v22 = vld [vmem:[#allocation8 + $0xa0] sm:$0xf] }
 0x1cb   :  { %v2426_v17 = vmax.f32 %v2419_v54, 0.0  ;;  %v5714_v30 = vor.u32 %v6371_v50, %v5711_v52  ;;  %v5786_v63 = vor.u32 %v6389_v16, %v5783_v23  ;;  %v6409_v50 = vld [vmem:[#allocation8 + $0x174] sm:$0xf] }
 0x1cc   :  { %3777 = vmatpush.bf16.msrb.mxu1 %v5730_v32  ;;  %v6401_v16 = vld [vmem:[#allocation8 + $0x134] sm:$0xf] }
 0x1cd   :  { %v2431_v35 = vpack.c.bf16 %v2426_v17, %v2426_v17  ;;  %v5797_v17 = vld [vmem:[#allocation8 + $0xf0] sm:$0xf] }
 0x1cf   :  { %3301 = vmatmul.bf16.vlgmr.msrb.gmra.mxu3 %v2431_v35  ;;  %3366 = vmatmul.bf16.vlgmr.msrb.gmra.mxu0 %v2431_v35 }
 0x1d0   :  { %3431 = vmatmul.bf16.vlgmr.msra.gmra.mxu1 %v2431_v35  ;;  %v2420_v0 = vpop.f32.mrf.mxu2  ;;  %3397 = vmatpush.bf16.msrb.mxu3 %v5482_v20  ;;  %v6394_v20 = vld [vmem:[#allocation8 + $0xf4] sm:$0xf0]  ;;  %v5702_v35 = vor.u32 %v6370_v31, %v5701_v28  ;;  %v6363_v28 = vld [vmem:[#allocation8 + $0x4] sm:$0xf]  ;;  %v5679_v31 = vld [vmem:[#allocation8 + $0x8] sm:$0xf0] }
 0x1d1   :  { %v3252_v33 = vpop.f32.mrf.mxu3  ;;  %v5798_v38 = vor.u32 %v6394_v20, %v5797_v17  ;;  %v6373_v0 = vld [vmem:[#allocation8 + $0x54] sm:$0xf]  ;;  %v5682_v32 = vor.u32 %v6363_v28, %v5679_v31  ;;  %v6387_v17 = vld [vmem:[#allocation8 + $0xc4] sm:$0xf]  ;;  %v5775_v20 = vld [vmem:[#allocation8 + $0xc8] sm:$0xf0] }
 0x1d2   :  { %v5693_v33 = vld [vmem:[#allocation8 + $0x20] sm:$0xf]  ;;  %v6400_v31 = vld [vmem:[#allocation8 + $0x124] sm:$0xf0] }
 0x1d3   :  { %v5821_v28 = vld [vmem:[#allocation8 + $0x120] sm:$0xf] }
 0x1d4   :  { %3398 = vmatpush.bf16.msrb.mxu3 %v5470_v39  ;;  %v5719_v39 = vld [vmem:[#allocation8 + $0x58] sm:$0xf0] }
 0x1d5   :  { %v5722_v42 = vor.u32 %v6373_v0, %v5719_v39 }
 0x1d7   :  { %3778 = vmatpush.bf16.msrb.mxu1 %v5722_v42  ;;  %v5767_v42 = vld [vmem:[#allocation8 + $0xb8] sm:$0xf0] }
 0x1d8   :  { %3399 = vmatpush.bf16.msrb.mxu3 %v5458_v41  ;;  %v5789_v41 = vld [vmem:[#allocation8 + $0xe0] sm:$0xf] }
 0x1d9   :  { %v5790_v48 = vor.u32 %v6392_v37, %v5789_v41  ;;  %v5741_v41 = vld [vmem:[#allocation8 + $0x80] sm:$0xf]  ;;  %v6380_v37 = vld [vmem:[#allocation8 + $0x84] sm:$0xf0] }
 0x1db   :  { %3779 = vmatpush.bf16.msrb.mxu1 %v5714_v30  ;;  %v6383_v30 = vld [vmem:[#allocation8 + $0xa4] sm:$0xf] }
 0x1dc   :  { %3400 = vmatpush.bf16.msrb.mxu3 %v5446_v47  ;;  %v5694_v47 = vor.u32 %v6368_v43, %v5693_v33  ;;  %v6385_v33 = vld [vmem:[#allocation8 + $0xb4] sm:$0xf] }
 0x1dd   :  { %v5770_v43 = vor.u32 %v6385_v33, %v5767_v42  ;;  %v5813_v42 = vld [vmem:[#allocation8 + $0x110] sm:$0xf] }
 0x1df   :  { %3353 = vmatmul.bf16.vlgmr.msra.gmra.mxu3 %v6841_v29  ;;  %3418 = vmatmul.bf16.vlgmr.msra.gmra.mxu0 %v6841_v29  ;;  %v2596_v29 = vperm.slane %v6851_v46, 1 }
 0x1e0   :  { %v3263_v56 = vpop.f32.mrf.mxu0  ;;  %3401 = vmatpush.bf16.msrb.mxu3 %v5434_v53  ;;  %v5685_v53 = vld [vmem:[#allocation8 + $0x10] sm:$0xf]  ;;  %3780 = vmatpush.bf16.msrb.mxu1 %v5706_v51 }
 0x1e1   :  { %v3264_v57 = vadd.f32 %v3263_v56, %v3251_v55  ;;  %v5781_v55 = vld [vmem:[#allocation8 + $0xd0] sm:$0xf]  ;;  %v6390_v56 = vld [vmem:[#allocation8 + $0xd4] sm:$0xf0] }
 0x1e4   :  { %3402 = vmatpush.bf16.msrb.mxu3 %v5422_v18  ;;  %v3276_v1 = vpop.f32.mrf.mxu1  ;;  %v5782_v18 = vor.u32 %v6390_v56, %v5781_v55 }
 0x1e5   :  { %v6856_v2 = vadd.f32 %v3276_v1, %v3264_v57  ;;  %v5686_v57 = vor.u32 %v6366_v44, %v5685_v53  ;;  %v6393_v1 = vld [vmem:[#allocation8 + $0xf4] sm:$0xf]  ;;  %v5863_v53 = vld [vmem:[#allocation8 + $0x178] sm:$0xf0]  ;;  %v5759_v44 = vld [vmem:[#allocation8 + $0xa8] sm:$0xf0] }
 0x1e6   :  { %v5866_v55 = vor.u32 %v6409_v50, %v5863_v53  ;;  %v5762_v56 = vor.u32 %v6383_v30, %v5759_v44  ;;  %v6395_v53 = vld [vmem:[#allocation8 + $0x104] sm:$0xf]  ;;  %v5807_v44 = vld [vmem:[#allocation8 + $0x108] sm:$0xf0] }
 0x1e8   :  { %v3265_v19 = vpop.f32.mrf.mxu0  ;;  %3403 = vmatpush.bf16.msrb.mxu3 %v5410_v60  ;;  %v5677_v60 = vld [vmem:[#allocation8] sm:$0xf] }
 0x1ec   :  { %3404 = vmatpush.bf16.msrb.mxu3 %v5398_v21  ;;  %v3278_v3 = vpop.f32.mrf.mxu1  ;;  %v5678_v21 = vor.u32 %v6364_v61, %v5677_v60  ;;  %v5855_v61 = vld [vmem:[#allocation8 + $0x168] sm:$0xf0] }
 0x1ed   :  { %v5799_v3 = vld [vmem:[#allocation8 + $0xf8] sm:$0xf0]  ;;  %v5858_v51 = vor.u32 %v6407_v59, %v5855_v61 }
 0x1ef   :  { %3405 = vmatmul.bf16.vlgmr.msrb.gmra.mxu3 %v6828_v26  ;;  %v5718_v26 = vor.u32 %v6374_v12, %v5717_v11  ;;  %v6386_v11 = vld [vmem:[#allocation8 + $0xb4] sm:$0xf0] }
 0x1f0   :  { %3750 = vmatpush.bf16.msra.mxu3 %v5798_v38  ;;  %v5766_v25 = vor.u32 %v6386_v11, %v5765_v10  ;;  %v5749_v38 = vld [vmem:[#allocation8 + $0x90] sm:$0xf]  ;;  %v5837_v10 = vld [vmem:[#allocation8 + $0x140] sm:$0xf]  ;;  %v6403_v11 = vld [vmem:[#allocation8 + $0x144] sm:$0xf] }
 0x1f1   :  { %3739 = vmatpush.bf16.msra.mxu2 %v5718_v26  ;;  %v6365_v26 = vld [vmem:[#allocation8 + $0x14] sm:$0xf] }
 0x1f2   :  { %v5690_v15 = vor.u32 %v6365_v26, %v5687_v27  ;;  %v5829_v27 = vld [vmem:[#allocation8 + $0x130] sm:$0xf] }
 0x1f4   :  { %3751 = vmatpush.bf16.msra.mxu3 %v5790_v48  ;;  %v6410_v48 = vld [vmem:[#allocation8 + $0x174] sm:$0xf0] }
 0x1f5   :  { %3740 = vmatpush.bf16.msra.mxu2 %v5710_v24  ;;  %v6384_v24 = vld [vmem:[#allocation8 + $0xa4] sm:$0xf0] }
 0x1f6   :  { %v5758_v36 = vor.u32 %v6384_v24, %v5757_v22  ;;  %v5831_v22 = vld [vmem:[#allocation8 + $0x138] sm:$0xf0] }
 0x1f8   :  { %3752 = vmatpush.bf16.msra.mxu3 %v5782_v18  ;;  %v5853_v18 = vld [vmem:[#allocation8 + $0x160] sm:$0xf] }
 0x1f9   :  { %3741 = vmatpush.bf16.msra.mxu2 %v5702_v35  ;;  %v5778_v35 = vor.u32 %v6387_v17, %v5775_v20  ;;  %v5854_v60 = vor.u32 %v6408_v58, %v5853_v18  ;;  %v5822_v20 = vor.u32 %v6400_v31, %v5821_v28  ;;  %v6434_v31 = vld [vmem:[#allocation11 + $0x38] sm:$0xff] }
 0x1fd   :  { %3742 = vmatpush.bf16.msra.mxu2 %v5694_v47  ;;  %v5861_v47 = vld [vmem:[#allocation8 + $0x170] sm:$0xf] }
 0x1fe   :  { %v5862_v52 = vor.u32 %v6410_v48, %v5861_v47  ;;  %v5815_v48 = vld [vmem:[#allocation8 + $0x118] sm:$0xf0] }
 0x200   :  { %v3315_v4 = vpop.f32.mrf.mxu0  ;;  %3763 = vmatpush.bf16.msrb.mxu0 %v5862_v52 }
 0x201   :  { %v3316_v5 = vadd.f32 %v3315_v4, %v2596_v29  ;;  %v3328_v6 = vpop.f32.mrf.mxu1  ;;  %3743 = vmatpush.bf16.msra.mxu2 %v5686_v57  ;;  %v5802_v29 = vor.u32 %v6393_v1, %v5799_v3  ;;  %v5773_v4 = vld [vmem:[#allocation8 + $0xc0] sm:$0xf]  ;;  %v5751_v1 = vld [vmem:[#allocation8 + $0x98] sm:$0xf0] }
 0x203   :  { %v6860_v34 = vadd.f32 %v3328_v6, %v3316_v5  ;;  %v6388_v5 = vld [vmem:[#allocation8 + $0xc4] sm:$0xf0] }
 0x204   :  { %v5774_v6 = vor.u32 %v6388_v5, %v5773_v4  ;;  %3764 = vmatpush.bf16.msrb.mxu0 %v5854_v60  ;;  %v6406_v4 = vld [vmem:[#allocation8 + $0x154] sm:$0xf0]  ;;  %v6405_v5 = vld [vmem:[#allocation8 + $0x154] sm:$0xf] }
 0x205   :  { %3744 = vmatpush.bf16.msra.mxu2 %v5678_v21  ;;  %v6381_v21 = vld [vmem:[#allocation8 + $0x94] sm:$0xf] }
 0x206   :  { %3753 = vmatpush.bf16.msra.mxu3 %v5774_v6  ;;  %v5754_v3 = vor.u32 %v6381_v21, %v5751_v1 }
 0x208   :  { %v3317_v49 = vpop.f32.mrf.mxu0 }
 0x209   :  { %v3330_v7 = vpop.f32.mrf.mxu1  ;;  %v6367_v49 = vld [vmem:[#allocation8 + $0x24] sm:$0xf]  ;;  %3789 = vmatpush.bf16.msrb.mxu2 %v5802_v29  ;;  %v5845_v29 = vld [vmem:[#allocation8 + $0x150] sm:$0xf] }
 0x20a   :  { %v5695_v7 = vld [vmem:[#allocation8 + $0x28] sm:$0xf0]  ;;  %3754 = vmatpush.bf16.msra.mxu3 %v5766_v25  ;;  %v5846_v6 = vor.u32 %v6406_v4, %v5845_v29 }
 0x20b   :  { %v5698_v8 = vor.u32 %v6367_v49, %v5695_v7  ;;  %v5847_v49 = vld [vmem:[#allocation8 + $0x158] sm:$0xf0] }
 0x20c   :  { %v5850_v7 = vor.u32 %v6405_v5, %v5847_v49  ;;  %3765 = vmatpush.bf16.msrb.mxu0 %v5846_v6 }
 0x20d   :  { %3781 = vmatpush.bf16.msrb.mxu1 %v5698_v8  ;;  %3790 = vmatpush.bf16.msrb.mxu2 %v5794_v13  ;;  %v6379_v8 = vld [vmem:[#allocation8 + $0x84] sm:$0xf]  ;;  %v6404_v13 = vld [vmem:[#allocation8 + $0x144] sm:$0xf0] }
 0x20e   :  { %3755 = vmatpush.bf16.msra.mxu3 %v5758_v36  ;;  %v5746_v62 = vor.u32 %v6379_v8, %v5743_v9  ;;  %v5838_v25 = vor.u32 %v6404_v13, %v5837_v10  ;;  %v5834_v36 = vor.u32 %v6401_v16, %v5831_v22  ;;  %v6418_v9 = vld [vmem:[#allocation10 + $0x38] sm:$0xff]  ;;  %v6425_v13 = vld [vmem:[#allocation10 + $0x70] sm:$0xff] }
 0x20f   :  { %v6426_v10 = vld [vmem:[#allocation10 + $0x78] sm:$0xff]  ;;  %v6421_v16 = vld [vmem:[#allocation10 + $0x50] sm:$0xff] }
 0x210   :  { %3766 = vmatpush.bf16.msrb.mxu0 %v5838_v25  ;;  %v6423_v25 = vld [vmem:[#allocation10 + $0x60] sm:$0xff] }
 0x211   :  { %3782 = vmatpush.bf16.msrb.mxu1 %v5690_v15  ;;  %3791 = vmatpush.bf16.msrb.mxu2 %v5786_v63  ;;  %v6402_v15 = vld [vmem:[#allocation8 + $0x134] sm:$0xf0] }
 0x212   :  { %v5830_v63 = vor.u32 %v6402_v15, %v5829_v27  ;;  %v6422_v27 = vld [vmem:[#allocation10 + $0x58] sm:$0xff]  ;;  %v6412_v15 = vld [vmem:[#allocation10 + $0x8] sm:$0xff] }
 0x214   :  { %v6862_v14 = vpop.f32.mrf.mxu2  ;;  %3767 = vmatpush.bf16.msrb.mxu0 %v5830_v63  ;;  %v6411_v63 = vld [vmem:[#allocation10] sm:$0xff] }
 0x215   :  { %3783 = vmatpush.bf16.msrb.mxu1 %v5682_v32  ;;  %3792 = vmatpush.bf16.msrb.mxu2 %v5778_v35  ;;  %v6399_v32 = vld [vmem:[#allocation8 + $0x124] sm:$0xf]  ;;  %v3290_v17 = vadd.f32 %v6862_v14, %v6856_v2  ;;  %v5823_v35 = vld [vmem:[#allocation8 + $0x128] sm:$0xf0]  ;;  %v5805_v2 = vld [vmem:[#allocation8 + $0x100] sm:$0xf] }
 0x216   :  { %v6396_v14 = vld [vmem:[#allocation8 + $0x104] sm:$0xf0] }
 0x217   :  { %v5806_v30 = vor.u32 %v6396_v14, %v5805_v2 }
 0x218   :  { %3768 = vmatpush.bf16.msrb.mxu0 %v5822_v20 }
 0x219   :  { %3793 = vmatpush.bf16.msrb.mxu2 %v5770_v43  ;;  %v6398_v43 = vld [vmem:[#allocation8 + $0x114] sm:$0xf0]  ;;  %3961 = vmatpush.bf16.msra.mxu1 %v6426_v10 }
 0x21a   :  { %v5814_v47 = vor.u32 %v6398_v43, %v5813_v42  ;;  %v6430_v43 = vld [vmem:[#allocation11 + $0x18] sm:$0xff] }
 0x21c   :  { %v3291_v40 = vpop.f32.mrf.mxu2  ;;  %3769 = vmatpush.bf16.msrb.mxu0 %v5814_v47 }
 0x21d   :  { %v6382_v40 = vld [vmem:[#allocation8 + $0x94] sm:$0xf0]  ;;  %3794 = vmatpush.bf16.msrb.mxu2 %v5762_v56  ;;  %v5810_v56 = vor.u32 %v6395_v53, %v5807_v44  ;;  %3962 = vmatpush.bf16.msra.mxu1 %v6425_v13 }
 0x21e   :  { %v5750_v39 = vor.u32 %v6382_v40, %v5749_v38  ;;  %v5826_v40 = vor.u32 %v6399_v32, %v5823_v35  ;;  %v6433_v32 = vld [vmem:[#allocation11 + $0x30] sm:$0xff]  ;;  %v6432_v35 = vld [vmem:[#allocation11 + $0x28] sm:$0xff] }
 0x220   :  { %3756 = vmatpush.bf16.msra.mxu3 %v5750_v39  ;;  %3770 = vmatpush.bf16.msrb.mxu0 %v5806_v30 }
 0x221   :  { %v6864_v54 = vpop.f32.mrf.mxu1  ;;  %3795 = vmatpush.bf16.msrb.mxu2 %v5754_v3  ;;  %v2597_v3 = vperm.slane %v6851_v46, 2  ;;  %v6416_v46 = vld [vmem:[#allocation10 + $0x28] sm:$0xff] }
 0x223   :  { %v3381_v29 = vadd.f32 %v6864_v54, %v2597_v3  ;;  %v6415_v54 = vld [vmem:[#allocation10 + $0x20] sm:$0xff] }
 0x224   :  { %v6866_v19 = vpop.f32.mrf.mxu2  ;;  %3948 = vmatpush.bf16.msra.mxu0 %v6418_v9 }
 0x225   :  { %3796 = vmatpush.bf16.msrb.mxu2 %v5746_v62  ;;  %v3342_v18 = vadd.f32 %v6866_v19, %v6860_v34  ;;  %v6417_v62 = vld [vmem:[#allocation10 + $0x30] sm:$0xff] }
 0x228   :  { %3949 = vmatpush.bf16.msra.mxu0 %v6417_v62 }
 0x229   :  { %v3382_v45 = vpop.f32.mrf.mxu1 }
 0x22a   :  { %v5742_v45 = vor.u32 %v6380_v37, %v5741_v41  ;;  %v6397_v41 = vld [vmem:[#allocation8 + $0x114] sm:$0xf] }
 0x22b   :  { %v5818_v50 = vor.u32 %v6397_v41, %v5815_v48 }
 0x22c   :  { %v3343_v12 = vpop.f32.mrf.mxu2  ;;  %3757 = vmatpush.bf16.msra.mxu3 %v5742_v45  ;;  %3950 = vmatpush.bf16.msra.mxu0 %v6416_v46 }
 0x22d   :  { %v5839_v12 = vld [vmem:[#allocation8 + $0x148] sm:$0xf0] }
 0x22e   :  { %v5842_v26 = vor.u32 %v6403_v11, %v5839_v12  ;;  %v6414_v11 = vld [vmem:[#allocation10 + $0x18] sm:$0xff]  ;;  %v6413_v12 = vld [vmem:[#allocation10 + $0x10] sm:$0xff] }
 0x230   :  { %3802 = vmatpush.bf16.msrb.mxu3 %v5866_v55  ;;  %3951 = vmatpush.bf16.msra.mxu0 %v6415_v54 }
 0x234   :  { %v6868_v0 = vpop.f32.mrf.mxu2  ;;  %3803 = vmatpush.bf16.msrb.mxu3 %v5858_v51  ;;  %3952 = vmatpush.bf16.msra.mxu0 %v6414_v11 }
 0x235   :  { %v3394_v4 = vadd.f32 %v6868_v0, %v3381_v29  ;;  %v6424_v0 = vld [vmem:[#allocation10 + $0x68] sm:$0xff] }
 0x236   :  { %3963 = vmatpush.bf16.msra.mxu1 %v6424_v0 }
 0x238   :  { %3804 = vmatpush.bf16.msrb.mxu3 %v5850_v7  ;;  %3953 = vmatpush.bf16.msra.mxu0 %v6413_v12 }
 0x23a   :  { %3964 = vmatpush.bf16.msra.mxu1 %v6423_v25 }
 0x23c   :  { %v3395_v57 = vpop.f32.mrf.mxu2  ;;  %3805 = vmatpush.bf16.msrb.mxu3 %v5842_v26  ;;  %3954 = vmatpush.bf16.msra.mxu0 %v6412_v15 }
 0x23e   :  { %3965 = vmatpush.bf16.msra.mxu1 %v6422_v27 }
 0x240   :  { %3806 = vmatpush.bf16.msrb.mxu3 %v5834_v36  ;;  %3955 = vmatpush.bf16.msra.mxu0 %v6411_v63  ;;  %v6419_v36 = vld [vmem:[#allocation10 + $0x40] sm:$0xff] }
 0x242   :  { %3966 = vmatpush.bf16.msra.mxu1 %v6421_v16 }
 0x244   :  { %3807 = vmatpush.bf16.msrb.mxu3 %v5826_v40  ;;  %v6431_v40 = vld [vmem:[#allocation11 + $0x20] sm:$0xff] }
 0x248   :  { %3808 = vmatpush.bf16.msrb.mxu3 %v5818_v50 }
 0x24c   :  { %v3367_v23 = vpop.f32.mrf.mxu0  ;;  %3809 = vmatpush.bf16.msrb.mxu3 %v5810_v56 }
 0x24d   :  { %v3432_v24 = vpop.f32.mrf.mxu1 }
 0x252   :  { %v3302_v38 = vpop.f32.mrf.mxu3 }
 0x253   :  { %v3303_v39 = vadd.f32 %v3302_v38, %v3290_v17  ;;  %v3491_v38 = vld [vmem:[#allocation13 + $0x2] ss:$8 sm:$0x3] }
 0x254   :  { %v3369_v33 = vpop.f32.mrf.mxu0 }
 0x255   :  { %v3436_v37 = vmax.f32 %v3303_v39, 0.0  ;;  %v3434_v45 = vpop.f32.mrf.mxu1  ;;  %v3493_v39 = vperm.slane %v3491_v38, 0 }
 0x257   :  { %v3439_v52 = vpack.c.bf16 %v3436_v37, %v3436_v37  ;;  %v3494_v37 = vperm.slane %v3491_v38, 1 }
 0x259   :  { %3745 = vmatmul.bf16.vlgmr.msra.gmra.mxu2 %v3439_v52  ;;  %3784 = vmatmul.bf16.vlgmr.msrb.gmra.mxu1 %v3439_v52 }
 0x25a   :  { %v3304_v55 = vpop.f32.mrf.mxu3  ;;  %4041 = vmatpush.bf16.msra.mxu2 %v6434_v31 }
 0x25c   :  { %v3419_v57 = vpop.f32.mrf.mxu0 }
 0x25e   :  { %4042 = vmatpush.bf16.msra.mxu2 %v6433_v32 }
 0x262   :  { %v3354_v58 = vpop.f32.mrf.mxu3  ;;  %4043 = vmatpush.bf16.msra.mxu2 %v6432_v35 }
 0x263   :  { %v3355_v59 = vadd.f32 %v3354_v58, %v3342_v18  ;;  %v6429_v18 = vld [vmem:[#allocation11 + $0x10] sm:$0xff]  ;;  %v6428_v58 = vld [vmem:[#allocation11 + $0x8] sm:$0xff] }
 0x264   :  { %v3421_v60 = vpop.f32.mrf.mxu0 }
 0x265   :  { %v3368_v61 = vadd.f32 %v3367_v23, %v3355_v59  ;;  %v6427_v59 = vld [vmem:[#allocation11] sm:$0xff] }
 0x266   :  { %4044 = vmatpush.bf16.msra.mxu2 %v6431_v40 }
 0x267   :  { %v3437_v51 = vmax.f32 %v3368_v61, 0.0  ;;  %v3851_v61 = vld [vmem:[#allocation13 + $0x3] ss:$0 sm:$0xff] }
 0x269   :  { %v3440_v21 = vpack.c.bf16 %v3437_v51, %v3437_v51 }
 0x26a   :  { %v3356_v1 = vpop.f32.mrf.mxu3  ;;  %4045 = vmatpush.bf16.msra.mxu2 %v6430_v43 }
 0x26b   :  { %3758 = vmatmul.bf16.vlgmr.msra.gmra.mxu3 %v3440_v21  ;;  %3797 = vmatmul.bf16.vlgmr.msrb.gmra.mxu2 %v3440_v21 }
 0x26e   :  { %4046 = vmatpush.bf16.msra.mxu2 %v6429_v18 }
 0x272   :  { %v3406_v5 = vpop.f32.mrf.mxu3  ;;  %4047 = vmatpush.bf16.msra.mxu2 %v6428_v58 }
 0x273   :  { %v3407_v6 = vadd.f32 %v3406_v5, %v3394_v4 }
 0x275   :  { %v3420_v49 = vadd.f32 %v3419_v57, %v3407_v6  ;;  %v3992_v6 = vld [vmem:[#allocation13 + $0x4] ss:$0 sm:$0xff] }
 0x276   :  { %4048 = vmatpush.bf16.msra.mxu2 %v6427_v59 }
 0x277   :  { %v3433_v7 = vadd.f32 %v3432_v24, %v3420_v49  ;;  %v6420_v24 = vld [vmem:[#allocation10 + $0x48] sm:$0xff] }
 0x278   :  { %3967 = vmatpush.bf16.msra.mxu1 %v6420_v24 }
 0x279   :  { %v3438_v34 = vmax.f32 %v3433_v7, 0.0 }
 0x27a   :  { %v3408_v19 = vpop.f32.mrf.mxu3 }
 0x27b   :  { %v3441_v8 = vpack.c.bf16 %v3438_v34, %v3438_v34 }
 0x27c   :  { %3968 = vmatpush.bf16.msra.mxu1 %v6419_v36 }
 0x27d   :  { %3771 = vmatmul.bf16.vlgmr.msrb.gmra.mxu0 %v3441_v8  ;;  %3810 = vmatmul.bf16.vlgmr.msrb.gmra.mxu3 %v3441_v8 }
 0x2d6   :  { %v3785_v26 = vpop.f32.mrf.mxu1 }
 0x2d7   :  { %v3786_v50 = vadd.f32 %v3785_v26, %v3494_v37 }
 0x2dc   :  { %v3746_v23 = vpop.f32.mrf.mxu2 }
 0x2dd   :  { %v3747_v41 = vadd.f32 %v3746_v23, %v3493_v39 }
 0x2de   :  { %v3787_v22 = vpop.f32.mrf.mxu1 }
 0x2e4   :  { %v3748_v28 = vpop.f32.mrf.mxu2 }
 0x2ee   :  { %v3759_v17 = vpop.f32.mrf.mxu3  ;;  %v3798_v20 = vpop.f32.mrf.mxu2 }
 0x2ef   :  { %v3760_v45 = vadd.f32 %v3759_v17, %v3747_v41  ;;  %v3799_v2 = vadd.f32 %v3798_v20, %v3786_v50 }
 0x2f6   :  { %v3761_v33 = vpop.f32.mrf.mxu3  ;;  %v3800_v42 = vpop.f32.mrf.mxu2 }
 0x2fa   :  { %v3772_v47 = vpop.f32.mrf.mxu0 }
 0x2fb   :  { %v3773_v48 = vadd.f32 %v3772_v47, %v3760_v45 }
 0x2fd   :  { %v3815_v52 = vmax.f32 %v3773_v48, 0.0 }
 0x2ff   :  { %v3817_v14 = vpack.c.bf16 %v3815_v52, %v3815_v52 }
 0x300   :  { %v3811_v53 = vpop.f32.mrf.mxu3 }
 0x301   :  { %v3812_v30 = vadd.f32 %v3811_v53, %v3799_v2  ;;  %3956 = vmatmul.bf16.vlgmr.msra.gmra.mxu0 %v3817_v14 }
 0x302   :  { %v3774_v44 = vpop.f32.mrf.mxu0 }
 0x303   :  { %v3816_v55 = vmax.f32 %v3812_v30, 0.0 }
 0x305   :  { %v3818_v56 = vpack.c.bf16 %v3816_v55, %v3816_v55 }
 0x307   :  { %3969 = vmatmul.bf16.vlgmr.msra.gmra.mxu1 %v3818_v56 }
 0x308   :  { %v3813_v57 = vpop.f32.mrf.mxu3 }
 0x37e   :  { %v3957_v60 = vpop.f32.mrf.mxu0 }
 0x37f   :  { %v3958_v51 = vadd.f32 %v3957_v60, %v3851_v61 }
 0x384   :  { %v3970_v21 = vpop.f32.mrf.mxu1 }
 0x385   :  { %v3971_v1 = vadd.f32 %v3970_v21, %v3958_v51 }
 0x386   :  { %v3959_v3 = vpop.f32.mrf.mxu0 }
 0x387   :  { %v3974_v29 = vmax.f32 %v3971_v1, 0.0 }
 0x389   :  { %v3975_v4 = vpack.c.bf16 %v3974_v29, %v3974_v29 }
 0x38b   :  { %4049 = vmatmul.bf16.vlgmr.msra.gmra.mxu2 %v3975_v4 }
 0x38c   :  { %v3972_v5 = vpop.f32.mrf.mxu1 }
 0x40e   :  { %v4050_v49 = vpop.f32.mrf.mxu2 }
 0x40f   :  { %v4051_v7 = vadd.f32 %v4050_v49, %v3992_v6 }
 0x411   :  { %4054 = vst [vmem:[#allocation14] sm:$0xff] %v4051_v7 }
 0x412   :  { %4065 = dma.vmem_to_hbm [thread:$0]  %s4061_s6, 128, %s4063_s17, [#allocation4]  }
 0x416   :  { %v4052_v34 = vpop.f32.mrf.mxu2 }
 0x417   :  { %6651 = dma.done.wait [#allocation4], 128  }
 0x418   :  { %6652 = vsyncadd [#allocation4], 4294967168 }
 0x419   :  { %4070 = vsyncpa [#allocation3], 1 }
 0x41a   :  { %4071 = vsyncpa [#allocation6], 1 }
 0x41b   :  { %4072 = vsyncpa [#allocation9], 1 }
 0x41c   :  { %4073 = vsyncpa [#allocation12], 1 }
 0x41d   :  { %4074 = vsyncpa [#allocation4], 1 }

</bundles_post_ra>
